<compile_context>
chip_gen: v6e
topology: v6e:2x2x1
jax: 0.10.0
libtpu: 0.0.40
codegen_flags: <defaults>
</compile_context>

<pallas_src>
import jax
import jax.numpy as jnp
from jax.experimental import pallas as pl
from jax.experimental.pallas import tpu as pltpu

se_ratio = 4
bn_eps = 2e-05
group_base = 8


def _cdiv(a, b):
    return -(-a // b)


def _round_up(a, b):
    return _cdiv(a, b) * b


def _vmem_limit_bytes():
    # v5e/v6e: 128 MiB physical VMEM, v7x: 64 MiB.  Use ~3/4 of capacity so
    # the default 16/32 MiB scoped limit does not constrain the pipeline.
    try:
        cap = getattr(pltpu.get_tpu_info(), "vmem_capacity_bytes", 128 * 2**20)
        return int(max(32 * 2**20, min(cap * 3 // 4, 96 * 2**20)))
    except Exception:
        return 32 * 2**20


_VMEM_LIMIT = _vmem_limit_bytes()


# ----------------------------- Pallas kernels -----------------------------

def _make_sep_s1_kernel(Ho, Wo, act_pw, fuse_res, emit_pool):
    """Stride-1 Separable_Conv2d for one batch image, fully fused:
    in-VMEM 3x3 tap formation -> grouped(dw) conv as 9 tap matmuls (block-diag
    weights, BN scale folded) -> BN shift + PReLU -> 1x1 conv -> BN shift
    [-> PReLU] [-> + residual -> PReLU] [-> per-image channel sum for SE]."""
    M = Ho * Wo

    def kernel(*refs):
        it = iter(refs)
        x_ref = next(it)
        dww = next(it)
        dws = next(it)
        dwa = next(it)
        pww = next(it)
        pws = next(it)
        pwa = next(it) if act_pw else None
        res = next(it) if fuse_res else None
        post_a = next(it) if fuse_res else None
        o_ref = next(it)
        pool_ref = next(it) if emit_pool else None

        C = x_ref.shape[-1]
        dw_out = dww.shape[-1]

        acc = jnp.zeros((M, dw_out), jnp.float32)
        t = 0
        for i in range(3):
            for j in range(3):
                tap = x_ref[0, pl.ds(i, Ho), pl.ds(j, Wo), :]      # (Ho, Wo, C) bf16
                acc = acc + jnp.dot(tap.reshape(M, C), dww[t],
                                    preferred_element_type=jnp.float32)
                t += 1

        y = acc + dws[...]                                         # BN (scale in dww)
        y = jnp.where(y > 0, y, y * dwa[...])                      # PReLU (dw)

        z = jnp.dot(y.astype(jnp.bfloat16), pww[...],
                    preferred_element_type=jnp.float32)            # 1x1 conv
        z = z + pws[...]                                           # BN (scale in pww)
        if act_pw:
            z = jnp.where(z > 0, z, z * pwa[...])                  # PReLU (pw)
        if fuse_res:
            z = z + res[0].astype(jnp.float32)                     # residual add
            z = jnp.where(z > 0, z, z * post_a[...])               # PReLU after add
        o_ref[0] = z.astype(o_ref.dtype)
        if emit_pool:
            pool_ref[0] = jnp.sum(z, axis=0, keepdims=True)        # SE avg-pool (sum)

    return kernel


def _make_branch_merge_kernel(Ho, Wo, cout):
    """shortcut + branch1 + branch2 (all stride-2 separable convs, no pw act)
    in one kernel per batch image.  dw weights concatenated along N; pw stage
    is a block matrix producing [shortcut | branch1+branch2]; the post-add
    PReLU uses alpha=1 on the shortcut columns (identity)."""
    M = Ho * Wo

    def kernel(x_ref, dww, dws, dwa, pww, pws, pwa, sc_ref, t_ref):
        C = x_ref.shape[-1]
        nd = dww.shape[-1]
        acc = jnp.zeros((M, nd), jnp.float32)
        t = 0
        for i in range(3):
            for j in range(3):
                plane = (i % 2) * 2 + (j % 2)                      # parity plane
                tap = x_ref[0, plane, pl.ds(i // 2, Ho), pl.ds(j // 2, Wo), :]
                acc = acc + jnp.dot(tap.reshape(M, C), dww[t],
                                    preferred_element_type=jnp.float32)
                t += 1
        y = acc + dws[...]
        y = jnp.where(y > 0, y, y * dwa[...])                      # per-branch dw PReLU
        z = jnp.dot(y.astype(jnp.bfloat16), pww[...],
                    preferred_element_type=jnp.float32)
        z = z + pws[...]
        z = jnp.where(z > 0, z, z * pwa[...])                      # alpha=1 on shortcut cols
        sc_ref[0] = z[:, :cout].astype(sc_ref.dtype)
        t_ref[0] = z[:, cout:].astype(t_ref.dtype)

    return kernel


def _make_se_gate_kernel(inv_hw):
    def kernel(p_ref, w1, b1, a1, w2, b2, g_ref):
        pooled = p_ref[0] * inv_hw                                 # AdaptiveAvgPool2d(1)
        h = jnp.dot(pooled, w1[...],
                    preferred_element_type=jnp.float32) + b1[...]  # 1x1 conv (+bias)
        h = jnp.where(h > 0, h, h * a1[...])                       # PReLU
        s = jnp.dot(h, w2[...],
                    preferred_element_type=jnp.float32) + b2[...]  # 1x1 conv (+bias)
        g_ref[0] = jax.nn.sigmoid(s)                               # Sigmoid
    return kernel


def _se_apply_kernel(x_ref, g_ref, r_ref, a_ref, o_ref):
    # out = PReLU(x * se_gate + shortcut), lane-dense folded channels
    y = x_ref[0].astype(jnp.float32) * g_ref[0] + r_ref[0].astype(jnp.float32)
    y = jnp.where(y > 0, y, y * a_ref[0])
    o_ref[0] = y.astype(o_ref.dtype)


# ----------------------------- kernel wrappers -----------------------------

def fused_sep_conv_s1(x, p, *, residual=None, post_alpha=None, emit_pool=False):
    """Separable_Conv2d, 3x3 stride 1 pad 1, per-batch-image grid (parallel)."""
    N, H, W, Cin = x.shape
    Ho, Wo = H, W
    M = Ho * Wo
    Hp, Wp = H + 2, W + 2
    xp = jnp.pad(x, ((0, 0), (1, 1), (1, 1), (0, 0)))              # halo pad only

    dw_out = p["dw_w"].shape[-1]
    cout = p["pw_w"].shape[-1]
    act_pw = p["pw_alpha"] is not None
    fuse_res = residual is not None
    if fuse_res:
        assert post_alpha is not None

    operands = [xp, p["dw_w"], p["dw_shift"], p["dw_alpha"], p["pw_w"], p["pw_shift"]]
    in_specs = [
        pl.BlockSpec((1, Hp, Wp, Cin), lambda n: (n, 0, 0, 0)),
        pl.BlockSpec((9, Cin, dw_out), lambda n: (0, 0, 0)),
        pl.BlockSpec((1, dw_out), lambda n: (0, 0)),
        pl.BlockSpec((1, dw_out), lambda n: (0, 0)),
        pl.BlockSpec((dw_out, cout), lambda n: (0, 0)),
        pl.BlockSpec((1, cout), lambda n: (0, 0)),
    ]
    if act_pw:
        operands.append(p["pw_alpha"])
        in_specs.append(pl.BlockSpec((1, cout), lambda n: (0, 0)))
    if fuse_res:
        operands.append(residual.reshape(N, M, cout).astype(jnp.bfloat16))
        operands.append(post_alpha)
        in_specs.append(pl.BlockSpec((1, M, cout), lambda n: (n, 0, 0)))
        in_specs.append(pl.BlockSpec((1, cout), lambda n: (0, 0)))

    out_shapes = [jax.ShapeDtypeStruct((N, M, cout), jnp.bfloat16)]
    out_specs = [pl.BlockSpec((1, M, cout), lambda n: (n, 0, 0))]
    if emit_pool:
        out_shapes.append(jax.ShapeDtypeStruct((N, 1, cout), jnp.float32))
        out_specs.append(pl.BlockSpec((1, 1, cout), lambda n: (n, 0, 0)))

    flops = 2 * N * M * (9 * Cin * dw_out + dw_out * cout)
    bytes_acc = (2 * N * Hp * Wp * Cin                    # input (bf16), read once
                 + 2 * (9 * Cin * dw_out + dw_out * cout)  # weights (bf16), once
                 + 4 * (2 * dw_out + cout + (cout if act_pw else 0))
                 + 2 * N * M * cout                        # output (bf16)
                 + (2 * N * M * cout + 4 * cout if fuse_res else 0)
                 + (4 * N * cout if emit_pool else 0))

    outs = pl.pallas_call(
        _make_sep_s1_kernel(Ho, Wo, act_pw, fuse_res, emit_pool),
        out_shape=tuple(out_shapes) if emit_pool else out_shapes[0],
        grid=(N,),
        in_specs=in_specs,
        out_specs=tuple(out_specs) if emit_pool else out_specs[0],
        compiler_params=pltpu.CompilerParams(
            dimension_semantics=("parallel",),
            vmem_limit_bytes=_VMEM_LIMIT),
        cost_estimate=pl.CostEstimate(flops=int(flops), transcendentals=0,
                                      bytes_accessed=int(bytes_acc)),
    )(*operands)

    if emit_pool:
        y, pooled = outs
        return y.reshape(N, Ho, Wo, cout), pooled
    return outs.reshape(N, Ho, Wo, cout)


def fused_branch_merge_head(x, hp):
    """shortcut/branch1/branch2 of VarGNet_Branch_Merge_Block (3x3 stride-2
    separable convs) reading the input once.  Returns (shortcut, PReLU(b1+b2))."""
    N, H, W, Cin = x.shape
    pad_h = pad_w = 1
    Ho = (H + 2 * pad_h - 3) // 2 + 1
    Wo = (W + 2 * pad_w - 3) // 2 + 1
    Hh = max(_cdiv(H + 2 * pad_h, 2), Ho + 1)
    Wh = max(_cdiv(W + 2 * pad_w, 2), Wo + 1)
    xp = jnp.pad(x, ((0, 0), (pad_h, 2 * Hh - H - pad_h),
                     (pad_w, 2 * Wh - W - pad_w), (0, 0)))
    # even/odd parity split -> strided stride-2 taps become contiguous slices
    xp = xp.reshape(N, Hh, 2, Wh, 2, Cin).transpose(0, 2, 4, 1, 3, 5)
    xp = xp.reshape(N, 4, Hh, Wh, Cin)

    nd = hp["dw_w"].shape[-1]          # 3 * dw_out
    ncols = hp["pw_w"].shape[-1]       # 2 * cout
    cout = ncols // 2
    M = Ho * Wo

    flops = 2 * N * M * (9 * Cin * nd + nd * ncols)
    bytes_acc = (2 * N * 4 * Hh * Wh * Cin + 2 * (9 * Cin * nd + nd * ncols)
                 + 4 * 2 * (nd + ncols) + 2 * 2 * N * M * cout)

    sc, t = pl.pallas_call(
        _make_branch_merge_kernel(Ho, Wo, cout),
        out_shape=(jax.ShapeDtypeStruct((N, M, cout), jnp.bfloat16),
                   jax.ShapeDtypeStruct((N, M, cout), jnp.bfloat16)),
        grid=(N,),
        in_specs=[
            pl.BlockSpec((1, 4, Hh, Wh, Cin), lambda n: (n, 0, 0, 0, 0)),
            pl.BlockSpec((9, Cin, nd), lambda n: (0, 0, 0)),
            pl.BlockSpec((1, nd), lambda n: (0, 0)),
            pl.BlockSpec((1, nd), lambda n: (0, 0)),
            pl.BlockSpec((nd, ncols), lambda n: (0, 0)),
            pl.BlockSpec((1, ncols), lambda n: (0, 0)),
            pl.BlockSpec((1, ncols), lambda n: (0, 0)),
        ],
        out_specs=(pl.BlockSpec((1, M, cout), lambda n: (n, 0, 0)),
                   pl.BlockSpec((1, M, cout), lambda n: (n, 0, 0))),
        compiler_params=pltpu.CompilerParams(
            dimension_semantics=("parallel",),
            vmem_limit_bytes=_VMEM_LIMIT),
        cost_estimate=pl.CostEstimate(flops=int(flops), transcendentals=0,
                                      bytes_accessed=int(bytes_acc)),
    )(xp, hp["dw_w"], hp["dw_shift"], hp["dw_alpha"],
      hp["pw_w"], hp["pw_shift"], hp["pw_alpha"])
    return sc.reshape(N, Ho, Wo, cout), t.reshape(N, Ho, Wo, cout)


def se_gate_from_pooled(pooled_sum, sp, hw):
    """SE gate MLP on the per-image channel sums emitted by the preceding
    separable-conv kernel (no re-streaming of the feature map)."""
    N, _, C = pooled_sum.shape
    Cr = sp["w1"].shape[1]
    return pl.pallas_call(
        _make_se_gate_kernel(1.0 / float(hw)),
        out_shape=jax.ShapeDtypeStruct((N, 1, C), jnp.float32),
        grid=(N,),
        in_specs=[
            pl.BlockSpec((1, 1, C), lambda n: (n, 0, 0)),
            pl.BlockSpec((C, Cr), lambda n: (0, 0)),
            pl.BlockSpec((1, Cr), lambda n: (0, 0)),
            pl.BlockSpec((1, Cr), lambda n: (0, 0)),
            pl.BlockSpec((Cr, C), lambda n: (0, 0)),
            pl.BlockSpec((1, C), lambda n: (0, 0)),
        ],
        out_specs=pl.BlockSpec((1, 1, C), lambda n: (n, 0, 0)),
        compiler_params=pltpu.CompilerParams(
            dimension_semantics=("parallel",),
            vmem_limit_bytes=_VMEM_LIMIT),
    )(pooled_sum, sp["w1"], sp["b1"], sp["a1"], sp["w2"], sp["b2"])


def se_scale_add_prelu(x, gate, shortcut, alpha):
    """out = PReLU(x * gate + shortcut).  Channels are folded into the lane
    axis (f*C = 128) via a free wrapper reshape so loads/stores are lane-dense."""
    N, H, W, C = x.shape
    HW = H * W
    f = 1
    if C < 128:
        f = max(1, 128 // C)
        while f > 1 and HW % f != 0:
            f //= 2
    rows = HW // f
    CF = f * C
    xr = x.reshape(N, rows, CF)
    rr = shortcut.reshape(N, rows, CF)
    gf = jnp.tile(gate, (1, 1, f))                           # (N, 1, f*C), tiny
    af = jnp.tile(alpha.reshape(1, 1, C), (1, 1, f))         # (1, 1, f*C)

    nt = max(1, _cdiv(rows, 1024))
    ts = _round_up(_cdiv(rows, nt), 8) if rows >= 8 else rows
    rows_p = ts * nt
    if rows_p != rows:
        xr = jnp.pad(xr, ((0, 0), (0, rows_p - rows), (0, 0)))
        rr = jnp.pad(rr, ((0, 0), (0, rows_p - rows), (0, 0)))

    out = pl.pallas_call(
        _se_apply_kernel,
        out_shape=jax.ShapeDtypeStruct((N, rows_p, CF), jnp.bfloat16),
        grid=(N, nt),
        in_specs=[
            pl.BlockSpec((1, ts, CF), lambda n, t: (n, t, 0)),
            pl.BlockSpec((1, 1, CF), lambda n, t: (n, 0, 0)),
            pl.BlockSpec((1, ts, CF), lambda n, t: (n, t, 0)),
            pl.BlockSpec((1, 1, CF), lambda n, t: (0, 0, 0)),
        ],
        out_specs=pl.BlockSpec((1, ts, CF), lambda n, t: (n, t, 0)),
        compiler_params=pltpu.CompilerParams(
            dimension_semantics=("parallel", "parallel"),
            vmem_limit_bytes=_VMEM_LIMIT),
    )(xr, gf, rr, af)
    return out[:, :rows, :].reshape(N, H, W, C)


# ----------------------------- parameter init -----------------------------

def _init_bn_fold(key, c):
    k1, k2 = jax.random.split(key)
    gamma = 1.0 + 0.1 * jax.random.normal(k1, (c,), jnp.float32)
    beta = 0.1 * jax.random.normal(k2, (c,), jnp.float32)
    running_mean = jnp.zeros((c,), jnp.float32)
    running_var = jnp.ones((c,), jnp.float32)
    scale = gamma / jnp.sqrt(running_var + bn_eps)
    shift = beta - running_mean * scale
    return scale, shift


def _make_pertap_blockdiag_dw(dw_w, cin):
    # torch grouped-conv weight (dw_out, group_base, 3, 3) -> per-tap
    # block-diagonal matmul weights (9, cin, dw_out).
    dw_out, _, kh, kw = dw_w.shape
    G = cin // group_base
    Og = dw_out // G
    wg = dw_w.reshape(G, Og, group_base, kh, kw)
    wt = jnp.transpose(wg, (3, 4, 0, 2, 1)).reshape(kh * kw, G, group_base, Og)
    eye = jnp.eye(G, dtype=wt.dtype)
    bd = jnp.einsum('tgco,gh->tgcho', wt, eye)               # zero off-diagonal groups
    return bd.reshape(kh * kw, cin, dw_out)


def init_separable(key, cin, cout, factor=2, act_pw=True):
    assert cin % group_base == 0
    ks = jax.random.split(key, 4)
    dw_out = cin * factor
    dw_w = 0.1 * jax.random.normal(ks[0], (dw_out, group_base, 3, 3), jnp.float32)
    dw_scale, dw_shift = _init_bn_fold(ks[1], dw_out)
    pw_w = 0.1 * jax.random.normal(ks[2], (cout, dw_out), jnp.float32)
    pw_scale, pw_shift = _init_bn_fold(ks[3], cout)

    # fold BN scale into weight columns (f32), then cast to bf16 for the MXU
    w_bd = _make_pertap_blockdiag_dw(dw_w, cin) * dw_scale[None, None, :]
    pw_mat = pw_w.T * pw_scale[None, :]
    return {
        "dw_w": w_bd.astype(jnp.bfloat16),
        "dw_shift": dw_shift.reshape(1, dw_out),
        "dw_alpha": jnp.full((1, dw_out), 0.25, jnp.float32),
        "pw_w": pw_mat.astype(jnp.bfloat16),
        "pw_shift": pw_shift.reshape(1, cout),
        "pw_alpha": jnp.full((1, cout), 0.25, jnp.float32) if act_pw else None,
    }


def _build_branch_merge_head(sc, b1, b2, alpha1, cout):
    dw_out = sc["dw_w"].shape[-1]
    dw_w = jnp.concatenate([sc["dw_w"], b1["dw_w"], b2["dw_w"]], axis=2)
    dw_shift = jnp.concatenate([sc["dw_shift"], b1["dw_shift"], b2["dw_shift"]], axis=1)
    dw_alpha = jnp.concatenate([sc["dw_alpha"], b1["dw_alpha"], b2["dw_alpha"]], axis=1)
    z = jnp.zeros((dw_out, cout), jnp.bfloat16)
    pw_w = jnp.concatenate([
        jnp.concatenate([sc["pw_w"], z], axis=1),
        jnp.concatenate([z, b1["pw_w"]], axis=1),
        jnp.concatenate([z, b2["pw_w"]], axis=1),
    ], axis=0)                                               # (3*dw_out, 2*cout)
    pw_shift = jnp.concatenate([sc["pw_shift"],
                                b1["pw_shift"] + b2["pw_shift"]], axis=1)
    pw_alpha = jnp.concatenate([jnp.ones((1, cout), jnp.float32), alpha1], axis=1)
    return {"dw_w": dw_w, "dw_shift": dw_shift, "dw_alpha": dw_alpha,
            "pw_w": pw_w, "pw_shift": pw_shift, "pw_alpha": pw_alpha}


def init_se(key, c):
    cr = c // se_ratio
    ks = jax.random.split(key, 4)
    return {
        "w1": (0.1 * jax.random.normal(ks[0], (cr, c), jnp.float32)).T,  # (C, Cr)
        "b1": 0.1 * jax.random.normal(ks[1], (1, cr), jnp.float32),
        "a1": jnp.full((1, cr), 0.25, jnp.float32),
        "w2": (0.1 * jax.random.normal(ks[2], (c, cr), jnp.float32)).T,  # (Cr, C)
        "b2": 0.1 * jax.random.normal(ks[3], (1, c), jnp.float32),
    }


def init_branch_merge(key, cin, cout):
    ks = jax.random.split(key, 4)
    sc = init_separable(ks[0], cin, cout, act_pw=False)
    b1 = init_separable(ks[1], cin, cout, act_pw=False)
    b2 = init_separable(ks[2], cin, cout, act_pw=False)
    alpha1 = jnp.full((1, cout), 0.25, jnp.float32)
    return {
        "head": _build_branch_merge_head(sc, b1, b2, alpha1, cout),
        "sep2": init_separable(ks[3], cout, cout, act_pw=False),
        "alpha3": jnp.full((1, cout), 0.25, jnp.float32),
    }


def init_vargnet_block(key, c):
    # dim_match=True: the (unused) shortcut Separable_Conv2d is not instantiated
    ks = jax.random.split(key, 3)
    return {
        "sep1": init_separable(ks[0], c, c, act_pw=True),
        "sep2": init_separable(ks[1], c, c, act_pw=False),
        "se": init_se(ks[2], c),
        "alpha4": jnp.full((1, c), 0.25, jnp.float32),
    }


def init_vargnet_conv_block(key, units, cin, cout):
    ks = jax.random.split(key, units)
    return {
        "branch_merge": init_branch_merge(ks[0], cin, cout),
        "features": [init_vargnet_block(ks[i + 1], cout) for i in range(units - 1)],
    }


# ----------------------------- forward passes -----------------------------

def branch_merge_block(x, p):
    short_cut, t = fused_branch_merge_head(x, p["head"])     # dim_match=False
    # sep2 fused with (+ short_cut) -> PReLU epilogue
    return fused_sep_conv_s1(t, p["sep2"], residual=short_cut,
                             post_alpha=p["alpha3"])


def vargnet_block(x, p):
    short_cut = x                                            # dim_match=True
    y = fused_sep_conv_s1(x, p["sep1"])
    y, pooled = fused_sep_conv_s1(y, p["sep2"], emit_pool=True)
    _, H, W, _ = y.shape
    gate = se_gate_from_pooled(pooled, p["se"], H * W)       # use_se = True
    return se_scale_add_prelu(y, gate, short_cut, p["alpha4"])


def vargnet_conv_block(x_nchw, params):
    x = jnp.transpose(x_nchw, (0, 2, 3, 1)).astype(jnp.bfloat16)  # NCHW -> NHWC bf16
    x = branch_merge_block(x, params["branch_merge"])
    for fp in params["features"]:
        x = vargnet_block(x, fp)
    return jnp.transpose(x, (0, 3, 1, 2)).astype(jnp.float32)     # NHWC -> NCHW


# ----------------------------- main -----------------------------

if __name__ == "__main__":
    key = jax.random.PRNGKey(0)
    kx, kp = jax.random.split(key)

    units = 2
    in_channels, out_channels = 8, 16                 # in_channels % group_base == 0
    x = jax.random.normal(kx, (2, in_channels, 16, 16), jnp.float32)  # NCHW

    params = init_vargnet_conv_block(kp, units, in_channels, out_channels)
    fwd = jax.jit(lambda a: vargnet_conv_block(a, params))
    out = jax.block_until_ready(fwd(x))

    assert out.shape == (2, out_channels, 8, 8), out.shape
    assert bool(jnp.all(jnp.isfinite(out)))
    print("KERNEL_OK")
</pallas_src>

<mosaic_0001>
module attributes {stable_mosaic.version = 11 : i64} {
  func.func @kernel(%arg0: i32, %arg1: memref<1x4x9x9x8xbf16, #tpu.memory_space<vmem>>, %arg2: memref<9x8x48xbf16, #tpu.memory_space<vmem>>, %arg3: memref<1x48xf32, #tpu.memory_space<vmem>>, %arg4: memref<1x48xf32, #tpu.memory_space<vmem>>, %arg5: memref<48x32xbf16, #tpu.memory_space<vmem>>, %arg6: memref<1x32xf32, #tpu.memory_space<vmem>>, %arg7: memref<1x32xf32, #tpu.memory_space<vmem>>, %arg8: memref<1x64x16xbf16, #tpu.memory_space<vmem>>, %arg9: memref<1x64x16xbf16, #tpu.memory_space<vmem>>) attributes {dimension_semantics = [#tpu.dimension_semantics<parallel>], iteration_bounds = array<i64: 2>, scalar_prefetch = 0 : i64, scratch_operands = 0 : i64, tpu.core_type = #tpu.core_type<tc>, window_params = [{transform_indices = @transform_0, window_bounds = array<i64: 1, 4, 9, 9, 8>}, {pipeline_mode = #tpu.pipeline_mode<synchronous>, transform_indices = @transform_1, window_bounds = array<i64: 9, 8, 48>}, {pipeline_mode = #tpu.pipeline_mode<synchronous>, transform_indices = @transform_2, window_bounds = array<i64: 1, 48>}, {pipeline_mode = #tpu.pipeline_mode<synchronous>, transform_indices = @transform_3, window_bounds = array<i64: 1, 48>}, {pipeline_mode = #tpu.pipeline_mode<synchronous>, transform_indices = @transform_4, window_bounds = array<i64: 48, 32>}, {pipeline_mode = #tpu.pipeline_mode<synchronous>, transform_indices = @transform_5, window_bounds = array<i64: 1, 32>}, {pipeline_mode = #tpu.pipeline_mode<synchronous>, transform_indices = @transform_6, window_bounds = array<i64: 1, 32>}, {transform_indices = @transform_7, window_bounds = array<i64: 1, 64, 16>}, {transform_indices = @transform_8, window_bounds = array<i64: 1, 64, 16>}]} {
    %cst = arith.constant 0.000000e+00 : f32
    %0 = vector.broadcast %cst : f32 to vector<64x48xf32>
    %c0 = arith.constant 0 : index
    %c0_0 = arith.constant 0 : index
    %c0_1 = arith.constant 0 : index
    %c0_2 = arith.constant 0 : index
    %c0_3 = arith.constant 0 : index
    %1 = vector.load %arg1[%c0, %c0_0, %c0_1, %c0_2, %c0_3] : memref<1x4x9x9x8xbf16, #tpu.memory_space<vmem>>, vector<1x1x8x8x8xbf16>
    %2 = vector.shape_cast %1 : vector<1x1x8x8x8xbf16> to vector<8x8x8xbf16>
    %3 = vector.shape_cast %2 : vector<8x8x8xbf16> to vector<64x8xbf16>
    %c0_4 = arith.constant 0 : index
    %c0_5 = arith.constant 0 : index
    %c0_6 = arith.constant 0 : index
    %4 = vector.load %arg2[%c0_4, %c0_5, %c0_6] : memref<9x8x48xbf16, #tpu.memory_space<vmem>>, vector<1x8x48xbf16>
    %5 = vector.shape_cast %4 : vector<1x8x48xbf16> to vector<8x48xbf16>
    %cst_7 = arith.constant dense<0.000000e+00> : vector<64x48xf32>
    %6 = tpu.matmul %3, %5, %cst_7 {dimension_numbers = #tpu.dot_dimension_numbers<[1], [0], [0], [1], [0, 0, 1, 1], [], []>} : vector<64x8xbf16>, vector<8x48xbf16>, vector<64x48xf32> -> vector<64x48xf32>
    %7 = arith.addf %0, %6 : vector<64x48xf32>
    %c0_8 = arith.constant 0 : index
    %c1 = arith.constant 1 : index
    %c0_9 = arith.constant 0 : index
    %c0_10 = arith.constant 0 : index
    %c0_11 = arith.constant 0 : index
    %8 = vector.load %arg1[%c0_8, %c1, %c0_9, %c0_10, %c0_11] : memref<1x4x9x9x8xbf16, #tpu.memory_space<vmem>>, vector<1x1x8x8x8xbf16>
    %9 = vector.shape_cast %8 : vector<1x1x8x8x8xbf16> to vector<8x8x8xbf16>
    %10 = vector.shape_cast %9 : vector<8x8x8xbf16> to vector<64x8xbf16>
    %c1_12 = arith.constant 1 : index
    %c0_13 = arith.constant 0 : index
    %c0_14 = arith.constant 0 : index
    %11 = vector.load %arg2[%c1_12, %c0_13, %c0_14] : memref<9x8x48xbf16, #tpu.memory_space<vmem>>, vector<1x8x48xbf16>
    %12 = vector.shape_cast %11 : vector<1x8x48xbf16> to vector<8x48xbf16>
    %cst_15 = arith.constant dense<0.000000e+00> : vector<64x48xf32>
    %13 = tpu.matmul %10, %12, %cst_15 {dimension_numbers = #tpu.dot_dimension_numbers<[1], [0], [0], [1], [0, 0, 1, 1], [], []>} : vector<64x8xbf16>, vector<8x48xbf16>, vector<64x48xf32> -> vector<64x48xf32>
    %14 = arith.addf %7, %13 : vector<64x48xf32>
    %c0_16 = arith.constant 0 : index
    %c0_17 = arith.constant 0 : index
    %c0_18 = arith.constant 0 : index
    %c1_19 = arith.constant 1 : index
    %c0_20 = arith.constant 0 : index
    %15 = vector.load %arg1[%c0_16, %c0_17, %c0_18, %c1_19, %c0_20] : memref<1x4x9x9x8xbf16, #tpu.memory_space<vmem>>, vector<1x1x8x8x8xbf16>
    %16 = vector.shape_cast %15 : vector<1x1x8x8x8xbf16> to vector<8x8x8xbf16>
    %17 = vector.shape_cast %16 : vector<8x8x8xbf16> to vector<64x8xbf16>
    %c2 = arith.constant 2 : index
    %c0_21 = arith.constant 0 : index
    %c0_22 = arith.constant 0 : index
    %18 = vector.load %arg2[%c2, %c0_21, %c0_22] : memref<9x8x48xbf16, #tpu.memory_space<vmem>>, vector<1x8x48xbf16>
    %19 = vector.shape_cast %18 : vector<1x8x48xbf16> to vector<8x48xbf16>
    %cst_23 = arith.constant dense<0.000000e+00> : vector<64x48xf32>
    %20 = tpu.matmul %17, %19, %cst_23 {dimension_numbers = #tpu.dot_dimension_numbers<[1], [0], [0], [1], [0, 0, 1, 1], [], []>} : vector<64x8xbf16>, vector<8x48xbf16>, vector<64x48xf32> -> vector<64x48xf32>
    %21 = arith.addf %14, %20 : vector<64x48xf32>
    %c0_24 = arith.constant 0 : index
    %c2_25 = arith.constant 2 : index
    %c0_26 = arith.constant 0 : index
    %c0_27 = arith.constant 0 : index
    %c0_28 = arith.constant 0 : index
    %22 = vector.load %arg1[%c0_24, %c2_25, %c0_26, %c0_27, %c0_28] : memref<1x4x9x9x8xbf16, #tpu.memory_space<vmem>>, vector<1x1x8x8x8xbf16>
    %23 = vector.shape_cast %22 : vector<1x1x8x8x8xbf16> to vector<8x8x8xbf16>
    %24 = vector.shape_cast %23 : vector<8x8x8xbf16> to vector<64x8xbf16>
    %c3 = arith.constant 3 : index
    %c0_29 = arith.constant 0 : index
    %c0_30 = arith.constant 0 : index
    %25 = vector.load %arg2[%c3, %c0_29, %c0_30] : memref<9x8x48xbf16, #tpu.memory_space<vmem>>, vector<1x8x48xbf16>
    %26 = vector.shape_cast %25 : vector<1x8x48xbf16> to vector<8x48xbf16>
    %cst_31 = arith.constant dense<0.000000e+00> : vector<64x48xf32>
    %27 = tpu.matmul %24, %26, %cst_31 {dimension_numbers = #tpu.dot_dimension_numbers<[1], [0], [0], [1], [0, 0, 1, 1], [], []>} : vector<64x8xbf16>, vector<8x48xbf16>, vector<64x48xf32> -> vector<64x48xf32>
    %28 = arith.addf %21, %27 : vector<64x48xf32>
    %c0_32 = arith.constant 0 : index
    %c3_33 = arith.constant 3 : index
    %c0_34 = arith.constant 0 : index
    %c0_35 = arith.constant 0 : index
    %c0_36 = arith.constant 0 : index
    %29 = vector.load %arg1[%c0_32, %c3_33, %c0_34, %c0_35, %c0_36] : memref<1x4x9x9x8xbf16, #tpu.memory_space<vmem>>, vector<1x1x8x8x8xbf16>
    %30 = vector.shape_cast %29 : vector<1x1x8x8x8xbf16> to vector<8x8x8xbf16>
    %31 = vector.shape_cast %30 : vector<8x8x8xbf16> to vector<64x8xbf16>
    %c4 = arith.constant 4 : index
    %c0_37 = arith.constant 0 : index
    %c0_38 = arith.constant 0 : index
    %32 = vector.load %arg2[%c4, %c0_37, %c0_38] : memref<9x8x48xbf16, #tpu.memory_space<vmem>>, vector<1x8x48xbf16>
    %33 = vector.shape_cast %32 : vector<1x8x48xbf16> to vector<8x48xbf16>
    %cst_39 = arith.constant dense<0.000000e+00> : vector<64x48xf32>
    %34 = tpu.matmul %31, %33, %cst_39 {dimension_numbers = #tpu.dot_dimension_numbers<[1], [0], [0], [1], [0, 0, 1, 1], [], []>} : vector<64x8xbf16>, vector<8x48xbf16>, vector<64x48xf32> -> vector<64x48xf32>
    %35 = arith.addf %28, %34 : vector<64x48xf32>
    %c0_40 = arith.constant 0 : index
    %c2_41 = arith.constant 2 : index
    %c0_42 = arith.constant 0 : index
    %c1_43 = arith.constant 1 : index
    %c0_44 = arith.constant 0 : index
    %36 = vector.load %arg1[%c0_40, %c2_41, %c0_42, %c1_43, %c0_44] : memref<1x4x9x9x8xbf16, #tpu.memory_space<vmem>>, vector<1x1x8x8x8xbf16>
    %37 = vector.shape_cast %36 : vector<1x1x8x8x8xbf16> to vector<8x8x8xbf16>
    %38 = vector.shape_cast %37 : vector<8x8x8xbf16> to vector<64x8xbf16>
    %c5 = arith.constant 5 : index
    %c0_45 = arith.constant 0 : index
    %c0_46 = arith.constant 0 : index
    %39 = vector.load %arg2[%c5, %c0_45, %c0_46] : memref<9x8x48xbf16, #tpu.memory_space<vmem>>, vector<1x8x48xbf16>
    %40 = vector.shape_cast %39 : vector<1x8x48xbf16> to vector<8x48xbf16>
    %cst_47 = arith.constant dense<0.000000e+00> : vector<64x48xf32>
    %41 = tpu.matmul %38, %40, %cst_47 {dimension_numbers = #tpu.dot_dimension_numbers<[1], [0], [0], [1], [0, 0, 1, 1], [], []>} : vector<64x8xbf16>, vector<8x48xbf16>, vector<64x48xf32> -> vector<64x48xf32>
    %42 = arith.addf %35, %41 : vector<64x48xf32>
    %c0_48 = arith.constant 0 : index
    %c0_49 = arith.constant 0 : index
    %c1_50 = arith.constant 1 : index
    %c0_51 = arith.constant 0 : index
    %c0_52 = arith.constant 0 : index
    %43 = vector.load %arg1[%c0_48, %c0_49, %c1_50, %c0_51, %c0_52] : memref<1x4x9x9x8xbf16, #tpu.memory_space<vmem>>, vector<1x1x8x8x8xbf16>
    %44 = vector.shape_cast %43 : vector<1x1x8x8x8xbf16> to vector<8x8x8xbf16>
    %45 = vector.shape_cast %44 : vector<8x8x8xbf16> to vector<64x8xbf16>
    %c6 = arith.constant 6 : index
    %c0_53 = arith.constant 0 : index
    %c0_54 = arith.constant 0 : index
    %46 = vector.load %arg2[%c6, %c0_53, %c0_54] : memref<9x8x48xbf16, #tpu.memory_space<vmem>>, vector<1x8x48xbf16>
    %47 = vector.shape_cast %46 : vector<1x8x48xbf16> to vector<8x48xbf16>
    %cst_55 = arith.constant dense<0.000000e+00> : vector<64x48xf32>
    %48 = tpu.matmul %45, %47, %cst_55 {dimension_numbers = #tpu.dot_dimension_numbers<[1], [0], [0], [1], [0, 0, 1, 1], [], []>} : vector<64x8xbf16>, vector<8x48xbf16>, vector<64x48xf32> -> vector<64x48xf32>
    %49 = arith.addf %42, %48 : vector<64x48xf32>
    %c0_56 = arith.constant 0 : index
    %c1_57 = arith.constant 1 : index
    %c1_58 = arith.constant 1 : index
    %c0_59 = arith.constant 0 : index
    %c0_60 = arith.constant 0 : index
    %50 = vector.load %arg1[%c0_56, %c1_57, %c1_58, %c0_59, %c0_60] : memref<1x4x9x9x8xbf16, #tpu.memory_space<vmem>>, vector<1x1x8x8x8xbf16>
    %51 = vector.shape_cast %50 : vector<1x1x8x8x8xbf16> to vector<8x8x8xbf16>
    %52 = vector.shape_cast %51 : vector<8x8x8xbf16> to vector<64x8xbf16>
    %c7 = arith.constant 7 : index
    %c0_61 = arith.constant 0 : index
    %c0_62 = arith.constant 0 : index
    %53 = vector.load %arg2[%c7, %c0_61, %c0_62] : memref<9x8x48xbf16, #tpu.memory_space<vmem>>, vector<1x8x48xbf16>
    %54 = vector.shape_cast %53 : vector<1x8x48xbf16> to vector<8x48xbf16>
    %cst_63 = arith.constant dense<0.000000e+00> : vector<64x48xf32>
    %55 = tpu.matmul %52, %54, %cst_63 {dimension_numbers = #tpu.dot_dimension_numbers<[1], [0], [0], [1], [0, 0, 1, 1], [], []>} : vector<64x8xbf16>, vector<8x48xbf16>, vector<64x48xf32> -> vector<64x48xf32>
    %56 = arith.addf %49, %55 : vector<64x48xf32>
    %c0_64 = arith.constant 0 : index
    %c0_65 = arith.constant 0 : index
    %c1_66 = arith.constant 1 : index
    %c1_67 = arith.constant 1 : index
    %c0_68 = arith.constant 0 : index
    %57 = vector.load %arg1[%c0_64, %c0_65, %c1_66, %c1_67, %c0_68] : memref<1x4x9x9x8xbf16, #tpu.memory_space<vmem>>, vector<1x1x8x8x8xbf16>
    %58 = vector.shape_cast %57 : vector<1x1x8x8x8xbf16> to vector<8x8x8xbf16>
    %59 = vector.shape_cast %58 : vector<8x8x8xbf16> to vector<64x8xbf16>
    %c8 = arith.constant 8 : index
    %c0_69 = arith.constant 0 : index
    %c0_70 = arith.constant 0 : index
    %60 = vector.load %arg2[%c8, %c0_69, %c0_70] : memref<9x8x48xbf16, #tpu.memory_space<vmem>>, vector<1x8x48xbf16>
    %61 = vector.shape_cast %60 : vector<1x8x48xbf16> to vector<8x48xbf16>
    %cst_71 = arith.constant dense<0.000000e+00> : vector<64x48xf32>
    %62 = tpu.matmul %59, %61, %cst_71 {dimension_numbers = #tpu.dot_dimension_numbers<[1], [0], [0], [1], [0, 0, 1, 1], [], []>} : vector<64x8xbf16>, vector<8x48xbf16>, vector<64x48xf32> -> vector<64x48xf32>
    %63 = arith.addf %56, %62 : vector<64x48xf32>
    %c0_72 = arith.constant 0 : index
    %c0_73 = arith.constant 0 : index
    %64 = vector.load %arg3[%c0_72, %c0_73] : memref<1x48xf32, #tpu.memory_space<vmem>>, vector<1x48xf32>
    %65 = vector.broadcast %64 : vector<1x48xf32> to vector<64x48xf32>
    %66 = arith.addf %63, %65 : vector<64x48xf32>
    %cst_74 = arith.constant 0.000000e+00 : f32
    %67 = vector.broadcast %cst_74 : f32 to vector<64x48xf32>
    %68 = arith.cmpf ogt, %66, %67 : vector<64x48xf32>
    %c0_75 = arith.constant 0 : index
    %c0_76 = arith.constant 0 : index
    %69 = vector.load %arg4[%c0_75, %c0_76] : memref<1x48xf32, #tpu.memory_space<vmem>>, vector<1x48xf32>
    %70 = vector.broadcast %69 : vector<1x48xf32> to vector<64x48xf32>
    %71 = arith.mulf %66, %70 : vector<64x48xf32>
    %72 = arith.select %68, %66, %71 : vector<64x48xi1>, vector<64x48xf32>
    %73 = arith.truncf %72 : vector<64x48xf32> to vector<64x48xbf16>
    %c0_77 = arith.constant 0 : index
    %c0_78 = arith.constant 0 : index
    %74 = vector.load %arg5[%c0_77, %c0_78] : memref<48x32xbf16, #tpu.memory_space<vmem>>, vector<48x32xbf16>
    %cst_79 = arith.constant dense<0.000000e+00> : vector<64x32xf32>
    %75 = tpu.matmul %73, %74, %cst_79 {dimension_numbers = #tpu.dot_dimension_numbers<[1], [0], [0], [1], [0, 0, 1, 1], [], []>} : vector<64x48xbf16>, vector<48x32xbf16>, vector<64x32xf32> -> vector<64x32xf32>
    %c0_80 = arith.constant 0 : index
    %c0_81 = arith.constant 0 : index
    %76 = vector.load %arg6[%c0_80, %c0_81] : memref<1x32xf32, #tpu.memory_space<vmem>>, vector<1x32xf32>
    %77 = vector.broadcast %76 : vector<1x32xf32> to vector<64x32xf32>
    %78 = arith.addf %75, %77 : vector<64x32xf32>
    %cst_82 = arith.constant 0.000000e+00 : f32
    %79 = vector.broadcast %cst_82 : f32 to vector<64x32xf32>
    %80 = arith.cmpf ogt, %78, %79 : vector<64x32xf32>
    %c0_83 = arith.constant 0 : index
    %c0_84 = arith.constant 0 : index
    %81 = vector.load %arg7[%c0_83, %c0_84] : memref<1x32xf32, #tpu.memory_space<vmem>>, vector<1x32xf32>
    %82 = vector.broadcast %81 : vector<1x32xf32> to vector<64x32xf32>
    %83 = arith.mulf %78, %82 : vector<64x32xf32>
    %84 = arith.select %80, %78, %83 : vector<64x32xi1>, vector<64x32xf32>
    %85 = vector.extract_strided_slice %84 {offsets = [0, 0], sizes = [64, 16], strides = [1, 1]} : vector<64x32xf32> to vector<64x16xf32>
    %86 = arith.truncf %85 : vector<64x16xf32> to vector<64x16xbf16>
    %c0_85 = arith.constant 0 : index
    %c0_86 = arith.constant 0 : index
    %c0_87 = arith.constant 0 : index
    %87 = vector.load %arg8[%c0_85, %c0_86, %c0_87] : memref<1x64x16xbf16, #tpu.memory_space<vmem>>, vector<1x64x16xbf16>
    %88 = vector.shape_cast %87 : vector<1x64x16xbf16> to vector<64x16xbf16>
    %89 = vector.shape_cast %86 : vector<64x16xbf16> to vector<1x64x16xbf16>
    tpu.vector_store %arg8[%c0_85, %c0_86, %c0_87], %89 {strides = array<i32>} : memref<1x64x16xbf16, #tpu.memory_space<vmem>>, vector<1x64x16xbf16>,
    %90 = vector.extract_strided_slice %84 {offsets = [0, 16], sizes = [64, 16], strides = [1, 1]} : vector<64x32xf32> to vector<64x16xf32>
    %91 = arith.truncf %90 : vector<64x16xf32> to vector<64x16xbf16>
    %c0_88 = arith.constant 0 : index
    %c0_89 = arith.constant 0 : index
    %c0_90 = arith.constant 0 : index
    %92 = vector.load %arg9[%c0_88, %c0_89, %c0_90] : memref<1x64x16xbf16, #tpu.memory_space<vmem>>, vector<1x64x16xbf16>
    %93 = vector.shape_cast %92 : vector<1x64x16xbf16> to vector<64x16xbf16>
    %94 = vector.shape_cast %91 : vector<64x16xbf16> to vector<1x64x16xbf16>
    tpu.vector_store %arg9[%c0_88, %c0_89, %c0_90], %94 {strides = array<i32>} : memref<1x64x16xbf16, #tpu.memory_space<vmem>>, vector<1x64x16xbf16>,
    return
  }
  func.func @transform_0(%arg0: i32) -> (i32, i32, i32, i32, i32) {
    %c0_i32 = arith.constant 0 : i32
    %c0_i32_0 = arith.constant 0 : i32
    %c0_i32_1 = arith.constant 0 : i32
    %c0_i32_2 = arith.constant 0 : i32
    %c0_i32_3 = arith.constant 0 : i32
    return %arg0, %c0_i32, %c0_i32_0, %c0_i32_1, %c0_i32_2 : i32, i32, i32, i32, i32
  }
  func.func @transform_1(%arg0: i32) -> (i32, i32, i32) {
    %c0_i32 = arith.constant 0 : i32
    %c0_i32_0 = arith.constant 0 : i32
    %c0_i32_1 = arith.constant 0 : i32
    %c0_i32_2 = arith.constant 0 : i32
    return %c0_i32, %c0_i32_0, %c0_i32_1 : i32, i32, i32
  }
  func.func @transform_2(%arg0: i32) -> (i32, i32) {
    %c0_i32 = arith.constant 0 : i32
    %c0_i32_0 = arith.constant 0 : i32
    %c0_i32_1 = arith.constant 0 : i32
    return %c0_i32, %c0_i32_0 : i32, i32
  }
  func.func @transform_3(%arg0: i32) -> (i32, i32) {
    %c0_i32 = arith.constant 0 : i32
    %c0_i32_0 = arith.constant 0 : i32
    %c0_i32_1 = arith.constant 0 : i32
    return %c0_i32, %c0_i32_0 : i32, i32
  }
  func.func @transform_4(%arg0: i32) -> (i32, i32) {
    %c0_i32 = arith.constant 0 : i32
    %c0_i32_0 = arith.constant 0 : i32
    %c0_i32_1 = arith.constant 0 : i32
    return %c0_i32, %c0_i32_0 : i32, i32
  }
  func.func @transform_5(%arg0: i32) -> (i32, i32) {
    %c0_i32 = arith.constant 0 : i32
    %c0_i32_0 = arith.constant 0 : i32
    %c0_i32_1 = arith.constant 0 : i32
    return %c0_i32, %c0_i32_0 : i32, i32
  }
  func.func @transform_6(%arg0: i32) -> (i32, i32) {
    %c0_i32 = arith.constant 0 : i32
    %c0_i32_0 = arith.constant 0 : i32
    %c0_i32_1 = arith.constant 0 : i32
    return %c0_i32, %c0_i32_0 : i32, i32
  }
  func.func @transform_7(%arg0: i32) -> (i32, i32, i32) {
    %c0_i32 = arith.constant 0 : i32
    %c0_i32_0 = arith.constant 0 : i32
    %c0_i32_1 = arith.constant 0 : i32
    return %arg0, %c0_i32, %c0_i32_0 : i32, i32, i32
  }
  func.func @transform_8(%arg0: i32) -> (i32, i32, i32) {
    %c0_i32 = arith.constant 0 : i32
    %c0_i32_0 = arith.constant 0 : i32
    %c0_i32_1 = arith.constant 0 : i32
    return %arg0, %c0_i32, %c0_i32_0 : i32, i32, i32
  }
}

module attributes {stable_mosaic.version = 11 : i64} {
  func.func @kernel(%arg0: i32, %arg1: memref<1x10x10x16xbf16, #tpu.memory_space<vmem>>, %arg2: memref<9x16x32xbf16, #tpu.memory_space<vmem>>, %arg3: memref<1x32xf32, #tpu.memory_space<vmem>>, %arg4: memref<1x32xf32, #tpu.memory_space<vmem>>, %arg5: memref<32x16xbf16, #tpu.memory_space<vmem>>, %arg6: memref<1x16xf32, #tpu.memory_space<vmem>>, %arg7: memref<1x64x16xbf16, #tpu.memory_space<vmem>>, %arg8: memref<1x16xf32, #tpu.memory_space<vmem>>, %arg9: memref<1x64x16xbf16, #tpu.memory_space<vmem>>) attributes {dimension_semantics = [#tpu.dimension_semantics<parallel>], iteration_bounds = array<i64: 2>, scalar_prefetch = 0 : i64, scratch_operands = 0 : i64, tpu.core_type = #tpu.core_type<tc>, window_params = [{transform_indices = @transform_0, window_bounds = array<i64: 1, 10, 10, 16>}, {pipeline_mode = #tpu.pipeline_mode<synchronous>, transform_indices = @transform_1, window_bounds = array<i64: 9, 16, 32>}, {pipeline_mode = #tpu.pipeline_mode<synchronous>, transform_indices = @transform_2, window_bounds = array<i64: 1, 32>}, {pipeline_mode = #tpu.pipeline_mode<synchronous>, transform_indices = @transform_3, window_bounds = array<i64: 1, 32>}, {pipeline_mode = #tpu.pipeline_mode<synchronous>, transform_indices = @transform_4, window_bounds = array<i64: 32, 16>}, {pipeline_mode = #tpu.pipeline_mode<synchronous>, transform_indices = @transform_5, window_bounds = array<i64: 1, 16>}, {transform_indices = @transform_6, window_bounds = array<i64: 1, 64, 16>}, {pipeline_mode = #tpu.pipeline_mode<synchronous>, transform_indices = @transform_7, window_bounds = array<i64: 1, 16>}, {transform_indices = @transform_8, window_bounds = array<i64: 1, 64, 16>}]} {
    %cst = arith.constant 0.000000e+00 : f32
    %0 = vector.broadcast %cst : f32 to vector<64x32xf32>
    %c0 = arith.constant 0 : index
    %c0_0 = arith.constant 0 : index
    %c0_1 = arith.constant 0 : index
    %c0_2 = arith.constant 0 : index
    %1 = vector.load %arg1[%c0, %c0_0, %c0_1, %c0_2] : memref<1x10x10x16xbf16, #tpu.memory_space<vmem>>, vector<1x8x8x16xbf16>
    %2 = vector.shape_cast %1 : vector<1x8x8x16xbf16> to vector<8x8x16xbf16>
    %3 = vector.shape_cast %2 : vector<8x8x16xbf16> to vector<64x16xbf16>
    %c0_3 = arith.constant 0 : index
    %c0_4 = arith.constant 0 : index
    %c0_5 = arith.constant 0 : index
    %4 = vector.load %arg2[%c0_3, %c0_4, %c0_5] : memref<9x16x32xbf16, #tpu.memory_space<vmem>>, vector<1x16x32xbf16>
    %5 = vector.shape_cast %4 : vector<1x16x32xbf16> to vector<16x32xbf16>
    %cst_6 = arith.constant dense<0.000000e+00> : vector<64x32xf32>
    %6 = tpu.matmul %3, %5, %cst_6 {dimension_numbers = #tpu.dot_dimension_numbers<[1], [0], [0], [1], [0, 0, 1, 1], [], []>} : vector<64x16xbf16>, vector<16x32xbf16>, vector<64x32xf32> -> vector<64x32xf32>
    %7 = arith.addf %0, %6 : vector<64x32xf32>
    %c0_7 = arith.constant 0 : index
    %c0_8 = arith.constant 0 : index
    %c1 = arith.constant 1 : index
    %c0_9 = arith.constant 0 : index
    %8 = vector.load %arg1[%c0_7, %c0_8, %c1, %c0_9] : memref<1x10x10x16xbf16, #tpu.memory_space<vmem>>, vector<1x8x8x16xbf16>
    %9 = vector.shape_cast %8 : vector<1x8x8x16xbf16> to vector<8x8x16xbf16>
    %10 = vector.shape_cast %9 : vector<8x8x16xbf16> to vector<64x16xbf16>
    %c1_10 = arith.constant 1 : index
    %c0_11 = arith.constant 0 : index
    %c0_12 = arith.constant 0 : index
    %11 = vector.load %arg2[%c1_10, %c0_11, %c0_12] : memref<9x16x32xbf16, #tpu.memory_space<vmem>>, vector<1x16x32xbf16>
    %12 = vector.shape_cast %11 : vector<1x16x32xbf16> to vector<16x32xbf16>
    %cst_13 = arith.constant dense<0.000000e+00> : vector<64x32xf32>
    %13 = tpu.matmul %10, %12, %cst_13 {dimension_numbers = #tpu.dot_dimension_numbers<[1], [0], [0], [1], [0, 0, 1, 1], [], []>} : vector<64x16xbf16>, vector<16x32xbf16>, vector<64x32xf32> -> vector<64x32xf32>
    %14 = arith.addf %7, %13 : vector<64x32xf32>
    %c0_14 = arith.constant 0 : index
    %c0_15 = arith.constant 0 : index
    %c2 = arith.constant 2 : index
    %c0_16 = arith.constant 0 : index
    %15 = vector.load %arg1[%c0_14, %c0_15, %c2, %c0_16] : memref<1x10x10x16xbf16, #tpu.memory_space<vmem>>, vector<1x8x8x16xbf16>
    %16 = vector.shape_cast %15 : vector<1x8x8x16xbf16> to vector<8x8x16xbf16>
    %17 = vector.shape_cast %16 : vector<8x8x16xbf16> to vector<64x16xbf16>
    %c2_17 = arith.constant 2 : index
    %c0_18 = arith.constant 0 : index
    %c0_19 = arith.constant 0 : index
    %18 = vector.load %arg2[%c2_17, %c0_18, %c0_19] : memref<9x16x32xbf16, #tpu.memory_space<vmem>>, vector<1x16x32xbf16>
    %19 = vector.shape_cast %18 : vector<1x16x32xbf16> to vector<16x32xbf16>
    %cst_20 = arith.constant dense<0.000000e+00> : vector<64x32xf32>
    %20 = tpu.matmul %17, %19, %cst_20 {dimension_numbers = #tpu.dot_dimension_numbers<[1], [0], [0], [1], [0, 0, 1, 1], [], []>} : vector<64x16xbf16>, vector<16x32xbf16>, vector<64x32xf32> -> vector<64x32xf32>
    %21 = arith.addf %14, %20 : vector<64x32xf32>
    %c0_21 = arith.constant 0 : index
    %c1_22 = arith.constant 1 : index
    %c0_23 = arith.constant 0 : index
    %c0_24 = arith.constant 0 : index
    %22 = vector.load %arg1[%c0_21, %c1_22, %c0_23, %c0_24] : memref<1x10x10x16xbf16, #tpu.memory_space<vmem>>, vector<1x8x8x16xbf16>
    %23 = vector.shape_cast %22 : vector<1x8x8x16xbf16> to vector<8x8x16xbf16>
    %24 = vector.shape_cast %23 : vector<8x8x16xbf16> to vector<64x16xbf16>
    %c3 = arith.constant 3 : index
    %c0_25 = arith.constant 0 : index
    %c0_26 = arith.constant 0 : index
    %25 = vector.load %arg2[%c3, %c0_25, %c0_26] : memref<9x16x32xbf16, #tpu.memory_space<vmem>>, vector<1x16x32xbf16>
    %26 = vector.shape_cast %25 : vector<1x16x32xbf16> to vector<16x32xbf16>
    %cst_27 = arith.constant dense<0.000000e+00> : vector<64x32xf32>
    %27 = tpu.matmul %24, %26, %cst_27 {dimension_numbers = #tpu.dot_dimension_numbers<[1], [0], [0], [1], [0, 0, 1, 1], [], []>} : vector<64x16xbf16>, vector<16x32xbf16>, vector<64x32xf32> -> vector<64x32xf32>
    %28 = arith.addf %21, %27 : vector<64x32xf32>
    %c0_28 = arith.constant 0 : index
    %c1_29 = arith.constant 1 : index
    %c1_30 = arith.constant 1 : index
    %c0_31 = arith.constant 0 : index
    %29 = vector.load %arg1[%c0_28, %c1_29, %c1_30, %c0_31] : memref<1x10x10x16xbf16, #tpu.memory_space<vmem>>, vector<1x8x8x16xbf16>
    %30 = vector.shape_cast %29 : vector<1x8x8x16xbf16> to vector<8x8x16xbf16>
    %31 = vector.shape_cast %30 : vector<8x8x16xbf16> to vector<64x16xbf16>
    %c4 = arith.constant 4 : index
    %c0_32 = arith.constant 0 : index
    %c0_33 = arith.constant 0 : index
    %32 = vector.load %arg2[%c4, %c0_32, %c0_33] : memref<9x16x32xbf16, #tpu.memory_space<vmem>>, vector<1x16x32xbf16>
    %33 = vector.shape_cast %32 : vector<1x16x32xbf16> to vector<16x32xbf16>
    %cst_34 = arith.constant dense<0.000000e+00> : vector<64x32xf32>
    %34 = tpu.matmul %31, %33, %cst_34 {dimension_numbers = #tpu.dot_dimension_numbers<[1], [0], [0], [1], [0, 0, 1, 1], [], []>} : vector<64x16xbf16>, vector<16x32xbf16>, vector<64x32xf32> -> vector<64x32xf32>
    %35 = arith.addf %28, %34 : vector<64x32xf32>
    %c0_35 = arith.constant 0 : index
    %c1_36 = arith.constant 1 : index
    %c2_37 = arith.constant 2 : index
    %c0_38 = arith.constant 0 : index
    %36 = vector.load %arg1[%c0_35, %c1_36, %c2_37, %c0_38] : memref<1x10x10x16xbf16, #tpu.memory_space<vmem>>, vector<1x8x8x16xbf16>
    %37 = vector.shape_cast %36 : vector<1x8x8x16xbf16> to vector<8x8x16xbf16>
    %38 = vector.shape_cast %37 : vector<8x8x16xbf16> to vector<64x16xbf16>
    %c5 = arith.constant 5 : index
    %c0_39 = arith.constant 0 : index
    %c0_40 = arith.constant 0 : index
    %39 = vector.load %arg2[%c5, %c0_39, %c0_40] : memref<9x16x32xbf16, #tpu.memory_space<vmem>>, vector<1x16x32xbf16>
    %40 = vector.shape_cast %39 : vector<1x16x32xbf16> to vector<16x32xbf16>
    %cst_41 = arith.constant dense<0.000000e+00> : vector<64x32xf32>
    %41 = tpu.matmul %38, %40, %cst_41 {dimension_numbers = #tpu.dot_dimension_numbers<[1], [0], [0], [1], [0, 0, 1, 1], [], []>} : vector<64x16xbf16>, vector<16x32xbf16>, vector<64x32xf32> -> vector<64x32xf32>
    %42 = arith.addf %35, %41 : vector<64x32xf32>
    %c0_42 = arith.constant 0 : index
    %c2_43 = arith.constant 2 : index
    %c0_44 = arith.constant 0 : index
    %c0_45 = arith.constant 0 : index
    %43 = vector.load %arg1[%c0_42, %c2_43, %c0_44, %c0_45] : memref<1x10x10x16xbf16, #tpu.memory_space<vmem>>, vector<1x8x8x16xbf16>
    %44 = vector.shape_cast %43 : vector<1x8x8x16xbf16> to vector<8x8x16xbf16>
    %45 = vector.shape_cast %44 : vector<8x8x16xbf16> to vector<64x16xbf16>
    %c6 = arith.constant 6 : index
    %c0_46 = arith.constant 0 : index
    %c0_47 = arith.constant 0 : index
    %46 = vector.load %arg2[%c6, %c0_46, %c0_47] : memref<9x16x32xbf16, #tpu.memory_space<vmem>>, vector<1x16x32xbf16>
    %47 = vector.shape_cast %46 : vector<1x16x32xbf16> to vector<16x32xbf16>
    %cst_48 = arith.constant dense<0.000000e+00> : vector<64x32xf32>
    %48 = tpu.matmul %45, %47, %cst_48 {dimension_numbers = #tpu.dot_dimension_numbers<[1], [0], [0], [1], [0, 0, 1, 1], [], []>} : vector<64x16xbf16>, vector<16x32xbf16>, vector<64x32xf32> -> vector<64x32xf32>
    %49 = arith.addf %42, %48 : vector<64x32xf32>
    %c0_49 = arith.constant 0 : index
    %c2_50 = arith.constant 2 : index
    %c1_51 = arith.constant 1 : index
    %c0_52 = arith.constant 0 : index
    %50 = vector.load %arg1[%c0_49, %c2_50, %c1_51, %c0_52] : memref<1x10x10x16xbf16, #tpu.memory_space<vmem>>, vector<1x8x8x16xbf16>
    %51 = vector.shape_cast %50 : vector<1x8x8x16xbf16> to vector<8x8x16xbf16>
    %52 = vector.shape_cast %51 : vector<8x8x16xbf16> to vector<64x16xbf16>
    %c7 = arith.constant 7 : index
    %c0_53 = arith.constant 0 : index
    %c0_54 = arith.constant 0 : index
    %53 = vector.load %arg2[%c7, %c0_53, %c0_54] : memref<9x16x32xbf16, #tpu.memory_space<vmem>>, vector<1x16x32xbf16>
    %54 = vector.shape_cast %53 : vector<1x16x32xbf16> to vector<16x32xbf16>
    %cst_55 = arith.constant dense<0.000000e+00> : vector<64x32xf32>
    %55 = tpu.matmul %52, %54, %cst_55 {dimension_numbers = #tpu.dot_dimension_numbers<[1], [0], [0], [1], [0, 0, 1, 1], [], []>} : vector<64x16xbf16>, vector<16x32xbf16>, vector<64x32xf32> -> vector<64x32xf32>
    %56 = arith.addf %49, %55 : vector<64x32xf32>
    %c0_56 = arith.constant 0 : index
    %c2_57 = arith.constant 2 : index
    %c2_58 = arith.constant 2 : index
    %c0_59 = arith.constant 0 : index
    %57 = vector.load %arg1[%c0_56, %c2_57, %c2_58, %c0_59] : memref<1x10x10x16xbf16, #tpu.memory_space<vmem>>, vector<1x8x8x16xbf16>
    %58 = vector.shape_cast %57 : vector<1x8x8x16xbf16> to vector<8x8x16xbf16>
    %59 = vector.shape_cast %58 : vector<8x8x16xbf16> to vector<64x16xbf16>
    %c8 = arith.constant 8 : index
    %c0_60 = arith.constant 0 : index
    %c0_61 = arith.constant 0 : index
    %60 = vector.load %arg2[%c8, %c0_60, %c0_61] : memref<9x16x32xbf16, #tpu.memory_space<vmem>>, vector<1x16x32xbf16>
    %61 = vector.shape_cast %60 : vector<1x16x32xbf16> to vector<16x32xbf16>
    %cst_62 = arith.constant dense<0.000000e+00> : vector<64x32xf32>
    %62 = tpu.matmul %59, %61, %cst_62 {dimension_numbers = #tpu.dot_dimension_numbers<[1], [0], [0], [1], [0, 0, 1, 1], [], []>} : vector<64x16xbf16>, vector<16x32xbf16>, vector<64x32xf32> -> vector<64x32xf32>
    %63 = arith.addf %56, %62 : vector<64x32xf32>
    %c0_63 = arith.constant 0 : index
    %c0_64 = arith.constant 0 : index
    %64 = vector.load %arg3[%c0_63, %c0_64] : memref<1x32xf32, #tpu.memory_space<vmem>>, vector<1x32xf32>
    %65 = vector.broadcast %64 : vector<1x32xf32> to vector<64x32xf32>
    %66 = arith.addf %63, %65 : vector<64x32xf32>
    %cst_65 = arith.constant 0.000000e+00 : f32
    %67 = vector.broadcast %cst_65 : f32 to vector<64x32xf32>
    %68 = arith.cmpf ogt, %66, %67 : vector<64x32xf32>
    %c0_66 = arith.constant 0 : index
    %c0_67 = arith.constant 0 : index
    %69 = vector.load %arg4[%c0_66, %c0_67] : memref<1x32xf32, #tpu.memory_space<vmem>>, vector<1x32xf32>
    %70 = vector.broadcast %69 : vector<1x32xf32> to vector<64x32xf32>
    %71 = arith.mulf %66, %70 : vector<64x32xf32>
    %72 = arith.select %68, %66, %71 : vector<64x32xi1>, vector<64x32xf32>
    %73 = arith.truncf %72 : vector<64x32xf32> to vector<64x32xbf16>
    %c0_68 = arith.constant 0 : index
    %c0_69 = arith.constant 0 : index
    %74 = vector.load %arg5[%c0_68, %c0_69] : memref<32x16xbf16, #tpu.memory_space<vmem>>, vector<32x16xbf16>
    %cst_70 = arith.constant dense<0.000000e+00> : vector<64x16xf32>
    %75 = tpu.matmul %73, %74, %cst_70 {dimension_numbers = #tpu.dot_dimension_numbers<[1], [0], [0], [1], [0, 0, 1, 1], [], []>} : vector<64x32xbf16>, vector<32x16xbf16>, vector<64x16xf32> -> vector<64x16xf32>
    %c0_71 = arith.constant 0 : index
    %c0_72 = arith.constant 0 : index
    %76 = vector.load %arg6[%c0_71, %c0_72] : memref<1x16xf32, #tpu.memory_space<vmem>>, vector<1x16xf32>
    %77 = vector.broadcast %76 : vector<1x16xf32> to vector<64x16xf32>
    %78 = arith.addf %75, %77 : vector<64x16xf32>
    %c0_73 = arith.constant 0 : index
    %c0_74 = arith.constant 0 : index
    %c0_75 = arith.constant 0 : index
    %79 = vector.load %arg7[%c0_73, %c0_74, %c0_75] : memref<1x64x16xbf16, #tpu.memory_space<vmem>>, vector<1x64x16xbf16>
    %80 = vector.shape_cast %79 : vector<1x64x16xbf16> to vector<64x16xbf16>
    %81 = arith.extf %80 : vector<64x16xbf16> to vector<64x16xf32>
    %82 = arith.addf %78, %81 : vector<64x16xf32>
    %cst_76 = arith.constant 0.000000e+00 : f32
    %83 = vector.broadcast %cst_76 : f32 to vector<64x16xf32>
    %84 = arith.cmpf ogt, %82, %83 : vector<64x16xf32>
    %c0_77 = arith.constant 0 : index
    %c0_78 = arith.constant 0 : index
    %85 = vector.load %arg8[%c0_77, %c0_78] : memref<1x16xf32, #tpu.memory_space<vmem>>, vector<1x16xf32>
    %86 = vector.broadcast %85 : vector<1x16xf32> to vector<64x16xf32>
    %87 = arith.mulf %82, %86 : vector<64x16xf32>
    %88 = arith.select %84, %82, %87 : vector<64x16xi1>, vector<64x16xf32>
    %89 = arith.truncf %88 : vector<64x16xf32> to vector<64x16xbf16>
    %c0_79 = arith.constant 0 : index
    %c0_80 = arith.constant 0 : index
    %c0_81 = arith.constant 0 : index
    %90 = vector.load %arg9[%c0_79, %c0_80, %c0_81] : memref<1x64x16xbf16, #tpu.memory_space<vmem>>, vector<1x64x16xbf16>
    %91 = vector.shape_cast %90 : vector<1x64x16xbf16> to vector<64x16xbf16>
    %92 = vector.shape_cast %89 : vector<64x16xbf16> to vector<1x64x16xbf16>
    tpu.vector_store %arg9[%c0_79, %c0_80, %c0_81], %92 {strides = array<i32>} : memref<1x64x16xbf16, #tpu.memory_space<vmem>>, vector<1x64x16xbf16>,
    return
  }
  func.func @transform_0(%arg0: i32) -> (i32, i32, i32, i32) {
    %c0_i32 = arith.constant 0 : i32
    %c0_i32_0 = arith.constant 0 : i32
    %c0_i32_1 = arith.constant 0 : i32
    %c0_i32_2 = arith.constant 0 : i32
    return %arg0, %c0_i32, %c0_i32_0, %c0_i32_1 : i32, i32, i32, i32
  }
  func.func @transform_1(%arg0: i32) -> (i32, i32, i32) {
    %c0_i32 = arith.constant 0 : i32
    %c0_i32_0 = arith.constant 0 : i32
    %c0_i32_1 = arith.constant 0 : i32
    %c0_i32_2 = arith.constant 0 : i32
    return %c0_i32, %c0_i32_0, %c0_i32_1 : i32, i32, i32
  }
  func.func @transform_2(%arg0: i32) -> (i32, i32) {
    %c0_i32 = arith.constant 0 : i32
    %c0_i32_0 = arith.constant 0 : i32
    %c0_i32_1 = arith.constant 0 : i32
    return %c0_i32, %c0_i32_0 : i32, i32
  }
  func.func @transform_3(%arg0: i32) -> (i32, i32) {
    %c0_i32 = arith.constant 0 : i32
    %c0_i32_0 = arith.constant 0 : i32
    %c0_i32_1 = arith.constant 0 : i32
    return %c0_i32, %c0_i32_0 : i32, i32
  }
  func.func @transform_4(%arg0: i32) -> (i32, i32) {
    %c0_i32 = arith.constant 0 : i32
    %c0_i32_0 = arith.constant 0 : i32
    %c0_i32_1 = arith.constant 0 : i32
    return %c0_i32, %c0_i32_0 : i32, i32
  }
  func.func @transform_5(%arg0: i32) -> (i32, i32) {
    %c0_i32 = arith.constant 0 : i32
    %c0_i32_0 = arith.constant 0 : i32
    %c0_i32_1 = arith.constant 0 : i32
    return %c0_i32, %c0_i32_0 : i32, i32
  }
  func.func @transform_6(%arg0: i32) -> (i32, i32, i32) {
    %c0_i32 = arith.constant 0 : i32
    %c0_i32_0 = arith.constant 0 : i32
    %c0_i32_1 = arith.constant 0 : i32
    return %arg0, %c0_i32, %c0_i32_0 : i32, i32, i32
  }
  func.func @transform_7(%arg0: i32) -> (i32, i32) {
    %c0_i32 = arith.constant 0 : i32
    %c0_i32_0 = arith.constant 0 : i32
    %c0_i32_1 = arith.constant 0 : i32
    return %c0_i32, %c0_i32_0 : i32, i32
  }
  func.func @transform_8(%arg0: i32) -> (i32, i32, i32) {
    %c0_i32 = arith.constant 0 : i32
    %c0_i32_0 = arith.constant 0 : i32
    %c0_i32_1 = arith.constant 0 : i32
    return %arg0, %c0_i32, %c0_i32_0 : i32, i32, i32
  }
}

module attributes {stable_mosaic.version = 11 : i64} {
  func.func @kernel(%arg0: i32, %arg1: memref<1x10x10x16xbf16, #tpu.memory_space<vmem>>, %arg2: memref<9x16x32xbf16, #tpu.memory_space<vmem>>, %arg3: memref<1x32xf32, #tpu.memory_space<vmem>>, %arg4: memref<1x32xf32, #tpu.memory_space<vmem>>, %arg5: memref<32x16xbf16, #tpu.memory_space<vmem>>, %arg6: memref<1x16xf32, #tpu.memory_space<vmem>>, %arg7: memref<1x16xf32, #tpu.memory_space<vmem>>, %arg8: memref<1x64x16xbf16, #tpu.memory_space<vmem>>) attributes {dimension_semantics = [#tpu.dimension_semantics<parallel>], iteration_bounds = array<i64: 2>, scalar_prefetch = 0 : i64, scratch_operands = 0 : i64, tpu.core_type = #tpu.core_type<tc>, window_params = [{transform_indices = @transform_0, window_bounds = array<i64: 1, 10, 10, 16>}, {pipeline_mode = #tpu.pipeline_mode<synchronous>, transform_indices = @transform_1, window_bounds = array<i64: 9, 16, 32>}, {pipeline_mode = #tpu.pipeline_mode<synchronous>, transform_indices = @transform_2, window_bounds = array<i64: 1, 32>}, {pipeline_mode = #tpu.pipeline_mode<synchronous>, transform_indices = @transform_3, window_bounds = array<i64: 1, 32>}, {pipeline_mode = #tpu.pipeline_mode<synchronous>, transform_indices = @transform_4, window_bounds = array<i64: 32, 16>}, {pipeline_mode = #tpu.pipeline_mode<synchronous>, transform_indices = @transform_5, window_bounds = array<i64: 1, 16>}, {pipeline_mode = #tpu.pipeline_mode<synchronous>, transform_indices = @transform_6, window_bounds = array<i64: 1, 16>}, {transform_indices = @transform_7, window_bounds = array<i64: 1, 64, 16>}]} {
    %cst = arith.constant 0.000000e+00 : f32
    %0 = vector.broadcast %cst : f32 to vector<64x32xf32>
    %c0 = arith.constant 0 : index
    %c0_0 = arith.constant 0 : index
    %c0_1 = arith.constant 0 : index
    %c0_2 = arith.constant 0 : index
    %1 = vector.load %arg1[%c0, %c0_0, %c0_1, %c0_2] : memref<1x10x10x16xbf16, #tpu.memory_space<vmem>>, vector<1x8x8x16xbf16>
    %2 = vector.shape_cast %1 : vector<1x8x8x16xbf16> to vector<8x8x16xbf16>
    %3 = vector.shape_cast %2 : vector<8x8x16xbf16> to vector<64x16xbf16>
    %c0_3 = arith.constant 0 : index
    %c0_4 = arith.constant 0 : index
    %c0_5 = arith.constant 0 : index
    %4 = vector.load %arg2[%c0_3, %c0_4, %c0_5] : memref<9x16x32xbf16, #tpu.memory_space<vmem>>, vector<1x16x32xbf16>
    %5 = vector.shape_cast %4 : vector<1x16x32xbf16> to vector<16x32xbf16>
    %cst_6 = arith.constant dense<0.000000e+00> : vector<64x32xf32>
    %6 = tpu.matmul %3, %5, %cst_6 {dimension_numbers = #tpu.dot_dimension_numbers<[1], [0], [0], [1], [0, 0, 1, 1], [], []>} : vector<64x16xbf16>, vector<16x32xbf16>, vector<64x32xf32> -> vector<64x32xf32>
    %7 = arith.addf %0, %6 : vector<64x32xf32>
    %c0_7 = arith.constant 0 : index
    %c0_8 = arith.constant 0 : index
    %c1 = arith.constant 1 : index
    %c0_9 = arith.constant 0 : index
    %8 = vector.load %arg1[%c0_7, %c0_8, %c1, %c0_9] : memref<1x10x10x16xbf16, #tpu.memory_space<vmem>>, vector<1x8x8x16xbf16>
    %9 = vector.shape_cast %8 : vector<1x8x8x16xbf16> to vector<8x8x16xbf16>
    %10 = vector.shape_cast %9 : vector<8x8x16xbf16> to vector<64x16xbf16>
    %c1_10 = arith.constant 1 : index
    %c0_11 = arith.constant 0 : index
    %c0_12 = arith.constant 0 : index
    %11 = vector.load %arg2[%c1_10, %c0_11, %c0_12] : memref<9x16x32xbf16, #tpu.memory_space<vmem>>, vector<1x16x32xbf16>
    %12 = vector.shape_cast %11 : vector<1x16x32xbf16> to vector<16x32xbf16>
    %cst_13 = arith.constant dense<0.000000e+00> : vector<64x32xf32>
    %13 = tpu.matmul %10, %12, %cst_13 {dimension_numbers = #tpu.dot_dimension_numbers<[1], [0], [0], [1], [0, 0, 1, 1], [], []>} : vector<64x16xbf16>, vector<16x32xbf16>, vector<64x32xf32> -> vector<64x32xf32>
    %14 = arith.addf %7, %13 : vector<64x32xf32>
    %c0_14 = arith.constant 0 : index
    %c0_15 = arith.constant 0 : index
    %c2 = arith.constant 2 : index
    %c0_16 = arith.constant 0 : index
    %15 = vector.load %arg1[%c0_14, %c0_15, %c2, %c0_16] : memref<1x10x10x16xbf16, #tpu.memory_space<vmem>>, vector<1x8x8x16xbf16>
    %16 = vector.shape_cast %15 : vector<1x8x8x16xbf16> to vector<8x8x16xbf16>
    %17 = vector.shape_cast %16 : vector<8x8x16xbf16> to vector<64x16xbf16>
    %c2_17 = arith.constant 2 : index
    %c0_18 = arith.constant 0 : index
    %c0_19 = arith.constant 0 : index
    %18 = vector.load %arg2[%c2_17, %c0_18, %c0_19] : memref<9x16x32xbf16, #tpu.memory_space<vmem>>, vector<1x16x32xbf16>
    %19 = vector.shape_cast %18 : vector<1x16x32xbf16> to vector<16x32xbf16>
    %cst_20 = arith.constant dense<0.000000e+00> : vector<64x32xf32>
    %20 = tpu.matmul %17, %19, %cst_20 {dimension_numbers = #tpu.dot_dimension_numbers<[1], [0], [0], [1], [0, 0, 1, 1], [], []>} : vector<64x16xbf16>, vector<16x32xbf16>, vector<64x32xf32> -> vector<64x32xf32>
    %21 = arith.addf %14, %20 : vector<64x32xf32>
    %c0_21 = arith.constant 0 : index
    %c1_22 = arith.constant 1 : index
    %c0_23 = arith.constant 0 : index
    %c0_24 = arith.constant 0 : index
    %22 = vector.load %arg1[%c0_21, %c1_22, %c0_23, %c0_24] : memref<1x10x10x16xbf16, #tpu.memory_space<vmem>>, vector<1x8x8x16xbf16>
    %23 = vector.shape_cast %22 : vector<1x8x8x16xbf16> to vector<8x8x16xbf16>
    %24 = vector.shape_cast %23 : vector<8x8x16xbf16> to vector<64x16xbf16>
    %c3 = arith.constant 3 : index
    %c0_25 = arith.constant 0 : index
    %c0_26 = arith.constant 0 : index
    %25 = vector.load %arg2[%c3, %c0_25, %c0_26] : memref<9x16x32xbf16, #tpu.memory_space<vmem>>, vector<1x16x32xbf16>
    %26 = vector.shape_cast %25 : vector<1x16x32xbf16> to vector<16x32xbf16>
    %cst_27 = arith.constant dense<0.000000e+00> : vector<64x32xf32>
    %27 = tpu.matmul %24, %26, %cst_27 {dimension_numbers = #tpu.dot_dimension_numbers<[1], [0], [0], [1], [0, 0, 1, 1], [], []>} : vector<64x16xbf16>, vector<16x32xbf16>, vector<64x32xf32> -> vector<64x32xf32>
    %28 = arith.addf %21, %27 : vector<64x32xf32>
    %c0_28 = arith.constant 0 : index
    %c1_29 = arith.constant 1 : index
    %c1_30 = arith.constant 1 : index
    %c0_31 = arith.constant 0 : index
    %29 = vector.load %arg1[%c0_28, %c1_29, %c1_30, %c0_31] : memref<1x10x10x16xbf16, #tpu.memory_space<vmem>>, vector<1x8x8x16xbf16>
    %30 = vector.shape_cast %29 : vector<1x8x8x16xbf16> to vector<8x8x16xbf16>
    %31 = vector.shape_cast %30 : vector<8x8x16xbf16> to vector<64x16xbf16>
    %c4 = arith.constant 4 : index
    %c0_32 = arith.constant 0 : index
    %c0_33 = arith.constant 0 : index
    %32 = vector.load %arg2[%c4, %c0_32, %c0_33] : memref<9x16x32xbf16, #tpu.memory_space<vmem>>, vector<1x16x32xbf16>
    %33 = vector.shape_cast %32 : vector<1x16x32xbf16> to vector<16x32xbf16>
    %cst_34 = arith.constant dense<0.000000e+00> : vector<64x32xf32>
    %34 = tpu.matmul %31, %33, %cst_34 {dimension_numbers = #tpu.dot_dimension_numbers<[1], [0], [0], [1], [0, 0, 1, 1], [], []>} : vector<64x16xbf16>, vector<16x32xbf16>, vector<64x32xf32> -> vector<64x32xf32>
    %35 = arith.addf %28, %34 : vector<64x32xf32>
    %c0_35 = arith.constant 0 : index
    %c1_36 = arith.constant 1 : index
    %c2_37 = arith.constant 2 : index
    %c0_38 = arith.constant 0 : index
    %36 = vector.load %arg1[%c0_35, %c1_36, %c2_37, %c0_38] : memref<1x10x10x16xbf16, #tpu.memory_space<vmem>>, vector<1x8x8x16xbf16>
    %37 = vector.shape_cast %36 : vector<1x8x8x16xbf16> to vector<8x8x16xbf16>
    %38 = vector.shape_cast %37 : vector<8x8x16xbf16> to vector<64x16xbf16>
    %c5 = arith.constant 5 : index
    %c0_39 = arith.constant 0 : index
    %c0_40 = arith.constant 0 : index
    %39 = vector.load %arg2[%c5, %c0_39, %c0_40] : memref<9x16x32xbf16, #tpu.memory_space<vmem>>, vector<1x16x32xbf16>
    %40 = vector.shape_cast %39 : vector<1x16x32xbf16> to vector<16x32xbf16>
    %cst_41 = arith.constant dense<0.000000e+00> : vector<64x32xf32>
    %41 = tpu.matmul %38, %40, %cst_41 {dimension_numbers = #tpu.dot_dimension_numbers<[1], [0], [0], [1], [0, 0, 1, 1], [], []>} : vector<64x16xbf16>, vector<16x32xbf16>, vector<64x32xf32> -> vector<64x32xf32>
    %42 = arith.addf %35, %41 : vector<64x32xf32>
    %c0_42 = arith.constant 0 : index
    %c2_43 = arith.constant 2 : index
    %c0_44 = arith.constant 0 : index
    %c0_45 = arith.constant 0 : index
    %43 = vector.load %arg1[%c0_42, %c2_43, %c0_44, %c0_45] : memref<1x10x10x16xbf16, #tpu.memory_space<vmem>>, vector<1x8x8x16xbf16>
    %44 = vector.shape_cast %43 : vector<1x8x8x16xbf16> to vector<8x8x16xbf16>
    %45 = vector.shape_cast %44 : vector<8x8x16xbf16> to vector<64x16xbf16>
    %c6 = arith.constant 6 : index
    %c0_46 = arith.constant 0 : index
    %c0_47 = arith.constant 0 : index
    %46 = vector.load %arg2[%c6, %c0_46, %c0_47] : memref<9x16x32xbf16, #tpu.memory_space<vmem>>, vector<1x16x32xbf16>
    %47 = vector.shape_cast %46 : vector<1x16x32xbf16> to vector<16x32xbf16>
    %cst_48 = arith.constant dense<0.000000e+00> : vector<64x32xf32>
    %48 = tpu.matmul %45, %47, %cst_48 {dimension_numbers = #tpu.dot_dimension_numbers<[1], [0], [0], [1], [0, 0, 1, 1], [], []>} : vector<64x16xbf16>, vector<16x32xbf16>, vector<64x32xf32> -> vector<64x32xf32>
    %49 = arith.addf %42, %48 : vector<64x32xf32>
    %c0_49 = arith.constant 0 : index
    %c2_50 = arith.constant 2 : index
    %c1_51 = arith.constant 1 : index
    %c0_52 = arith.constant 0 : index
    %50 = vector.load %arg1[%c0_49, %c2_50, %c1_51, %c0_52] : memref<1x10x10x16xbf16, #tpu.memory_space<vmem>>, vector<1x8x8x16xbf16>
    %51 = vector.shape_cast %50 : vector<1x8x8x16xbf16> to vector<8x8x16xbf16>
    %52 = vector.shape_cast %51 : vector<8x8x16xbf16> to vector<64x16xbf16>
    %c7 = arith.constant 7 : index
    %c0_53 = arith.constant 0 : index
    %c0_54 = arith.constant 0 : index
    %53 = vector.load %arg2[%c7, %c0_53, %c0_54] : memref<9x16x32xbf16, #tpu.memory_space<vmem>>, vector<1x16x32xbf16>
    %54 = vector.shape_cast %53 : vector<1x16x32xbf16> to vector<16x32xbf16>
    %cst_55 = arith.constant dense<0.000000e+00> : vector<64x32xf32>
    %55 = tpu.matmul %52, %54, %cst_55 {dimension_numbers = #tpu.dot_dimension_numbers<[1], [0], [0], [1], [0, 0, 1, 1], [], []>} : vector<64x16xbf16>, vector<16x32xbf16>, vector<64x32xf32> -> vector<64x32xf32>
    %56 = arith.addf %49, %55 : vector<64x32xf32>
    %c0_56 = arith.constant 0 : index
    %c2_57 = arith.constant 2 : index
    %c2_58 = arith.constant 2 : index
    %c0_59 = arith.constant 0 : index
    %57 = vector.load %arg1[%c0_56, %c2_57, %c2_58, %c0_59] : memref<1x10x10x16xbf16, #tpu.memory_space<vmem>>, vector<1x8x8x16xbf16>
    %58 = vector.shape_cast %57 : vector<1x8x8x16xbf16> to vector<8x8x16xbf16>
    %59 = vector.shape_cast %58 : vector<8x8x16xbf16> to vector<64x16xbf16>
    %c8 = arith.constant 8 : index
    %c0_60 = arith.constant 0 : index
    %c0_61 = arith.constant 0 : index
    %60 = vector.load %arg2[%c8, %c0_60, %c0_61] : memref<9x16x32xbf16, #tpu.memory_space<vmem>>, vector<1x16x32xbf16>
    %61 = vector.shape_cast %60 : vector<1x16x32xbf16> to vector<16x32xbf16>
    %cst_62 = arith.constant dense<0.000000e+00> : vector<64x32xf32>
    %62 = tpu.matmul %59, %61, %cst_62 {dimension_numbers = #tpu.dot_dimension_numbers<[1], [0], [0], [1], [0, 0, 1, 1], [], []>} : vector<64x16xbf16>, vector<16x32xbf16>, vector<64x32xf32> -> vector<64x32xf32>
    %63 = arith.addf %56, %62 : vector<64x32xf32>
    %c0_63 = arith.constant 0 : index
    %c0_64 = arith.constant 0 : index
    %64 = vector.load %arg3[%c0_63, %c0_64] : memref<1x32xf32, #tpu.memory_space<vmem>>, vector<1x32xf32>
    %65 = vector.broadcast %64 : vector<1x32xf32> to vector<64x32xf32>
    %66 = arith.addf %63, %65 : vector<64x32xf32>
    %cst_65 = arith.constant 0.000000e+00 : f32
    %67 = vector.broadcast %cst_65 : f32 to vector<64x32xf32>
    %68 = arith.cmpf ogt, %66, %67 : vector<64x32xf32>
    %c0_66 = arith.constant 0 : index
    %c0_67 = arith.constant 0 : index
    %69 = vector.load %arg4[%c0_66, %c0_67] : memref<1x32xf32, #tpu.memory_space<vmem>>, vector<1x32xf32>
    %70 = vector.broadcast %69 : vector<1x32xf32> to vector<64x32xf32>
    %71 = arith.mulf %66, %70 : vector<64x32xf32>
    %72 = arith.select %68, %66, %71 : vector<64x32xi1>, vector<64x32xf32>
    %73 = arith.truncf %72 : vector<64x32xf32> to vector<64x32xbf16>
    %c0_68 = arith.constant 0 : index
    %c0_69 = arith.constant 0 : index
    %74 = vector.load %arg5[%c0_68, %c0_69] : memref<32x16xbf16, #tpu.memory_space<vmem>>, vector<32x16xbf16>
    %cst_70 = arith.constant dense<0.000000e+00> : vector<64x16xf32>
    %75 = tpu.matmul %73, %74, %cst_70 {dimension_numbers = #tpu.dot_dimension_numbers<[1], [0], [0], [1], [0, 0, 1, 1], [], []>} : vector<64x32xbf16>, vector<32x16xbf16>, vector<64x16xf32> -> vector<64x16xf32>
    %c0_71 = arith.constant 0 : index
    %c0_72 = arith.constant 0 : index
    %76 = vector.load %arg6[%c0_71, %c0_72] : memref<1x16xf32, #tpu.memory_space<vmem>>, vector<1x16xf32>
    %77 = vector.broadcast %76 : vector<1x16xf32> to vector<64x16xf32>
    %78 = arith.addf %75, %77 : vector<64x16xf32>
    %cst_73 = arith.constant 0.000000e+00 : f32
    %79 = vector.broadcast %cst_73 : f32 to vector<64x16xf32>
    %80 = arith.cmpf ogt, %78, %79 : vector<64x16xf32>
    %c0_74 = arith.constant 0 : index
    %c0_75 = arith.constant 0 : index
    %81 = vector.load %arg7[%c0_74, %c0_75] : memref<1x16xf32, #tpu.memory_space<vmem>>, vector<1x16xf32>
    %82 = vector.broadcast %81 : vector<1x16xf32> to vector<64x16xf32>
    %83 = arith.mulf %78, %82 : vector<64x16xf32>
    %84 = arith.select %80, %78, %83 : vector<64x16xi1>, vector<64x16xf32>
    %85 = arith.truncf %84 : vector<64x16xf32> to vector<64x16xbf16>
    %c0_76 = arith.constant 0 : index
    %c0_77 = arith.constant 0 : index
    %c0_78 = arith.constant 0 : index
    %86 = vector.load %arg8[%c0_76, %c0_77, %c0_78] : memref<1x64x16xbf16, #tpu.memory_space<vmem>>, vector<1x64x16xbf16>
    %87 = vector.shape_cast %86 : vector<1x64x16xbf16> to vector<64x16xbf16>
    %88 = vector.shape_cast %85 : vector<64x16xbf16> to vector<1x64x16xbf16>
    tpu.vector_store %arg8[%c0_76, %c0_77, %c0_78], %88 {strides = array<i32>} : memref<1x64x16xbf16, #tpu.memory_space<vmem>>, vector<1x64x16xbf16>,
    return
  }
  func.func @transform_0(%arg0: i32) -> (i32, i32, i32, i32) {
    %c0_i32 = arith.constant 0 : i32
    %c0_i32_0 = arith.constant 0 : i32
    %c0_i32_1 = arith.constant 0 : i32
    %c0_i32_2 = arith.constant 0 : i32
    return %arg0, %c0_i32, %c0_i32_0, %c0_i32_1 : i32, i32, i32, i32
  }
  func.func @transform_1(%arg0: i32) -> (i32, i32, i32) {
    %c0_i32 = arith.constant 0 : i32
    %c0_i32_0 = arith.constant 0 : i32
    %c0_i32_1 = arith.constant 0 : i32
    %c0_i32_2 = arith.constant 0 : i32
    return %c0_i32, %c0_i32_0, %c0_i32_1 : i32, i32, i32
  }
  func.func @transform_2(%arg0: i32) -> (i32, i32) {
    %c0_i32 = arith.constant 0 : i32
    %c0_i32_0 = arith.constant 0 : i32
    %c0_i32_1 = arith.constant 0 : i32
    return %c0_i32, %c0_i32_0 : i32, i32
  }
  func.func @transform_3(%arg0: i32) -> (i32, i32) {
    %c0_i32 = arith.constant 0 : i32
    %c0_i32_0 = arith.constant 0 : i32
    %c0_i32_1 = arith.constant 0 : i32
    return %c0_i32, %c0_i32_0 : i32, i32
  }
  func.func @transform_4(%arg0: i32) -> (i32, i32) {
    %c0_i32 = arith.constant 0 : i32
    %c0_i32_0 = arith.constant 0 : i32
    %c0_i32_1 = arith.constant 0 : i32
    return %c0_i32, %c0_i32_0 : i32, i32
  }
  func.func @transform_5(%arg0: i32) -> (i32, i32) {
    %c0_i32 = arith.constant 0 : i32
    %c0_i32_0 = arith.constant 0 : i32
    %c0_i32_1 = arith.constant 0 : i32
    return %c0_i32, %c0_i32_0 : i32, i32
  }
  func.func @transform_6(%arg0: i32) -> (i32, i32) {
    %c0_i32 = arith.constant 0 : i32
    %c0_i32_0 = arith.constant 0 : i32
    %c0_i32_1 = arith.constant 0 : i32
    return %c0_i32, %c0_i32_0 : i32, i32
  }
  func.func @transform_7(%arg0: i32) -> (i32, i32, i32) {
    %c0_i32 = arith.constant 0 : i32
    %c0_i32_0 = arith.constant 0 : i32
    %c0_i32_1 = arith.constant 0 : i32
    return %arg0, %c0_i32, %c0_i32_0 : i32, i32, i32
  }
}

module attributes {stable_mosaic.version = 11 : i64} {
  func.func @kernel(%arg0: i32, %arg1: memref<1x10x10x16xbf16, #tpu.memory_space<vmem>>, %arg2: memref<9x16x32xbf16, #tpu.memory_space<vmem>>, %arg3: memref<1x32xf32, #tpu.memory_space<vmem>>, %arg4: memref<1x32xf32, #tpu.memory_space<vmem>>, %arg5: memref<32x16xbf16, #tpu.memory_space<vmem>>, %arg6: memref<1x16xf32, #tpu.memory_space<vmem>>, %arg7: memref<1x64x16xbf16, #tpu.memory_space<vmem>>, %arg8: memref<1x1x16xf32, #tpu.memory_space<vmem>>) attributes {dimension_semantics = [#tpu.dimension_semantics<parallel>], iteration_bounds = array<i64: 2>, scalar_prefetch = 0 : i64, scratch_operands = 0 : i64, tpu.core_type = #tpu.core_type<tc>, window_params = [{transform_indices = @transform_0, window_bounds = array<i64: 1, 10, 10, 16>}, {pipeline_mode = #tpu.pipeline_mode<synchronous>, transform_indices = @transform_1, window_bounds = array<i64: 9, 16, 32>}, {pipeline_mode = #tpu.pipeline_mode<synchronous>, transform_indices = @transform_2, window_bounds = array<i64: 1, 32>}, {pipeline_mode = #tpu.pipeline_mode<synchronous>, transform_indices = @transform_3, window_bounds = array<i64: 1, 32>}, {pipeline_mode = #tpu.pipeline_mode<synchronous>, transform_indices = @transform_4, window_bounds = array<i64: 32, 16>}, {pipeline_mode = #tpu.pipeline_mode<synchronous>, transform_indices = @transform_5, window_bounds = array<i64: 1, 16>}, {transform_indices = @transform_6, window_bounds = array<i64: 1, 64, 16>}, {transform_indices = @transform_7, window_bounds = array<i64: 1, 1, 16>}]} {
    %cst = arith.constant 0.000000e+00 : f32
    %0 = vector.broadcast %cst : f32 to vector<64x32xf32>
    %c0 = arith.constant 0 : index
    %c0_0 = arith.constant 0 : index
    %c0_1 = arith.constant 0 : index
    %c0_2 = arith.constant 0 : index
    %1 = vector.load %arg1[%c0, %c0_0, %c0_1, %c0_2] : memref<1x10x10x16xbf16, #tpu.memory_space<vmem>>, vector<1x8x8x16xbf16>
    %2 = vector.shape_cast %1 : vector<1x8x8x16xbf16> to vector<8x8x16xbf16>
    %3 = vector.shape_cast %2 : vector<8x8x16xbf16> to vector<64x16xbf16>
    %c0_3 = arith.constant 0 : index
    %c0_4 = arith.constant 0 : index
    %c0_5 = arith.constant 0 : index
    %4 = vector.load %arg2[%c0_3, %c0_4, %c0_5] : memref<9x16x32xbf16, #tpu.memory_space<vmem>>, vector<1x16x32xbf16>
    %5 = vector.shape_cast %4 : vector<1x16x32xbf16> to vector<16x32xbf16>
    %cst_6 = arith.constant dense<0.000000e+00> : vector<64x32xf32>
    %6 = tpu.matmul %3, %5, %cst_6 {dimension_numbers = #tpu.dot_dimension_numbers<[1], [0], [0], [1], [0, 0, 1, 1], [], []>} : vector<64x16xbf16>, vector<16x32xbf16>, vector<64x32xf32> -> vector<64x32xf32>
    %7 = arith.addf %0, %6 : vector<64x32xf32>
    %c0_7 = arith.constant 0 : index
    %c0_8 = arith.constant 0 : index
    %c1 = arith.constant 1 : index
    %c0_9 = arith.constant 0 : index
    %8 = vector.load %arg1[%c0_7, %c0_8, %c1, %c0_9] : memref<1x10x10x16xbf16, #tpu.memory_space<vmem>>, vector<1x8x8x16xbf16>
    %9 = vector.shape_cast %8 : vector<1x8x8x16xbf16> to vector<8x8x16xbf16>
    %10 = vector.shape_cast %9 : vector<8x8x16xbf16> to vector<64x16xbf16>
    %c1_10 = arith.constant 1 : index
    %c0_11 = arith.constant 0 : index
    %c0_12 = arith.constant 0 : index
    %11 = vector.load %arg2[%c1_10, %c0_11, %c0_12] : memref<9x16x32xbf16, #tpu.memory_space<vmem>>, vector<1x16x32xbf16>
    %12 = vector.shape_cast %11 : vector<1x16x32xbf16> to vector<16x32xbf16>
    %cst_13 = arith.constant dense<0.000000e+00> : vector<64x32xf32>
    %13 = tpu.matmul %10, %12, %cst_13 {dimension_numbers = #tpu.dot_dimension_numbers<[1], [0], [0], [1], [0, 0, 1, 1], [], []>} : vector<64x16xbf16>, vector<16x32xbf16>, vector<64x32xf32> -> vector<64x32xf32>
    %14 = arith.addf %7, %13 : vector<64x32xf32>
    %c0_14 = arith.constant 0 : index
    %c0_15 = arith.constant 0 : index
    %c2 = arith.constant 2 : index
    %c0_16 = arith.constant 0 : index
    %15 = vector.load %arg1[%c0_14, %c0_15, %c2, %c0_16] : memref<1x10x10x16xbf16, #tpu.memory_space<vmem>>, vector<1x8x8x16xbf16>
    %16 = vector.shape_cast %15 : vector<1x8x8x16xbf16> to vector<8x8x16xbf16>
    %17 = vector.shape_cast %16 : vector<8x8x16xbf16> to vector<64x16xbf16>
    %c2_17 = arith.constant 2 : index
    %c0_18 = arith.constant 0 : index
    %c0_19 = arith.constant 0 : index
    %18 = vector.load %arg2[%c2_17, %c0_18, %c0_19] : memref<9x16x32xbf16, #tpu.memory_space<vmem>>, vector<1x16x32xbf16>
    %19 = vector.shape_cast %18 : vector<1x16x32xbf16> to vector<16x32xbf16>
    %cst_20 = arith.constant dense<0.000000e+00> : vector<64x32xf32>
    %20 = tpu.matmul %17, %19, %cst_20 {dimension_numbers = #tpu.dot_dimension_numbers<[1], [0], [0], [1], [0, 0, 1, 1], [], []>} : vector<64x16xbf16>, vector<16x32xbf16>, vector<64x32xf32> -> vector<64x32xf32>
    %21 = arith.addf %14, %20 : vector<64x32xf32>
    %c0_21 = arith.constant 0 : index
    %c1_22 = arith.constant 1 : index
    %c0_23 = arith.constant 0 : index
    %c0_24 = arith.constant 0 : index
    %22 = vector.load %arg1[%c0_21, %c1_22, %c0_23, %c0_24] : memref<1x10x10x16xbf16, #tpu.memory_space<vmem>>, vector<1x8x8x16xbf16>
    %23 = vector.shape_cast %22 : vector<1x8x8x16xbf16> to vector<8x8x16xbf16>
    %24 = vector.shape_cast %23 : vector<8x8x16xbf16> to vector<64x16xbf16>
    %c3 = arith.constant 3 : index
    %c0_25 = arith.constant 0 : index
    %c0_26 = arith.constant 0 : index
    %25 = vector.load %arg2[%c3, %c0_25, %c0_26] : memref<9x16x32xbf16, #tpu.memory_space<vmem>>, vector<1x16x32xbf16>
    %26 = vector.shape_cast %25 : vector<1x16x32xbf16> to vector<16x32xbf16>
    %cst_27 = arith.constant dense<0.000000e+00> : vector<64x32xf32>
    %27 = tpu.matmul %24, %26, %cst_27 {dimension_numbers = #tpu.dot_dimension_numbers<[1], [0], [0], [1], [0, 0, 1, 1], [], []>} : vector<64x16xbf16>, vector<16x32xbf16>, vector<64x32xf32> -> vector<64x32xf32>
    %28 = arith.addf %21, %27 : vector<64x32xf32>
    %c0_28 = arith.constant 0 : index
    %c1_29 = arith.constant 1 : index
    %c1_30 = arith.constant 1 : index
    %c0_31 = arith.constant 0 : index
    %29 = vector.load %arg1[%c0_28, %c1_29, %c1_30, %c0_31] : memref<1x10x10x16xbf16, #tpu.memory_space<vmem>>, vector<1x8x8x16xbf16>
    %30 = vector.shape_cast %29 : vector<1x8x8x16xbf16> to vector<8x8x16xbf16>
    %31 = vector.shape_cast %30 : vector<8x8x16xbf16> to vector<64x16xbf16>
    %c4 = arith.constant 4 : index
    %c0_32 = arith.constant 0 : index
    %c0_33 = arith.constant 0 : index
    %32 = vector.load %arg2[%c4, %c0_32, %c0_33] : memref<9x16x32xbf16, #tpu.memory_space<vmem>>, vector<1x16x32xbf16>
    %33 = vector.shape_cast %32 : vector<1x16x32xbf16> to vector<16x32xbf16>
    %cst_34 = arith.constant dense<0.000000e+00> : vector<64x32xf32>
    %34 = tpu.matmul %31, %33, %cst_34 {dimension_numbers = #tpu.dot_dimension_numbers<[1], [0], [0], [1], [0, 0, 1, 1], [], []>} : vector<64x16xbf16>, vector<16x32xbf16>, vector<64x32xf32> -> vector<64x32xf32>
    %35 = arith.addf %28, %34 : vector<64x32xf32>
    %c0_35 = arith.constant 0 : index
    %c1_36 = arith.constant 1 : index
    %c2_37 = arith.constant 2 : index
    %c0_38 = arith.constant 0 : index
    %36 = vector.load %arg1[%c0_35, %c1_36, %c2_37, %c0_38] : memref<1x10x10x16xbf16, #tpu.memory_space<vmem>>, vector<1x8x8x16xbf16>
    %37 = vector.shape_cast %36 : vector<1x8x8x16xbf16> to vector<8x8x16xbf16>
    %38 = vector.shape_cast %37 : vector<8x8x16xbf16> to vector<64x16xbf16>
    %c5 = arith.constant 5 : index
    %c0_39 = arith.constant 0 : index
    %c0_40 = arith.constant 0 : index
    %39 = vector.load %arg2[%c5, %c0_39, %c0_40] : memref<9x16x32xbf16, #tpu.memory_space<vmem>>, vector<1x16x32xbf16>
    %40 = vector.shape_cast %39 : vector<1x16x32xbf16> to vector<16x32xbf16>
    %cst_41 = arith.constant dense<0.000000e+00> : vector<64x32xf32>
    %41 = tpu.matmul %38, %40, %cst_41 {dimension_numbers = #tpu.dot_dimension_numbers<[1], [0], [0], [1], [0, 0, 1, 1], [], []>} : vector<64x16xbf16>, vector<16x32xbf16>, vector<64x32xf32> -> vector<64x32xf32>
    %42 = arith.addf %35, %41 : vector<64x32xf32>
    %c0_42 = arith.constant 0 : index
    %c2_43 = arith.constant 2 : index
    %c0_44 = arith.constant 0 : index
    %c0_45 = arith.constant 0 : index
    %43 = vector.load %arg1[%c0_42, %c2_43, %c0_44, %c0_45] : memref<1x10x10x16xbf16, #tpu.memory_space<vmem>>, vector<1x8x8x16xbf16>
    %44 = vector.shape_cast %43 : vector<1x8x8x16xbf16> to vector<8x8x16xbf16>
    %45 = vector.shape_cast %44 : vector<8x8x16xbf16> to vector<64x16xbf16>
    %c6 = arith.constant 6 : index
    %c0_46 = arith.constant 0 : index
    %c0_47 = arith.constant 0 : index
    %46 = vector.load %arg2[%c6, %c0_46, %c0_47] : memref<9x16x32xbf16, #tpu.memory_space<vmem>>, vector<1x16x32xbf16>
    %47 = vector.shape_cast %46 : vector<1x16x32xbf16> to vector<16x32xbf16>
    %cst_48 = arith.constant dense<0.000000e+00> : vector<64x32xf32>
    %48 = tpu.matmul %45, %47, %cst_48 {dimension_numbers = #tpu.dot_dimension_numbers<[1], [0], [0], [1], [0, 0, 1, 1], [], []>} : vector<64x16xbf16>, vector<16x32xbf16>, vector<64x32xf32> -> vector<64x32xf32>
    %49 = arith.addf %42, %48 : vector<64x32xf32>
    %c0_49 = arith.constant 0 : index
    %c2_50 = arith.constant 2 : index
    %c1_51 = arith.constant 1 : index
    %c0_52 = arith.constant 0 : index
    %50 = vector.load %arg1[%c0_49, %c2_50, %c1_51, %c0_52] : memref<1x10x10x16xbf16, #tpu.memory_space<vmem>>, vector<1x8x8x16xbf16>
    %51 = vector.shape_cast %50 : vector<1x8x8x16xbf16> to vector<8x8x16xbf16>
    %52 = vector.shape_cast %51 : vector<8x8x16xbf16> to vector<64x16xbf16>
    %c7 = arith.constant 7 : index
    %c0_53 = arith.constant 0 : index
    %c0_54 = arith.constant 0 : index
    %53 = vector.load %arg2[%c7, %c0_53, %c0_54] : memref<9x16x32xbf16, #tpu.memory_space<vmem>>, vector<1x16x32xbf16>
    %54 = vector.shape_cast %53 : vector<1x16x32xbf16> to vector<16x32xbf16>
    %cst_55 = arith.constant dense<0.000000e+00> : vector<64x32xf32>
    %55 = tpu.matmul %52, %54, %cst_55 {dimension_numbers = #tpu.dot_dimension_numbers<[1], [0], [0], [1], [0, 0, 1, 1], [], []>} : vector<64x16xbf16>, vector<16x32xbf16>, vector<64x32xf32> -> vector<64x32xf32>
    %56 = arith.addf %49, %55 : vector<64x32xf32>
    %c0_56 = arith.constant 0 : index
    %c2_57 = arith.constant 2 : index
    %c2_58 = arith.constant 2 : index
    %c0_59 = arith.constant 0 : index
    %57 = vector.load %arg1[%c0_56, %c2_57, %c2_58, %c0_59] : memref<1x10x10x16xbf16, #tpu.memory_space<vmem>>, vector<1x8x8x16xbf16>
    %58 = vector.shape_cast %57 : vector<1x8x8x16xbf16> to vector<8x8x16xbf16>
    %59 = vector.shape_cast %58 : vector<8x8x16xbf16> to vector<64x16xbf16>
    %c8 = arith.constant 8 : index
    %c0_60 = arith.constant 0 : index
    %c0_61 = arith.constant 0 : index
    %60 = vector.load %arg2[%c8, %c0_60, %c0_61] : memref<9x16x32xbf16, #tpu.memory_space<vmem>>, vector<1x16x32xbf16>
    %61 = vector.shape_cast %60 : vector<1x16x32xbf16> to vector<16x32xbf16>
    %cst_62 = arith.constant dense<0.000000e+00> : vector<64x32xf32>
    %62 = tpu.matmul %59, %61, %cst_62 {dimension_numbers = #tpu.dot_dimension_numbers<[1], [0], [0], [1], [0, 0, 1, 1], [], []>} : vector<64x16xbf16>, vector<16x32xbf16>, vector<64x32xf32> -> vector<64x32xf32>
    %63 = arith.addf %56, %62 : vector<64x32xf32>
    %c0_63 = arith.constant 0 : index
    %c0_64 = arith.constant 0 : index
    %64 = vector.load %arg3[%c0_63, %c0_64] : memref<1x32xf32, #tpu.memory_space<vmem>>, vector<1x32xf32>
    %65 = vector.broadcast %64 : vector<1x32xf32> to vector<64x32xf32>
    %66 = arith.addf %63, %65 : vector<64x32xf32>
    %cst_65 = arith.constant 0.000000e+00 : f32
    %67 = vector.broadcast %cst_65 : f32 to vector<64x32xf32>
    %68 = arith.cmpf ogt, %66, %67 : vector<64x32xf32>
    %c0_66 = arith.constant 0 : index
    %c0_67 = arith.constant 0 : index
    %69 = vector.load %arg4[%c0_66, %c0_67] : memref<1x32xf32, #tpu.memory_space<vmem>>, vector<1x32xf32>
    %70 = vector.broadcast %69 : vector<1x32xf32> to vector<64x32xf32>
    %71 = arith.mulf %66, %70 : vector<64x32xf32>
    %72 = arith.select %68, %66, %71 : vector<64x32xi1>, vector<64x32xf32>
    %73 = arith.truncf %72 : vector<64x32xf32> to vector<64x32xbf16>
    %c0_68 = arith.constant 0 : index
    %c0_69 = arith.constant 0 : index
    %74 = vector.load %arg5[%c0_68, %c0_69] : memref<32x16xbf16, #tpu.memory_space<vmem>>, vector<32x16xbf16>
    %cst_70 = arith.constant dense<0.000000e+00> : vector<64x16xf32>
    %75 = tpu.matmul %73, %74, %cst_70 {dimension_numbers = #tpu.dot_dimension_numbers<[1], [0], [0], [1], [0, 0, 1, 1], [], []>} : vector<64x32xbf16>, vector<32x16xbf16>, vector<64x16xf32> -> vector<64x16xf32>
    %c0_71 = arith.constant 0 : index
    %c0_72 = arith.constant 0 : index
    %76 = vector.load %arg6[%c0_71, %c0_72] : memref<1x16xf32, #tpu.memory_space<vmem>>, vector<1x16xf32>
    %77 = vector.broadcast %76 : vector<1x16xf32> to vector<64x16xf32>
    %78 = arith.addf %75, %77 : vector<64x16xf32>
    %79 = arith.truncf %78 : vector<64x16xf32> to vector<64x16xbf16>
    %c0_73 = arith.constant 0 : index
    %c0_74 = arith.constant 0 : index
    %c0_75 = arith.constant 0 : index
    %80 = vector.load %arg7[%c0_73, %c0_74, %c0_75] : memref<1x64x16xbf16, #tpu.memory_space<vmem>>, vector<1x64x16xbf16>
    %81 = vector.shape_cast %80 : vector<1x64x16xbf16> to vector<64x16xbf16>
    %82 = vector.shape_cast %79 : vector<64x16xbf16> to vector<1x64x16xbf16>
    tpu.vector_store %arg7[%c0_73, %c0_74, %c0_75], %82 {strides = array<i32>} : memref<1x64x16xbf16, #tpu.memory_space<vmem>>, vector<1x64x16xbf16>,
    %cst_76 = arith.constant dense<0.000000e+00> : vector<16xf32>
    %83 = vector.multi_reduction <add>, %78, %cst_76 [0] : vector<64x16xf32> to vector<16xf32>
    %84 = vector.shape_cast %83 : vector<16xf32> to vector<1x16xf32>
    %c0_77 = arith.constant 0 : index
    %c0_78 = arith.constant 0 : index
    %c0_79 = arith.constant 0 : index
    %85 = vector.load %arg8[%c0_77, %c0_78, %c0_79] : memref<1x1x16xf32, #tpu.memory_space<vmem>>, vector<1x1x16xf32>
    %86 = vector.shape_cast %85 : vector<1x1x16xf32> to vector<1x16xf32>
    %87 = vector.shape_cast %84 : vector<1x16xf32> to vector<1x1x16xf32>
    tpu.vector_store %arg8[%c0_77, %c0_78, %c0_79], %87 {strides = array<i32>} : memref<1x1x16xf32, #tpu.memory_space<vmem>>, vector<1x1x16xf32>,
    return
  }
  func.func @transform_0(%arg0: i32) -> (i32, i32, i32, i32) {
    %c0_i32 = arith.constant 0 : i32
    %c0_i32_0 = arith.constant 0 : i32
    %c0_i32_1 = arith.constant 0 : i32
    %c0_i32_2 = arith.constant 0 : i32
    return %arg0, %c0_i32, %c0_i32_0, %c0_i32_1 : i32, i32, i32, i32
  }
  func.func @transform_1(%arg0: i32) -> (i32, i32, i32) {
    %c0_i32 = arith.constant 0 : i32
    %c0_i32_0 = arith.constant 0 : i32
    %c0_i32_1 = arith.constant 0 : i32
    %c0_i32_2 = arith.constant 0 : i32
    return %c0_i32, %c0_i32_0, %c0_i32_1 : i32, i32, i32
  }
  func.func @transform_2(%arg0: i32) -> (i32, i32) {
    %c0_i32 = arith.constant 0 : i32
    %c0_i32_0 = arith.constant 0 : i32
    %c0_i32_1 = arith.constant 0 : i32
    return %c0_i32, %c0_i32_0 : i32, i32
  }
  func.func @transform_3(%arg0: i32) -> (i32, i32) {
    %c0_i32 = arith.constant 0 : i32
    %c0_i32_0 = arith.constant 0 : i32
    %c0_i32_1 = arith.constant 0 : i32
    return %c0_i32, %c0_i32_0 : i32, i32
  }
  func.func @transform_4(%arg0: i32) -> (i32, i32) {
    %c0_i32 = arith.constant 0 : i32
    %c0_i32_0 = arith.constant 0 : i32
    %c0_i32_1 = arith.constant 0 : i32
    return %c0_i32, %c0_i32_0 : i32, i32
  }
  func.func @transform_5(%arg0: i32) -> (i32, i32) {
    %c0_i32 = arith.constant 0 : i32
    %c0_i32_0 = arith.constant 0 : i32
    %c0_i32_1 = arith.constant 0 : i32
    return %c0_i32, %c0_i32_0 : i32, i32
  }
  func.func @transform_6(%arg0: i32) -> (i32, i32, i32) {
    %c0_i32 = arith.constant 0 : i32
    %c0_i32_0 = arith.constant 0 : i32
    %c0_i32_1 = arith.constant 0 : i32
    return %arg0, %c0_i32, %c0_i32_0 : i32, i32, i32
  }
  func.func @transform_7(%arg0: i32) -> (i32, i32, i32) {
    %c0_i32 = arith.constant 0 : i32
    %c0_i32_0 = arith.constant 0 : i32
    %c0_i32_1 = arith.constant 0 : i32
    return %arg0, %c0_i32, %c0_i32_0 : i32, i32, i32
  }
}

module attributes {stable_mosaic.version = 11 : i64} {
  func.func @kernel(%arg0: i32, %arg1: memref<1x1x16xf32, #tpu.memory_space<vmem>>, %arg2: memref<16x4xf32, #tpu.memory_space<vmem>>, %arg3: memref<1x4xf32, #tpu.memory_space<vmem>>, %arg4: memref<1x4xf32, #tpu.memory_space<vmem>>, %arg5: memref<4x16xf32, #tpu.memory_space<vmem>>, %arg6: memref<1x16xf32, #tpu.memory_space<vmem>>, %arg7: memref<1x1x16xf32, #tpu.memory_space<vmem>>) attributes {dimension_semantics = [#tpu.dimension_semantics<parallel>], iteration_bounds = array<i64: 2>, scalar_prefetch = 0 : i64, scratch_operands = 0 : i64, tpu.core_type = #tpu.core_type<tc>, window_params = [{transform_indices = @transform_0, window_bounds = array<i64: 1, 1, 16>}, {pipeline_mode = #tpu.pipeline_mode<synchronous>, transform_indices = @transform_1, window_bounds = array<i64: 16, 4>}, {pipeline_mode = #tpu.pipeline_mode<synchronous>, transform_indices = @transform_2, window_bounds = array<i64: 1, 4>}, {pipeline_mode = #tpu.pipeline_mode<synchronous>, transform_indices = @transform_3, window_bounds = array<i64: 1, 4>}, {pipeline_mode = #tpu.pipeline_mode<synchronous>, transform_indices = @transform_4, window_bounds = array<i64: 4, 16>}, {pipeline_mode = #tpu.pipeline_mode<synchronous>, transform_indices = @transform_5, window_bounds = array<i64: 1, 16>}, {transform_indices = @transform_6, window_bounds = array<i64: 1, 1, 16>}]} {
    %c0 = arith.constant 0 : index
    %c0_0 = arith.constant 0 : index
    %c0_1 = arith.constant 0 : index
    %0 = vector.load %arg1[%c0, %c0_0, %c0_1] : memref<1x1x16xf32, #tpu.memory_space<vmem>>, vector<1x1x16xf32>
    %1 = vector.shape_cast %0 : vector<1x1x16xf32> to vector<1x16xf32>
    %cst = arith.constant 1.562500e-02 : f32
    %2 = vector.broadcast %cst : f32 to vector<1x16xf32>
    %3 = arith.mulf %1, %2 : vector<1x16xf32>
    %c0_2 = arith.constant 0 : index
    %c0_3 = arith.constant 0 : index
    %4 = vector.load %arg2[%c0_2, %c0_3] : memref<16x4xf32, #tpu.memory_space<vmem>>, vector<16x4xf32>
    %cst_4 = arith.constant dense<0.000000e+00> : vector<1x4xf32>
    %5 = tpu.matmul %3, %4, %cst_4 {dimension_numbers = #tpu.dot_dimension_numbers<[1], [0], [0], [1], [0, 0, 1, 1], [], []>} : vector<1x16xf32>, vector<16x4xf32>, vector<1x4xf32> -> vector<1x4xf32>
    %c0_5 = arith.constant 0 : index
    %c0_6 = arith.constant 0 : index
    %6 = vector.load %arg3[%c0_5, %c0_6] : memref<1x4xf32, #tpu.memory_space<vmem>>, vector<1x4xf32>
    %7 = arith.addf %5, %6 : vector<1x4xf32>
    %cst_7 = arith.constant 0.000000e+00 : f32
    %8 = vector.broadcast %cst_7 : f32 to vector<1x4xf32>
    %9 = arith.cmpf ogt, %7, %8 : vector<1x4xf32>
    %c0_8 = arith.constant 0 : index
    %c0_9 = arith.constant 0 : index
    %10 = vector.load %arg4[%c0_8, %c0_9] : memref<1x4xf32, #tpu.memory_space<vmem>>, vector<1x4xf32>
    %11 = arith.mulf %7, %10 : vector<1x4xf32>
    %12 = arith.select %9, %7, %11 : vector<1x4xi1>, vector<1x4xf32>
    %c0_10 = arith.constant 0 : index
    %c0_11 = arith.constant 0 : index
    %13 = vector.load %arg5[%c0_10, %c0_11] : memref<4x16xf32, #tpu.memory_space<vmem>>, vector<4x16xf32>
    %cst_12 = arith.constant dense<0.000000e+00> : vector<1x16xf32>
    %14 = tpu.matmul %12, %13, %cst_12 {dimension_numbers = #tpu.dot_dimension_numbers<[1], [0], [0], [1], [0, 0, 1, 1], [], []>} : vector<1x4xf32>, vector<4x16xf32>, vector<1x16xf32> -> vector<1x16xf32>
    %c0_13 = arith.constant 0 : index
    %c0_14 = arith.constant 0 : index
    %15 = vector.load %arg6[%c0_13, %c0_14] : memref<1x16xf32, #tpu.memory_space<vmem>>, vector<1x16xf32>
    %16 = arith.addf %14, %15 : vector<1x16xf32>
    %17 = arith.negf %16 : vector<1x16xf32>
    %18 = math.exp %17 : vector<1x16xf32>
    %cst_15 = arith.constant 1.000000e+00 : f32
    %19 = vector.broadcast %cst_15 : f32 to vector<1x16xf32>
    %20 = arith.addf %19, %18 : vector<1x16xf32>
    %21 = arith.divf %19, %20 : vector<1x16xf32>
    %c0_16 = arith.constant 0 : index
    %c0_17 = arith.constant 0 : index
    %c0_18 = arith.constant 0 : index
    %22 = vector.load %arg7[%c0_16, %c0_17, %c0_18] : memref<1x1x16xf32, #tpu.memory_space<vmem>>, vector<1x1x16xf32>
    %23 = vector.shape_cast %22 : vector<1x1x16xf32> to vector<1x16xf32>
    %24 = vector.shape_cast %21 : vector<1x16xf32> to vector<1x1x16xf32>
    tpu.vector_store %arg7[%c0_16, %c0_17, %c0_18], %24 {strides = array<i32>} : memref<1x1x16xf32, #tpu.memory_space<vmem>>, vector<1x1x16xf32>,
    return
  }
  func.func @transform_0(%arg0: i32) -> (i32, i32, i32) {
    %c0_i32 = arith.constant 0 : i32
    %c0_i32_0 = arith.constant 0 : i32
    %c0_i32_1 = arith.constant 0 : i32
    return %arg0, %c0_i32, %c0_i32_0 : i32, i32, i32
  }
  func.func @transform_1(%arg0: i32) -> (i32, i32) {
    %c0_i32 = arith.constant 0 : i32
    %c0_i32_0 = arith.constant 0 : i32
    %c0_i32_1 = arith.constant 0 : i32
    return %c0_i32, %c0_i32_0 : i32, i32
  }
  func.func @transform_2(%arg0: i32) -> (i32, i32) {
    %c0_i32 = arith.constant 0 : i32
    %c0_i32_0 = arith.constant 0 : i32
    %c0_i32_1 = arith.constant 0 : i32
    return %c0_i32, %c0_i32_0 : i32, i32
  }
  func.func @transform_3(%arg0: i32) -> (i32, i32) {
    %c0_i32 = arith.constant 0 : i32
    %c0_i32_0 = arith.constant 0 : i32
    %c0_i32_1 = arith.constant 0 : i32
    return %c0_i32, %c0_i32_0 : i32, i32
  }
  func.func @transform_4(%arg0: i32) -> (i32, i32) {
    %c0_i32 = arith.constant 0 : i32
    %c0_i32_0 = arith.constant 0 : i32
    %c0_i32_1 = arith.constant 0 : i32
    return %c0_i32, %c0_i32_0 : i32, i32
  }
  func.func @transform_5(%arg0: i32) -> (i32, i32) {
    %c0_i32 = arith.constant 0 : i32
    %c0_i32_0 = arith.constant 0 : i32
    %c0_i32_1 = arith.constant 0 : i32
    return %c0_i32, %c0_i32_0 : i32, i32
  }
  func.func @transform_6(%arg0: i32) -> (i32, i32, i32) {
    %c0_i32 = arith.constant 0 : i32
    %c0_i32_0 = arith.constant 0 : i32
    %c0_i32_1 = arith.constant 0 : i32
    return %arg0, %c0_i32, %c0_i32_0 : i32, i32, i32
  }
}

module attributes {stable_mosaic.version = 11 : i64} {
  func.func @_se_apply_kernel(%arg0: i32, %arg1: i32, %arg2: memref<1x8x128xbf16, #tpu.memory_space<vmem>>, %arg3: memref<1x1x128xf32, #tpu.memory_space<vmem>>, %arg4: memref<1x8x128xbf16, #tpu.memory_space<vmem>>, %arg5: memref<1x1x128xf32, #tpu.memory_space<vmem>>, %arg6: memref<1x8x128xbf16, #tpu.memory_space<vmem>>) attributes {dimension_semantics = [#tpu.dimension_semantics<parallel>, #tpu.dimension_semantics<parallel>], iteration_bounds = array<i64: 2, 1>, scalar_prefetch = 0 : i64, scratch_operands = 0 : i64, tpu.core_type = #tpu.core_type<tc>, window_params = [{transform_indices = @transform_0, window_bounds = array<i64: 1, 8, 128>}, {transform_indices = @transform_1, window_bounds = array<i64: 1, 1, 128>}, {transform_indices = @transform_2, window_bounds = array<i64: 1, 8, 128>}, {pipeline_mode = #tpu.pipeline_mode<synchronous>, transform_indices = @transform_3, window_bounds = array<i64: 1, 1, 128>}, {transform_indices = @transform_4, window_bounds = array<i64: 1, 8, 128>}]} {
    %c0 = arith.constant 0 : index
    %c0_0 = arith.constant 0 : index
    %c0_1 = arith.constant 0 : index
    %0 = vector.load %arg2[%c0, %c0_0, %c0_1] : memref<1x8x128xbf16, #tpu.memory_space<vmem>>, vector<1x8x128xbf16>
    %1 = vector.shape_cast %0 : vector<1x8x128xbf16> to vector<8x128xbf16>
    %2 = arith.extf %1 : vector<8x128xbf16> to vector<8x128xf32>
    %c0_2 = arith.constant 0 : index
    %c0_3 = arith.constant 0 : index
    %c0_4 = arith.constant 0 : index
    %3 = vector.load %arg3[%c0_2, %c0_3, %c0_4] : memref<1x1x128xf32, #tpu.memory_space<vmem>>, vector<1x1x128xf32>
    %4 = vector.shape_cast %3 : vector<1x1x128xf32> to vector<1x128xf32>
    %5 = vector.broadcast %4 : vector<1x128xf32> to vector<8x128xf32>
    %6 = arith.mulf %2, %5 : vector<8x128xf32>
    %c0_5 = arith.constant 0 : index
    %c0_6 = arith.constant 0 : index
    %c0_7 = arith.constant 0 : index
    %7 = vector.load %arg4[%c0_5, %c0_6, %c0_7] : memref<1x8x128xbf16, #tpu.memory_space<vmem>>, vector<1x8x128xbf16>
    %8 = vector.shape_cast %7 : vector<1x8x128xbf16> to vector<8x128xbf16>
    %9 = arith.extf %8 : vector<8x128xbf16> to vector<8x128xf32>
    %10 = arith.addf %6, %9 : vector<8x128xf32>
    %cst = arith.constant 0.000000e+00 : f32
    %11 = vector.broadcast %cst : f32 to vector<8x128xf32>
    %12 = arith.cmpf ogt, %10, %11 : vector<8x128xf32>
    %c0_8 = arith.constant 0 : index
    %c0_9 = arith.constant 0 : index
    %c0_10 = arith.constant 0 : index
    %13 = vector.load %arg5[%c0_8, %c0_9, %c0_10] : memref<1x1x128xf32, #tpu.memory_space<vmem>>, vector<1x1x128xf32>
    %14 = vector.shape_cast %13 : vector<1x1x128xf32> to vector<1x128xf32>
    %15 = vector.broadcast %14 : vector<1x128xf32> to vector<8x128xf32>
    %16 = arith.mulf %10, %15 : vector<8x128xf32>
    %17 = arith.select %12, %10, %16 : vector<8x128xi1>, vector<8x128xf32>
    %18 = arith.truncf %17 : vector<8x128xf32> to vector<8x128xbf16>
    %c0_11 = arith.constant 0 : index
    %c0_12 = arith.constant 0 : index
    %c0_13 = arith.constant 0 : index
    %19 = vector.load %arg6[%c0_11, %c0_12, %c0_13] : memref<1x8x128xbf16, #tpu.memory_space<vmem>>, vector<1x8x128xbf16>
    %20 = vector.shape_cast %19 : vector<1x8x128xbf16> to vector<8x128xbf16>
    %21 = vector.shape_cast %18 : vector<8x128xbf16> to vector<1x8x128xbf16>
    tpu.vector_store %arg6[%c0_11, %c0_12, %c0_13], %21 {strides = array<i32>} : memref<1x8x128xbf16, #tpu.memory_space<vmem>>, vector<1x8x128xbf16>,
    return
  }
  func.func @transform_0(%arg0: i32, %arg1: i32) -> (i32, i32, i32) {
    %c0_i32 = arith.constant 0 : i32
    %c0_i32_0 = arith.constant 0 : i32
    return %arg0, %arg1, %c0_i32 : i32, i32, i32
  }
  func.func @transform_1(%arg0: i32, %arg1: i32) -> (i32, i32, i32) {
    %c0_i32 = arith.constant 0 : i32
    %c0_i32_0 = arith.constant 0 : i32
    %c0_i32_1 = arith.constant 0 : i32
    return %arg0, %c0_i32, %c0_i32_0 : i32, i32, i32
  }
  func.func @transform_2(%arg0: i32, %arg1: i32) -> (i32, i32, i32) {
    %c0_i32 = arith.constant 0 : i32
    %c0_i32_0 = arith.constant 0 : i32
    return %arg0, %arg1, %c0_i32 : i32, i32, i32
  }
  func.func @transform_3(%arg0: i32, %arg1: i32) -> (i32, i32, i32) {
    %c0_i32 = arith.constant 0 : i32
    %c0_i32_0 = arith.constant 0 : i32
    %c0_i32_1 = arith.constant 0 : i32
    %c0_i32_2 = arith.constant 0 : i32
    return %c0_i32, %c0_i32_0, %c0_i32_1 : i32, i32, i32
  }
  func.func @transform_4(%arg0: i32, %arg1: i32) -> (i32, i32, i32) {
    %c0_i32 = arith.constant 0 : i32
    %c0_i32_0 = arith.constant 0 : i32
    return %arg0, %arg1, %c0_i32 : i32, i32, i32
  }
}

</mosaic_0001>

<bundles_post_ra>
// kernel: _lambda_.8
= control target key start
LH: loop header
LB: loop body
LE: loop exit
PB: predicated region body
PF: predicated region fallthrough
CT: control target
= control target key end

     0   :  { %s2551_s24 = smov 0   ;;  %s3022_s0 = inlined_call_operand.vmem [shape: bf16[2,10,10,16], index: 0, kind: input, shape index: {}]   ;;  %s3023_s1 = inlined_call_operand.vmem [shape: bf16[9,16,32], index: 1, kind: input, shape index: {}]   ;;  %s3024_s2 = inlined_call_operand.vmem [shape: f32[1,32], index: 2, kind: input, shape index: {}]   ;;  %s3025_s3 = inlined_call_operand.vmem [shape: f32[1,32], index: 3, kind: input, shape index: {}]   ;;  %s3026_s4 = inlined_call_operand.vmem [shape: bf16[32,16], index: 4, kind: input, shape index: {}]   ;;  %s3027_s5 = inlined_call_operand.vmem [shape: f32[1,16], index: 5, kind: input, shape index: {}]   ;;  %s3028_s6 = inlined_call_operand.vmem [shape: f32[1,16], index: 6, kind: input, shape index: {}]   ;;  %s3029_s7 = inlined_call_operand.vmem [shape: bf16[2,64,16], index: 7, kind: output, shape index: {}]  }
   0x1 LB: > { %s2096_s25 = sadd.s32 4294967295, %s2509_s24   ;;  %p2100_p0 = scmp.ge.s32.totalorder %s2509_s24, 1  ;;  %s2509_s24 = sphi %s2551_s24, %s17_s24  }
   0x2   : > { %p237_p1 = scmp.lt.s32.totalorder %s2509_s24, 3 }
   0x4   : > { %p238_p2 = pnand %p2100_p0, %p237_p1 }
   0x6   : > { %241 = sbr.rel (%p238_p2) target bundleno = 525 (0x20d), region = 48 }
   0xb   : > { %v2480_v0 = vld [vmem:[%s3023_s1 + $0x8] sm:$0xff]   ;;  %p269_p3 = scmp.lt.s32.totalorder %s2096_s25, 1  ;;  %v2481_v1 = vld [vmem:[%s3023_s1] sm:$0xff]   ;;  %v2570_v2 = vld [vmem:[%s3023_s1 + $0x10] sm:$0xff]   ;;  %vm434_vm0 = vcmask 130048   ;;  %vm639_vm4 = vcmask 1042432  }
   0xc   : > { %2369 = vmatprep.subr.bf16.mxu0 %v2480_v0  ;;  %2379 = vmatprep.subr.bf16.mxu1 %v2481_v1  ;;  %v2487_v3 = vld [vmem:[%s3023_s1 + $0x18] sm:$0xff]   ;;  %vm298_vm1 = vsmask.f32 3328  ;;  %vm299_vm2 = vsmask.f32 7440  ;;  %v2606_v32 = vld [vmem:[%s3023_s1 + $0x28] sm:$0xff]  }
   0xd   : > { %s3043_s25 = smov (!%p269_p3, %s2096_s25), 1  ;;  %2370 = vmatpush3.bf16.msra.mxu0 %v2480_v0  ;;  %2380 = vmatpush3.bf16.msra.mxu1 %v2481_v1  ;;  %vm2610_vm3 = vmor %vm298_vm1, %vm299_vm2  ;;  %vm640_vm5 = vcmask 1046532   ;;  %vm1891_vm11 = vcmask 261120   ;;  %vm2032_vm1 = vcmask 125952  }
   0xe   : > { %s2471_s9 = smul.u32 80, %s3043_s25  ;;  %2389 = vmatprep.subr.bf16.mxu0 %v2570_v2  ;;  %2399 = vmatprep.subr.bf16.mxu1 %v2487_v3  ;;  %vm2666_vm6 = vmor %vm639_vm4, %vm640_vm5  ;;  %s2309_s16 = sshll.u32 %s3043_s25, 5 }
   0xf   : > { %s3001_s19 = scalar_lea.vmem %s3029_s7, %s2309_s16 }
  0x10   : > { %s2580_s14 = scalar_lea.vmem %s3022_s0, %s2471_s9 }
  0x11   : > { %v280_v4 = vld [vmem:[%s2580_s14] sm:$0xf]  ;;  %v281_v5 = vld [vmem:[%s2580_s14 + $0x8] sm:$0xf]  ;;  %v2585_v6 = vld [vmem:[%s2580_s14 + $0x4] sm:$0x1] }
  0x12   : > { %v2588_v7 = vld [vmem:[%s2580_s14 + $0xc] sm:$0x1]  ;;  %v302_v8 = vshrl.u32 %v280_v4, 16  ;;  %v305_v9 = vshll.u32 %v280_v4, 16  ;;  %v311_v10 = vshll.u32 %v2585_v6, 16  ;;  %v316_v11 = vshrl.u32 %v281_v5, 16 }
  0x13   : > { %v319_v12 = vshll.u32 %v281_v5, 16  ;;  %v325_v13 = vshll.u32 %v2588_v7, 16  ;;  %v644_v14 = vrot.slane %v2585_v6, 5  ;;  %v648_v15 = vrot.slane %v2588_v7, 5  ;;  %v282_v16 = vld [vmem:[%s2580_s14 + $0x10] sm:$0xf] }
  0x14   : > { %v304_v17 = vrot.slane %v302_v8, 4  ;;  %v307_v18 = vrot.slane %v305_v9, 5  ;;  %v313_v19 = vrot.slane %v311_v10, 5  ;;  %v318_v20 = vrot.slane %v316_v11, 4  ;;  %v283_v21 = vld [vmem:[%s2580_s14 + $0x18] sm:$0xf] }
  0x15   : > { %v321_v22 = vrot.slane %v319_v12, 5  ;;  %v327_v23 = vrot.slane %v325_v13, 5  ;;  %v2115_v24 = vcombine.low %v280_v4, %v281_v5  ;;  %v2597_v25 = vld [vmem:[%s2580_s14 + $0x14] sm:$0x1]  ;;  %v2600_v26 = vld [vmem:[%s2580_s14 + $0x1c] sm:$0x1]  ;;  %v2116_v27 = vcombine.low %v282_v16, %v283_v21 }
  0x16   : > { %v308_v28 = vor.u32 %v307_v18, %v304_v17  ;;  %v330_v29 = vshrl.u32 %v282_v16, 16  ;;  %v333_v30 = vshll.u32 %v282_v16, 16  ;;  %v339_v31 = vshll.u32 %v2597_v25, 16  ;;  %v284_v38 = vld [vmem:[%s2580_s14 + $0x20] sm:$0xf] }
  0x17   : > { %v322_v34 = vor.u32 %v321_v22, %v318_v20  ;;  %2381 = vmatprep.mubr.msk.bf16.mxu1 %vm434_vm0, %v2115_v24  ;;  %v344_v35 = vshrl.u32 %v283_v21, 16  ;;  %v347_v36 = vshll.u32 %v283_v21, 16  ;;  %v353_v37 = vshll.u32 %v2600_v26, 16  ;;  %v285_v43 = vld [vmem:[%s2580_s14 + $0x28] sm:$0xf] }
  0x18   : > { %v309_v39 = vrot.slane %v308_v28, 4  ;;  %v332_v40 = vrot.slane %v330_v29, 4  ;;  %v335_v41 = vrot.slane %v333_v30, 5  ;;  %v341_v42 = vrot.slane %v339_v31, 5  ;;  %2382 = vmatmul.mubr.msk.bf16.vlgmr.msra.gmra.mxu1 %vm434_vm0, %v2116_v27  ;;  %v2620_v48 = vld [vmem:[%s2580_s14 + $0x24] sm:$0x1] }
  0x19   : > { %v323_v44 = vrot.slane %v322_v34, 4  ;;  %v346_v45 = vrot.slane %v344_v35, 4  ;;  %v349_v46 = vrot.slane %v347_v36, 5  ;;  %v355_v47 = vrot.slane %v353_v37, 5  ;;  %2400 = vmatpush3.bf16.msra.mxu1 %v2487_v3  ;;  %v2630_v55 = vld [vmem:[%s2580_s14 + $0x2c] sm:$0x1] }
  0x1a   : > { %v314_v49 = vsel %vm2610_vm3, %v309_v39, %v313_v19  ;;  %v336_v50 = vor.u32 %v335_v41, %v332_v40  ;;  %v652_v51 = vrot.slane %v2597_v25, 5  ;;  %v656_v52 = vrot.slane %v2600_v26, 5  ;;  %2419 = vmatprep.subr.bf16.mxu1 %v2606_v32  ;;  %v286_v62 = vld [vmem:[%s2580_s14 + $0x30] sm:$0xf]  ;;  %v287_v4 = vld [vmem:[%s2580_s14 + $0x38] sm:$0xf] }
  0x1b   : > { %v328_v53 = vsel %vm2610_vm3, %v323_v44, %v327_v23  ;;  %v350_v54 = vor.u32 %v349_v46, %v346_v45  ;;  %v358_v56 = vshrl.u32 %v284_v38, 16  ;;  %v361_v57 = vshll.u32 %v284_v38, 16  ;;  %v2640_v11 = vld [vmem:[%s2580_s14 + $0x34] sm:$0x1]  ;;  %v2645_v18 = vld [vmem:[%s2580_s14 + $0x3c] sm:$0x1] }
  0x1c   : > { %v2106_v58 = vcombine.low %v314_v49, %v328_v53  ;;  %v337_v59 = vrot.slane %v336_v50, 4  ;;  %v367_v60 = vshll.u32 %v2620_v48, 16  ;;  %v372_v61 = vshrl.u32 %v285_v43, 16  ;;  %v615_v23 = vld [vmem:[%s2580_s14] sm:$0xe] }
  0x1d   : > { %v351_v63 = vrot.slane %v350_v54, 4  ;;  %v360_v0 = vrot.slane %v358_v56, 4  ;;  %v363_v1 = vrot.slane %v361_v57, 5  ;;  %v375_v3 = vshll.u32 %v285_v43, 16  ;;  %v616_v24 = vld [vmem:[%s2580_s14 + $0x8] sm:$0xe] }
  0x1e   : > { %2371 = vmatprep.mubr.msk.bf16.mxu0 %vm434_vm0, %v2106_v58  ;;  %v342_v5 = vsel %vm2610_vm3, %v337_v59, %v341_v42  ;;  %v369_v8 = vrot.slane %v367_v60, 5  ;;  %v374_v9 = vrot.slane %v372_v61, 4  ;;  %v381_v10 = vshll.u32 %v2630_v55, 16  ;;  %v2652_v27 = vld [vmem:[%s3023_s1 + $0x20] sm:$0xff]   ;;  %v617_v28 = vld [vmem:[%s2580_s14 + $0x10] sm:$0xe] }
  0x1f   : > { %v356_v12 = vsel %vm2610_vm3, %v351_v63, %v355_v47  ;;  %v364_v13 = vor.u32 %v363_v1, %v360_v0  ;;  %v377_v16 = vrot.slane %v375_v3, 5  ;;  %v2117_v17 = vcombine.low %v284_v38, %v285_v43  ;;  %v618_v35 = vld [vmem:[%s2580_s14 + $0x18] sm:$0xe]  ;;  %v2489_v36 = vld [vmem:[%s2580_s14 + $0x8] ss:$8 sps:$4 sm:$0xff]  }
  0x20   : > { %v2107_v19 = vcombine.low %v342_v5, %v356_v12  ;;  %v383_v20 = vrot.slane %v381_v10, 5  ;;  %v386_v21 = vshrl.u32 %v286_v62, 16  ;;  %v389_v22 = vshll.u32 %v286_v62, 16  ;;  %v620_v58 = vld [vmem:[%s2580_s14 + $0x28] sm:$0xe] }
  0x21   : > { %v365_v29 = vrot.slane %v364_v13, 4  ;;  %v378_v30 = vor.u32 %v377_v16, %v374_v9  ;;  %2385 = vmatprep.mubr.msk.bf16.mxu1 %vm434_vm0, %v2117_v17  ;;  %v395_v31 = vshll.u32 %v2640_v11, 16  ;;  %v400_v34 = vshrl.u32 %v287_v4, 16  ;;  %v621_v63 = vld [vmem:[%s2580_s14 + $0x30] sm:$0xe] }
  0x22   : > { %2372 = vmatmul.mubr.msk.bf16.vlgmr.msra.gmra.mxu0 %vm434_vm0, %v2107_v19  ;;  %v388_v37 = vrot.slane %v386_v21, 4  ;;  %v391_v38 = vrot.slane %v389_v22, 5  ;;  %v403_v39 = vshll.u32 %v287_v4, 16  ;;  %v409_v40 = vshll.u32 %v2645_v18, 16  ;;  %v622_v0 = vld [vmem:[%s2580_s14 + $0x38] sm:$0xe] }
  0x23   : > { %2390 = vmatpush3.bf16.msra.mxu0 %v2570_v2  ;;  %v370_v41 = vsel %vm2610_vm3, %v365_v29, %v369_v8  ;;  %v379_v42 = vrot.slane %v378_v30, 4  ;;  %v397_v43 = vrot.slane %v395_v31, 5  ;;  %v402_v44 = vrot.slane %v400_v34, 4  ;;  %v619_v2 = vld [vmem:[%s2580_s14 + $0x20] sm:$0xe] }
  0x24   : > { %v392_v45 = vor.u32 %v391_v38, %v388_v37  ;;  %v405_v46 = vrot.slane %v403_v39, 5  ;;  %v411_v47 = vrot.slane %v409_v40, 5  ;;  %v2118_v49 = vcombine.low %v286_v62, %v287_v4  ;;  %2409 = vmatprep.subr.bf16.mxu0 %v2652_v27  ;;  %v2490_v7 = vld [vmem:[%s2580_s14 + $0x18] ss:$8 sps:$4 sm:$0xff]   ;;  %v2491_v17 = vld [vmem:[%s2580_s14 + $0x28] ss:$8 sps:$4 sm:$0xff]  }
  0x25   : > { %v384_v53 = vsel %vm2610_vm3, %v379_v42, %v383_v20  ;;  %v2124_v54 = vrot.slane %v615_v23, 9  ;;  %v2125_v56 = vrot.slane %v616_v24, 9  ;;  %v2126_v57 = vrot.slane %v617_v28, 9  ;;  %v2162_v19 = vld [vmem:[%s2580_s14 + $0x8] sm:$0xf] }
  0x26   : > { %v2108_v59 = vcombine.low %v370_v41, %v384_v53  ;;  %v393_v60 = vrot.slane %v392_v45, 4  ;;  %v406_v61 = vor.u32 %v405_v46, %v402_v44  ;;  %2386 = vmatmul.mubr.msk.bf16.gmra.mxu1 %vm434_vm0, %v2118_v49  ;;  %v2127_v62 = vrot.slane %v618_v35, 9  ;;  %v2720_v20 = vld [vmem:[%s2580_s14 + $0xc] sm:$0x1]  ;;  %v2164_v23 = vld [vmem:[%s2580_s14 + $0x10] sm:$0xf] }
  0x27   : > { %v645_v1 = vsel %vm2666_vm6, %v2124_v54, %v644_v14  ;;  %v649_v3 = vsel %vm2666_vm6, %v2125_v56, %v648_v15  ;;  %2401 = vmatprep.mubr.msk.bf16.mxu1 %vm434_vm0, %v2489_v36  ;;  %v2128_v4 = vrot.slane %v619_v2, 9  ;;  %v2694_v6 = vsel %vm2666_vm6, %v2126_v57, %v652_v51  ;;  %v2735_v24 = vld [vmem:[%s2580_s14 + $0x14] sm:$0x1]  ;;  %v2166_v42 = vld [vmem:[%s2580_s14 + $0x18] sm:$0xf] }
  0x28   : > { %2375 = vmatprep.mubr.msk.bf16.mxu0 %vm434_vm0, %v2108_v59  ;;  %v398_v5 = vsel %vm2610_vm3, %v393_v60, %v397_v43  ;;  %v407_v8 = vrot.slane %v406_v61, 4  ;;  %v2134_v9 = vcombine.low %v645_v1, %v649_v3  ;;  %v2701_v14 = vsel %vm2666_vm6, %v2127_v62, %v656_v52  ;;  %v2168_v49 = vld [vmem:[%s2580_s14 + $0x20] sm:$0xf]  ;;  %v2761_v54 = vld [vmem:[%s3023_s1 + $0x30] sm:$0xff]   ;;  %v2169_v56 = vld [vmem:[%s2580_s14 + $0x24] sm:$0x1] }
  0x29   : > { %v660_v15 = vrot.slane %v2620_v48, 5  ;;  %v2129_v10 = vrot.slane %v620_v58, 9  ;;  %v664_v12 = vrot.slane %v2630_v55, 5  ;;  %v2130_v51 = vrot.slane %v621_v63, 9  ;;  %v2492_v53 = vld [vmem:[%s2580_s14 + $0x38] ss:$8 sps:$4 sm:$0xff]  }
  0x2a   : > { %v412_v25 = vsel %vm2610_vm3, %v407_v8, %v411_v47  ;;  %v668_v13 = vrot.slane %v2640_v11, 5  ;;  %v2131_v16 = vrot.slane %v622_v0, 9  ;;  %v672_v55 = vrot.slane %v2645_v18, 5  ;;  %v2725_v11 = vld [vmem:[%s3023_s1 + $0x38] sm:$0xff]   ;;  %v2189_v0 = vld [vmem:[%s2580_s14 + $0x8] sm:$0xe] }
  0x2b   : > { %v2109_v26 = vcombine.low %v398_v5, %v412_v25  ;;  %v2711_v52 = vsel %vm2666_vm6, %v2128_v4, %v660_v15  ;;  %v2715_v48 = vsel %vm2666_vm6, %v2129_v10, %v664_v12  ;;  %v2135_v21 = vcombine.low %v2694_v6, %v2701_v14  ;;  %v2167_v47 = vld [vmem:[%s2580_s14 + $0x1c] sm:$0x1]  ;;  %v2190_v8 = vld [vmem:[%s2580_s14 + $0x10] sm:$0xe]  ;;  %v2191_v15 = vld [vmem:[%s2580_s14 + $0x18] sm:$0xe] }
  0x2c   : > { %v2731_v22 = vsel %vm2666_vm6, %v2130_v51, %v668_v13  ;;  %v920_v28 = vshrl.u32 %v2162_v19, 16  ;;  %v923_v18 = vshll.u32 %v2162_v19, 16  ;;  %v2740_v29 = vsel %vm2666_vm6, %v2131_v16, %v672_v55  ;;  %v2192_v13 = vld [vmem:[%s2580_s14 + $0x20] sm:$0xe]  ;;  %v2170_v16 = vld [vmem:[%s2580_s14 + $0x28] sm:$0xf] }
  0x2d   : > { %2376 = vmatmul.mubr.msk.bf16.gmra.mxu0 %vm434_vm0, %v2109_v26  ;;  %v929_v30 = vshll.u32 %v2720_v20, 16  ;;  %v934_v31 = vshrl.u32 %v2164_v23, 16  ;;  %v937_v34 = vshll.u32 %v2164_v23, 16  ;;  %v2136_v35 = vcombine.low %v2711_v52, %v2715_v48  ;;  %v2780_v55 = vld [vmem:[%s2580_s14 + $0x2c] sm:$0x1] }
  0x2e   : > { %2391 = vmatprep.mubr.msk.bf16.mxu0 %vm434_vm0, %v2134_v9  ;;  %2402 = vmatmul.mubr.msk.bf16.vlgmr.msra.gmra.mxu1 %vm434_vm0, %v2490_v7  ;;  %v922_v36 = vrot.slane %v920_v28, 4  ;;  %v925_v37 = vrot.slane %v923_v18, 5  ;;  %v943_v38 = vshll.u32 %v2735_v24, 16  ;;  %v1163_v43 = vrot.slane %v2720_v20, 5  ;;  %v2172_v23 = vld [vmem:[%s2580_s14 + $0x30] sm:$0xf] }
  0x2f   : > { %2405 = vmatprep.mubr.msk.bf16.mxu1 %vm434_vm0, %v2491_v17  ;;  %2420 = vmatpush3.bf16.msra.mxu1 %v2606_v32  ;;  %v931_v39 = vrot.slane %v929_v30, 5  ;;  %v936_v40 = vrot.slane %v934_v31, 4  ;;  %v939_v41 = vrot.slane %v937_v34, 5  ;;  %v2137_v44 = vcombine.low %v2731_v22, %v2740_v29 }
  0x30   : > { %v926_v45 = vor.u32 %v925_v37, %v922_v36  ;;  %v945_v46 = vrot.slane %v943_v38, 5  ;;  %v948_v2 = vshrl.u32 %v2166_v42, 16  ;;  %2439 = vmatprep.subr.bf16.mxu1 %v2725_v11  ;;  %v951_v57 = vshll.u32 %v2166_v42, 16  ;;  %v2174_v38 = vld [vmem:[%s2580_s14 + $0x38] sm:$0xf] }
  0x31   : > { %v940_v32 = vor.u32 %v939_v41, %v936_v40  ;;  %v957_v58 = vshll.u32 %v2167_v47, 16  ;;  %v962_v59 = vshrl.u32 %v2168_v49, 16  ;;  %v965_v62 = vshll.u32 %v2168_v49, 16 }
  0x32   : > { %v927_v60 = vrot.slane %v926_v45, 4  ;;  %v950_v61 = vrot.slane %v948_v2, 4  ;;  %v971_v63 = vshll.u32 %v2169_v56, 16  ;;  %v953_v3 = vrot.slane %v951_v57, 5  ;;  %v2176_v45 = vld [vmem:[%s2580_s14 + $0x40] sm:$0xf] }
  0x33   : > { %v941_v1 = vrot.slane %v940_v32, 4  ;;  %v959_v4 = vrot.slane %v957_v58, 5  ;;  %v964_v5 = vrot.slane %v962_v59, 4  ;;  %v967_v6 = vrot.slane %v965_v62, 5  ;;  %v2193_v32 = vld [vmem:[%s2580_s14 + $0x28] sm:$0xe] }
  0x34   : > { %v932_v9 = vsel %vm2610_vm3, %v927_v60, %v931_v39  ;;  %v973_v7 = vrot.slane %v971_v63, 5  ;;  %v2197_v14 = vrot.slane %v2189_v0, 9  ;;  %v954_v12 = vor.u32 %v953_v3, %v950_v61  ;;  %v2194_v60 = vld [vmem:[%s2580_s14 + $0x30] sm:$0xe] }
  0x35   : > { %2392 = vmatmul.mubr.msk.bf16.vlgmr.msra.gmra.mxu0 %vm434_vm0, %v2135_v21  ;;  %v946_v10 = vsel %vm2610_vm3, %v941_v1, %v945_v46  ;;  %v2198_v25 = vrot.slane %v2190_v8, 9  ;;  %v1167_v51 = vrot.slane %v2735_v24, 5  ;;  %v968_v26 = vor.u32 %v967_v6, %v964_v5  ;;  %v2195_v8 = vld [vmem:[%s2580_s14 + $0x38] sm:$0xe] }
  0x36   : > { %2410 = vmatpush3.bf16.msra.mxu0 %v2652_v27  ;;  %2395 = vmatprep.mubr.msk.bf16.mxu0 %vm434_vm0, %v2136_v35  ;;  %v2180_v17 = vcombine.low %v932_v9, %v946_v10  ;;  %v1164_v52 = vsel %vm2666_vm6, %v2197_v14, %v1163_v43  ;;  %v2199_v48 = vrot.slane %v2191_v15, 9  ;;  %v955_v19 = vrot.slane %v954_v12, 4  ;;  %v2173_v35 = vld [vmem:[%s2580_s14 + $0x34] sm:$0x1]  ;;  %v2175_v43 = vld [vmem:[%s2580_s14 + $0x3c] sm:$0x1] }
  0x37   : > { %2406 = vmatmul.mubr.msk.bf16.gmra.mxu1 %vm434_vm0, %v2492_v53  ;;  %2429 = vmatprep.subr.bf16.mxu0 %v2761_v54  ;;  %v1168_v27 = vsel %vm2666_vm6, %v2198_v25, %v1167_v51  ;;  %v1171_v20 = vrot.slane %v2167_v47, 5  ;;  %v2200_v21 = vrot.slane %v2192_v13, 9  ;;  %v969_v24 = vrot.slane %v968_v26, 4  ;;  %v2802_v53 = vld [vmem:[%s2580_s14 + $0x44] sm:$0x1] }
  0x38   : > { %v2207_v28 = vcombine.low %v1164_v52, %v1168_v27  ;;  %v1175_v18 = vrot.slane %v2169_v56, 5  ;;  %v976_v30 = vshrl.u32 %v2170_v16, 16  ;;  %v960_v31 = vsel %vm2610_vm3, %v955_v19, %v959_v4  ;;  %v2196_v13 = vld [vmem:[%s2580_s14 + $0x40] sm:$0xe] }
  0x39   : > { %v1172_v34 = vsel %vm2666_vm6, %v2199_v48, %v1171_v20  ;;  %v979_v36 = vshll.u32 %v2170_v16, 16  ;;  %v985_v37 = vshll.u32 %v2780_v55, 16  ;;  %v974_v39 = vsel %vm2610_vm3, %v969_v24, %v973_v7  ;;  %v2828_v24 = vld [vmem:[%s3023_s1 + $0x40] sm:$0xff]  }
  0x3a   : > { %2421 = vmatprep.mubr.msk.bf16.mxu1 %vm434_vm0, %v2207_v28  ;;  %v1176_v40 = vsel %vm2666_vm6, %v2200_v21, %v1175_v18  ;;  %v978_v41 = vrot.slane %v976_v30, 4  ;;  %v990_v42 = vshrl.u32 %v2172_v23, 16  ;;  %v2181_v46 = vcombine.low %v960_v31, %v974_v39  ;;  %v2845_v39 = vld [vmem:[%s2580_s14 + $0x1c] sm:$0x1] }
  0x3b   : > { %v2208_v47 = vcombine.low %v1172_v34, %v1176_v40  ;;  %v981_v49 = vrot.slane %v979_v36, 5  ;;  %v987_v2 = vrot.slane %v985_v37, 5  ;;  %v993_v57 = vshll.u32 %v2172_v23, 16  ;;  %v2235_v34 = vld [vmem:[%s2580_s14 + $0x10] sm:$0xf] }
  0x3c   : > { %v992_v56 = vrot.slane %v990_v42, 4  ;;  %v999_v58 = vshll.u32 %v2173_v35, 16  ;;  %v1004_v59 = vshrl.u32 %v2174_v38, 16  ;;  %v1007_v62 = vshll.u32 %v2174_v38, 16  ;;  %v2237_v36 = vld [vmem:[%s2580_s14 + $0x18] sm:$0xf] }
  0x3d   : > { %2396 = vmatmul.mubr.msk.bf16.gmra.mxu0 %vm434_vm0, %v2137_v44  ;;  %v982_v61 = vor.u32 %v981_v49, %v978_v41  ;;  %v1013_v63 = vshll.u32 %v2175_v43, 16  ;;  %v1018_v0 = vshrl.u32 %v2176_v45, 16  ;;  %v995_v1 = vrot.slane %v993_v57, 5  ;;  %v2496_v49 = vld [vmem:[%s2580_s14 + $0x10] ss:$8 sps:$4 sm:$0xff]  }
  0x3e   : > { %2411 = vmatprep.mubr.msk.bf16.mxu0 %vm434_vm0, %v2180_v17  ;;  %v1001_v3 = vrot.slane %v999_v58, 5  ;;  %v1006_v4 = vrot.slane %v1004_v59, 4  ;;  %v1021_v5 = vshll.u32 %v2176_v45, 16  ;;  %v1009_v6 = vrot.slane %v1007_v62, 5 }
  0x3f   : > { %2422 = vmatmul.mubr.msk.bf16.vlgmr.msra.gmra.mxu1 %vm434_vm0, %v2208_v47  ;;  %v983_v9 = vrot.slane %v982_v61, 4  ;;  %v1015_v7 = vrot.slane %v1013_v63, 5  ;;  %v1020_v22 = vrot.slane %v1018_v0, 4  ;;  %v996_v29 = vor.u32 %v995_v1, %v992_v56  ;;  %v2857_v56 = vld [vmem:[%s2580_s14 + $0x24] sm:$0x1] }
  0x40   : > { %v1023_v44 = vrot.slane %v1021_v5, 5  ;;  %v1027_v14 = vshll.u32 %v2802_v53, 16  ;;  %v2201_v15 = vrot.slane %v2193_v32, 9  ;;  %2440 = vmatpush3.bf16.msra.mxu1 %v2725_v11  ;;  %v1010_v12 = vor.u32 %v1009_v6, %v1006_v4  ;;  %v2241_v61 = vld [vmem:[%s2580_s14 + $0x28] sm:$0xf] }
  0x41   : > { %v988_v10 = vsel %vm2610_vm3, %v983_v9, %v987_v2  ;;  %v1179_v25 = vrot.slane %v2780_v55, 5  ;;  %v2202_v51 = vrot.slane %v2194_v60, 9  ;;  %v997_v16 = vrot.slane %v996_v29, 4  ;;  %v2861_v0 = vld [vmem:[%s2580_s14 + $0x2c] sm:$0x1] }
  0x42   : > { %v1024_v17 = vor.u32 %v1023_v44, %v1020_v22  ;;  %v1029_v26 = vrot.slane %v1027_v14, 5  ;;  %v1183_v52 = vrot.slane %v2173_v35, 5  ;;  %v1011_v48 = vrot.slane %v1010_v12, 4  ;;  %v2837_v35 = vld [vmem:[%s2580_s14 + $0x14] sm:$0x1] }
  0x43   : > { %v1180_v19 = vsel %vm2666_vm6, %v2201_v15, %v1179_v25  ;;  %v2203_v11 = vrot.slane %v2195_v8, 9  ;;  %v1187_v27 = vrot.slane %v2175_v43, 5  ;;  %v1002_v20 = vsel %vm2610_vm3, %v997_v16, %v1001_v3 }
  0x44   : > { %v1025_v55 = vrot.slane %v1024_v17, 4  ;;  %v1184_v21 = vsel %vm2666_vm6, %v2202_v51, %v1183_v52  ;;  %v2204_v23 = vrot.slane %v2196_v13, 9  ;;  %v2182_v28 = vcombine.low %v988_v10, %v1002_v20  ;;  %v2498_v51 = vld [vmem:[%s2580_s14 + $0x20] ss:$8 sps:$4 sm:$0xff]   ;;  %v2875_v52 = vld [vmem:[%s2580_s14 + $0x34] sm:$0x1] }
  0x45   : > { %2412 = vmatmul.mubr.msk.bf16.vlgmr.msra.gmra.mxu0 %vm434_vm0, %v2181_v46  ;;  %v1016_v18 = vsel %vm2610_vm3, %v1011_v48, %v1015_v7  ;;  %v2209_v30 = vcombine.low %v1180_v19, %v1184_v21  ;;  %v1188_v31 = vsel %vm2666_vm6, %v2203_v11, %v1187_v27  ;;  %v1191_v38 = vrot.slane %v2802_v53, 5  ;;  %v2239_v46 = vld [vmem:[%s2580_s14 + $0x20] sm:$0xf]  ;;  %v2245_v27 = vld [vmem:[%s2580_s14 + $0x38] sm:$0xf] }
  0x46   : > { %2430 = vmatpush3.bf16.msra.mxu0 %v2761_v54  ;;  %v1030_v37 = vsel %vm2610_vm3, %v1025_v55, %v1029_v26  ;;  %v1439_v40 = vshrl.u32 %v2235_v34, 16  ;;  %v1442_v41 = vshll.u32 %v2235_v34, 16  ;;  %2415 = vmatprep.mubr.msk.bf16.mxu0 %vm434_vm0, %v2182_v28  ;;  %v1448_v43 = vshll.u32 %v2837_v35, 16  ;;  %v2243_v26 = vld [vmem:[%s2580_s14 + $0x30] sm:$0xf] }
  0x47   : > { %v2183_v42 = vcombine.low %v1016_v18, %v1030_v37  ;;  %2425 = vmatprep.mubr.msk.bf16.mxu1 %vm434_vm0, %v2209_v30  ;;  %v1453_v45 = vshrl.u32 %v2237_v36, 16  ;;  %v1456_v54 = vshll.u32 %v2237_v36, 16  ;;  %v1192_v47 = vsel %vm2666_vm6, %v2204_v23, %v1191_v38  ;;  %2449 = vmatprep.subr.bf16.mxu0 %v2828_v24  ;;  %v2880_v20 = vld [vmem:[%s2580_s14 + $0x3c] sm:$0x1]  ;;  %v2499_v23 = vld [vmem:[%s2580_s14 + $0x30] ss:$8 sps:$4 sm:$0xff]  }
  0x48   : > { %v1441_v2 = vrot.slane %v1439_v40, 4  ;;  %v1444_v53 = vrot.slane %v1442_v41, 5  ;;  %v1462_v32 = vshll.u32 %v2845_v39, 16  ;;  %v2210_v57 = vcombine.low %v1188_v31, %v1192_v47  ;;  %v2247_v31 = vld [vmem:[%s2580_s14 + $0x40] sm:$0xf] }
  0x49   : > { %v1450_v58 = vrot.slane %v1448_v43, 5  ;;  %v1455_v59 = vrot.slane %v1453_v45, 4  ;;  %v1458_v60 = vrot.slane %v1456_v54, 5  ;;  %v1467_v1 = vshrl.u32 %v2239_v46, 16  ;;  %v2890_v38 = vld [vmem:[%s2580_s14 + $0x44] sm:$0x1] }
  0x4a   : > { %v1445_v62 = vor.u32 %v1444_v53, %v1441_v2  ;;  %v1464_v63 = vrot.slane %v1462_v32, 5  ;;  %v1470_v3 = vshll.u32 %v2239_v46, 16  ;;  %2426 = vmatmul.mubr.msk.bf16.gmra.mxu1 %vm434_vm0, %v2210_v57  ;;  %v1476_v5 = vshll.u32 %v2857_v56, 16  ;;  %v2249_v45 = vld [vmem:[%s2580_s14 + $0x48] sm:$0xf] }
  0x4b   : > { %v1459_v4 = vor.u32 %v1458_v60, %v1455_v59  ;;  %v1481_v8 = vshrl.u32 %v2241_v61, 16  ;;  %v1484_v9 = vshll.u32 %v2241_v61, 16  ;;  %v1469_v7 = vrot.slane %v1467_v1, 4  ;;  %v2262_v59 = vld [vmem:[%s2580_s14 + $0x10] sm:$0xe] }
  0x4c   : > { %v1446_v6 = vrot.slane %v1445_v62, 4  ;;  %v1472_v22 = vrot.slane %v1470_v3, 5  ;;  %v1490_v29 = vshll.u32 %v2861_v0, 16  ;;  %v1478_v25 = vrot.slane %v1476_v5, 5  ;;  %v2263_v1 = vld [vmem:[%s2580_s14 + $0x18] sm:$0xe] }
  0x4d   : > { %2416 = vmatmul.mubr.msk.bf16.gmra.mxu0 %vm434_vm0, %v2183_v42  ;;  %v1460_v44 = vrot.slane %v1459_v4, 4  ;;  %v1483_v14 = vrot.slane %v1481_v8, 4  ;;  %v1486_v15 = vrot.slane %v1484_v9, 5  ;;  %v1682_v48 = vrot.slane %v2837_v35, 5  ;;  %v2264_v9 = vld [vmem:[%s2580_s14 + $0x20] sm:$0xe] }
  0x4e   : > { %2431 = vmatprep.mubr.msk.bf16.mxu0 %vm434_vm0, %v2496_v49  ;;  %v1451_v10 = vsel %vm2610_vm3, %v1446_v6, %v1450_v58  ;;  %v1473_v12 = vor.u32 %v1472_v22, %v1469_v7  ;;  %v1492_v17 = vrot.slane %v1490_v29, 5  ;;  %v1495_v55 = vshrl.u32 %v2243_v26, 16  ;;  %v2896_v49 = vld [vmem:[%s2580_s14 + $0x4c] sm:$0x1]  ;;  %v2500_v29 = vld [vmem:[%s2580_s14 + $0x40] ss:$8 sps:$4 sm:$0xff]  }
  0x4f   : > { %v1465_v13 = vsel %vm2610_vm3, %v1460_v44, %v1464_v63  ;;  %v1487_v16 = vor.u32 %v1486_v15, %v1483_v14  ;;  %v1498_v28 = vshll.u32 %v2243_v26, 16  ;;  %v1504_v18 = vshll.u32 %v2875_v52, 16  ;;  %v2267_v26 = vld [vmem:[%s2580_s14 + $0x38] sm:$0xe] }
  0x50   : > { %v2253_v19 = vcombine.low %v1451_v10, %v1465_v13  ;;  %v1474_v11 = vrot.slane %v1473_v12, 4  ;;  %v1509_v30 = vshrl.u32 %v2245_v27, 16  ;;  %v1497_v35 = vrot.slane %v1495_v55, 4  ;;  %v2265_v12 = vld [vmem:[%s2580_s14 + $0x28] sm:$0xe] }
  0x51   : > { %v1488_v21 = vrot.slane %v1487_v16, 4  ;;  %v1512_v36 = vshll.u32 %v2245_v27, 16  ;;  %v1518_v37 = vshll.u32 %v2880_v20, 16  ;;  %v1500_v41 = vrot.slane %v1498_v28, 5 }
  0x52   : > { %2441 = vmatprep.mubr.msk.bf16.mxu1 %vm434_vm0, %v2253_v19  ;;  %v1479_v34 = vsel %vm2610_vm3, %v1474_v11, %v1478_v25  ;;  %v1506_v42 = vrot.slane %v1504_v18, 5  ;;  %v1511_v43 = vrot.slane %v1509_v30, 4  ;;  %v1523_v2 = vshrl.u32 %v2247_v31, 16 }
  0x53   : > { %v1493_v40 = vsel %vm2610_vm3, %v1488_v21, %v1492_v17  ;;  %v1514_v46 = vrot.slane %v1512_v36, 5  ;;  %v1520_v47 = vrot.slane %v1518_v37, 5  ;;  %v1501_v53 = vor.u32 %v1500_v41, %v1497_v35  ;;  %v2266_v17 = vld [vmem:[%s2580_s14 + $0x30] sm:$0xe]  ;;  %v2268_v36 = vld [vmem:[%s2580_s14 + $0x40] sm:$0xe] }
  0x54   : > { %v2254_v54 = vcombine.low %v1479_v34, %v1493_v40  ;;  %v1526_v32 = vshll.u32 %v2247_v31, 16  ;;  %v1532_v57 = vshll.u32 %v2890_v38, 16  ;;  %v1537_v58 = vshrl.u32 %v2249_v45, 16  ;;  %v2269_v41 = vld [vmem:[%s2580_s14 + $0x48] sm:$0xe] }
  0x55   : > { %2432 = vmatmul.mubr.msk.bf16.vlgmr.msra.gmra.mxu0 %vm434_vm0, %v2498_v51  ;;  %v1515_v60 = vor.u32 %v1514_v46, %v1511_v43  ;;  %v1525_v61 = vrot.slane %v1523_v2, 4  ;;  %v1540_v62 = vshll.u32 %v2249_v45, 16  ;;  %v1546_v63 = vshll.u32 %v2896_v49, 16 }
  0x56   : > { %2450 = vmatpush3.bf16.msra.mxu0 %v2828_v24  ;;  %2442 = vmatmul.mubr.msk.bf16.vlgmr.msra.gmra.mxu1 %vm434_vm0, %v2254_v54  ;;  %v1502_v3 = vrot.slane %v1501_v53, 4  ;;  %v1528_v4 = vrot.slane %v1526_v32, 5  ;;  %v1534_v5 = vrot.slane %v1532_v57, 5  ;;  %v1539_v8 = vrot.slane %v1537_v58, 4 }
  0x57   : > { %2435 = vmatprep.mubr.msk.bf16.mxu0 %vm434_vm0, %v2499_v23  ;;  %v1516_v24 = vrot.slane %v1515_v60, 4  ;;  %v1542_v6 = vrot.slane %v1540_v62, 5  ;;  %v1548_v7 = vrot.slane %v1546_v63, 5  ;;  %v2270_v22 = vrot.slane %v2262_v59, 9 }
  0x58   : > { %v1507_v44 = vsel %vm2610_vm3, %v1502_v3, %v1506_v42  ;;  %v1529_v14 = vor.u32 %v1528_v4, %v1525_v61  ;;  %v2271_v15 = vrot.slane %v2263_v1, 9  ;;  %v1686_v10 = vrot.slane %v2845_v39, 5 }
  0x59   : > { %v1521_v25 = vsel %vm2610_vm3, %v1516_v24, %v1520_v47  ;;  %v1543_v51 = vor.u32 %v1542_v6, %v1539_v8  ;;  %v1683_v13 = vsel %vm2666_vm6, %v2270_v22, %v1682_v48  ;;  %v2272_v16 = vrot.slane %v2264_v9, 9 }
  0x5a   : > { %v2255_v19 = vcombine.low %v1507_v44, %v1521_v25  ;;  %v1530_v11 = vrot.slane %v1529_v14, 4  ;;  %v1687_v27 = vsel %vm2666_vm6, %v2271_v15, %v1686_v10  ;;  %v1690_v55 = vrot.slane %v2857_v56, 5 }
  0x5b   : > { %v1544_v39 = vrot.slane %v1543_v51, 4  ;;  %v2280_v21 = vcombine.low %v1683_v13, %v1687_v27  ;;  %v2273_v23 = vrot.slane %v2265_v12, 9  ;;  %v1694_v28 = vrot.slane %v2861_v0, 5 }
  0x5c   : > { %2445 = vmatprep.mubr.msk.bf16.mxu1 %vm434_vm0, %v2255_v19  ;;  %v1535_v48 = vsel %vm2610_vm3, %v1530_v11, %v1534_v5  ;;  %v1691_v18 = vsel %vm2666_vm6, %v2272_v16, %v1690_v55  ;;  %v2274_v30 = vrot.slane %v2266_v17, 9  ;;  %v1698_v56 = vrot.slane %v2875_v52, 5 }
  0x5d   : > { %2436 = vmatmul.mubr.msk.bf16.gmra.mxu0 %vm434_vm0, %v2500_v29  ;;  %v1549_v31 = vsel %vm2610_vm3, %v1544_v39, %v1548_v7  ;;  %v1695_v0 = vsel %vm2666_vm6, %v2273_v23, %v1694_v28  ;;  %v2275_v34 = vrot.slane %v2267_v26, 9  ;;  %v1702_v35 = vrot.slane %v2880_v20, 5 }
  0x5e   : > { %2451 = vmatprep.mubr.msk.bf16.mxu0 %vm434_vm0, %v2280_v21  ;;  %v2256_v37 = vcombine.low %v1535_v48, %v1549_v31  ;;  %v1699_v40 = vsel %vm2666_vm6, %v2274_v30, %v1698_v56  ;;  %v2281_v33 = vcombine.low %v1691_v18, %v1695_v0  ;;  %v2276_v42 = vrot.slane %v2268_v36, 9 }
  0x5f   : > { %v1703_v52 = vsel %vm2666_vm6, %v2275_v34, %v1702_v35  ;;  %v1706_v45 = vrot.slane %v2890_v38, 5  ;;  %v2277_v54 = vrot.slane %v2269_v41, 9  ;;  %v1710_v46 = vrot.slane %v2896_v49, 5  ;;  %v2501_v38 = vld [vmem:[%s3026_s4 + $0x8] sm:$0xff]   ;;  %v2502_v49 = vld [vmem:[%s3026_s4] sm:$0xff]  }
  0x60   : > { %2446 = vmatmul.mubr.msk.bf16.gmra.mxu1 %vm434_vm0, %v2256_v37  ;;  %v2282_v43 = vcombine.low %v1699_v40, %v1703_v52  ;;  %2459 = vmatprep.subr.bf16.mxu1 %v2501_v38 }
  0x61   : > { %v1707_v20 = vsel %vm2666_vm6, %v2276_v42, %v1706_v45  ;;  %v1711_v47 = vsel %vm2666_vm6, %v2277_v54, %v1710_v46  ;;  %2460 = vmatpush3.bf16.msra.mxu1 %v2501_v38 }
  0x62   : > { %v2283_v2 = vcombine.low %v1707_v20, %v1711_v47  ;;  %2461 = vmatprep.subr.bf16.mxu1 %v2502_v49 }
  0x65   : > { %2452 = vmatmul.mubr.msk.bf16.vlgmr.msra.gmra.mxu0 %vm434_vm0, %v2281_v33  ;;  %2462 = vmatpush3.bf16.msra.mxu1 %v2502_v49 }
  0x66   : > { %2455 = vmatprep.mubr.msk.bf16.mxu0 %vm434_vm0, %v2282_v43 }
  0x6d   : > { %2456 = vmatmul.mubr.msk.bf16.gmra.mxu0 %vm434_vm0, %v2283_v2 }
  0xd8   : > { %v2383_v53 = vpop.f32.mrf.mxu1 }
  0xda   : > { %v584_v32 = vpop.f32.mrf.mxu1 }
  0xdc   : > { %v2384_v57 = vpop.f32.mrf.mxu1 }
  0xde   : > { %v587_v58 = vpop.f32.mrf.mxu1 }
  0xe2   : > { %v2373_v50 = vpop.f32.mrf.mxu0 }
  0xe3   : > { %v593_v36 = vadd.f32 %v2383_v53, %v2373_v50 }
  0xe4   : > { %v481_v59 = vpop.f32.mrf.mxu0 }
  0xe5   : > { %v585_v37 = vadd.f32 %v584_v32, %v481_v59 }
  0xe6   : > { %v2374_v60 = vpop.f32.mrf.mxu0  ;;  %v2387_v61 = vpop.f32.mrf.mxu1 }
  0xe7   : > { %v596_v41 = vadd.f32 %v2384_v57, %v2374_v60 }
  0xe8   : > { %v600_v62 = vpop.f32.mrf.mxu1  ;;  %v484_v63 = vpop.f32.mrf.mxu0 }
  0xe9   : > { %v588_v46 = vadd.f32 %v587_v58, %v484_v63 }
  0xea   : > { %v2388_v1 = vpop.f32.mrf.mxu1 }
  0xec   : > { %v2957_v3 = vpop.f32.mrf.mxu1 }
  0xed   : > { %v2377_v4 = vpop.f32.mrf.mxu0 }
  0xee   : > { %v2403_v5 = vpop.f32.mrf.mxu1  ;;  %v609_v38 = vadd.f32 %v2387_v61, %v2377_v4 }
  0xef   : > { %v497_v8 = vpop.f32.mrf.mxu0 }
  0xf0   : > { %v864_v9 = vpop.f32.mrf.mxu1 }
  0xf1   : > { %v2378_v24 = vpop.f32.mrf.mxu0 }
  0xf2   : > { %v2404_v6 = vpop.f32.mrf.mxu1  ;;  %v612_v50 = vadd.f32 %v2388_v1, %v2378_v24 }
  0xf3   : > { %v2959_v7 = vpop.f32.mrf.mxu0 }
  0xf4   : > { %v867_v22 = vpop.f32.mrf.mxu1  ;;  %v604_v61 = vadd.f32 %v2957_v3, %v2959_v7 }
  0xf5   : > { %v2393_v29 = vpop.f32.mrf.mxu0 }
  0xf6   : > { %v774_v52 = vadd.f32 %v2393_v29, %v593_v36 }
  0xf7   : > { %v741_v44 = vpop.f32.mrf.mxu0  ;;  %v2407_v14 = vpop.f32.mrf.mxu1 }
  0xf8   : > { %v772_v33 = vadd.f32 %v741_v44, %v585_v37  ;;  %v897_v47 = vadd.f32 %v2403_v5, %v774_v52 }
  0xf9   : > { %v2394_v15 = vpop.f32.mrf.mxu0  ;;  %v880_v10 = vpop.f32.mrf.mxu1 }
  0xfa   : > { %v775_v45 = vadd.f32 %v2394_v15, %v596_v41  ;;  %v895_v2 = vadd.f32 %v864_v9, %v772_v33 }
  0xfb   : > { %v744_v12 = vpop.f32.mrf.mxu0  ;;  %v2961_v25 = vpop.f32.mrf.mxu1 }
  0xfc   : > { %v773_v49 = vadd.f32 %v744_v12, %v588_v46 }
  0xfd   : > { %v2397_v51 = vpop.f32.mrf.mxu0  ;;  %v2963_v13 = vpop.f32.mrf.mxu1 }
  0xfe   : > { %v778_v57 = vadd.f32 %v2397_v51, %v609_v38  ;;  %v896_v44 = vadd.f32 %v867_v22, %v773_v49 }
  0xff   : > { %v757_v16 = vpop.f32.mrf.mxu0  ;;  %v2423_v17 = vpop.f32.mrf.mxu1 }
 0x100   : > { %v901_v4 = vadd.f32 %v2407_v14, %v778_v57 }
 0x101   : > { %v2398_v26 = vpop.f32.mrf.mxu0  ;;  %v1260_v19 = vpop.f32.mrf.mxu1 }
 0x102   : > { %v779_v15 = vadd.f32 %v2398_v26, %v612_v50 }
 0x103   : > { %v760_v11 = vpop.f32.mrf.mxu0  ;;  %v2424_v27 = vpop.f32.mrf.mxu1 }
 0x104   : > { %v777_v24 = vadd.f32 %v760_v11, %v604_v61  ;;  %v902_v51 = vadd.f32 %v2961_v25, %v779_v15 }
 0x105   : > { %v2413_v55 = vpop.f32.mrf.mxu0  ;;  %v1263_v21 = vpop.f32.mrf.mxu1 }
 0x106   : > { %v900_v7 = vadd.f32 %v2963_v13, %v777_v24 }
 0x107   : > { %v1098_v39 = vpop.f32.mrf.mxu0 }
 0x108   : > { %v1129_v53 = vadd.f32 %v1098_v39, %v895_v2  ;;  %v2290_v2 = vld [vmem:[%s3025_s3] ss:$0 sm:$0xff] }
 0x109   : > { %v2414_v23 = vpop.f32.mrf.mxu0 }
 0x10a   : > { %v2427_v48 = vpop.f32.mrf.mxu1  ;;  %v1291_v63 = vadd.f32 %v1260_v19, %v1129_v53 }
 0x10b   : > { %v1101_v28 = vpop.f32.mrf.mxu0 }
 0x10c   : > { %v2965_v30 = vpop.f32.mrf.mxu1 }
 0x10d   : > { %v2417_v18 = vpop.f32.mrf.mxu0  ;;  %3034 = vst [vmem:[#allocation2_spill] sm:$0xff] %v2965_v30  ;;  %v898_v30 = vadd.f32 %v2404_v6, %v775_v45 }
 0x10e   : > { %v2967_v31 = vpop.f32.mrf.mxu1 }
 0x10f   : > { %v1114_v56 = vpop.f32.mrf.mxu0  ;;  %3035 = vst [vmem:[#allocation3_spill] sm:$0xff] %v2967_v31  ;;  %v1132_v29 = vadd.f32 %v2414_v23, %v898_v30 }
 0x110   : > { %v2969_v34 = vpop.f32.mrf.mxu1 }
 0x111   : > { %v2418_v0 = vpop.f32.mrf.mxu0  ;;  %3036 = vst [vmem:[#allocation4_spill] sm:$0xff] %v2969_v34  ;;  %v601_v34 = vadd.f32 %v600_v62, %v497_v8  ;;  %v1130_v62 = vadd.f32 %v1101_v28, %v896_v44  ;;  %v1294_v6 = vadd.f32 %v2424_v27, %v1132_v29 }
 0x112   : > { %v1136_v39 = vadd.f32 %v2418_v0, %v902_v51 }
 0x113   : > { %v2971_v35 = vpop.f32.mrf.mxu0  ;;  %v776_v60 = vadd.f32 %v757_v16, %v601_v34  ;;  %v1135_v16 = vadd.f32 %v2417_v18, %v901_v4  ;;  %v1292_v19 = vadd.f32 %v1263_v21, %v1130_v62  ;;  %v2289_v21 = vld [vmem:[%s3024_s2] ss:$0 sm:$0xff] }
 0x114   : > { %3037 = vst [vmem:[#allocation5_spill] sm:$0xff] %v2971_v35  ;;  %v1131_v35 = vadd.f32 %v2413_v55, %v897_v47  ;;  %v3038_v28 = vld [vmem:[#allocation2_spill] sm:$0xff] }
 0x115   : > { %v2433_v40 = vpop.f32.mrf.mxu0  ;;  %v899_v9 = vadd.f32 %v880_v10, %v776_v60  ;;  %v1297_v14 = vadd.f32 %v2427_v48, %v1135_v16 }
 0x116   : > { %v2443_v42 = vpop.f32.mrf.mxu1  ;;  %v1293_v58 = vadd.f32 %v2423_v17, %v1131_v35 }
 0x117   : > { %v1383_v43 = vpop.f32.mrf.mxu0  ;;  %v1133_v26 = vadd.f32 %v1114_v56, %v899_v9 }
 0x118   : > { %v1617_v54 = vpop.f32.mrf.mxu1  ;;  %v1416_v12 = vadd.f32 %v2433_v40, %v1293_v58  ;;  %v1414_v1 = vadd.f32 %v1383_v43, %v1291_v63  ;;  %v3040_v40 = vld [vmem:[#allocation3_spill] sm:$0xff] }
 0x119   : > { %v2434_v20 = vpop.f32.mrf.mxu0  ;;  %v1295_v34 = vadd.f32 %v3038_v28, %v1133_v26  ;;  %v1298_v41 = vadd.f32 %v3040_v40, %v1136_v39 }
 0x11a   : > { %v2444_v32 = vpop.f32.mrf.mxu1  ;;  %v1417_v55 = vadd.f32 %v2434_v20, %v1294_v6  ;;  %v1650_v30 = vadd.f32 %v2443_v42, %v1416_v12  ;;  %v1648_v3 = vadd.f32 %v1617_v54, %v1414_v1  ;;  %v3041_v20 = vld [vmem:[#allocation4_spill] sm:$0xff] }
 0x11b   : > { %v1386_v31 = vpop.f32.mrf.mxu0  ;;  %v3039_v37 = vld [vmem:[#allocation5_spill] sm:$0xff] }
 0x11c   : > { %v1620_v5 = vpop.f32.mrf.mxu1  ;;  %v1415_v10 = vadd.f32 %v1386_v31, %v1292_v19  ;;  %v1651_v11 = vadd.f32 %v2444_v32, %v1417_v55  ;;  %v1134_v56 = vadd.f32 %v3039_v37, %v900_v7 }
 0x11d   : > { %v2437_v59 = vpop.f32.mrf.mxu0 }
 0x11e   : > { %v1420_v52 = vadd.f32 %v2437_v59, %v1297_v14  ;;  %v1649_v31 = vadd.f32 %v1620_v5, %v1415_v10  ;;  %v1296_v47 = vadd.f32 %v3041_v20, %v1134_v56 }
 0x11f   : > { %v1399_v36 = vpop.f32.mrf.mxu0 }
 0x120   : > { %v2447_v17 = vpop.f32.mrf.mxu1  ;;  %v1418_v13 = vadd.f32 %v1399_v36, %v1295_v34  ;;  %v2291_v34 = vld [vmem:[%s3027_s5] ss:$0 sm:$0xff] }
 0x121   : > { %v2438_v8 = vpop.f32.mrf.mxu0  ;;  %v1654_v53 = vadd.f32 %v2447_v17, %v1420_v52 }
 0x122   : > { %v1633_v35 = vpop.f32.mrf.mxu1  ;;  %v1421_v33 = vadd.f32 %v2438_v8, %v1298_v41 }
 0x123   : > { %v1402_v22 = vpop.f32.mrf.mxu0  ;;  %v1652_v32 = vadd.f32 %v1633_v35, %v1418_v13  ;;  %v2298_v35 = vld [vmem:[%s3028_s6] ss:$0 sm:$0xff] }
 0x124   : > { %v2448_v43 = vpop.f32.mrf.mxu1  ;;  %v1419_v50 = vadd.f32 %v1402_v22, %v1296_v47 }
 0x125   : > { %v2453_v23 = vpop.f32.mrf.mxu0  ;;  %v1655_v57 = vadd.f32 %v2448_v43, %v1421_v33 }
 0x126   : > { %v1812_v25 = vadd.f32 %v2453_v23, %v1650_v30  ;;  %v1636_v44 = vpop.f32.mrf.mxu1 }
 0x127   : > { %v1779_v27 = vpop.f32.mrf.mxu0  ;;  %v1653_v62 = vadd.f32 %v1636_v44, %v1419_v50 }
 0x128   : > { %v1810_v18 = vadd.f32 %v1779_v27, %v1648_v3  ;;  %v1827_v45 = vadd.f32 %v2289_v21, %v1812_v25 }
 0x129   : > { %v2454_v0 = vpop.f32.mrf.mxu0 }
 0x12a   : > { %v1813_v48 = vadd.f32 %v2454_v0, %v1651_v11  ;;  %v1825_v54 = vadd.f32 %v2289_v21, %v1810_v18  ;;  %v1850_v15 = vmul.f32 %v2290_v2, %v1827_v45  ;;  %vm1835_vm10 = vcmp.gt.f32.partialorder %v1827_v45, 0.0 }
 0x12b   : > { %v1782_v42 = vpop.f32.mrf.mxu0 }
 0x12c   : > { %v1828_v46 = vadd.f32 %v2289_v21, %v1813_v48  ;;  %v1811_v38 = vadd.f32 %v1782_v42, %v1649_v31  ;;  %v1848_v36 = vmul.f32 %v2290_v2, %v1825_v54  ;;  %vm1833_vm8 = vcmp.gt.f32.partialorder %v1825_v54, 0.0 }
 0x12d   : > { %v2457_v49 = vpop.f32.mrf.mxu0  ;;  %v1858_v51 = vsel %vm1835_vm10, %v1827_v45, %v1850_v15 }
 0x12e   : > { %v1851_v59 = vmul.f32 %v2290_v2, %v1828_v46  ;;  %v1826_v60 = vadd.f32 %v2289_v21, %v1811_v38  ;;  %vm1836_vm7 = vcmp.gt.f32.partialorder %v1828_v46, 0.0  ;;  %v1816_v5 = vadd.f32 %v2457_v49, %v1654_v53 }
 0x12f   : > { %v1795_v29 = vpop.f32.mrf.mxu0  ;;  %v1856_v1 = vsel %vm1833_vm8, %v1825_v54, %v1848_v36 }
 0x130   : > { %v1814_v58 = vadd.f32 %v1795_v29, %v1652_v32  ;;  %vm1834_vm9 = vcmp.gt.f32.partialorder %v1826_v60, 0.0  ;;  %v1849_v63 = vmul.f32 %v2290_v2, %v1826_v60  ;;  %v1859_v8 = vsel %vm1836_vm7, %v1828_v46, %v1851_v59 }
 0x131   : > { %v2458_v61 = vpop.f32.mrf.mxu0  ;;  %v1831_v16 = vadd.f32 %v2289_v21, %v1816_v5  ;;  %v1865_v55 = vpack.c.bf16 %v1859_v8, %v1858_v51 }
 0x132   : > { %v1817_v4 = vadd.f32 %v2458_v61, %v1655_v57  ;;  %v1857_v9 = vsel %vm1834_vm9, %v1826_v60, %v1849_v63  ;;  %v1829_v6 = vadd.f32 %v2289_v21, %v1814_v58 }
 0x133   : > { %v1798_v12 = vpop.f32.mrf.mxu0  ;;  %v1864_v26 = vpack.c.bf16 %v1857_v9, %v1856_v1  ;;  %v1854_v23 = vmul.f32 %v2290_v2, %v1831_v16  ;;  %vm1839_vm15 = vcmp.gt.f32.partialorder %v1831_v16, 0.0 }
 0x134   : > { %v1832_v24 = vadd.f32 %v2289_v21, %v1817_v4  ;;  %v1815_v22 = vadd.f32 %v1798_v12, %v1653_v62  ;;  %v1852_v17 = vmul.f32 %v2290_v2, %v1829_v6  ;;  %vm1837_vm12 = vcmp.gt.f32.partialorder %v1829_v6, 0.0 }
 0x135   : > { %2463 = vmatprep.mubr.msk.bf16.mxu1 %vm1891_vm11, %v1864_v26  ;;  %v1862_v27 = vsel %vm1839_vm15, %v1831_v16, %v1854_v23 }
 0x136   : > { %v1855_v19 = vmul.f32 %v2290_v2, %v1832_v24  ;;  %v1830_v39 = vadd.f32 %v2289_v21, %v1815_v22  ;;  %vm1840_vm13 = vcmp.gt.f32.partialorder %v1832_v24, 0.0  ;;  %2464 = vmatmul.mubr.msk.bf16.vlgmr.msra.gmra.mxu1 %vm1891_vm11, %v1865_v55  ;;  %v1860_v3 = vsel %vm1837_vm12, %v1829_v6, %v1852_v17 }
 0x138   : > { %vm1838_vm14 = vcmp.gt.f32.partialorder %v1830_v39, 0.0  ;;  %v1853_v30 = vmul.f32 %v2290_v2, %v1830_v39  ;;  %v1863_v7 = vsel %vm1840_vm13, %v1832_v24, %v1855_v19 }
 0x139   : > { %v1867_v28 = vpack.c.bf16 %v1863_v7, %v1862_v27 }
 0x13a   : > { %v1861_v14 = vsel %vm1838_vm14, %v1830_v39, %v1853_v30 }
 0x13b   : > { %v1866_v10 = vpack.c.bf16 %v1861_v14, %v1860_v3 }
 0x13d   : > { %2467 = vmatprep.mubr.msk.bf16.mxu1 %vm1891_vm11, %v1866_v10 }
 0x13e   : > { %2468 = vmatmul.mubr.msk.bf16.gmra.mxu1 %vm1891_vm11, %v1867_v28 }
 0x1f6   : > { %v2465_v11 = vpop.f32.mrf.mxu1 }
 0x1f7   : > { %v1947_v25 = vadd.f32 %v2465_v11, %v2291_v34 }
 0x1f8   : > { %v1938_v18 = vpop.f32.mrf.mxu1 }
 0x1f9   : > { %vm1971_vm0 = vcmp.gt.f32.partialorder %v1947_v25, 0.0  ;;  %v1986_v37 = vmul.f32 %v2298_v35, %v1947_v25  ;;  %v1939_v56 = vadd.f32 %v2291_v34, %v1938_v18 }
 0x1fa   : > { %v2466_v40 = vpop.f32.mrf.mxu1 }
 0x1fb   : > { %v1994_v41 = vsel %vm1971_vm0, %v1947_v25, %v1986_v37  ;;  %vm1969_vm2 = vcmp.gt.f32.partialorder %v1939_v56, 0.0  ;;  %v1984_v21 = vmul.f32 %v2298_v35, %v1939_v56  ;;  %v1950_v0 = vadd.f32 %v2466_v40, %v2291_v34 }
 0x1fc   : > { %v2312_v52 = vpack.c.bf16 %v1994_v41, %v1994_v41  ;;  %v1941_v13 = vpop.f32.mrf.mxu1 }
 0x1fd   : > { %v1992_v48 = vsel %vm1969_vm2, %v1939_v56, %v1984_v21  ;;  %vm1972_vm3 = vcmp.gt.f32.partialorder %v1950_v0, 0.0  ;;  %v1987_v31 = vmul.f32 %v2298_v35, %v1950_v0  ;;  %v1942_v33 = vadd.f32 %v2291_v34, %v1941_v13 }
 0x1fe   : > { %2035 = vst.msk [vmem:[%s3001_s19 + $0x8] sm:$0xf] %vm2032_vm1, %v2312_v52  ;;  %v2310_v42 = vpack.c.bf16 %v1992_v48, %v1992_v48  ;;  %v2469_v43 = vpop.f32.mrf.mxu1 }
 0x1ff   : > { %v1995_v45 = vsel %vm1972_vm3, %v1950_v0, %v1987_v31  ;;  %vm1970_vm4 = vcmp.gt.f32.partialorder %v1942_v33, 0.0  ;;  %v1985_v54 = vmul.f32 %v2298_v35, %v1942_v33  ;;  %v1963_v46 = vadd.f32 %v2469_v43, %v2291_v34 }
 0x200   : > { %2033 = vst.msk [vmem:[%s3001_s19] sm:$0xf] %vm2032_vm1, %v2310_v42  ;;  %v2313_v20 = vpack.c.bf16 %v1995_v45, %v1995_v45  ;;  %v1954_v47 = vpop.f32.mrf.mxu1 }
 0x201   : > { %v1993_v2 = vsel %vm1970_vm4, %v1942_v33, %v1985_v54  ;;  %vm1975_vm5 = vcmp.gt.f32.partialorder %v1963_v46, 0.0  ;;  %v1990_v38 = vmul.f32 %v2298_v35, %v1963_v46  ;;  %v1955_v49 = vadd.f32 %v2291_v34, %v1954_v47 }
 0x202   : > { %2036 = vst.msk [vmem:[%s3001_s19 + $0xc] sm:$0xf] %vm2032_vm1, %v2313_v20  ;;  %v2311_v53 = vpack.c.bf16 %v1993_v2, %v1993_v2  ;;  %v2470_v32 = vpop.f32.mrf.mxu1 }
 0x203   : > { %v1998_v50 = vsel %vm1975_vm5, %v1963_v46, %v1990_v38  ;;  %vm1973_vm6 = vcmp.gt.f32.partialorder %v1955_v49, 0.0  ;;  %v1988_v57 = vmul.f32 %v2298_v35, %v1955_v49  ;;  %v1966_v59 = vadd.f32 %v2470_v32, %v2291_v34 }
 0x204   : > { %2034 = vst.msk [vmem:[%s3001_s19 + $0x4] sm:$0xf] %vm2032_vm1, %v2311_v53  ;;  %v2316_v60 = vpack.c.bf16 %v1998_v50, %v1998_v50  ;;  %v1957_v29 = vpop.f32.mrf.mxu1 }
 0x205   : > { %v1996_v44 = vsel %vm1973_vm6, %v1955_v49, %v1988_v57  ;;  %vm1976_vm7 = vcmp.gt.f32.partialorder %v1966_v59, 0.0  ;;  %v1991_v15 = vmul.f32 %v2298_v35, %v1966_v59  ;;  %v1958_v36 = vadd.f32 %v2291_v34, %v1957_v29 }
 0x206   : > { %2039 = vst.msk [vmem:[%s3001_s19 + $0x18] sm:$0xf] %vm2032_vm1, %v2316_v60  ;;  %v2314_v58 = vpack.c.bf16 %v1996_v44, %v1996_v44 }
 0x207   : > { %v1999_v63 = vsel %vm1976_vm7, %v1966_v59, %v1991_v15  ;;  %vm1974_vm8 = vcmp.gt.f32.partialorder %v1958_v36, 0.0  ;;  %v1989_v5 = vmul.f32 %v2298_v35, %v1958_v36 }
 0x208   : > { %2037 = vst.msk [vmem:[%s3001_s19 + $0x10] sm:$0xf] %vm2032_vm1, %v2314_v58  ;;  %v2317_v61 = vpack.c.bf16 %v1999_v63, %v1999_v63 }
 0x209   : > { %v1997_v4 = vsel %vm1974_vm8, %v1958_v36, %v1989_v5 }
 0x20a   : > { %2040 = vst.msk [vmem:[%s3001_s19 + $0x1c] sm:$0xf] %vm2032_vm1, %v2317_v61  ;;  %v2315_v62 = vpack.c.bf16 %v1997_v4, %v1997_v4 }
 0x20c   : > { %2038 = vst.msk [vmem:[%s3001_s19 + $0x14] sm:$0xf] %vm2032_vm1, %v2315_v62 }
 0x20d PF: > { %s17_s24 = sadd.s32 1, %s2509_s24  }
 0x20e   : > { %p14_p4 = scmp.ge.s32.totalorder %s17_s24, 4  }
 0x210   :  { %16 = sbr.rel (!%p14_p4) target bundleno = 1 (0x1), region = 88 }

// kernel: _lambda_.6
= control target key start
LH: loop header
LB: loop body
LE: loop exit
PB: predicated region body
PF: predicated region fallthrough
CT: control target
= control target key end

     0   :  { %s2511_s27 = smov 0   ;;  %s2843_s0 = inlined_call_operand.vmem [shape: bf16[2,4,9,9,8], index: 0, kind: input, shape index: {}]   ;;  %s2844_s1 = inlined_call_operand.vmem [shape: bf16[9,8,48], index: 1, kind: input, shape index: {}]   ;;  %s2845_s2 = inlined_call_operand.vmem [shape: f32[1,48], index: 2, kind: input, shape index: {}]   ;;  %s2846_s3 = inlined_call_operand.vmem [shape: f32[1,48], index: 3, kind: input, shape index: {}]   ;;  %s2847_s4 = inlined_call_operand.vmem [shape: bf16[48,32], index: 4, kind: input, shape index: {}]   ;;  %s2848_s5 = inlined_call_operand.vmem [shape: f32[1,32], index: 5, kind: input, shape index: {}]   ;;  %s2849_s6 = inlined_call_operand.vmem [shape: f32[1,32], index: 6, kind: input, shape index: {}]   ;;  %s2850_s7 = inlined_call_operand.vmem [shape: bf16[2,64,16], index: 7, kind: output, shape index: {0}]   ;;  %s2851_s8 = inlined_call_operand.vmem [shape: bf16[2,64,16], index: 8, kind: output, shape index: {1}]  }
   0x1 LB: > { %s2062_s28 = sadd.s32 4294967295, %s2463_s27   ;;  %p2066_p0 = scmp.ge.s32.totalorder %s2463_s27, 1  ;;  %s2463_s27 = sphi %s2511_s27, %s19_s27  }
   0x2   : > { %p265_p1 = scmp.lt.s32.totalorder %s2463_s27, 3 }
   0x4   : > { %p266_p2 = pnand %p2066_p0, %p265_p1 }
   0x5   : > { %p304_p3 = scmp.lt.s32.totalorder (!%p266_p2), %s2062_s28, 1  ;;  %s2465_s29 = smov (!%p266_p2), 112  }
   0x6   : > { %269 = sbr.rel (%p266_p2) target bundleno = 628 (0x274), region = 48 }
   0xb   : > { %v2080_v0 = vld [vmem:[%s2844_s1 + $0x4] sm:$0xf]  ;;  %vm373_vm0 = vcmask 1043456   ;;  %v328_v1 = vld [vmem:[%s2844_s1] sm:$0xf]  ;;  %s2855_s28 = smov (!%p304_p3, %s2062_s28), 1 }
   0xc   : > { %2411 = vmatprep.subr.msk.bf16.mxu0 %vm373_vm0, %v2080_v0  ;;  %v375_v2 = vsel %vm373_vm0, %v2080_v0, 0  ;;  %2412 = vmatprep.subr.msk.bf16.mxu1 %vm373_vm0, %v328_v1  ;;  %v475_v3 = vsel %vm373_vm0, %v328_v1, 0  ;;  %v2097_v4 = vld [vmem:[%s2844_s1 + $0x8] sm:$0xf]  ;;  %v2114_v5 = vld [vmem:[%s2844_s1 + $0xc] sm:$0xf] }
   0xd   : > { %2308 = vmatpush3.bf16.msra.mxu0 %v375_v2  ;;  %2318 = vmatpush3.bf16.msra.mxu1 %v475_v3  ;;  %v2131_v6 = vld [vmem:[%s2844_s1 + $0x10] sm:$0xf]  ;;  %s2420_s17 = smul.u32 288, %s2855_s28  ;;  %v2156_v7 = vld [vmem:[%s2844_s1 + $0x14] sm:$0xf]  ;;  %vm360_vm1 = vcmask 64512  }
   0xe   : > { %2413 = vmatprep.subr.msk.bf16.mxu0 %vm373_vm0, %v2097_v4  ;;  %2414 = vmatprep.subr.msk.bf16.mxu1 %vm373_vm0, %v2114_v5  ;;  %v700_v8 = vsel %vm373_vm0, %v2097_v4, 0  ;;  %v819_v9 = vsel %vm373_vm0, %v2114_v5, 0  ;;  %v2554_v10 = vsel %vm373_vm0, %v2131_v6, 0  ;;  %v2557_v11 = vsel %vm373_vm0, %v2156_v7, 0  ;;  %v2605_v5 = vld [vmem:[%s2844_s1 + $0x1c] sm:$0xf] }
   0xf   : > { %s2551_s22 = scalar_lea.vmem %s2843_s0, %s2420_s17  ;;  %vm558_vm2 = vsmask.f32 3328  ;;  %vm559_vm3 = vsmask.f32 7440  ;;  %v2456_v46 = vld [vmem:[%s2847_s4] sm:$0xff]   ;;  %vm1792_vm9 = vcmask 392192  }
  0x10   : > { %v2430_v12 = vld [vmem:[%s2551_s22 + $0x48] ss:$8 sps:$4 sm:$0xff]   ;;  %v2432_v14 = vld [vmem:[%s2551_s22 + $0x58] ss:$8 sps:$4 sm:$0xff]   ;;  %v543_v21 = vld [vmem:[%s2551_s22 + $0x4] sm:$0x1] }
  0x11   : > { %v2431_v13 = vld [vmem:[%s2551_s22] ss:$8 sps:$4 sm:$0xff]   ;;  %2309 = vmatprep.mubr.msk.bf16.mxu0 %vm360_vm1, %v2430_v12  ;;  %v2433_v15 = vld [vmem:[%s2551_s22 + $0x10] ss:$8 sps:$4 sm:$0xff]   ;;  %v545_v23 = vld [vmem:[%s2551_s22 + $0xc] sm:$0x1] }
  0x12   : > { %2319 = vmatprep.mubr.msk.bf16.mxu1 %vm360_vm1, %v2431_v13  ;;  %2310 = vmatmul.mubr.msk.bf16.vlgmr.msra.gmra.mxu0 %vm360_vm1, %v2432_v14  ;;  %v2434_v16 = vld [vmem:[%s2551_s22 + $0x68] ss:$8 sps:$4 sm:$0xff]   ;;  %v2436_v18 = vld [vmem:[%s2551_s22 + $0x78] ss:$8 sps:$4 sm:$0xff]   ;;  %v571_v26 = vshll.u32 %v543_v21, 16  ;;  %v585_v29 = vshll.u32 %v545_v23, 16  ;;  %vm2587_vm4 = vmor %vm558_vm2, %vm559_vm3 }
  0x13   : > { %2320 = vmatmul.mubr.msk.bf16.vlgmr.msra.gmra.mxu1 %vm360_vm1, %v2433_v15  ;;  %2328 = vmatpush3.bf16.msra.mxu0 %v700_v8  ;;  %v2435_v17 = vld [vmem:[%s2551_s22 + $0x20] ss:$8 sps:$4 sm:$0xff]   ;;  %v2437_v19 = vld [vmem:[%s2551_s22 + $0x30] ss:$8 sps:$4 sm:$0xff]   ;;  %v547_v31 = vld [vmem:[%s2551_s22 + $0x14] sm:$0x1] }
  0x14   : > { %2313 = vmatprep.mubr.msk.bf16.mxu0 %vm360_vm1, %v2434_v16  ;;  %2338 = vmatpush3.bf16.msra.mxu1 %v819_v9  ;;  %v542_v20 = vld [vmem:[%s2551_s22] sm:$0xf]  ;;  %v544_v22 = vld [vmem:[%s2551_s22 + $0x8] sm:$0xf]  ;;  %v546_v30 = vld [vmem:[%s2551_s22 + $0x10] sm:$0xf] }
  0x15   : > { %2323 = vmatprep.mubr.msk.bf16.mxu1 %vm360_vm1, %v2435_v17  ;;  %2415 = vmatprep.subr.msk.bf16.mxu0 %vm373_vm0, %v2131_v6  ;;  %v562_v24 = vshrl.u32 %v542_v20, 16  ;;  %v565_v25 = vshll.u32 %v542_v20, 16  ;;  %v576_v27 = vshrl.u32 %v544_v22, 16  ;;  %v579_v28 = vshll.u32 %v544_v22, 16  ;;  %v548_v36 = vld [vmem:[%s2551_s22 + $0x18] sm:$0xf] }
  0x16   : > { %2416 = vmatprep.subr.msk.bf16.mxu1 %vm373_vm0, %v2156_v7  ;;  %v573_v34 = vrot.slane %v571_v26, 5  ;;  %v587_v38 = vrot.slane %v585_v29, 5  ;;  %v549_v39 = vld [vmem:[%s2551_s22 + $0x1c] sm:$0x1]  ;;  %v590_v40 = vshrl.u32 %v546_v30, 16  ;;  %v593_v41 = vshll.u32 %v546_v30, 16 }
  0x17   : > { %v564_v32 = vrot.slane %v562_v24, 4  ;;  %v567_v33 = vrot.slane %v565_v25, 5  ;;  %v578_v35 = vrot.slane %v576_v27, 4  ;;  %v581_v37 = vrot.slane %v579_v28, 5  ;;  %v2438_v55 = vld [vmem:[%s2551_s22 + $0x90] ss:$8 sps:$4 sm:$0xff]  }
  0x18   : > { %v599_v43 = vshll.u32 %v547_v31, 16  ;;  %v604_v44 = vshrl.u32 %v548_v36, 16  ;;  %v607_v45 = vshll.u32 %v548_v36, 16  ;;  %v592_v48 = vrot.slane %v590_v40, 4  ;;  %v2439_v61 = vld [vmem:[%s2551_s22 + $0xa0] ss:$8 sps:$4 sm:$0xff]  }
  0x19   : > { %v568_v42 = vor.u32 %v567_v33, %v564_v32  ;;  %v582_v47 = vor.u32 %v581_v37, %v578_v35  ;;  %v595_v49 = vrot.slane %v593_v41, 5  ;;  %v613_v50 = vshll.u32 %v549_v39, 16  ;;  %v550_v62 = vld [vmem:[%s2551_s22 + $0x20] sm:$0xf]  ;;  %v551_v63 = vld [vmem:[%s2551_s22 + $0x24] sm:$0x1] }
  0x1a   : > { %2314 = vmatmul.mubr.msk.bf16.gmra.mxu0 %vm360_vm1, %v2436_v18  ;;  %v601_v52 = vrot.slane %v599_v43, 5  ;;  %v606_v53 = vrot.slane %v604_v44, 4  ;;  %v609_v54 = vrot.slane %v607_v45, 5  ;;  %v552_v2 = vld [vmem:[%s2551_s22 + $0x28] sm:$0xf]  ;;  %v618_v4 = vshrl.u32 %v550_v62, 16 }
  0x1b   : > { %2324 = vmatmul.mubr.msk.bf16.gmra.mxu1 %vm360_vm1, %v2437_v19  ;;  %v569_v51 = vrot.slane %v568_v42, 4  ;;  %v583_v56 = vrot.slane %v582_v47, 4  ;;  %v596_v57 = vor.u32 %v595_v49, %v592_v48  ;;  %v615_v58 = vrot.slane %v613_v50, 5  ;;  %v553_v3 = vld [vmem:[%s2551_s22 + $0x2c] sm:$0x1]  ;;  %s2245_s23 = sshll.u32 %s2855_s28, 5 }
  0x1c   : > { %v610_v60 = vor.u32 %v609_v54, %v606_v53  ;;  %2339 = vmatprep.mubr.msk.bf16.mxu1 %vm360_vm1, %v2438_v55  ;;  %v621_v8 = vshll.u32 %v550_v62, 16  ;;  %v627_v9 = vshll.u32 %v551_v63, 16  ;;  %v554_v12 = vld [vmem:[%s2551_s22 + $0x30] sm:$0xf]  ;;  %v620_v14 = vrot.slane %v618_v4, 4  ;;  %s2801_s26 = scalar_lea.vmem %s2850_s7, %s2245_s23  ;;  %s318_s10 = scalar_lea.vmem %s2851_s8, %s2245_s23 }
  0x1d   : > { %v574_v59 = vsel %vm2587_vm4, %v569_v51, %v573_v34  ;;  %v588_v0 = vsel %vm2587_vm4, %v583_v56, %v587_v38  ;;  %v597_v1 = vrot.slane %v596_v57, 4  ;;  %v632_v15 = vshrl.u32 %v552_v2, 16  ;;  %v555_v17 = vld [vmem:[%s2551_s22 + $0x34] sm:$0x1]  ;;  %v556_v22 = vld [vmem:[%s2551_s22 + $0x38] sm:$0xf] }
  0x1e   : > { %v2098_v6 = vcombine.low %v574_v59, %v588_v0  ;;  %v611_v7 = vrot.slane %v610_v60, 4  ;;  %v635_v16 = vshll.u32 %v552_v2, 16  ;;  %v623_v19 = vrot.slane %v621_v8, 5  ;;  %v2619_v23 = vld [vmem:[%s2844_s1 + $0x18] sm:$0xf] }
  0x1f   : > { %v602_v13 = vsel %vm2587_vm4, %v597_v1, %v601_v52  ;;  %v629_v20 = vrot.slane %v627_v9, 5  ;;  %v641_v21 = vshll.u32 %v553_v3, 16  ;;  %v634_v25 = vrot.slane %v632_v15, 4  ;;  %v557_v27 = vld [vmem:[%s2551_s22 + $0x3c] sm:$0x1] }
  0x20   : > { %2329 = vmatprep.mubr.msk.bf16.mxu0 %vm360_vm1, %v2098_v6  ;;  %v616_v18 = vsel %vm2587_vm4, %v611_v7, %v615_v58  ;;  %v637_v26 = vrot.slane %v635_v16, 5  ;;  %v646_v28 = vshrl.u32 %v554_v12, 16  ;;  %v624_v29 = vor.u32 %v623_v19, %v620_v14  ;;  %v2442_v53 = vld [vmem:[%s2551_s22 + $0xd8] ss:$8 sps:$4 sm:$0xff]   ;;  %v2140_v54 = vld [vmem:[%s2551_s22 + $0x90] sm:$0xf] }
  0x21   : > { %v2099_v24 = vcombine.low %v602_v13, %v616_v18  ;;  %v643_v30 = vrot.slane %v641_v21, 5  ;;  %v649_v31 = vshll.u32 %v554_v12, 16  ;;  %v655_v32 = vshll.u32 %v555_v17, 16  ;;  %v2141_v56 = vld [vmem:[%s2551_s22 + $0x94] sm:$0x1] }
  0x22   : > { %v638_v33 = vor.u32 %v637_v26, %v634_v25  ;;  %v648_v34 = vrot.slane %v646_v28, 4  ;;  %v660_v35 = vshrl.u32 %v556_v22, 16  ;;  %v663_v36 = vshll.u32 %v556_v22, 16  ;;  %v2142_v57 = vld [vmem:[%s2551_s22 + $0x98] sm:$0xf] }
  0x23   : > { %2340 = vmatmul.mubr.msk.bf16.vlgmr.msra.gmra.mxu1 %vm360_vm1, %v2439_v61  ;;  %2330 = vmatmul.mubr.msk.bf16.vlgmr.msra.gmra.mxu0 %vm360_vm1, %v2099_v24  ;;  %v625_v37 = vrot.slane %v624_v29, 4  ;;  %v651_v38 = vrot.slane %v649_v31, 5  ;;  %v669_v39 = vshll.u32 %v557_v27, 16  ;;  %v657_v45 = vrot.slane %v655_v32, 5  ;;  %v2143_v58 = vld [vmem:[%s2551_s22 + $0x9c] sm:$0x1] }
  0x24   : > { %2358 = vmatpush3.bf16.msra.mxu1 %v2557_v11  ;;  %2348 = vmatpush3.bf16.msra.mxu0 %v2554_v10  ;;  %v2440_v11 = vld [vmem:[%s2551_s22 + $0xb0] ss:$8 sps:$4 sm:$0xff]   ;;  %v639_v40 = vrot.slane %v638_v33, 4  ;;  %v662_v41 = vrot.slane %v660_v35, 4  ;;  %v665_v42 = vrot.slane %v663_v36, 5  ;;  %v1030_v60 = vshrl.u32 %v2140_v54, 16 }
  0x25   : > { %2418 = vmatprep.subr.msk.bf16.mxu1 %vm373_vm0, %v2605_v5  ;;  %2417 = vmatprep.subr.msk.bf16.mxu0 %vm373_vm0, %v2619_v23  ;;  %v630_v43 = vsel %vm2587_vm4, %v625_v37, %v629_v20  ;;  %v652_v44 = vor.u32 %v651_v38, %v648_v34  ;;  %v2441_v10 = vld [vmem:[%s2551_s22 + $0xc0] ss:$8 sps:$4 sm:$0xff]   ;;  %v671_v49 = vrot.slane %v669_v39, 5  ;;  %v1033_v61 = vshll.u32 %v2140_v54, 16  ;;  %v2145_v4 = vld [vmem:[%s2551_s22 + $0xa4] sm:$0x1] }
  0x26   : > { %2343 = vmatprep.mubr.msk.bf16.mxu1 %vm360_vm1, %v2440_v11  ;;  %v644_v47 = vsel %vm2587_vm4, %v639_v40, %v643_v30  ;;  %v666_v48 = vor.u32 %v665_v42, %v662_v41  ;;  %v1039_v62 = vshll.u32 %v2141_v56, 16  ;;  %v2144_v63 = vld [vmem:[%s2551_s22 + $0xa0] sm:$0xf]  ;;  %v1044_v1 = vshrl.u32 %v2142_v57, 16  ;;  %v2146_v9 = vld [vmem:[%s2551_s22 + $0xa8] sm:$0xf] }
  0x27   : > { %v2100_v50 = vcombine.low %v630_v43, %v644_v47  ;;  %v653_v51 = vrot.slane %v652_v44, 4  ;;  %v1047_v2 = vshll.u32 %v2142_v57, 16  ;;  %v1053_v3 = vshll.u32 %v2143_v58, 16  ;;  %v2147_v16 = vld [vmem:[%s2551_s22 + $0xac] sm:$0x1] }
  0x28   : > { %v667_v52 = vrot.slane %v666_v48, 4  ;;  %v1032_v6 = vrot.slane %v1030_v60, 4  ;;  %v1035_v7 = vrot.slane %v1033_v61, 5  ;;  %v1041_v8 = vrot.slane %v1039_v62, 5  ;;  %v2443_v27 = vld [vmem:[%s2551_s22 + $0xe8] ss:$8 sps:$4 sm:$0xff]  }
  0x29   : > { %2333 = vmatprep.mubr.msk.bf16.mxu0 %vm360_vm1, %v2100_v50  ;;  %v658_v55 = vsel %vm2587_vm4, %v653_v51, %v657_v45  ;;  %v1058_v12 = vshrl.u32 %v2144_v63, 16  ;;  %v1046_v13 = vrot.slane %v1044_v1, 4  ;;  %v1049_v14 = vrot.slane %v1047_v2, 5  ;;  %v2444_v35 = vld [vmem:[%s2551_s22 + $0xf8] ss:$8 sps:$4 sm:$0xff]  }
  0x2a   : > { %v672_v59 = vsel %vm2587_vm4, %v667_v52, %v671_v49  ;;  %v1055_v15 = vrot.slane %v1053_v3, 5  ;;  %v1061_v17 = vshll.u32 %v2144_v63, 16  ;;  %v1036_v18 = vor.u32 %v1035_v7, %v1032_v6  ;;  %v2148_v38 = vld [vmem:[%s2551_s22 + $0xb0] sm:$0xf]  ;;  %v2149_v42 = vld [vmem:[%s2551_s22 + $0xb4] sm:$0x1] }
  0x2b   : > { %2344 = vmatmul.mubr.msk.bf16.gmra.mxu1 %vm360_vm1, %v2441_v10  ;;  %v2101_v0 = vcombine.low %v658_v55, %v672_v59  ;;  %v1060_v19 = vrot.slane %v1058_v12, 4  ;;  %v1067_v20 = vshll.u32 %v2145_v4, 16  ;;  %v1072_v21 = vshrl.u32 %v2146_v9, 16  ;;  %v2150_v43 = vld [vmem:[%s2551_s22 + $0xb8] sm:$0xf] }
  0x2c   : > { %v1050_v22 = vor.u32 %v1049_v14, %v1046_v13  ;;  %v1063_v24 = vrot.slane %v1061_v17, 5  ;;  %v1075_v25 = vshll.u32 %v2146_v9, 16  ;;  %v1081_v26 = vshll.u32 %v2147_v16, 16  ;;  %v2151_v10 = vld [vmem:[%s2551_s22 + $0xbc] sm:$0x1] }
  0x2d   : > { %2334 = vmatmul.mubr.msk.bf16.gmra.mxu0 %vm360_vm1, %v2101_v0  ;;  %v1287_v28 = vsel %vm373_vm0, %v2619_v23, 0  ;;  %v1037_v29 = vrot.slane %v1036_v18, 4  ;;  %v1069_v30 = vrot.slane %v1067_v20, 5  ;;  %v1074_v31 = vrot.slane %v1072_v21, 4  ;;  %v2665_v23 = vld [vmem:[%s2844_s1 + $0x20] sm:$0xf] }
  0x2e   : > { %2349 = vmatprep.mubr.msk.bf16.mxu0 %vm360_vm1, %v2442_v53  ;;  %v1051_v32 = vrot.slane %v1050_v22, 4  ;;  %v1064_v33 = vor.u32 %v1063_v24, %v1060_v19  ;;  %v1077_v34 = vrot.slane %v1075_v25, 5  ;;  %v1083_v37 = vrot.slane %v1081_v26, 5  ;;  %v2152_v53 = vld [vmem:[%s2551_s22 + $0xc0] sm:$0xf] }
  0x2f   : > { %v1042_v36 = vsel %vm2587_vm4, %v1037_v29, %v1041_v8  ;;  %v1406_v39 = vsel %vm373_vm0, %v2605_v5, 0  ;;  %v1086_v44 = vshrl.u32 %v2148_v38, 16  ;;  %v1089_v47 = vshll.u32 %v2148_v38, 16  ;;  %v2153_v58 = vld [vmem:[%s2551_s22 + $0xc4] sm:$0x1] }
  0x30   : > { %v1056_v11 = vsel %vm2587_vm4, %v1051_v32, %v1055_v15  ;;  %v1065_v40 = vrot.slane %v1064_v33, 4  ;;  %v1078_v41 = vor.u32 %v1077_v34, %v1074_v31  ;;  %v1095_v48 = vshll.u32 %v2149_v42, 16  ;;  %v2445_v60 = vld [vmem:[%s2551_s22 + $0x108] ss:$8 sps:$4 sm:$0xff]   ;;  %v2155_v63 = vld [vmem:[%s2551_s22 + $0xcc] sm:$0x1] }
  0x31   : > { %v2157_v45 = vcombine.low %v1042_v36, %v1056_v11  ;;  %v1100_v5 = vshrl.u32 %v2150_v43, 16  ;;  %v1088_v51 = vrot.slane %v1086_v44, 4  ;;  %v1103_v52 = vshll.u32 %v2150_v43, 16  ;;  %v2154_v62 = vld [vmem:[%s2551_s22 + $0xc8] sm:$0xf] }
  0x32   : > { %v1070_v49 = vsel %vm2587_vm4, %v1065_v40, %v1069_v30  ;;  %v1079_v50 = vrot.slane %v1078_v41, 4  ;;  %v1091_v54 = vrot.slane %v1089_v47, 5  ;;  %v1097_v55 = vrot.slane %v1095_v48, 5  ;;  %v2446_v12 = vld [vmem:[%s2551_s22 + $0x8] ss:$8 sps:$4 sm:$0xff]  }
  0x33   : > { %2359 = vmatprep.mubr.msk.bf16.mxu1 %vm360_vm1, %v2157_v45  ;;  %v1102_v56 = vrot.slane %v1100_v5, 4  ;;  %v1109_v57 = vshll.u32 %v2151_v10, 16  ;;  %v1105_v61 = vrot.slane %v1103_v52, 5  ;;  %v1114_v0 = vshrl.u32 %v2152_v53, 16  ;;  %v2447_v32 = vld [vmem:[%s2551_s22 + $0x18] ss:$8 sps:$4 sm:$0xff]  }
  0x34   : > { %v1084_v59 = vsel %vm2587_vm4, %v1079_v50, %v1083_v37  ;;  %v1092_v2 = vor.u32 %v1091_v54, %v1088_v51  ;;  %v1117_v4 = vshll.u32 %v2152_v53, 16  ;;  %v1123_v8 = vshll.u32 %v2153_v58, 16  ;;  %v2448_v34 = vld [vmem:[%s2551_s22 + $0x50] ss:$8 sps:$4 sm:$0xff]   ;;  %v2199_v37 = vld [vmem:[%s2551_s22 + $0x8] sm:$0xf] }
  0x35   : > { %2350 = vmatmul.mubr.msk.bf16.vlgmr.msra.gmra.mxu0 %vm360_vm1, %v2443_v27  ;;  %v2158_v1 = vcombine.low %v1070_v49, %v1084_v59  ;;  %v1111_v3 = vrot.slane %v1109_v57, 5  ;;  %v1106_v6 = vor.u32 %v1105_v61, %v1102_v56  ;;  %v1116_v7 = vrot.slane %v1114_v0, 4  ;;  %v2450_v36 = vld [vmem:[%s2551_s22 + $0x28] ss:$8 sps:$4 sm:$0xff]   ;;  %v2200_v38 = vld [vmem:[%s2551_s22 + $0xc] sm:$0x1] }
  0x36   : > { %2368 = vmatpush3.bf16.msra.mxu0 %v1287_v28  ;;  %2353 = vmatprep.mubr.msk.bf16.mxu0 %vm360_vm1, %v2444_v35  ;;  %v1128_v9 = vshrl.u32 %v2154_v62, 16  ;;  %v1093_v13 = vrot.slane %v1092_v2, 4  ;;  %v1119_v14 = vrot.slane %v1117_v4, 5  ;;  %v1131_v15 = vshll.u32 %v2154_v62, 16  ;;  %v2202_v11 = vld [vmem:[%s2551_s22 + $0x14] sm:$0x1] }
  0x37   : > { %2419 = vmatprep.subr.msk.bf16.mxu0 %vm373_vm0, %v2665_v23  ;;  %2360 = vmatmul.mubr.msk.bf16.vlgmr.msra.gmra.mxu1 %vm360_vm1, %v2158_v1  ;;  %v1137_v16 = vshll.u32 %v2155_v63, 16  ;;  %v1107_v17 = vrot.slane %v1106_v6, 4  ;;  %v1125_v21 = vrot.slane %v1123_v8, 5  ;;  %v1636_v31 = vsel %vm373_vm0, %v2665_v23, 0  ;;  %v2203_v45 = vld [vmem:[%s2551_s22 + $0x18] sm:$0xf] }
  0x38   : > { %v1130_v18 = vrot.slane %v1128_v9, 4  ;;  %2378 = vmatpush3.bf16.msra.mxu1 %v1406_v39  ;;  %v1098_v19 = vsel %vm2587_vm4, %v1093_v13, %v1097_v55  ;;  %v1120_v20 = vor.u32 %v1119_v14, %v1116_v7  ;;  %v1133_v22 = vrot.slane %v1131_v15, 5  ;;  %v2201_v39 = vld [vmem:[%s2551_s22 + $0x10] sm:$0xf]  ;;  %v2204_v48 = vld [vmem:[%s2551_s22 + $0x1c] sm:$0x1] }
  0x39   : > { %v1112_v24 = vsel %vm2587_vm4, %v1107_v17, %v1111_v3  ;;  %v1139_v28 = vrot.slane %v1137_v16, 5  ;;  %v1498_v40 = vshrl.u32 %v2199_v37, 16  ;;  %v1501_v41 = vshll.u32 %v2199_v37, 16  ;;  %v2205_v5 = vld [vmem:[%s2551_s22 + $0x20] sm:$0xf] }
  0x3a   : > { %v2159_v25 = vcombine.low %v1098_v19, %v1112_v24  ;;  %v1121_v26 = vrot.slane %v1120_v20, 4  ;;  %v1134_v27 = vor.u32 %v1133_v22, %v1130_v18  ;;  %v1507_v23 = vshll.u32 %v2200_v38, 16  ;;  %v2449_v49 = vld [vmem:[%s2551_s22 + $0x60] ss:$8 sps:$4 sm:$0xff]   ;;  %v2206_v55 = vld [vmem:[%s2551_s22 + $0x24] sm:$0x1] }
  0x3b   : > { %v1512_v42 = vshrl.u32 %v2201_v39, 16  ;;  %v1515_v43 = vshll.u32 %v2201_v39, 16  ;;  %v1521_v44 = vshll.u32 %v2202_v11, 16  ;;  %v1500_v10 = vrot.slane %v1498_v40, 4  ;;  %v2451_v50 = vld [vmem:[%s2551_s22 + $0x38] ss:$8 sps:$4 sm:$0xff]  }
  0x3c   : > { %2363 = vmatprep.mubr.msk.bf16.mxu1 %vm360_vm1, %v2159_v25  ;;  %v1126_v29 = vsel %vm2587_vm4, %v1121_v26, %v1125_v21  ;;  %v1135_v30 = vrot.slane %v1134_v27, 4  ;;  %v1503_v47 = vrot.slane %v1501_v41, 5  ;;  %v1509_v51 = vrot.slane %v1507_v23, 5  ;;  %v2452_v56 = vld [vmem:[%s2551_s22 + $0x70] ss:$8 sps:$4 sm:$0xff]  }
  0x3d   : > { %2354 = vmatmul.mubr.msk.bf16.gmra.mxu0 %vm360_vm1, %v2445_v60  ;;  %v1514_v52 = vrot.slane %v1512_v42, 4  ;;  %v1517_v53 = vrot.slane %v1515_v43, 5  ;;  %v1523_v54 = vrot.slane %v1521_v44, 5  ;;  %v1526_v58 = vshrl.u32 %v2203_v45, 16  ;;  %v2207_v61 = vld [vmem:[%s2551_s22 + $0x28] sm:$0xf] }
  0x3e   : > { %2369 = vmatprep.mubr.msk.bf16.mxu0 %vm360_vm1, %v2446_v12  ;;  %v1140_v33 = vsel %vm2587_vm4, %v1135_v30, %v1139_v28  ;;  %v1504_v57 = vor.u32 %v1503_v47, %v1500_v10  ;;  %v1529_v59 = vshll.u32 %v2203_v45, 16  ;;  %v1535_v60 = vshll.u32 %v2204_v48, 16  ;;  %v2208_v2 = vld [vmem:[%s2551_s22 + $0x2c] sm:$0x1]  ;;  %v2209_v8 = vld [vmem:[%s2551_s22 + $0x30] sm:$0xf] }
  0x3f   : > { %v2160_v35 = vcombine.low %v1126_v29, %v1140_v33  ;;  %v1518_v62 = vor.u32 %v1517_v53, %v1514_v52  ;;  %v1540_v63 = vshrl.u32 %v2205_v5, 16  ;;  %v1543_v0 = vshll.u32 %v2205_v5, 16  ;;  %v2210_v17 = vld [vmem:[%s2551_s22 + $0x34] sm:$0x1]  ;;  %v2211_v25 = vld [vmem:[%s2551_s22 + $0x38] sm:$0xf] }
  0x40   : > { %v1549_v1 = vshll.u32 %v2206_v55, 16  ;;  %v1505_v3 = vrot.slane %v1504_v57, 4  ;;  %v1528_v4 = vrot.slane %v1526_v58, 4  ;;  %v1531_v6 = vrot.slane %v1529_v59, 5  ;;  %v2212_v26 = vld [vmem:[%s2551_s22 + $0x3c] sm:$0x1] }
  0x41   : > { %2364 = vmatmul.mubr.msk.bf16.gmra.mxu1 %vm360_vm1, %v2160_v35  ;;  %v1537_v7 = vrot.slane %v1535_v60, 5  ;;  %v1519_v9 = vrot.slane %v1518_v62, 4  ;;  %v1542_v12 = vrot.slane %v1540_v63, 4  ;;  %v1545_v13 = vrot.slane %v1543_v0, 5  ;;  %v2214_v23 = vld [vmem:[%s2551_s22 + $0x44] sm:$0x1] }
  0x42   : > { %2379 = vmatprep.mubr.msk.bf16.mxu1 %vm360_vm1, %v2448_v34  ;;  %v1551_v14 = vrot.slane %v1549_v1, 5  ;;  %v1510_v15 = vsel %vm2587_vm4, %v1505_v3, %v1509_v51  ;;  %v1532_v16 = vor.u32 %v1531_v6, %v1528_v4  ;;  %v1554_v18 = vshrl.u32 %v2207_v61, 16  ;;  %v2454_v3 = vld [vmem:[%s2847_s4 + $0x10] sm:$0xff]   ;;  %v2455_v4 = vld [vmem:[%s2847_s4 + $0x8] sm:$0xff]  }
  0x43   : > { %v1557_v19 = vshll.u32 %v2207_v61, 16  ;;  %v1524_v20 = vsel %vm2587_vm4, %v1519_v9, %v1523_v54  ;;  %v1546_v21 = vor.u32 %v1545_v13, %v1542_v12  ;;  %v1563_v22 = vshll.u32 %v2208_v2, 16  ;;  %2397 = vmatprep.subr.bf16.mxu1 %v2454_v3 }
  0x44   : > { %v1568_v24 = vshrl.u32 %v2209_v8, 16  ;;  %v2216_v27 = vcombine.low %v1510_v15, %v1524_v20  ;;  %v1533_v28 = vrot.slane %v1532_v16, 4  ;;  %v1556_v29 = vrot.slane %v1554_v18, 4 }
  0x45   : > { %2370 = vmatmul.mubr.msk.bf16.vlgmr.msra.gmra.mxu0 %vm360_vm1, %v2447_v32  ;;  %v1559_v30 = vrot.slane %v1557_v19, 5  ;;  %v2453_v32 = vld [vmem:[%s2551_s22 + $0x80] ss:$8 sps:$4 sm:$0xff]   ;;  %v1547_v33 = vrot.slane %v1546_v21, 4  ;;  %v1571_v35 = vshll.u32 %v2209_v8, 16  ;;  %v1577_v38 = vshll.u32 %v2210_v17, 16 }
  0x46   : > { %2388 = vmatpush3.bf16.msra.mxu0 %v1636_v31  ;;  %2373 = vmatprep.mubr.msk.bf16.mxu0 %vm360_vm1, %v2450_v36  ;;  %v2213_v31 = vld [vmem:[%s2551_s22 + $0x40] sm:$0xf]  ;;  %v1570_v34 = vrot.slane %v1568_v24, 4  ;;  %v1538_v36 = vsel %vm2587_vm4, %v1533_v28, %v1537_v7  ;;  %v1582_v39 = vshrl.u32 %v2211_v25, 16  ;;  %v1565_v40 = vrot.slane %v1563_v22, 5 }
  0x47   : > { %v1560_v37 = vor.u32 %v1559_v30, %v1556_v29  ;;  %v1552_v11 = vsel %vm2587_vm4, %v1547_v33, %v1551_v14  ;;  %v1573_v41 = vrot.slane %v1571_v35, 5  ;;  %v1585_v42 = vshll.u32 %v2211_v25, 16 }
  0x48   : > { %v2217_v43 = vcombine.low %v1538_v36, %v1552_v11  ;;  %v1584_v45 = vrot.slane %v1582_v39, 4  ;;  %v1591_v10 = vshll.u32 %v2212_v26, 16  ;;  %v1579_v48 = vrot.slane %v1577_v38, 5 }
  0x49   : > { %2380 = vmatmul.mubr.msk.bf16.vlgmr.msra.gmra.mxu1 %vm360_vm1, %v2449_v49  ;;  %v1561_v44 = vrot.slane %v1560_v37, 4  ;;  %v1574_v47 = vor.u32 %v1573_v41, %v1570_v34  ;;  %v1587_v5 = vrot.slane %v1585_v42, 5  ;;  %v1596_v49 = vshrl.u32 %v2213_v31, 16 }
  0x4a   : > { %2383 = vmatprep.mubr.msk.bf16.mxu1 %vm360_vm1, %v2452_v56  ;;  %v1605_v51 = vshll.u32 %v2214_v23, 16  ;;  %v1593_v56 = vrot.slane %v1591_v10, 5  ;;  %2398 = vmatpush3.bf16.msra.mxu1 %v2454_v3  ;;  %vm1933_vm15 = vcmask 125952  }
  0x4b   : > { %v1566_v52 = vsel %vm2587_vm4, %v1561_v44, %v1565_v40  ;;  %v1575_v53 = vrot.slane %v1574_v47, 4  ;;  %v1588_v54 = vor.u32 %v1587_v5, %v1584_v45  ;;  %v1598_v55 = vrot.slane %v1596_v49, 4  ;;  %2399 = vmatprep.subr.bf16.mxu1 %v2455_v4 }
  0x4c   : > { %v1607_v62 = vrot.slane %v1605_v51, 5 }
  0x4d   : > { %2374 = vmatmul.mubr.msk.bf16.gmra.mxu0 %vm360_vm1, %v2451_v50  ;;  %v1599_v50 = vshll.u32 %v2213_v31, 16  ;;  %v1580_v58 = vsel %vm2587_vm4, %v1575_v53, %v1579_v48  ;;  %v1589_v59 = vrot.slane %v1588_v54, 4 }
  0x4e   : > { %2389 = vmatprep.mubr.msk.bf16.mxu0 %vm360_vm1, %v2216_v27  ;;  %v2218_v60 = vcombine.low %v1566_v52, %v1580_v58  ;;  %2400 = vmatpush3.bf16.msra.mxu1 %v2455_v4 }
  0x4f   : > { %v1601_v57 = vrot.slane %v1599_v50, 5  ;;  %v1594_v63 = vsel %vm2587_vm4, %v1589_v59, %v1593_v56  ;;  %2401 = vmatprep.subr.bf16.mxu1 %v2456_v46 }
  0x51   : > { %2384 = vmatmul.mubr.msk.bf16.gmra.mxu1 %vm360_vm1, %v2453_v32  ;;  %v1602_v61 = vor.u32 %v1601_v57, %v1598_v55 }
  0x52   : > { %2402 = vmatpush3.bf16.msra.mxu1 %v2456_v46 }
  0x53   : > { %v1603_v0 = vrot.slane %v1602_v61, 4 }
  0x55   : > { %2390 = vmatmul.mubr.msk.bf16.vlgmr.msra.gmra.mxu0 %vm360_vm1, %v2217_v43  ;;  %v1608_v1 = vsel %vm2587_vm4, %v1603_v0, %v1607_v62 }
  0x56   : > { %2393 = vmatprep.mubr.msk.bf16.mxu0 %vm360_vm1, %v2218_v60  ;;  %v2219_v2 = vcombine.low %v1594_v63, %v1608_v1 }
  0x5d   : > { %2394 = vmatmul.mubr.msk.bf16.gmra.mxu0 %vm360_vm1, %v2219_v2 }
  0xd2   : > { %v2311_v6 = vpop.f32.mrf.mxu0 }
  0xd3   : > { %v2321_v7 = vpop.f32.mrf.mxu1 }
  0xd4   : > { %v411_v8 = vpop.f32.mrf.mxu0  ;;  %v520_v51 = vadd.f32 %v2321_v7, %v2311_v6 }
  0xd5   : > { %v511_v9 = vpop.f32.mrf.mxu1 }
  0xd6   : > { %v2312_v12 = vpop.f32.mrf.mxu0  ;;  %v512_v50 = vadd.f32 %v511_v9, %v411_v8 }
  0xd7   : > { %v2322_v13 = vpop.f32.mrf.mxu1 }
  0xd8   : > { %v414_v14 = vpop.f32.mrf.mxu0  ;;  %v523_v55 = vadd.f32 %v2322_v13, %v2312_v12 }
  0xd9   : > { %v514_v15 = vpop.f32.mrf.mxu1 }
  0xda   : > { %v2315_v16 = vpop.f32.mrf.mxu0  ;;  %v515_v59 = vadd.f32 %v514_v15, %v414_v14 }
  0xdb   : > { %v2325_v17 = vpop.f32.mrf.mxu1 }
  0xdc   : > { %v427_v18 = vpop.f32.mrf.mxu0  ;;  %v536_v9 = vadd.f32 %v2325_v17, %v2315_v16 }
  0xdd   : > { %v527_v19 = vpop.f32.mrf.mxu1 }
  0xde   : > { %v2316_v20 = vpop.f32.mrf.mxu0 }
  0xdf   : > { %v2326_v21 = vpop.f32.mrf.mxu1 }
  0xe0   : > { %v430_v24 = vpop.f32.mrf.mxu0  ;;  %v539_v14 = vadd.f32 %v2326_v21, %v2316_v20 }
  0xe1   : > { %v2761_v22 = vpop.f32.mrf.mxu1 }
  0xe3   : > { %v2341_v25 = vpop.f32.mrf.mxu1  ;;  %v2331_v27 = vpop.f32.mrf.mxu0 }
  0xe4   : > { %v769_v56 = vadd.f32 %v2331_v27, %v520_v51 }
  0xe5   : > { %v855_v26 = vpop.f32.mrf.mxu1  ;;  %v736_v29 = vpop.f32.mrf.mxu0 }
  0xe6   : > { %v767_v54 = vadd.f32 %v736_v29, %v512_v50  ;;  %v888_v0 = vadd.f32 %v2341_v25, %v769_v56  ;;  %v528_v29 = vadd.f32 %v527_v19, %v427_v18  ;;  %v531_v25 = vadd.f32 %v2761_v22, %v430_v24 }
  0xe7   : > { %v2342_v28 = vpop.f32.mrf.mxu1  ;;  %v2332_v30 = vpop.f32.mrf.mxu0 }
  0xe8   : > { %v770_v60 = vadd.f32 %v2332_v30, %v523_v55  ;;  %v886_v63 = vadd.f32 %v855_v26, %v767_v54 }
  0xe9   : > { %v858_v31 = vpop.f32.mrf.mxu1  ;;  %v739_v32 = vpop.f32.mrf.mxu0 }
  0xea   : > { %v768_v1 = vadd.f32 %v739_v32, %v515_v59  ;;  %v889_v46 = vadd.f32 %v2342_v28, %v770_v60 }
  0xeb   : > { %v2763_v33 = vpop.f32.mrf.mxu1 }
  0xec   : > { %v887_v12 = vadd.f32 %v858_v31, %v768_v1 }
  0xed   : > { %v2335_v34 = vpop.f32.mrf.mxu0  ;;  %v2765_v35 = vpop.f32.mrf.mxu1 }
  0xee   : > { %v773_v15 = vadd.f32 %v2335_v34, %v536_v9 }
  0xef   : > { %v752_v36 = vpop.f32.mrf.mxu0  ;;  %v2767_v38 = vpop.f32.mrf.mxu1 }
  0xf0   : > { %v771_v30 = vadd.f32 %v752_v36, %v528_v29  ;;  %v892_v19 = vadd.f32 %v2763_v33, %v773_v15 }
  0xf1   : > { %v2336_v37 = vpop.f32.mrf.mxu0  ;;  %v2769_v40 = vpop.f32.mrf.mxu1 }
  0xf2   : > { %v774_v28 = vadd.f32 %v2336_v37, %v539_v14  ;;  %v890_v20 = vadd.f32 %v2765_v35, %v771_v30 }
  0xf3   : > { %v755_v39 = vpop.f32.mrf.mxu0 }
  0xf4   : > { %v772_v55 = vadd.f32 %v755_v39, %v531_v25  ;;  %v893_v22 = vadd.f32 %v2767_v38, %v774_v28  ;;  %v2224_v38 = vld [vmem:[%s2845_s2] ss:$0 sm:$0xff] }
  0xf5   : > { %v2351_v11 = vpop.f32.mrf.mxu0 }
  0xf6   : > { %v1007_v6 = vadd.f32 %v2351_v11, %v888_v0  ;;  %v891_v37 = vadd.f32 %v2769_v40, %v772_v55 }
  0xf7   : > { %v974_v41 = vpop.f32.mrf.mxu0  ;;  %v2361_v42 = vpop.f32.mrf.mxu1 }
  0xf8   : > { %v1005_v4 = vadd.f32 %v974_v41, %v886_v63  ;;  %v1237_v26 = vadd.f32 %v2361_v42, %v1007_v6 }
  0xf9   : > { %v2352_v23 = vpop.f32.mrf.mxu0  ;;  %v1204_v44 = vpop.f32.mrf.mxu1 }
  0xfa   : > { %v1008_v13 = vadd.f32 %v2352_v23, %v889_v46  ;;  %v1235_v51 = vadd.f32 %v1204_v44, %v1005_v4 }
  0xfb   : > { %v977_v43 = vpop.f32.mrf.mxu0  ;;  %v2362_v10 = vpop.f32.mrf.mxu1 }
  0xfc   : > { %v1006_v32 = vadd.f32 %v977_v43, %v887_v12  ;;  %v1238_v56 = vadd.f32 %v2362_v10, %v1008_v13 }
  0xfd   : > { %v2355_v45 = vpop.f32.mrf.mxu0  ;;  %v1207_v48 = vpop.f32.mrf.mxu1 }
  0xfe   : > { %v1236_v21 = vadd.f32 %v1207_v48, %v1006_v32  ;;  %v1011_v24 = vadd.f32 %v2355_v45, %v892_v19 }
  0xff   : > { %v990_v47 = vpop.f32.mrf.mxu0 }
 0x100   : > { %v1009_v36 = vadd.f32 %v990_v47, %v890_v20 }
 0x101   : > { %v2356_v5 = vpop.f32.mrf.mxu0  ;;  %v2771_v52 = vpop.f32.mrf.mxu1 }
 0x102   : > { %v1012_v10 = vadd.f32 %v2356_v5, %v893_v22  ;;  %v1241_v48 = vadd.f32 %v2771_v52, %v1011_v24  ;;  %v2225_v52 = vld [vmem:[%s2846_s3] ss:$0 sm:$0xff] }
 0x103   : > { %v993_v49 = vpop.f32.mrf.mxu0  ;;  %v1220_v57 = vpop.f32.mrf.mxu1 }
 0x104   : > { %v1239_v60 = vadd.f32 %v1220_v57, %v1009_v36 }
 0x105   : > { %v2371_v53 = vpop.f32.mrf.mxu0  ;;  %v2366_v61 = vpop.f32.mrf.mxu1 }
 0x106   : > { %v1356_v16 = vadd.f32 %v2371_v53, %v1237_v26  ;;  %v1242_v63 = vadd.f32 %v2366_v61, %v1012_v10 }
 0x107   : > { %v1323_v58 = vpop.f32.mrf.mxu0  ;;  %v1223_v2 = vpop.f32.mrf.mxu1 }
 0x108   : > { %v1354_v11 = vadd.f32 %v1323_v58, %v1235_v51  ;;  %v1010_v58 = vadd.f32 %v993_v49, %v891_v37 }
 0x109   : > { %v2372_v62 = vpop.f32.mrf.mxu0  ;;  %v2381_v7 = vpop.f32.mrf.mxu1 }
 0x10a   : > { %v1357_v31 = vadd.f32 %v2372_v62, %v1238_v56  ;;  %v1475_v39 = vadd.f32 %v2381_v7, %v1356_v16 }
 0x10b   : > { %v1326_v3 = vpop.f32.mrf.mxu0  ;;  %v1442_v27 = vpop.f32.mrf.mxu1 }
 0x10c   : > { %v1473_v23 = vadd.f32 %v1442_v27, %v1354_v11  ;;  %v1355_v43 = vadd.f32 %v1326_v3, %v1236_v21  ;;  %v1240_v3 = vadd.f32 %v1223_v2, %v1010_v58 }
 0x10d   : > { %v2375_v8 = vpop.f32.mrf.mxu0  ;;  %v2382_v54 = vpop.f32.mrf.mxu1 }
 0x10e   : > { %v1476_v33 = vadd.f32 %v2382_v54, %v1357_v31  ;;  %v1360_v0 = vadd.f32 %v2375_v8, %v1241_v48 }
 0x10f   : > { %v1339_v50 = vpop.f32.mrf.mxu0  ;;  %v1445_v17 = vpop.f32.mrf.mxu1 }
 0x110   : > { %v1474_v45 = vadd.f32 %v1445_v17, %v1355_v43  ;;  %v1358_v1 = vadd.f32 %v1339_v50, %v1239_v60 }
 0x111   : > { %v2376_v41 = vpop.f32.mrf.mxu0  ;;  %v2385_v42 = vpop.f32.mrf.mxu1 }
 0x112   : > { %v1361_v6 = vadd.f32 %v2376_v41, %v1242_v63  ;;  %v1479_v13 = vadd.f32 %v2385_v42, %v1360_v0 }
 0x113   : > { %v1342_v18 = vpop.f32.mrf.mxu0  ;;  %v1458_v62 = vpop.f32.mrf.mxu1 }
 0x114   : > { %v1359_v57 = vadd.f32 %v1342_v18, %v1240_v3  ;;  %v1477_v27 = vadd.f32 %v1458_v62, %v1358_v1 }
 0x115   : > { %v2391_v34 = vpop.f32.mrf.mxu0  ;;  %v2386_v7 = vpop.f32.mrf.mxu1 }
 0x116   : > { %v1705_v59 = vadd.f32 %v2391_v34, %v1475_v39  ;;  %v1480_v14 = vadd.f32 %v2386_v7, %v1361_v6 }
 0x117   : > { %v1672_v44 = vpop.f32.mrf.mxu0  ;;  %v1461_v15 = vpop.f32.mrf.mxu1 }
 0x118   : > { %v1703_v53 = vadd.f32 %v1672_v44, %v1473_v23  ;;  %v1720_v49 = vadd.f32 %v2224_v38, %v1705_v59  ;;  %v1478_v28 = vadd.f32 %v1461_v15, %v1359_v57  ;;  %v2226_v44 = vld [vmem:[%s2848_s5] ss:$0 sm:$0xff] }
 0x119   : > { %v2392_v35 = vpop.f32.mrf.mxu0 }
 0x11a   : > { %v1706_v47 = vadd.f32 %v2392_v35, %v1476_v33  ;;  %v1718_v5 = vadd.f32 %v2224_v38, %v1703_v53  ;;  %v1743_v8 = vmul.f32 %v2225_v52, %v1720_v49  ;;  %vm1728_vm8 = vcmp.gt.f32.partialorder %v1720_v49, 0.0  ;;  %v2234_v53 = vld [vmem:[%s2849_s6] ss:$0 sm:$0xff] }
 0x11b   : > { %v1675_v40 = vpop.f32.mrf.mxu0 }
 0x11c   : > { %v1721_v4 = vadd.f32 %v2224_v38, %v1706_v47  ;;  %v1704_v46 = vadd.f32 %v1675_v40, %v1474_v45  ;;  %v1741_v61 = vmul.f32 %v2225_v52, %v1718_v5  ;;  %vm1726_vm6 = vcmp.gt.f32.partialorder %v1718_v5, 0.0 }
 0x11d   : > { %v2395_v12 = vpop.f32.mrf.mxu0  ;;  %v1751_v11 = vsel %vm1728_vm8, %v1720_v49, %v1743_v8 }
 0x11e   : > { %v1744_v9 = vmul.f32 %v2225_v52, %v1721_v4  ;;  %v1719_v29 = vadd.f32 %v2224_v38, %v1704_v46  ;;  %vm1729_vm5 = vcmp.gt.f32.partialorder %v1721_v4, 0.0  ;;  %v1709_v30 = vadd.f32 %v2395_v12, %v1479_v13 }
 0x11f   : > { %v1688_v50 = vpop.f32.mrf.mxu0  ;;  %v1749_v54 = vsel %vm1726_vm6, %v1718_v5, %v1741_v61 }
 0x120   : > { %vm1727_vm7 = vcmp.gt.f32.partialorder %v1719_v29, 0.0  ;;  %v1742_v2 = vmul.f32 %v2225_v52, %v1719_v29  ;;  %v1707_v51 = vadd.f32 %v1688_v50, %v1477_v27  ;;  %v1752_v25 = vsel %vm1729_vm5, %v1721_v4, %v1744_v9 }
 0x121   : > { %v2396_v32 = vpop.f32.mrf.mxu0  ;;  %v1758_v17 = vpack.c.bf16 %v1752_v25, %v1751_v11  ;;  %v1724_v18 = vadd.f32 %v2224_v38, %v1709_v30 }
 0x122   : > { %v1750_v26 = vsel %vm1727_vm7, %v1719_v29, %v1742_v2  ;;  %v1710_v41 = vadd.f32 %v2396_v32, %v1480_v14  ;;  %v1722_v55 = vadd.f32 %v2224_v38, %v1707_v51 }
 0x123   : > { %v1691_v56 = vpop.f32.mrf.mxu0  ;;  %v1757_v16 = vpack.c.bf16 %v1750_v26, %v1749_v54  ;;  %v1747_v22 = vmul.f32 %v2225_v52, %v1724_v18  ;;  %vm1732_vm12 = vcmp.gt.f32.partialorder %v1724_v18, 0.0 }
 0x124   : > { %v1725_v19 = vadd.f32 %v2224_v38, %v1710_v41  ;;  %v1708_v20 = vadd.f32 %v1691_v56, %v1478_v28  ;;  %v1745_v31 = vmul.f32 %v2225_v52, %v1722_v55  ;;  %vm1730_vm11 = vcmp.gt.f32.partialorder %v1722_v55, 0.0 }
 0x125   : > { %2403 = vmatprep.mubr.msk.bf16.mxu1 %vm1792_vm9, %v1757_v16  ;;  %v1755_v37 = vsel %vm1732_vm12, %v1724_v18, %v1747_v22 }
 0x126   : > { %v1748_v21 = vmul.f32 %v2225_v52, %v1725_v19  ;;  %2404 = vmatmul.mubr.msk.bf16.vlgmr.msra.gmra.mxu1 %vm1792_vm9, %v1758_v17  ;;  %vm1733_vm10 = vcmp.gt.f32.partialorder %v1725_v19, 0.0  ;;  %v1723_v34 = vadd.f32 %v2224_v38, %v1708_v20  ;;  %v1753_v23 = vsel %vm1730_vm11, %v1722_v55, %v1745_v31 }
 0x128   : > { %vm1731_vm13 = vcmp.gt.f32.partialorder %v1723_v34, 0.0  ;;  %v1746_v24 = vmul.f32 %v2225_v52, %v1723_v34  ;;  %v1756_v36 = vsel %vm1733_vm10, %v1725_v19, %v1748_v21 }
 0x129   : > { %v1760_v43 = vpack.c.bf16 %v1756_v36, %v1755_v37 }
 0x12a   : > { %v1754_v42 = vsel %vm1731_vm13, %v1723_v34, %v1746_v24 }
 0x12b   : > { %v1759_v39 = vpack.c.bf16 %v1754_v42, %v1753_v23 }
 0x12d   : > { %2407 = vmatprep.mubr.msk.bf16.mxu1 %vm1792_vm9, %v1759_v39 }
 0x12e   : > { %2408 = vmatmul.mubr.msk.bf16.gmra.mxu1 %vm1792_vm9, %v1760_v43 }
 0x1e6   : > { %v2405_v10 = vpop.f32.mrf.mxu1 }
 0x1e7   : > { %v1848_v58 = vadd.f32 %v2405_v10, %v2226_v44 }
 0x1e8   : > { %v1839_v33 = vpop.f32.mrf.mxu1 }
 0x1e9   : > { %v1887_v59 = vmul.f32 %v2234_v53, %v1848_v58  ;;  %v1840_v35 = vadd.f32 %v2226_v44, %v1839_v33  ;;  %vm1872_vm14 = vcmp.gt.f32.partialorder %v1848_v58, 0.0 }
 0x1ea   : > { %v2406_v48 = vpop.f32.mrf.mxu1 }
 0x1eb   : > { %v1885_v60 = vmul.f32 %v2234_v53, %v1840_v35  ;;  %v1851_v62 = vadd.f32 %v2406_v48, %v2226_v44  ;;  %v1895_v38 = vsel %vm1872_vm14, %v1848_v58, %v1887_v59  ;;  %vm1870_vm0 = vcmp.gt.f32.partialorder %v1840_v35, 0.0 }
 0x1ec   : > { %v1842_v45 = vpop.f32.mrf.mxu1  ;;  %v2249_v47 = vpack.c.bf16 %v1895_v38, %v1895_v38 }
 0x1ed   : > { %vm1873_vm1 = vcmp.gt.f32.partialorder %v1851_v62, 0.0  ;;  %v1888_v40 = vmul.f32 %v2234_v53, %v1851_v62  ;;  %v1843_v63 = vadd.f32 %v2226_v44, %v1842_v45  ;;  %v1893_v0 = vsel %vm1870_vm0, %v1840_v35, %v1885_v60 }
 0x1ee   : > { %1946 = vrot.lane.b32.xlu1 %v2249_v47, %s2465_s29  ;;  %1936 = vst.msk [vmem:[%s2801_s26 + $0x8] sm:$0xf] %vm1933_vm15, %v2249_v47  ;;  %v2247_v1 = vpack.c.bf16 %v1893_v0, %v1893_v0  ;;  %v2409_v3 = vpop.f32.mrf.mxu1 }
 0x1ef   : > { %vm1871_vm2 = vcmp.gt.f32.partialorder %v1843_v63, 0.0  ;;  %v1886_v5 = vmul.f32 %v2234_v53, %v1843_v63  ;;  %v1896_v49 = vsel %vm1873_vm1, %v1851_v62, %v1888_v40  ;;  %v1864_v4 = vadd.f32 %v2409_v3, %v2226_v44 }
 0x1f0   : > { %1942 = vrot.lane.b32.xlu0 %v2247_v1, %s2465_s29  ;;  %1934 = vst.msk [vmem:[%s2801_s26] sm:$0xf] %vm1933_vm15, %v2247_v1  ;;  %v2250_v46 = vpack.c.bf16 %v1896_v49, %v1896_v49  ;;  %v1855_v6 = vpop.f32.mrf.mxu1 }
 0x1f1   : > { %v1894_v7 = vsel %vm1871_vm2, %v1843_v63, %v1886_v5  ;;  %vm1876_vm3 = vcmp.gt.f32.partialorder %v1864_v4, 0.0  ;;  %v1891_v52 = vmul.f32 %v2234_v53, %v1864_v4  ;;  %v1856_v57 = vadd.f32 %v2226_v44, %v1855_v6 }
 0x1f2   : > { %1948 = vrot.lane.b32.xlu1 %v2250_v46, %s2465_s29  ;;  %1937 = vst.msk [vmem:[%s2801_s26 + $0xc] sm:$0xf] %vm1933_vm15, %v2250_v46  ;;  %v2248_v9 = vpack.c.bf16 %v1894_v7, %v1894_v7  ;;  %v2410_v29 = vpop.f32.mrf.mxu1 }
 0x1f3   : > { %vm1874_vm4 = vcmp.gt.f32.partialorder %v1856_v57, 0.0  ;;  %v1889_v12 = vmul.f32 %v2234_v53, %v1856_v57  ;;  %v1867_v13 = vadd.f32 %v2410_v29, %v2226_v44  ;;  %v1899_v27 = vsel %vm1876_vm3, %v1864_v4, %v1891_v52 }
 0x1f4   : > { %1935 = vst.msk [vmem:[%s2801_s26 + $0x4] sm:$0xf] %vm1933_vm15, %v2248_v9  ;;  %1944 = vrot.lane.b32.xlu0 %v2248_v9, %s2465_s29  ;;  %v1858_v61 = vpop.f32.mrf.mxu1  ;;  %v2253_v8 = vpack.c.bf16 %v1899_v27, %v1899_v27 }
 0x1f5   : > { %vm1877_vm5 = vcmp.gt.f32.partialorder %v1867_v13, 0.0  ;;  %v1892_v2 = vmul.f32 %v2234_v53, %v1867_v13  ;;  %v1859_v50 = vadd.f32 %v2226_v44, %v1858_v61  ;;  %v1897_v14 = vsel %vm1874_vm4, %v1856_v57, %v1889_v12 }
 0x1f6   : > { %v2251_v15 = vpack.c.bf16 %v1897_v14, %v1897_v14  ;;  %1940 = vst.msk [vmem:[%s2801_s26 + $0x18] sm:$0xf] %vm1933_vm15, %v2253_v8 }
 0x1f7   : > { %vm1875_vm6 = vcmp.gt.f32.partialorder %v1859_v50, 0.0  ;;  %v1890_v30 = vmul.f32 %v2234_v53, %v1859_v50  ;;  %v1900_v51 = vsel %vm1877_vm5, %v1867_v13, %v1892_v2 }
 0x1f8   : > { %1938 = vst.msk [vmem:[%s2801_s26 + $0x10] sm:$0xf] %vm1933_vm15, %v2251_v15  ;;  %1950 = vrot.lane.b32.xlu0 %v2251_v15, %s2465_s29  ;;  %v2254_v25 = vpack.c.bf16 %v1900_v51, %v1900_v51 }
 0x1f9   : > { %v1898_v26 = vsel %vm1875_vm6, %v1859_v50, %v1890_v30 }
 0x1fa   : > { %v2252_v32 = vpack.c.bf16 %v1898_v26, %v1898_v26  ;;  %1941 = vst.msk [vmem:[%s2801_s26 + $0x1c] sm:$0xf] %vm1933_vm15, %v2254_v25 }
 0x1fc   : > { %1952 = vrot.lane.b32.xlu1 %v2252_v32, %s2465_s29  ;;  %1939 = vst.msk [vmem:[%s2801_s26 + $0x14] sm:$0xf] %vm1933_vm15, %v2252_v32  ;;  %1954 = vrot.lane.b32.xlu0 %v2253_v8, %s2465_s29 }
 0x200   : > { %1956 = vrot.lane.b32.xlu1 %v2254_v25, %s2465_s29 }
 0x260   : > { %v1947_v54 = vpop.permute.xlu1 %1946 }
 0x261   : > { %1968 = vst.msk [vmem:[%s318_s10 + $0x8] sm:$0xf] %vm1933_vm15, %v1947_v54 }
 0x262   : > { %v1943_v41 = vpop.permute.xlu0 %1942 }
 0x263   : > { %1966 = vst.msk [vmem:[%s318_s10] sm:$0xf] %vm1933_vm15, %v1943_v41 }
 0x264   : > { %v1949_v28 = vpop.permute.xlu1 %1948 }
 0x265   : > { %1969 = vst.msk [vmem:[%s318_s10 + $0xc] sm:$0xf] %vm1933_vm15, %v1949_v28 }
 0x266   : > { %v1945_v11 = vpop.permute.xlu0 %1944 }
 0x267   : > { %1967 = vst.msk [vmem:[%s318_s10 + $0x4] sm:$0xf] %vm1933_vm15, %v1945_v11 }
 0x26a   : > { %v1951_v55 = vpop.permute.xlu0 %1950 }
 0x26b   : > { %1970 = vst.msk [vmem:[%s318_s10 + $0x10] sm:$0xf] %vm1933_vm15, %v1951_v55 }
 0x26e   : > { %v1953_v56 = vpop.permute.xlu1 %1952  ;;  %v1955_v16 = vpop.permute.xlu0 %1954 }
 0x26f   : > { %1971 = vst.msk [vmem:[%s318_s10 + $0x14] sm:$0xf] %vm1933_vm15, %v1953_v56  ;;  %1972 = vst.msk [vmem:[%s318_s10 + $0x18] sm:$0xf] %vm1933_vm15, %v1955_v16 }
 0x272   : > { %v1957_v17 = vpop.permute.xlu1 %1956 }
 0x273   : > { %1973 = vst.msk [vmem:[%s318_s10 + $0x1c] sm:$0xf] %vm1933_vm15, %v1957_v17 }
 0x274 PF: > { %s19_s27 = sadd.s32 1, %s2463_s27  }
 0x275   : > { %p16_p4 = scmp.ge.s32.totalorder %s19_s27, 4  }
 0x277   :  { %18 = sbr.rel (!%p16_p4) target bundleno = 1 (0x1), region = 103 }

// kernel: _lambda_.7
= control target key start
LH: loop header
LB: loop body
LE: loop exit
PB: predicated region body
PF: predicated region fallthrough
CT: control target
= control target key end

     0   :  { %s2661_s27 = smov 0   ;;  %s3145_s0 = inlined_call_operand.vmem [shape: bf16[2,10,10,16], index: 0, kind: input, shape index: {}]   ;;  %s3146_s1 = inlined_call_operand.vmem [shape: bf16[9,16,32], index: 1, kind: input, shape index: {}]   ;;  %s3147_s2 = inlined_call_operand.vmem [shape: f32[1,32], index: 2, kind: input, shape index: {}]   ;;  %s3148_s3 = inlined_call_operand.vmem [shape: f32[1,32], index: 3, kind: input, shape index: {}]   ;;  %s3149_s4 = inlined_call_operand.vmem [shape: bf16[32,16], index: 4, kind: input, shape index: {}]   ;;  %s3150_s5 = inlined_call_operand.vmem [shape: f32[1,16], index: 5, kind: input, shape index: {}]   ;;  %s3151_s6 = inlined_call_operand.vmem [shape: bf16[2,64,16], index: 6, kind: input, shape index: {}]   ;;  %s3152_s7 = inlined_call_operand.vmem [shape: f32[1,16], index: 7, kind: input, shape index: {}]   ;;  %s3153_s8 = inlined_call_operand.vmem [shape: bf16[2,64,16], index: 8, kind: output, shape index: {}]  }
   0x1 LB: > { %s2179_s28 = sadd.s32 4294967295, %s2614_s27   ;;  %p2183_p0 = scmp.ge.s32.totalorder %s2614_s27, 1  ;;  %s2614_s27 = sphi %s2661_s27, %s18_s27  }
   0x2   : > { %p272_p1 = scmp.lt.s32.totalorder %s2614_s27, 3 }
   0x4   : > { %p273_p2 = pnand %p2183_p0, %p272_p1 }
   0x6   : > { %276 = sbr.rel (%p273_p2) target bundleno = 528 (0x210), region = 52 }
   0xb   : > { %v2585_v0 = vld [vmem:[%s3146_s1 + $0x8] sm:$0xff]   ;;  %p311_p3 = scmp.lt.s32.totalorder %s2179_s28, 1  ;;  %v2586_v1 = vld [vmem:[%s3146_s1] sm:$0xff]   ;;  %v2680_v2 = vld [vmem:[%s3146_s1 + $0x10] sm:$0xff]   ;;  %vm481_vm0 = vcmask 130048   ;;  %vm686_vm4 = vcmask 1042432  }
   0xc   : > { %2474 = vmatprep.subr.bf16.mxu0 %v2585_v0  ;;  %2484 = vmatprep.subr.bf16.mxu1 %v2586_v1  ;;  %v2592_v3 = vld [vmem:[%s3146_s1 + $0x18] sm:$0xff]   ;;  %vm345_vm1 = vsmask.f32 3328  ;;  %vm346_vm2 = vsmask.f32 7440  ;;  %v2716_v32 = vld [vmem:[%s3146_s1 + $0x28] sm:$0xff]  }
   0xd   : > { %s3167_s28 = smov (!%p311_p3, %s2179_s28), 1  ;;  %2475 = vmatpush3.bf16.msra.mxu0 %v2585_v0  ;;  %2485 = vmatpush3.bf16.msra.mxu1 %v2586_v1  ;;  %vm2720_vm3 = vmor %vm345_vm1, %vm346_vm2  ;;  %vm687_vm5 = vcmask 1046532   ;;  %vm1938_vm11 = vcmask 261120   ;;  %vm2103_vm1 = vcmask 125952  }
   0xe   : > { %s2576_s13 = smul.u32 80, %s3167_s28  ;;  %2494 = vmatprep.subr.bf16.mxu0 %v2680_v2  ;;  %2504 = vmatprep.subr.bf16.mxu1 %v2592_v3  ;;  %vm2776_vm6 = vmor %vm686_vm4, %vm687_vm5  ;;  %s2394_s17 = sshll.u32 %s3167_s28, 5 }
   0xf   : > { %s320_s20 = scalar_lea.vmem %s3151_s6, %s2394_s17  ;;  %s3117_s26 = scalar_lea.vmem %s3153_s8, %s2394_s17 }
  0x10   : > { %s2690_s18 = scalar_lea.vmem %s3145_s0, %s2576_s13 }
  0x11   : > { %v327_v4 = vld [vmem:[%s2690_s18] sm:$0xf]  ;;  %v328_v5 = vld [vmem:[%s2690_s18 + $0x8] sm:$0xf]  ;;  %v2695_v6 = vld [vmem:[%s2690_s18 + $0x4] sm:$0x1] }
  0x12   : > { %v2698_v7 = vld [vmem:[%s2690_s18 + $0xc] sm:$0x1]  ;;  %v349_v8 = vshrl.u32 %v327_v4, 16  ;;  %v352_v9 = vshll.u32 %v327_v4, 16  ;;  %v358_v10 = vshll.u32 %v2695_v6, 16  ;;  %v363_v11 = vshrl.u32 %v328_v5, 16 }
  0x13   : > { %v366_v12 = vshll.u32 %v328_v5, 16  ;;  %v372_v13 = vshll.u32 %v2698_v7, 16  ;;  %v691_v14 = vrot.slane %v2695_v6, 5  ;;  %v695_v15 = vrot.slane %v2698_v7, 5  ;;  %v329_v16 = vld [vmem:[%s2690_s18 + $0x10] sm:$0xf] }
  0x14   : > { %v351_v17 = vrot.slane %v349_v8, 4  ;;  %v354_v18 = vrot.slane %v352_v9, 5  ;;  %v360_v19 = vrot.slane %v358_v10, 5  ;;  %v365_v20 = vrot.slane %v363_v11, 4  ;;  %v330_v21 = vld [vmem:[%s2690_s18 + $0x18] sm:$0xf] }
  0x15   : > { %v368_v22 = vrot.slane %v366_v12, 5  ;;  %v374_v23 = vrot.slane %v372_v13, 5  ;;  %v2200_v24 = vcombine.low %v327_v4, %v328_v5  ;;  %v2707_v25 = vld [vmem:[%s2690_s18 + $0x14] sm:$0x1]  ;;  %v2710_v26 = vld [vmem:[%s2690_s18 + $0x1c] sm:$0x1]  ;;  %v2201_v27 = vcombine.low %v329_v16, %v330_v21 }
  0x16   : > { %v355_v28 = vor.u32 %v354_v18, %v351_v17  ;;  %v377_v29 = vshrl.u32 %v329_v16, 16  ;;  %v380_v30 = vshll.u32 %v329_v16, 16  ;;  %v386_v31 = vshll.u32 %v2707_v25, 16  ;;  %v331_v38 = vld [vmem:[%s2690_s18 + $0x20] sm:$0xf] }
  0x17   : > { %v369_v34 = vor.u32 %v368_v22, %v365_v20  ;;  %2486 = vmatprep.mubr.msk.bf16.mxu1 %vm481_vm0, %v2200_v24  ;;  %v391_v35 = vshrl.u32 %v330_v21, 16  ;;  %v394_v36 = vshll.u32 %v330_v21, 16  ;;  %v400_v37 = vshll.u32 %v2710_v26, 16  ;;  %v332_v43 = vld [vmem:[%s2690_s18 + $0x28] sm:$0xf] }
  0x18   : > { %v356_v39 = vrot.slane %v355_v28, 4  ;;  %v379_v40 = vrot.slane %v377_v29, 4  ;;  %v382_v41 = vrot.slane %v380_v30, 5  ;;  %v388_v42 = vrot.slane %v386_v31, 5  ;;  %2487 = vmatmul.mubr.msk.bf16.vlgmr.msra.gmra.mxu1 %vm481_vm0, %v2201_v27  ;;  %v2730_v48 = vld [vmem:[%s2690_s18 + $0x24] sm:$0x1] }
  0x19   : > { %v370_v44 = vrot.slane %v369_v34, 4  ;;  %v393_v45 = vrot.slane %v391_v35, 4  ;;  %v396_v46 = vrot.slane %v394_v36, 5  ;;  %v402_v47 = vrot.slane %v400_v37, 5  ;;  %2505 = vmatpush3.bf16.msra.mxu1 %v2592_v3  ;;  %v2740_v55 = vld [vmem:[%s2690_s18 + $0x2c] sm:$0x1] }
  0x1a   : > { %v361_v49 = vsel %vm2720_vm3, %v356_v39, %v360_v19  ;;  %v383_v50 = vor.u32 %v382_v41, %v379_v40  ;;  %v699_v51 = vrot.slane %v2707_v25, 5  ;;  %v703_v52 = vrot.slane %v2710_v26, 5  ;;  %2524 = vmatprep.subr.bf16.mxu1 %v2716_v32  ;;  %v333_v62 = vld [vmem:[%s2690_s18 + $0x30] sm:$0xf]  ;;  %v334_v4 = vld [vmem:[%s2690_s18 + $0x38] sm:$0xf] }
  0x1b   : > { %v375_v53 = vsel %vm2720_vm3, %v370_v44, %v374_v23  ;;  %v397_v54 = vor.u32 %v396_v46, %v393_v45  ;;  %v405_v56 = vshrl.u32 %v331_v38, 16  ;;  %v408_v57 = vshll.u32 %v331_v38, 16  ;;  %v2750_v11 = vld [vmem:[%s2690_s18 + $0x34] sm:$0x1]  ;;  %v2755_v18 = vld [vmem:[%s2690_s18 + $0x3c] sm:$0x1] }
  0x1c   : > { %v2191_v58 = vcombine.low %v361_v49, %v375_v53  ;;  %v384_v59 = vrot.slane %v383_v50, 4  ;;  %v414_v60 = vshll.u32 %v2730_v48, 16  ;;  %v419_v61 = vshrl.u32 %v332_v43, 16  ;;  %v662_v23 = vld [vmem:[%s2690_s18] sm:$0xe] }
  0x1d   : > { %v398_v63 = vrot.slane %v397_v54, 4  ;;  %v407_v0 = vrot.slane %v405_v56, 4  ;;  %v410_v1 = vrot.slane %v408_v57, 5  ;;  %v422_v3 = vshll.u32 %v332_v43, 16  ;;  %v663_v24 = vld [vmem:[%s2690_s18 + $0x8] sm:$0xe] }
  0x1e   : > { %2476 = vmatprep.mubr.msk.bf16.mxu0 %vm481_vm0, %v2191_v58  ;;  %v389_v5 = vsel %vm2720_vm3, %v384_v59, %v388_v42  ;;  %v416_v8 = vrot.slane %v414_v60, 5  ;;  %v421_v9 = vrot.slane %v419_v61, 4  ;;  %v428_v10 = vshll.u32 %v2740_v55, 16  ;;  %v2762_v27 = vld [vmem:[%s3146_s1 + $0x20] sm:$0xff]   ;;  %v664_v28 = vld [vmem:[%s2690_s18 + $0x10] sm:$0xe] }
  0x1f   : > { %v403_v12 = vsel %vm2720_vm3, %v398_v63, %v402_v47  ;;  %v411_v13 = vor.u32 %v410_v1, %v407_v0  ;;  %v424_v16 = vrot.slane %v422_v3, 5  ;;  %v2202_v17 = vcombine.low %v331_v38, %v332_v43  ;;  %v665_v35 = vld [vmem:[%s2690_s18 + $0x18] sm:$0xe]  ;;  %v2594_v36 = vld [vmem:[%s2690_s18 + $0x8] ss:$8 sps:$4 sm:$0xff]  }
  0x20   : > { %v2192_v19 = vcombine.low %v389_v5, %v403_v12  ;;  %v430_v20 = vrot.slane %v428_v10, 5  ;;  %v433_v21 = vshrl.u32 %v333_v62, 16  ;;  %v436_v22 = vshll.u32 %v333_v62, 16  ;;  %v667_v58 = vld [vmem:[%s2690_s18 + $0x28] sm:$0xe] }
  0x21   : > { %v412_v29 = vrot.slane %v411_v13, 4  ;;  %v425_v30 = vor.u32 %v424_v16, %v421_v9  ;;  %2490 = vmatprep.mubr.msk.bf16.mxu1 %vm481_vm0, %v2202_v17  ;;  %v442_v31 = vshll.u32 %v2750_v11, 16  ;;  %v447_v34 = vshrl.u32 %v334_v4, 16  ;;  %v668_v63 = vld [vmem:[%s2690_s18 + $0x30] sm:$0xe] }
  0x22   : > { %2477 = vmatmul.mubr.msk.bf16.vlgmr.msra.gmra.mxu0 %vm481_vm0, %v2192_v19  ;;  %v435_v37 = vrot.slane %v433_v21, 4  ;;  %v438_v38 = vrot.slane %v436_v22, 5  ;;  %v450_v39 = vshll.u32 %v334_v4, 16  ;;  %v456_v40 = vshll.u32 %v2755_v18, 16  ;;  %v669_v0 = vld [vmem:[%s2690_s18 + $0x38] sm:$0xe] }
  0x23   : > { %2495 = vmatpush3.bf16.msra.mxu0 %v2680_v2  ;;  %v417_v41 = vsel %vm2720_vm3, %v412_v29, %v416_v8  ;;  %v426_v42 = vrot.slane %v425_v30, 4  ;;  %v444_v43 = vrot.slane %v442_v31, 5  ;;  %v449_v44 = vrot.slane %v447_v34, 4  ;;  %v666_v2 = vld [vmem:[%s2690_s18 + $0x20] sm:$0xe] }
  0x24   : > { %v439_v45 = vor.u32 %v438_v38, %v435_v37  ;;  %v452_v46 = vrot.slane %v450_v39, 5  ;;  %v458_v47 = vrot.slane %v456_v40, 5  ;;  %v2203_v49 = vcombine.low %v333_v62, %v334_v4  ;;  %2514 = vmatprep.subr.bf16.mxu0 %v2762_v27  ;;  %v2595_v7 = vld [vmem:[%s2690_s18 + $0x18] ss:$8 sps:$4 sm:$0xff]   ;;  %v2596_v17 = vld [vmem:[%s2690_s18 + $0x28] ss:$8 sps:$4 sm:$0xff]  }
  0x25   : > { %v431_v53 = vsel %vm2720_vm3, %v426_v42, %v430_v20  ;;  %v2209_v54 = vrot.slane %v662_v23, 9  ;;  %v2210_v56 = vrot.slane %v663_v24, 9  ;;  %v2211_v57 = vrot.slane %v664_v28, 9  ;;  %v2247_v19 = vld [vmem:[%s2690_s18 + $0x8] sm:$0xf] }
  0x26   : > { %v2193_v59 = vcombine.low %v417_v41, %v431_v53  ;;  %v440_v60 = vrot.slane %v439_v45, 4  ;;  %v453_v61 = vor.u32 %v452_v46, %v449_v44  ;;  %2491 = vmatmul.mubr.msk.bf16.gmra.mxu1 %vm481_vm0, %v2203_v49  ;;  %v2212_v62 = vrot.slane %v665_v35, 9  ;;  %v2830_v20 = vld [vmem:[%s2690_s18 + $0xc] sm:$0x1]  ;;  %v2249_v23 = vld [vmem:[%s2690_s18 + $0x10] sm:$0xf] }
  0x27   : > { %v692_v1 = vsel %vm2776_vm6, %v2209_v54, %v691_v14  ;;  %v696_v3 = vsel %vm2776_vm6, %v2210_v56, %v695_v15  ;;  %2506 = vmatprep.mubr.msk.bf16.mxu1 %vm481_vm0, %v2594_v36  ;;  %v2213_v4 = vrot.slane %v666_v2, 9  ;;  %v2804_v6 = vsel %vm2776_vm6, %v2211_v57, %v699_v51  ;;  %v2845_v24 = vld [vmem:[%s2690_s18 + $0x14] sm:$0x1]  ;;  %v2251_v42 = vld [vmem:[%s2690_s18 + $0x18] sm:$0xf] }
  0x28   : > { %2480 = vmatprep.mubr.msk.bf16.mxu0 %vm481_vm0, %v2193_v59  ;;  %v445_v5 = vsel %vm2720_vm3, %v440_v60, %v444_v43  ;;  %v454_v8 = vrot.slane %v453_v61, 4  ;;  %v2219_v9 = vcombine.low %v692_v1, %v696_v3  ;;  %v2811_v14 = vsel %vm2776_vm6, %v2212_v62, %v703_v52  ;;  %v2253_v49 = vld [vmem:[%s2690_s18 + $0x20] sm:$0xf]  ;;  %v2871_v54 = vld [vmem:[%s3146_s1 + $0x30] sm:$0xff]   ;;  %v2254_v56 = vld [vmem:[%s2690_s18 + $0x24] sm:$0x1] }
  0x29   : > { %v707_v15 = vrot.slane %v2730_v48, 5  ;;  %v2214_v10 = vrot.slane %v667_v58, 9  ;;  %v711_v12 = vrot.slane %v2740_v55, 5  ;;  %v2215_v51 = vrot.slane %v668_v63, 9  ;;  %v2597_v53 = vld [vmem:[%s2690_s18 + $0x38] ss:$8 sps:$4 sm:$0xff]  }
  0x2a   : > { %v459_v25 = vsel %vm2720_vm3, %v454_v8, %v458_v47  ;;  %v715_v13 = vrot.slane %v2750_v11, 5  ;;  %v2216_v16 = vrot.slane %v669_v0, 9  ;;  %v719_v55 = vrot.slane %v2755_v18, 5  ;;  %v2835_v11 = vld [vmem:[%s3146_s1 + $0x38] sm:$0xff]   ;;  %v2274_v0 = vld [vmem:[%s2690_s18 + $0x8] sm:$0xe] }
  0x2b   : > { %v2194_v26 = vcombine.low %v445_v5, %v459_v25  ;;  %v2821_v52 = vsel %vm2776_vm6, %v2213_v4, %v707_v15  ;;  %v2825_v48 = vsel %vm2776_vm6, %v2214_v10, %v711_v12  ;;  %v2220_v21 = vcombine.low %v2804_v6, %v2811_v14  ;;  %v2252_v47 = vld [vmem:[%s2690_s18 + $0x1c] sm:$0x1]  ;;  %v2275_v8 = vld [vmem:[%s2690_s18 + $0x10] sm:$0xe]  ;;  %v2276_v15 = vld [vmem:[%s2690_s18 + $0x18] sm:$0xe] }
  0x2c   : > { %v2841_v22 = vsel %vm2776_vm6, %v2215_v51, %v715_v13  ;;  %v967_v28 = vshrl.u32 %v2247_v19, 16  ;;  %v970_v18 = vshll.u32 %v2247_v19, 16  ;;  %v2850_v29 = vsel %vm2776_vm6, %v2216_v16, %v719_v55  ;;  %v2277_v13 = vld [vmem:[%s2690_s18 + $0x20] sm:$0xe]  ;;  %v2255_v16 = vld [vmem:[%s2690_s18 + $0x28] sm:$0xf] }
  0x2d   : > { %2481 = vmatmul.mubr.msk.bf16.gmra.mxu0 %vm481_vm0, %v2194_v26  ;;  %v976_v30 = vshll.u32 %v2830_v20, 16  ;;  %v981_v31 = vshrl.u32 %v2249_v23, 16  ;;  %v984_v34 = vshll.u32 %v2249_v23, 16  ;;  %v2221_v35 = vcombine.low %v2821_v52, %v2825_v48  ;;  %v2890_v55 = vld [vmem:[%s2690_s18 + $0x2c] sm:$0x1] }
  0x2e   : > { %2496 = vmatprep.mubr.msk.bf16.mxu0 %vm481_vm0, %v2219_v9  ;;  %2507 = vmatmul.mubr.msk.bf16.vlgmr.msra.gmra.mxu1 %vm481_vm0, %v2595_v7  ;;  %v969_v36 = vrot.slane %v967_v28, 4  ;;  %v972_v37 = vrot.slane %v970_v18, 5  ;;  %v990_v38 = vshll.u32 %v2845_v24, 16  ;;  %v1210_v43 = vrot.slane %v2830_v20, 5  ;;  %v2257_v23 = vld [vmem:[%s2690_s18 + $0x30] sm:$0xf] }
  0x2f   : > { %2510 = vmatprep.mubr.msk.bf16.mxu1 %vm481_vm0, %v2596_v17  ;;  %2525 = vmatpush3.bf16.msra.mxu1 %v2716_v32  ;;  %v978_v39 = vrot.slane %v976_v30, 5  ;;  %v983_v40 = vrot.slane %v981_v31, 4  ;;  %v986_v41 = vrot.slane %v984_v34, 5  ;;  %v2222_v44 = vcombine.low %v2841_v22, %v2850_v29 }
  0x30   : > { %v973_v45 = vor.u32 %v972_v37, %v969_v36  ;;  %v992_v46 = vrot.slane %v990_v38, 5  ;;  %v995_v2 = vshrl.u32 %v2251_v42, 16  ;;  %2544 = vmatprep.subr.bf16.mxu1 %v2835_v11  ;;  %v998_v57 = vshll.u32 %v2251_v42, 16  ;;  %v2259_v38 = vld [vmem:[%s2690_s18 + $0x38] sm:$0xf] }
  0x31   : > { %v987_v32 = vor.u32 %v986_v41, %v983_v40  ;;  %v1004_v58 = vshll.u32 %v2252_v47, 16  ;;  %v1009_v59 = vshrl.u32 %v2253_v49, 16  ;;  %v1012_v62 = vshll.u32 %v2253_v49, 16 }
  0x32   : > { %v974_v60 = vrot.slane %v973_v45, 4  ;;  %v997_v61 = vrot.slane %v995_v2, 4  ;;  %v1018_v63 = vshll.u32 %v2254_v56, 16  ;;  %v1000_v3 = vrot.slane %v998_v57, 5  ;;  %v2261_v45 = vld [vmem:[%s2690_s18 + $0x40] sm:$0xf] }
  0x33   : > { %v988_v1 = vrot.slane %v987_v32, 4  ;;  %v1006_v4 = vrot.slane %v1004_v58, 5  ;;  %v1011_v5 = vrot.slane %v1009_v59, 4  ;;  %v1014_v6 = vrot.slane %v1012_v62, 5  ;;  %v2278_v32 = vld [vmem:[%s2690_s18 + $0x28] sm:$0xe] }
  0x34   : > { %v979_v9 = vsel %vm2720_vm3, %v974_v60, %v978_v39  ;;  %v1020_v7 = vrot.slane %v1018_v63, 5  ;;  %v2282_v14 = vrot.slane %v2274_v0, 9  ;;  %v1001_v12 = vor.u32 %v1000_v3, %v997_v61  ;;  %v2279_v60 = vld [vmem:[%s2690_s18 + $0x30] sm:$0xe] }
  0x35   : > { %2497 = vmatmul.mubr.msk.bf16.vlgmr.msra.gmra.mxu0 %vm481_vm0, %v2220_v21  ;;  %v993_v10 = vsel %vm2720_vm3, %v988_v1, %v992_v46  ;;  %v2283_v25 = vrot.slane %v2275_v8, 9  ;;  %v1214_v51 = vrot.slane %v2845_v24, 5  ;;  %v1015_v26 = vor.u32 %v1014_v6, %v1011_v5  ;;  %v2280_v8 = vld [vmem:[%s2690_s18 + $0x38] sm:$0xe] }
  0x36   : > { %2515 = vmatpush3.bf16.msra.mxu0 %v2762_v27  ;;  %2500 = vmatprep.mubr.msk.bf16.mxu0 %vm481_vm0, %v2221_v35  ;;  %v2265_v17 = vcombine.low %v979_v9, %v993_v10  ;;  %v1211_v52 = vsel %vm2776_vm6, %v2282_v14, %v1210_v43  ;;  %v2284_v48 = vrot.slane %v2276_v15, 9  ;;  %v1002_v19 = vrot.slane %v1001_v12, 4  ;;  %v2258_v35 = vld [vmem:[%s2690_s18 + $0x34] sm:$0x1]  ;;  %v2260_v43 = vld [vmem:[%s2690_s18 + $0x3c] sm:$0x1] }
  0x37   : > { %2511 = vmatmul.mubr.msk.bf16.gmra.mxu1 %vm481_vm0, %v2597_v53  ;;  %2534 = vmatprep.subr.bf16.mxu0 %v2871_v54  ;;  %v1215_v27 = vsel %vm2776_vm6, %v2283_v25, %v1214_v51  ;;  %v1218_v20 = vrot.slane %v2252_v47, 5  ;;  %v2285_v21 = vrot.slane %v2277_v13, 9  ;;  %v1016_v24 = vrot.slane %v1015_v26, 4  ;;  %v2912_v53 = vld [vmem:[%s2690_s18 + $0x44] sm:$0x1] }
  0x38   : > { %v2292_v28 = vcombine.low %v1211_v52, %v1215_v27  ;;  %v1222_v18 = vrot.slane %v2254_v56, 5  ;;  %v1023_v30 = vshrl.u32 %v2255_v16, 16  ;;  %v1007_v31 = vsel %vm2720_vm3, %v1002_v19, %v1006_v4  ;;  %v2281_v13 = vld [vmem:[%s2690_s18 + $0x40] sm:$0xe] }
  0x39   : > { %v1219_v34 = vsel %vm2776_vm6, %v2284_v48, %v1218_v20  ;;  %v1026_v36 = vshll.u32 %v2255_v16, 16  ;;  %v1032_v37 = vshll.u32 %v2890_v55, 16  ;;  %v1021_v39 = vsel %vm2720_vm3, %v1016_v24, %v1020_v7  ;;  %v2938_v24 = vld [vmem:[%s3146_s1 + $0x40] sm:$0xff]  }
  0x3a   : > { %2526 = vmatprep.mubr.msk.bf16.mxu1 %vm481_vm0, %v2292_v28  ;;  %v1223_v40 = vsel %vm2776_vm6, %v2285_v21, %v1222_v18  ;;  %v1025_v41 = vrot.slane %v1023_v30, 4  ;;  %v1037_v42 = vshrl.u32 %v2257_v23, 16  ;;  %v2266_v46 = vcombine.low %v1007_v31, %v1021_v39  ;;  %v2955_v39 = vld [vmem:[%s2690_s18 + $0x1c] sm:$0x1] }
  0x3b   : > { %v2293_v47 = vcombine.low %v1219_v34, %v1223_v40  ;;  %v1028_v49 = vrot.slane %v1026_v36, 5  ;;  %v1034_v2 = vrot.slane %v1032_v37, 5  ;;  %v1040_v57 = vshll.u32 %v2257_v23, 16  ;;  %v2320_v34 = vld [vmem:[%s2690_s18 + $0x10] sm:$0xf] }
  0x3c   : > { %v1039_v56 = vrot.slane %v1037_v42, 4  ;;  %v1046_v58 = vshll.u32 %v2258_v35, 16  ;;  %v1051_v59 = vshrl.u32 %v2259_v38, 16  ;;  %v1054_v62 = vshll.u32 %v2259_v38, 16  ;;  %v2322_v36 = vld [vmem:[%s2690_s18 + $0x18] sm:$0xf] }
  0x3d   : > { %2501 = vmatmul.mubr.msk.bf16.gmra.mxu0 %vm481_vm0, %v2222_v44  ;;  %v1029_v61 = vor.u32 %v1028_v49, %v1025_v41  ;;  %v1060_v63 = vshll.u32 %v2260_v43, 16  ;;  %v1065_v0 = vshrl.u32 %v2261_v45, 16  ;;  %v1042_v1 = vrot.slane %v1040_v57, 5  ;;  %v2601_v49 = vld [vmem:[%s2690_s18 + $0x10] ss:$8 sps:$4 sm:$0xff]  }
  0x3e   : > { %2516 = vmatprep.mubr.msk.bf16.mxu0 %vm481_vm0, %v2265_v17  ;;  %v1048_v3 = vrot.slane %v1046_v58, 5  ;;  %v1053_v4 = vrot.slane %v1051_v59, 4  ;;  %v1068_v5 = vshll.u32 %v2261_v45, 16  ;;  %v1056_v6 = vrot.slane %v1054_v62, 5 }
  0x3f   : > { %2527 = vmatmul.mubr.msk.bf16.vlgmr.msra.gmra.mxu1 %vm481_vm0, %v2293_v47  ;;  %v1030_v9 = vrot.slane %v1029_v61, 4  ;;  %v1062_v7 = vrot.slane %v1060_v63, 5  ;;  %v1067_v22 = vrot.slane %v1065_v0, 4  ;;  %v1043_v29 = vor.u32 %v1042_v1, %v1039_v56  ;;  %v2967_v56 = vld [vmem:[%s2690_s18 + $0x24] sm:$0x1] }
  0x40   : > { %v1070_v44 = vrot.slane %v1068_v5, 5  ;;  %v1074_v14 = vshll.u32 %v2912_v53, 16  ;;  %v2286_v15 = vrot.slane %v2278_v32, 9  ;;  %2545 = vmatpush3.bf16.msra.mxu1 %v2835_v11  ;;  %v1057_v12 = vor.u32 %v1056_v6, %v1053_v4  ;;  %v2326_v61 = vld [vmem:[%s2690_s18 + $0x28] sm:$0xf] }
  0x41   : > { %v1035_v10 = vsel %vm2720_vm3, %v1030_v9, %v1034_v2  ;;  %v1226_v25 = vrot.slane %v2890_v55, 5  ;;  %v2287_v51 = vrot.slane %v2279_v60, 9  ;;  %v1044_v16 = vrot.slane %v1043_v29, 4  ;;  %v2971_v0 = vld [vmem:[%s2690_s18 + $0x2c] sm:$0x1] }
  0x42   : > { %v1071_v17 = vor.u32 %v1070_v44, %v1067_v22  ;;  %v1076_v26 = vrot.slane %v1074_v14, 5  ;;  %v1230_v52 = vrot.slane %v2258_v35, 5  ;;  %v1058_v48 = vrot.slane %v1057_v12, 4  ;;  %v2947_v35 = vld [vmem:[%s2690_s18 + $0x14] sm:$0x1] }
  0x43   : > { %v1227_v19 = vsel %vm2776_vm6, %v2286_v15, %v1226_v25  ;;  %v2288_v11 = vrot.slane %v2280_v8, 9  ;;  %v1234_v27 = vrot.slane %v2260_v43, 5  ;;  %v1049_v20 = vsel %vm2720_vm3, %v1044_v16, %v1048_v3 }
  0x44   : > { %v1072_v55 = vrot.slane %v1071_v17, 4  ;;  %v1231_v21 = vsel %vm2776_vm6, %v2287_v51, %v1230_v52  ;;  %v2289_v23 = vrot.slane %v2281_v13, 9  ;;  %v2267_v28 = vcombine.low %v1035_v10, %v1049_v20  ;;  %v2603_v51 = vld [vmem:[%s2690_s18 + $0x20] ss:$8 sps:$4 sm:$0xff]   ;;  %v2985_v52 = vld [vmem:[%s2690_s18 + $0x34] sm:$0x1] }
  0x45   : > { %2517 = vmatmul.mubr.msk.bf16.vlgmr.msra.gmra.mxu0 %vm481_vm0, %v2266_v46  ;;  %v1063_v18 = vsel %vm2720_vm3, %v1058_v48, %v1062_v7  ;;  %v2294_v30 = vcombine.low %v1227_v19, %v1231_v21  ;;  %v1235_v31 = vsel %vm2776_vm6, %v2288_v11, %v1234_v27  ;;  %v1238_v38 = vrot.slane %v2912_v53, 5  ;;  %v2324_v46 = vld [vmem:[%s2690_s18 + $0x20] sm:$0xf]  ;;  %v2330_v27 = vld [vmem:[%s2690_s18 + $0x38] sm:$0xf] }
  0x46   : > { %2535 = vmatpush3.bf16.msra.mxu0 %v2871_v54  ;;  %v1077_v37 = vsel %vm2720_vm3, %v1072_v55, %v1076_v26  ;;  %v1486_v40 = vshrl.u32 %v2320_v34, 16  ;;  %v1489_v41 = vshll.u32 %v2320_v34, 16  ;;  %2520 = vmatprep.mubr.msk.bf16.mxu0 %vm481_vm0, %v2267_v28  ;;  %v1495_v43 = vshll.u32 %v2947_v35, 16  ;;  %v2328_v26 = vld [vmem:[%s2690_s18 + $0x30] sm:$0xf] }
  0x47   : > { %v2268_v42 = vcombine.low %v1063_v18, %v1077_v37  ;;  %2530 = vmatprep.mubr.msk.bf16.mxu1 %vm481_vm0, %v2294_v30  ;;  %v1500_v45 = vshrl.u32 %v2322_v36, 16  ;;  %v1503_v54 = vshll.u32 %v2322_v36, 16  ;;  %v1239_v47 = vsel %vm2776_vm6, %v2289_v23, %v1238_v38  ;;  %2554 = vmatprep.subr.bf16.mxu0 %v2938_v24  ;;  %v2990_v20 = vld [vmem:[%s2690_s18 + $0x3c] sm:$0x1]  ;;  %v2604_v23 = vld [vmem:[%s2690_s18 + $0x30] ss:$8 sps:$4 sm:$0xff]  }
  0x48   : > { %v1488_v2 = vrot.slane %v1486_v40, 4  ;;  %v1491_v53 = vrot.slane %v1489_v41, 5  ;;  %v1509_v32 = vshll.u32 %v2955_v39, 16  ;;  %v2295_v57 = vcombine.low %v1235_v31, %v1239_v47  ;;  %v2332_v31 = vld [vmem:[%s2690_s18 + $0x40] sm:$0xf] }
  0x49   : > { %v1497_v58 = vrot.slane %v1495_v43, 5  ;;  %v1502_v59 = vrot.slane %v1500_v45, 4  ;;  %v1505_v60 = vrot.slane %v1503_v54, 5  ;;  %v1514_v1 = vshrl.u32 %v2324_v46, 16  ;;  %v3000_v38 = vld [vmem:[%s2690_s18 + $0x44] sm:$0x1] }
  0x4a   : > { %v1492_v62 = vor.u32 %v1491_v53, %v1488_v2  ;;  %v1511_v63 = vrot.slane %v1509_v32, 5  ;;  %v1517_v3 = vshll.u32 %v2324_v46, 16  ;;  %2531 = vmatmul.mubr.msk.bf16.gmra.mxu1 %vm481_vm0, %v2295_v57  ;;  %v1523_v5 = vshll.u32 %v2967_v56, 16  ;;  %v2334_v45 = vld [vmem:[%s2690_s18 + $0x48] sm:$0xf] }
  0x4b   : > { %v1506_v4 = vor.u32 %v1505_v60, %v1502_v59  ;;  %v1528_v8 = vshrl.u32 %v2326_v61, 16  ;;  %v1531_v9 = vshll.u32 %v2326_v61, 16  ;;  %v1516_v7 = vrot.slane %v1514_v1, 4  ;;  %v2347_v59 = vld [vmem:[%s2690_s18 + $0x10] sm:$0xe] }
  0x4c   : > { %v1493_v6 = vrot.slane %v1492_v62, 4  ;;  %v1519_v22 = vrot.slane %v1517_v3, 5  ;;  %v1537_v29 = vshll.u32 %v2971_v0, 16  ;;  %v1525_v25 = vrot.slane %v1523_v5, 5  ;;  %v2348_v1 = vld [vmem:[%s2690_s18 + $0x18] sm:$0xe] }
  0x4d   : > { %2521 = vmatmul.mubr.msk.bf16.gmra.mxu0 %vm481_vm0, %v2268_v42  ;;  %v1507_v44 = vrot.slane %v1506_v4, 4  ;;  %v1530_v14 = vrot.slane %v1528_v8, 4  ;;  %v1533_v15 = vrot.slane %v1531_v9, 5  ;;  %v1729_v48 = vrot.slane %v2947_v35, 5  ;;  %v2349_v9 = vld [vmem:[%s2690_s18 + $0x20] sm:$0xe] }
  0x4e   : > { %2536 = vmatprep.mubr.msk.bf16.mxu0 %vm481_vm0, %v2601_v49  ;;  %v1498_v10 = vsel %vm2720_vm3, %v1493_v6, %v1497_v58  ;;  %v1520_v12 = vor.u32 %v1519_v22, %v1516_v7  ;;  %v1539_v17 = vrot.slane %v1537_v29, 5  ;;  %v1542_v55 = vshrl.u32 %v2328_v26, 16  ;;  %v3006_v49 = vld [vmem:[%s2690_s18 + $0x4c] sm:$0x1]  ;;  %v2605_v29 = vld [vmem:[%s2690_s18 + $0x40] ss:$8 sps:$4 sm:$0xff]  }
  0x4f   : > { %v1512_v13 = vsel %vm2720_vm3, %v1507_v44, %v1511_v63  ;;  %v1534_v16 = vor.u32 %v1533_v15, %v1530_v14  ;;  %v1545_v28 = vshll.u32 %v2328_v26, 16  ;;  %v1551_v18 = vshll.u32 %v2985_v52, 16  ;;  %v2352_v26 = vld [vmem:[%s2690_s18 + $0x38] sm:$0xe] }
  0x50   : > { %v2338_v19 = vcombine.low %v1498_v10, %v1512_v13  ;;  %v1521_v11 = vrot.slane %v1520_v12, 4  ;;  %v1556_v30 = vshrl.u32 %v2330_v27, 16  ;;  %v1544_v35 = vrot.slane %v1542_v55, 4  ;;  %v2350_v12 = vld [vmem:[%s2690_s18 + $0x28] sm:$0xe] }
  0x51   : > { %v1535_v21 = vrot.slane %v1534_v16, 4  ;;  %v1559_v36 = vshll.u32 %v2330_v27, 16  ;;  %v1565_v37 = vshll.u32 %v2990_v20, 16  ;;  %v1547_v41 = vrot.slane %v1545_v28, 5 }
  0x52   : > { %2546 = vmatprep.mubr.msk.bf16.mxu1 %vm481_vm0, %v2338_v19  ;;  %v1526_v34 = vsel %vm2720_vm3, %v1521_v11, %v1525_v25  ;;  %v1553_v42 = vrot.slane %v1551_v18, 5  ;;  %v1558_v43 = vrot.slane %v1556_v30, 4  ;;  %v1570_v2 = vshrl.u32 %v2332_v31, 16 }
  0x53   : > { %v1540_v40 = vsel %vm2720_vm3, %v1535_v21, %v1539_v17  ;;  %v1561_v46 = vrot.slane %v1559_v36, 5  ;;  %v1567_v47 = vrot.slane %v1565_v37, 5  ;;  %v1548_v53 = vor.u32 %v1547_v41, %v1544_v35  ;;  %v2351_v17 = vld [vmem:[%s2690_s18 + $0x30] sm:$0xe]  ;;  %v2353_v36 = vld [vmem:[%s2690_s18 + $0x40] sm:$0xe] }
  0x54   : > { %v2339_v54 = vcombine.low %v1526_v34, %v1540_v40  ;;  %v1573_v32 = vshll.u32 %v2332_v31, 16  ;;  %v1579_v57 = vshll.u32 %v3000_v38, 16  ;;  %v1584_v58 = vshrl.u32 %v2334_v45, 16  ;;  %v2354_v41 = vld [vmem:[%s2690_s18 + $0x48] sm:$0xe] }
  0x55   : > { %2537 = vmatmul.mubr.msk.bf16.vlgmr.msra.gmra.mxu0 %vm481_vm0, %v2603_v51  ;;  %v1562_v60 = vor.u32 %v1561_v46, %v1558_v43  ;;  %v1572_v61 = vrot.slane %v1570_v2, 4  ;;  %v1587_v62 = vshll.u32 %v2334_v45, 16  ;;  %v1593_v63 = vshll.u32 %v3006_v49, 16 }
  0x56   : > { %2555 = vmatpush3.bf16.msra.mxu0 %v2938_v24  ;;  %2547 = vmatmul.mubr.msk.bf16.vlgmr.msra.gmra.mxu1 %vm481_vm0, %v2339_v54  ;;  %v1549_v3 = vrot.slane %v1548_v53, 4  ;;  %v1575_v4 = vrot.slane %v1573_v32, 5  ;;  %v1581_v5 = vrot.slane %v1579_v57, 5  ;;  %v1586_v8 = vrot.slane %v1584_v58, 4 }
  0x57   : > { %2540 = vmatprep.mubr.msk.bf16.mxu0 %vm481_vm0, %v2604_v23  ;;  %v1563_v24 = vrot.slane %v1562_v60, 4  ;;  %v1589_v6 = vrot.slane %v1587_v62, 5  ;;  %v1595_v7 = vrot.slane %v1593_v63, 5  ;;  %v2355_v22 = vrot.slane %v2347_v59, 9 }
  0x58   : > { %v1554_v44 = vsel %vm2720_vm3, %v1549_v3, %v1553_v42  ;;  %v1576_v14 = vor.u32 %v1575_v4, %v1572_v61  ;;  %v2356_v15 = vrot.slane %v2348_v1, 9  ;;  %v1733_v10 = vrot.slane %v2955_v39, 5 }
  0x59   : > { %v1568_v25 = vsel %vm2720_vm3, %v1563_v24, %v1567_v47  ;;  %v1590_v51 = vor.u32 %v1589_v6, %v1586_v8  ;;  %v1730_v13 = vsel %vm2776_vm6, %v2355_v22, %v1729_v48  ;;  %v2357_v16 = vrot.slane %v2349_v9, 9 }
  0x5a   : > { %v2340_v19 = vcombine.low %v1554_v44, %v1568_v25  ;;  %v1577_v11 = vrot.slane %v1576_v14, 4  ;;  %v1734_v27 = vsel %vm2776_vm6, %v2356_v15, %v1733_v10  ;;  %v1737_v55 = vrot.slane %v2967_v56, 5 }
  0x5b   : > { %v1591_v39 = vrot.slane %v1590_v51, 4  ;;  %v2365_v21 = vcombine.low %v1730_v13, %v1734_v27  ;;  %v2358_v23 = vrot.slane %v2350_v12, 9  ;;  %v1741_v28 = vrot.slane %v2971_v0, 5 }
  0x5c   : > { %2550 = vmatprep.mubr.msk.bf16.mxu1 %vm481_vm0, %v2340_v19  ;;  %v1582_v48 = vsel %vm2720_vm3, %v1577_v11, %v1581_v5  ;;  %v1738_v18 = vsel %vm2776_vm6, %v2357_v16, %v1737_v55  ;;  %v2359_v30 = vrot.slane %v2351_v17, 9  ;;  %v1745_v56 = vrot.slane %v2985_v52, 5 }
  0x5d   : > { %2541 = vmatmul.mubr.msk.bf16.gmra.mxu0 %vm481_vm0, %v2605_v29  ;;  %v1596_v31 = vsel %vm2720_vm3, %v1591_v39, %v1595_v7  ;;  %v1742_v0 = vsel %vm2776_vm6, %v2358_v23, %v1741_v28  ;;  %v2360_v34 = vrot.slane %v2352_v26, 9  ;;  %v1749_v35 = vrot.slane %v2990_v20, 5 }
  0x5e   : > { %2556 = vmatprep.mubr.msk.bf16.mxu0 %vm481_vm0, %v2365_v21  ;;  %v2341_v37 = vcombine.low %v1582_v48, %v1596_v31  ;;  %v1746_v40 = vsel %vm2776_vm6, %v2359_v30, %v1745_v56  ;;  %v2366_v33 = vcombine.low %v1738_v18, %v1742_v0  ;;  %v2361_v42 = vrot.slane %v2353_v36, 9 }
  0x5f   : > { %v1750_v52 = vsel %vm2776_vm6, %v2360_v34, %v1749_v35  ;;  %v1753_v45 = vrot.slane %v3000_v38, 5  ;;  %v2362_v54 = vrot.slane %v2354_v41, 9  ;;  %v1757_v46 = vrot.slane %v3006_v49, 5  ;;  %v2606_v38 = vld [vmem:[%s3149_s4 + $0x8] sm:$0xff]   ;;  %v2607_v49 = vld [vmem:[%s3149_s4] sm:$0xff]  }
  0x60   : > { %2551 = vmatmul.mubr.msk.bf16.gmra.mxu1 %vm481_vm0, %v2341_v37  ;;  %v2367_v43 = vcombine.low %v1746_v40, %v1750_v52  ;;  %2564 = vmatprep.subr.bf16.mxu1 %v2606_v38 }
  0x61   : > { %v1754_v20 = vsel %vm2776_vm6, %v2361_v42, %v1753_v45  ;;  %v1758_v47 = vsel %vm2776_vm6, %v2362_v54, %v1757_v46  ;;  %2565 = vmatpush3.bf16.msra.mxu1 %v2606_v38 }
  0x62   : > { %v2368_v2 = vcombine.low %v1754_v20, %v1758_v47  ;;  %2566 = vmatprep.subr.bf16.mxu1 %v2607_v49 }
  0x65   : > { %2557 = vmatmul.mubr.msk.bf16.vlgmr.msra.gmra.mxu0 %vm481_vm0, %v2366_v33  ;;  %2567 = vmatpush3.bf16.msra.mxu1 %v2607_v49 }
  0x66   : > { %2560 = vmatprep.mubr.msk.bf16.mxu0 %vm481_vm0, %v2367_v43 }
  0x6d   : > { %2561 = vmatmul.mubr.msk.bf16.gmra.mxu0 %vm481_vm0, %v2368_v2 }
  0xd8   : > { %v2488_v53 = vpop.f32.mrf.mxu1 }
  0xda   : > { %v631_v32 = vpop.f32.mrf.mxu1 }
  0xdc   : > { %v2489_v57 = vpop.f32.mrf.mxu1 }
  0xde   : > { %v634_v58 = vpop.f32.mrf.mxu1 }
  0xe2   : > { %v2478_v50 = vpop.f32.mrf.mxu0 }
  0xe3   : > { %v640_v36 = vadd.f32 %v2488_v53, %v2478_v50 }
  0xe4   : > { %v528_v59 = vpop.f32.mrf.mxu0 }
  0xe5   : > { %v632_v37 = vadd.f32 %v631_v32, %v528_v59 }
  0xe6   : > { %v2479_v60 = vpop.f32.mrf.mxu0  ;;  %v2492_v61 = vpop.f32.mrf.mxu1 }
  0xe7   : > { %v643_v41 = vadd.f32 %v2489_v57, %v2479_v60 }
  0xe8   : > { %v647_v62 = vpop.f32.mrf.mxu1  ;;  %v531_v63 = vpop.f32.mrf.mxu0 }
  0xe9   : > { %v635_v46 = vadd.f32 %v634_v58, %v531_v63 }
  0xea   : > { %v2493_v1 = vpop.f32.mrf.mxu1 }
  0xec   : > { %v3067_v3 = vpop.f32.mrf.mxu1 }
  0xed   : > { %v2482_v4 = vpop.f32.mrf.mxu0 }
  0xee   : > { %v2508_v5 = vpop.f32.mrf.mxu1  ;;  %v656_v38 = vadd.f32 %v2492_v61, %v2482_v4 }
  0xef   : > { %v544_v8 = vpop.f32.mrf.mxu0 }
  0xf0   : > { %v911_v9 = vpop.f32.mrf.mxu1 }
  0xf1   : > { %v2483_v24 = vpop.f32.mrf.mxu0 }
  0xf2   : > { %v2509_v6 = vpop.f32.mrf.mxu1  ;;  %v659_v50 = vadd.f32 %v2493_v1, %v2483_v24 }
  0xf3   : > { %v3069_v7 = vpop.f32.mrf.mxu0 }
  0xf4   : > { %v914_v22 = vpop.f32.mrf.mxu1  ;;  %v651_v61 = vadd.f32 %v3067_v3, %v3069_v7 }
  0xf5   : > { %v2498_v29 = vpop.f32.mrf.mxu0 }
  0xf6   : > { %v821_v52 = vadd.f32 %v2498_v29, %v640_v36 }
  0xf7   : > { %v788_v44 = vpop.f32.mrf.mxu0  ;;  %v2512_v14 = vpop.f32.mrf.mxu1 }
  0xf8   : > { %v819_v33 = vadd.f32 %v788_v44, %v632_v37  ;;  %v944_v47 = vadd.f32 %v2508_v5, %v821_v52 }
  0xf9   : > { %v2499_v15 = vpop.f32.mrf.mxu0  ;;  %v927_v10 = vpop.f32.mrf.mxu1 }
  0xfa   : > { %v822_v45 = vadd.f32 %v2499_v15, %v643_v41  ;;  %v942_v2 = vadd.f32 %v911_v9, %v819_v33 }
  0xfb   : > { %v791_v12 = vpop.f32.mrf.mxu0  ;;  %v3071_v25 = vpop.f32.mrf.mxu1 }
  0xfc   : > { %v820_v49 = vadd.f32 %v791_v12, %v635_v46 }
  0xfd   : > { %v2502_v51 = vpop.f32.mrf.mxu0  ;;  %v3073_v13 = vpop.f32.mrf.mxu1 }
  0xfe   : > { %v825_v57 = vadd.f32 %v2502_v51, %v656_v38  ;;  %v943_v44 = vadd.f32 %v914_v22, %v820_v49 }
  0xff   : > { %v804_v16 = vpop.f32.mrf.mxu0  ;;  %v2528_v17 = vpop.f32.mrf.mxu1 }
 0x100   : > { %v948_v4 = vadd.f32 %v2512_v14, %v825_v57 }
 0x101   : > { %v2503_v26 = vpop.f32.mrf.mxu0  ;;  %v1307_v19 = vpop.f32.mrf.mxu1 }
 0x102   : > { %v826_v15 = vadd.f32 %v2503_v26, %v659_v50 }
 0x103   : > { %v807_v11 = vpop.f32.mrf.mxu0  ;;  %v2529_v27 = vpop.f32.mrf.mxu1 }
 0x104   : > { %v824_v24 = vadd.f32 %v807_v11, %v651_v61  ;;  %v949_v51 = vadd.f32 %v3071_v25, %v826_v15 }
 0x105   : > { %v2518_v55 = vpop.f32.mrf.mxu0  ;;  %v1310_v21 = vpop.f32.mrf.mxu1 }
 0x106   : > { %v947_v7 = vadd.f32 %v3073_v13, %v824_v24 }
 0x107   : > { %v1145_v39 = vpop.f32.mrf.mxu0 }
 0x108   : > { %v1176_v53 = vadd.f32 %v1145_v39, %v942_v2  ;;  %v2375_v2 = vld [vmem:[%s3148_s3] ss:$0 sm:$0xff] }
 0x109   : > { %v2519_v23 = vpop.f32.mrf.mxu0 }
 0x10a   : > { %v2532_v48 = vpop.f32.mrf.mxu1  ;;  %v1338_v63 = vadd.f32 %v1307_v19, %v1176_v53 }
 0x10b   : > { %v1148_v28 = vpop.f32.mrf.mxu0 }
 0x10c   : > { %v3075_v30 = vpop.f32.mrf.mxu1 }
 0x10d   : > { %v2522_v18 = vpop.f32.mrf.mxu0  ;;  %3158 = vst [vmem:[#allocation2_spill] sm:$0xff] %v3075_v30  ;;  %v945_v30 = vadd.f32 %v2509_v6, %v822_v45 }
 0x10e   : > { %v3077_v31 = vpop.f32.mrf.mxu1 }
 0x10f   : > { %v1161_v56 = vpop.f32.mrf.mxu0  ;;  %3159 = vst [vmem:[#allocation3_spill] sm:$0xff] %v3077_v31  ;;  %v1179_v29 = vadd.f32 %v2519_v23, %v945_v30 }
 0x110   : > { %v3079_v34 = vpop.f32.mrf.mxu1 }
 0x111   : > { %v2523_v0 = vpop.f32.mrf.mxu0  ;;  %3160 = vst [vmem:[#allocation4_spill] sm:$0xff] %v3079_v34  ;;  %v648_v34 = vadd.f32 %v647_v62, %v544_v8  ;;  %v1177_v62 = vadd.f32 %v1148_v28, %v943_v44  ;;  %v1341_v6 = vadd.f32 %v2529_v27, %v1179_v29 }
 0x112   : > { %v1183_v39 = vadd.f32 %v2523_v0, %v949_v51 }
 0x113   : > { %v3081_v35 = vpop.f32.mrf.mxu0  ;;  %v823_v60 = vadd.f32 %v804_v16, %v648_v34  ;;  %v1182_v16 = vadd.f32 %v2522_v18, %v948_v4  ;;  %v1339_v19 = vadd.f32 %v1310_v21, %v1177_v62  ;;  %v2374_v21 = vld [vmem:[%s3147_s2] ss:$0 sm:$0xff] }
 0x114   : > { %3161 = vst [vmem:[#allocation5_spill] sm:$0xff] %v3081_v35  ;;  %v1178_v35 = vadd.f32 %v2518_v55, %v944_v47  ;;  %v3162_v28 = vld [vmem:[#allocation2_spill] sm:$0xff] }
 0x115   : > { %v2538_v40 = vpop.f32.mrf.mxu0  ;;  %v946_v9 = vadd.f32 %v927_v10, %v823_v60  ;;  %v1344_v14 = vadd.f32 %v2532_v48, %v1182_v16 }
 0x116   : > { %v2548_v42 = vpop.f32.mrf.mxu1  ;;  %v1340_v58 = vadd.f32 %v2528_v17, %v1178_v35 }
 0x117   : > { %v1430_v43 = vpop.f32.mrf.mxu0  ;;  %v1180_v26 = vadd.f32 %v1161_v56, %v946_v9 }
 0x118   : > { %v1664_v54 = vpop.f32.mrf.mxu1  ;;  %v1463_v12 = vadd.f32 %v2538_v40, %v1340_v58  ;;  %v1461_v1 = vadd.f32 %v1430_v43, %v1338_v63  ;;  %v3164_v40 = vld [vmem:[#allocation3_spill] sm:$0xff] }
 0x119   : > { %v2539_v20 = vpop.f32.mrf.mxu0  ;;  %v1342_v34 = vadd.f32 %v3162_v28, %v1180_v26  ;;  %v1345_v41 = vadd.f32 %v3164_v40, %v1183_v39  ;;  %v3111_v40 = vld [vmem:[%s3152_s7] ss:$0 sm:$0xff] }
 0x11a   : > { %v2549_v32 = vpop.f32.mrf.mxu1  ;;  %v1464_v55 = vadd.f32 %v2539_v20, %v1341_v6  ;;  %v1697_v30 = vadd.f32 %v2548_v42, %v1463_v12  ;;  %v1695_v3 = vadd.f32 %v1664_v54, %v1461_v1  ;;  %v3165_v20 = vld [vmem:[#allocation4_spill] sm:$0xff] }
 0x11b   : > { %v1433_v31 = vpop.f32.mrf.mxu0  ;;  %v3163_v37 = vld [vmem:[#allocation5_spill] sm:$0xff] }
 0x11c   : > { %v1667_v5 = vpop.f32.mrf.mxu1  ;;  %v1462_v10 = vadd.f32 %v1433_v31, %v1339_v19  ;;  %v1698_v11 = vadd.f32 %v2549_v32, %v1464_v55  ;;  %v1181_v56 = vadd.f32 %v3163_v37, %v947_v7 }
 0x11d   : > { %v2542_v59 = vpop.f32.mrf.mxu0 }
 0x11e   : > { %v1467_v52 = vadd.f32 %v2542_v59, %v1344_v14  ;;  %v1696_v31 = vadd.f32 %v1667_v5, %v1462_v10  ;;  %v1343_v47 = vadd.f32 %v3165_v20, %v1181_v56 }
 0x11f   : > { %v1446_v36 = vpop.f32.mrf.mxu0 }
 0x120   : > { %v2552_v17 = vpop.f32.mrf.mxu1  ;;  %v1465_v13 = vadd.f32 %v1446_v36, %v1342_v34  ;;  %v2420_v34 = vld [vmem:[%s320_s20 + $0x8] sm:$0xff]  }
 0x121   : > { %v2543_v8 = vpop.f32.mrf.mxu0  ;;  %v1701_v53 = vadd.f32 %v2552_v17, %v1467_v52  ;;  %v2411_v52 = vunpack.c.h.bf16 %v2420_v34 }
 0x122   : > { %v1680_v35 = vpop.f32.mrf.mxu1  ;;  %v1468_v33 = vadd.f32 %v2543_v8, %v1345_v41 }
 0x123   : > { %v1449_v22 = vpop.f32.mrf.mxu0  ;;  %v1699_v32 = vadd.f32 %v1680_v35, %v1465_v13  ;;  %v2405_v35 = vld [vmem:[%s320_s20] sm:$0xff]   ;;  %v2422_v13 = vld [vmem:[%s320_s20 + $0x18] sm:$0xff]  }
 0x124   : > { %v2553_v43 = vpop.f32.mrf.mxu1  ;;  %v1466_v50 = vadd.f32 %v1449_v22, %v1343_v47  ;;  %v2406_v56 = vunpack.c.l.bf16 %v2405_v35 }
 0x125   : > { %v2558_v23 = vpop.f32.mrf.mxu0  ;;  %v1702_v57 = vadd.f32 %v2553_v43, %v1468_v33  ;;  %v2421_v43 = vld [vmem:[%s320_s20 + $0x10] sm:$0xff]  }
 0x126   : > { %v1859_v25 = vadd.f32 %v2558_v23, %v1697_v30  ;;  %v1683_v44 = vpop.f32.mrf.mxu1 }
 0x127   : > { %v1826_v27 = vpop.f32.mrf.mxu0  ;;  %v1700_v62 = vadd.f32 %v1683_v44, %v1466_v50 }
 0x128   : > { %v1857_v18 = vadd.f32 %v1826_v27, %v1695_v3  ;;  %v1874_v45 = vadd.f32 %v2374_v21, %v1859_v25  ;;  %v2410_v25 = vunpack.c.l.bf16 %v2420_v34 }
 0x129   : > { %v2559_v0 = vpop.f32.mrf.mxu0 }
 0x12a   : > { %v1860_v48 = vadd.f32 %v2559_v0, %v1698_v11  ;;  %v1872_v54 = vadd.f32 %v2374_v21, %v1857_v18  ;;  %v1897_v15 = vmul.f32 %v2375_v2, %v1874_v45  ;;  %vm1882_vm10 = vcmp.gt.f32.partialorder %v1874_v45, 0.0  ;;  %v2376_v11 = vld [vmem:[%s3150_s5] ss:$0 sm:$0xff] }
 0x12b   : > { %v1829_v42 = vpop.f32.mrf.mxu0 }
 0x12c   : > { %v1875_v46 = vadd.f32 %v2374_v21, %v1860_v48  ;;  %v1858_v38 = vadd.f32 %v1829_v42, %v1696_v31  ;;  %v1895_v36 = vmul.f32 %v2375_v2, %v1872_v54  ;;  %vm1880_vm8 = vcmp.gt.f32.partialorder %v1872_v54, 0.0 }
 0x12d   : > { %v2562_v49 = vpop.f32.mrf.mxu0  ;;  %v1905_v51 = vsel %vm1882_vm10, %v1874_v45, %v1897_v15 }
 0x12e   : > { %v1898_v59 = vmul.f32 %v2375_v2, %v1875_v46  ;;  %v1873_v60 = vadd.f32 %v2374_v21, %v1858_v38  ;;  %vm1883_vm7 = vcmp.gt.f32.partialorder %v1875_v46, 0.0  ;;  %v1863_v5 = vadd.f32 %v2562_v49, %v1701_v53 }
 0x12f   : > { %v1842_v29 = vpop.f32.mrf.mxu0  ;;  %v1903_v1 = vsel %vm1880_vm8, %v1872_v54, %v1895_v36  ;;  %v2407_v54 = vunpack.c.h.bf16 %v2405_v35 }
 0x130   : > { %v1861_v58 = vadd.f32 %v1842_v29, %v1699_v32  ;;  %vm1881_vm9 = vcmp.gt.f32.partialorder %v1873_v60, 0.0  ;;  %v1896_v63 = vmul.f32 %v2375_v2, %v1873_v60  ;;  %v1906_v8 = vsel %vm1883_vm7, %v1875_v46, %v1898_v59 }
 0x131   : > { %v2563_v61 = vpop.f32.mrf.mxu0  ;;  %v1878_v16 = vadd.f32 %v2374_v21, %v1863_v5  ;;  %v1912_v55 = vpack.c.bf16 %v1906_v8, %v1905_v51  ;;  %v2418_v46 = vunpack.c.l.bf16 %v2422_v13  ;;  %v2414_v32 = vunpack.c.l.bf16 %v2421_v43 }
 0x132   : > { %v1864_v4 = vadd.f32 %v2563_v61, %v1702_v57  ;;  %v1904_v9 = vsel %vm1881_vm9, %v1873_v60, %v1896_v63  ;;  %v1876_v6 = vadd.f32 %v2374_v21, %v1861_v58 }
 0x133   : > { %v1845_v12 = vpop.f32.mrf.mxu0  ;;  %v1911_v26 = vpack.c.bf16 %v1904_v9, %v1903_v1  ;;  %v1901_v23 = vmul.f32 %v2375_v2, %v1878_v16  ;;  %vm1886_vm15 = vcmp.gt.f32.partialorder %v1878_v16, 0.0  ;;  %v2415_v1 = vunpack.c.h.bf16 %v2421_v43 }
 0x134   : > { %v1879_v24 = vadd.f32 %v2374_v21, %v1864_v4  ;;  %v1862_v22 = vadd.f32 %v1845_v12, %v1700_v62  ;;  %v1899_v17 = vmul.f32 %v2375_v2, %v1876_v6  ;;  %vm1884_vm12 = vcmp.gt.f32.partialorder %v1876_v6, 0.0 }
 0x135   : > { %2568 = vmatprep.mubr.msk.bf16.mxu1 %vm1938_vm11, %v1911_v26  ;;  %v1909_v27 = vsel %vm1886_vm15, %v1878_v16, %v1901_v23  ;;  %v2419_v4 = vunpack.c.h.bf16 %v2422_v13 }
 0x136   : > { %v1902_v19 = vmul.f32 %v2375_v2, %v1879_v24  ;;  %v1877_v39 = vadd.f32 %v2374_v21, %v1862_v22  ;;  %vm1887_vm13 = vcmp.gt.f32.partialorder %v1879_v24, 0.0  ;;  %2569 = vmatmul.mubr.msk.bf16.vlgmr.msra.gmra.mxu1 %vm1938_vm11, %v1912_v55  ;;  %v1907_v3 = vsel %vm1884_vm12, %v1876_v6, %v1899_v17 }
 0x138   : > { %vm1885_vm14 = vcmp.gt.f32.partialorder %v1877_v39, 0.0  ;;  %v1900_v30 = vmul.f32 %v2375_v2, %v1877_v39  ;;  %v1910_v7 = vsel %vm1887_vm13, %v1879_v24, %v1902_v19 }
 0x139   : > { %v1914_v28 = vpack.c.bf16 %v1910_v7, %v1909_v27 }
 0x13a   : > { %v1908_v14 = vsel %vm1885_vm14, %v1877_v39, %v1900_v30 }
 0x13b   : > { %v1913_v10 = vpack.c.bf16 %v1908_v14, %v1907_v3 }
 0x13d   : > { %2572 = vmatprep.mubr.msk.bf16.mxu1 %vm1938_vm11, %v1913_v10 }
 0x13e   : > { %2573 = vmatmul.mubr.msk.bf16.gmra.mxu1 %vm1938_vm11, %v1914_v28 }
 0x1f6   : > { %v2570_v18 = vpop.f32.mrf.mxu1 }
 0x1f7   : > { %v1994_v37 = vadd.f32 %v2570_v18, %v2376_v11 }
 0x1f8   : > { %v1985_v41 = vpop.f32.mrf.mxu1 }
 0x1f9   : > { %v2034_v21 = vadd.f32 %v2410_v25, %v1994_v37  ;;  %v1986_v0 = vadd.f32 %v2376_v11, %v1985_v41 }
 0x1fa   : > { %v2571_v48 = vpop.f32.mrf.mxu1 }
 0x1fb   : > { %vm2042_vm0 = vcmp.gt.f32.partialorder %v2034_v21, 0.0  ;;  %v2057_v31 = vmul.f32 %v3111_v40, %v2034_v21  ;;  %v2032_v33 = vadd.f32 %v2406_v56, %v1986_v0  ;;  %v1997_v42 = vadd.f32 %v2571_v48, %v2376_v11 }
 0x1fc   : > { %v1988_v45 = vpop.f32.mrf.mxu1 }
 0x1fd   : > { %v2065_v20 = vsel %vm2042_vm0, %v2034_v21, %v2057_v31  ;;  %vm2040_vm2 = vcmp.gt.f32.partialorder %v2032_v33, 0.0  ;;  %v2055_v47 = vmul.f32 %v3111_v40, %v2032_v33  ;;  %v2035_v2 = vadd.f32 %v2411_v52, %v1997_v42 }
 0x1fe   : > { %v2398_v38 = vpack.c.bf16 %v2065_v20, %v2065_v20  ;;  %v1989_v49 = vadd.f32 %v2376_v11, %v1988_v45  ;;  %v2574_v53 = vpop.f32.mrf.mxu1 }
 0x1ff   : > { %v2063_v50 = vsel %vm2040_vm2, %v2032_v33, %v2055_v47  ;;  %vm2043_vm3 = vcmp.gt.f32.partialorder %v2035_v2, 0.0  ;;  %v2058_v57 = vmul.f32 %v3111_v40, %v2035_v2  ;;  %v2010_v59 = vadd.f32 %v2574_v53, %v2376_v11 }
 0x200   : > { %2106 = vst.msk [vmem:[%s3117_s26 + $0x8] sm:$0xf] %vm2103_vm1, %v2398_v38  ;;  %v2396_v60 = vpack.c.bf16 %v2063_v50, %v2063_v50  ;;  %v2033_v29 = vadd.f32 %v2407_v54, %v1989_v49  ;;  %v2001_v44 = vpop.f32.mrf.mxu1 }
 0x201   : > { %v2066_v15 = vsel %vm2043_vm3, %v2035_v2, %v2058_v57  ;;  %v2038_v36 = vadd.f32 %v2418_v46, %v2010_v59  ;;  %v2002_v58 = vadd.f32 %v2376_v11, %v2001_v44 }
 0x202   : > { %2104 = vst.msk [vmem:[%s3117_s26] sm:$0xf] %vm2103_vm1, %v2396_v60  ;;  %v2399_v63 = vpack.c.bf16 %v2066_v15, %v2066_v15  ;;  %vm2041_vm4 = vcmp.gt.f32.partialorder %v2033_v29, 0.0  ;;  %v2056_v5 = vmul.f32 %v3111_v40, %v2033_v29  ;;  %v2575_v61 = vpop.f32.mrf.mxu1 }
 0x203   : > { %vm2046_vm5 = vcmp.gt.f32.partialorder %v2038_v36, 0.0  ;;  %v2061_v62 = vmul.f32 %v3111_v40, %v2038_v36  ;;  %v2036_v8 = vadd.f32 %v2414_v32, %v2002_v58  ;;  %v2013_v9 = vadd.f32 %v2575_v61, %v2376_v11 }
 0x204   : > { %2107 = vst.msk [vmem:[%s3117_s26 + $0xc] sm:$0xf] %vm2103_vm1, %v2399_v63  ;;  %v2064_v6 = vsel %vm2041_vm4, %v2033_v29, %v2056_v5  ;;  %v2004_v12 = vpop.f32.mrf.mxu1 }
 0x205   : > { %v2397_v24 = vpack.c.bf16 %v2064_v6, %v2064_v6  ;;  %v2069_v51 = vsel %vm2046_vm5, %v2038_v36, %v2061_v62  ;;  %vm2044_vm6 = vcmp.gt.f32.partialorder %v2036_v8, 0.0  ;;  %v2059_v16 = vmul.f32 %v3111_v40, %v2036_v8 }
 0x206   : > { %v2402_v22 = vpack.c.bf16 %v2069_v51, %v2069_v51  ;;  %v2039_v26 = vadd.f32 %v2419_v4, %v2013_v9  ;;  %v2005_v55 = vadd.f32 %v2376_v11, %v2004_v12 }
 0x207   : > { %2105 = vst.msk [vmem:[%s3117_s26 + $0x4] sm:$0xf] %vm2103_vm1, %v2397_v24  ;;  %v2067_v17 = vsel %vm2044_vm6, %v2036_v8, %v2059_v16 }
 0x208   : > { %2110 = vst.msk [vmem:[%s3117_s26 + $0x18] sm:$0xf] %vm2103_vm1, %v2402_v22  ;;  %v2400_v19 = vpack.c.bf16 %v2067_v17, %v2067_v17  ;;  %vm2047_vm7 = vcmp.gt.f32.partialorder %v2039_v26, 0.0  ;;  %v2062_v39 = vmul.f32 %v3111_v40, %v2039_v26  ;;  %v2037_v23 = vadd.f32 %v2415_v1, %v2005_v55 }
 0x20a   : > { %2108 = vst.msk [vmem:[%s3117_s26 + $0x10] sm:$0xf] %vm2103_vm1, %v2400_v19  ;;  %v2070_v30 = vsel %vm2047_vm7, %v2039_v26, %v2062_v39  ;;  %vm2045_vm8 = vcmp.gt.f32.partialorder %v2037_v23, 0.0  ;;  %v2060_v3 = vmul.f32 %v3111_v40, %v2037_v23 }
 0x20b   : > { %v2403_v7 = vpack.c.bf16 %v2070_v30, %v2070_v30 }
 0x20c   : > { %v2068_v14 = vsel %vm2045_vm8, %v2037_v23, %v2060_v3 }
 0x20d   : > { %2111 = vst.msk [vmem:[%s3117_s26 + $0x1c] sm:$0xf] %vm2103_vm1, %v2403_v7  ;;  %v2401_v10 = vpack.c.bf16 %v2068_v14, %v2068_v14 }
 0x20f   : > { %2109 = vst.msk [vmem:[%s3117_s26 + $0x14] sm:$0xf] %vm2103_vm1, %v2401_v10 }
 0x210 PF: > { %s18_s27 = sadd.s32 1, %s2614_s27  }
 0x211   : > { %p15_p4 = scmp.ge.s32.totalorder %s18_s27, 4  }
 0x213   :  { %17 = sbr.rel (!%p15_p4) target bundleno = 1 (0x1), region = 95 }

// kernel: tile.6
= control target key start
LH: loop header
LB: loop body
LE: loop exit
PB: predicated region body
PF: predicated region fallthrough
CT: control target
= control target key end

     0   :  { %s20_s0 = inlined_call_operand.<no memory space> [shape: f32[], index: 0, kind: input, shape index: {}]   ;;  %s21_s1 = inlined_call_operand.vmem [shape: f32[1,1,128], index: 1, kind: output, shape index: {}]  }
   0x1   :  { %v2_v0 = vstv %s20_s0 }
   0x2   :  { %3 = vst [vmem:[%s21_s1] sm:$0x1] %v2_v0 }

// kernel: _lambda_.9
= control target key start
LH: loop header
LB: loop body
LE: loop exit
PB: predicated region body
PF: predicated region fallthrough
CT: control target
= control target key end

     0   :  { %s2576_s24 = smov 0   ;;  %s3056_s0 = inlined_call_operand.vmem [shape: bf16[2,10,10,16], index: 0, kind: input, shape index: {}]   ;;  %s3057_s1 = inlined_call_operand.vmem [shape: bf16[9,16,32], index: 1, kind: input, shape index: {}]   ;;  %s3058_s2 = inlined_call_operand.vmem [shape: f32[1,32], index: 2, kind: input, shape index: {}]   ;;  %s3059_s3 = inlined_call_operand.vmem [shape: f32[1,32], index: 3, kind: input, shape index: {}]   ;;  %s3060_s4 = inlined_call_operand.vmem [shape: bf16[32,16], index: 4, kind: input, shape index: {}]   ;;  %s3061_s5 = inlined_call_operand.vmem [shape: f32[1,16], index: 5, kind: input, shape index: {}]   ;;  %s3062_s6 = inlined_call_operand.vmem [shape: bf16[2,64,16], index: 6, kind: output, shape index: {0}]   ;;  %s3063_s7 = inlined_call_operand.vmem [shape: f32[2,1,16], index: 7, kind: output, shape index: {1}]  }
   0x1 LB: > { %s2122_s25 = sadd.s32 4294967295, %s2534_s24   ;;  %p2126_p0 = scmp.ge.s32.totalorder %s2534_s24, 1  ;;  %s2534_s24 = sphi %s2576_s24, %s18_s24  }
   0x2   : > { %p240_p1 = scmp.lt.s32.totalorder %s2534_s24, 3 }
   0x4   : > { %p241_p2 = pnand %p2126_p0, %p240_p1 }
   0x6   : > { %244 = sbr.rel (%p241_p2) target bundleno = 539 (0x21b), region = 44 }
   0xb   : > { %v2505_v0 = vld [vmem:[%s3057_s1 + $0x8] sm:$0xff]   ;;  %p275_p3 = scmp.lt.s32.totalorder %s2122_s25, 1  ;;  %v2506_v1 = vld [vmem:[%s3057_s1] sm:$0xff]   ;;  %v2595_v2 = vld [vmem:[%s3057_s1 + $0x10] sm:$0xff]   ;;  %vm443_vm0 = vcmask 130048   ;;  %vm648_vm4 = vcmask 1042432  }
   0xc   : > { %2394 = vmatprep.subr.bf16.mxu0 %v2505_v0  ;;  %2404 = vmatprep.subr.bf16.mxu1 %v2506_v1  ;;  %v2512_v3 = vld [vmem:[%s3057_s1 + $0x18] sm:$0xff]   ;;  %vm307_vm1 = vsmask.f32 3328  ;;  %vm308_vm2 = vsmask.f32 7440  ;;  %v2631_v32 = vld [vmem:[%s3057_s1 + $0x28] sm:$0xff]  }
   0xd   : > { %s3077_s25 = smov (!%p275_p3, %s2122_s25), 1  ;;  %2395 = vmatpush3.bf16.msra.mxu0 %v2505_v0  ;;  %2405 = vmatpush3.bf16.msra.mxu1 %v2506_v1  ;;  %vm2635_vm3 = vmor %vm307_vm1, %vm308_vm2  ;;  %vm649_vm5 = vcmask 1046532   ;;  %vm1900_vm11 = vcmask 261120   ;;  %vm2010_vm1 = vcmask 125952   ;;  %vm2040_vm2 = vcmask 122880  }
   0xe   : > { %s2496_s9 = smul.u32 80, %s3077_s25  ;;  %2414 = vmatprep.subr.bf16.mxu0 %v2595_v2  ;;  %2424 = vmatprep.subr.bf16.mxu1 %v2512_v3  ;;  %vm2691_vm6 = vmor %vm648_vm4, %vm649_vm5  ;;  %s287_s20 = scalar_lea.vmem %s3063_s7, %s3077_s25 }
  0x10   : > { %s2605_s14 = scalar_lea.vmem %s3056_s0, %s2496_s9 }
  0x11   : > { %v289_v4 = vld [vmem:[%s2605_s14] sm:$0xf]  ;;  %v290_v5 = vld [vmem:[%s2605_s14 + $0x8] sm:$0xf]  ;;  %v2610_v6 = vld [vmem:[%s2605_s14 + $0x4] sm:$0x1] }
  0x12   : > { %v2613_v7 = vld [vmem:[%s2605_s14 + $0xc] sm:$0x1]  ;;  %v311_v8 = vshrl.u32 %v289_v4, 16  ;;  %v314_v9 = vshll.u32 %v289_v4, 16  ;;  %v320_v10 = vshll.u32 %v2610_v6, 16  ;;  %v325_v11 = vshrl.u32 %v290_v5, 16 }
  0x13   : > { %v328_v12 = vshll.u32 %v290_v5, 16  ;;  %v334_v13 = vshll.u32 %v2613_v7, 16  ;;  %v653_v14 = vrot.slane %v2610_v6, 5  ;;  %v657_v15 = vrot.slane %v2613_v7, 5  ;;  %v291_v16 = vld [vmem:[%s2605_s14 + $0x10] sm:$0xf] }
  0x14   : > { %v313_v17 = vrot.slane %v311_v8, 4  ;;  %v316_v18 = vrot.slane %v314_v9, 5  ;;  %v322_v19 = vrot.slane %v320_v10, 5  ;;  %v327_v20 = vrot.slane %v325_v11, 4  ;;  %v292_v21 = vld [vmem:[%s2605_s14 + $0x18] sm:$0xf] }
  0x15   : > { %v330_v22 = vrot.slane %v328_v12, 5  ;;  %v336_v23 = vrot.slane %v334_v13, 5  ;;  %v2141_v24 = vcombine.low %v289_v4, %v290_v5  ;;  %v2622_v25 = vld [vmem:[%s2605_s14 + $0x14] sm:$0x1]  ;;  %v2625_v26 = vld [vmem:[%s2605_s14 + $0x1c] sm:$0x1]  ;;  %v2142_v27 = vcombine.low %v291_v16, %v292_v21 }
  0x16   : > { %v317_v28 = vor.u32 %v316_v18, %v313_v17  ;;  %v339_v29 = vshrl.u32 %v291_v16, 16  ;;  %v342_v30 = vshll.u32 %v291_v16, 16  ;;  %v348_v31 = vshll.u32 %v2622_v25, 16  ;;  %v293_v38 = vld [vmem:[%s2605_s14 + $0x20] sm:$0xf] }
  0x17   : > { %v331_v34 = vor.u32 %v330_v22, %v327_v20  ;;  %2406 = vmatprep.mubr.msk.bf16.mxu1 %vm443_vm0, %v2141_v24  ;;  %v353_v35 = vshrl.u32 %v292_v21, 16  ;;  %v356_v36 = vshll.u32 %v292_v21, 16  ;;  %v362_v37 = vshll.u32 %v2625_v26, 16  ;;  %v294_v43 = vld [vmem:[%s2605_s14 + $0x28] sm:$0xf] }
  0x18   : > { %v318_v39 = vrot.slane %v317_v28, 4  ;;  %v341_v40 = vrot.slane %v339_v29, 4  ;;  %v344_v41 = vrot.slane %v342_v30, 5  ;;  %v350_v42 = vrot.slane %v348_v31, 5  ;;  %2407 = vmatmul.mubr.msk.bf16.vlgmr.msra.gmra.mxu1 %vm443_vm0, %v2142_v27  ;;  %v2645_v48 = vld [vmem:[%s2605_s14 + $0x24] sm:$0x1] }
  0x19   : > { %v332_v44 = vrot.slane %v331_v34, 4  ;;  %v355_v45 = vrot.slane %v353_v35, 4  ;;  %v358_v46 = vrot.slane %v356_v36, 5  ;;  %v364_v47 = vrot.slane %v362_v37, 5  ;;  %2425 = vmatpush3.bf16.msra.mxu1 %v2512_v3  ;;  %v2655_v55 = vld [vmem:[%s2605_s14 + $0x2c] sm:$0x1] }
  0x1a   : > { %v323_v49 = vsel %vm2635_vm3, %v318_v39, %v322_v19  ;;  %v345_v50 = vor.u32 %v344_v41, %v341_v40  ;;  %v661_v51 = vrot.slane %v2622_v25, 5  ;;  %v665_v52 = vrot.slane %v2625_v26, 5  ;;  %2444 = vmatprep.subr.bf16.mxu1 %v2631_v32  ;;  %v295_v62 = vld [vmem:[%s2605_s14 + $0x30] sm:$0xf]  ;;  %v296_v4 = vld [vmem:[%s2605_s14 + $0x38] sm:$0xf] }
  0x1b   : > { %v337_v53 = vsel %vm2635_vm3, %v332_v44, %v336_v23  ;;  %v359_v54 = vor.u32 %v358_v46, %v355_v45  ;;  %v367_v56 = vshrl.u32 %v293_v38, 16  ;;  %v370_v57 = vshll.u32 %v293_v38, 16  ;;  %v2665_v11 = vld [vmem:[%s2605_s14 + $0x34] sm:$0x1]  ;;  %v2670_v18 = vld [vmem:[%s2605_s14 + $0x3c] sm:$0x1] }
  0x1c   : > { %v2132_v58 = vcombine.low %v323_v49, %v337_v53  ;;  %v346_v59 = vrot.slane %v345_v50, 4  ;;  %v376_v60 = vshll.u32 %v2645_v48, 16  ;;  %v381_v61 = vshrl.u32 %v294_v43, 16  ;;  %v624_v23 = vld [vmem:[%s2605_s14] sm:$0xe] }
  0x1d   : > { %v360_v63 = vrot.slane %v359_v54, 4  ;;  %v369_v0 = vrot.slane %v367_v56, 4  ;;  %v372_v1 = vrot.slane %v370_v57, 5  ;;  %v384_v3 = vshll.u32 %v294_v43, 16  ;;  %v625_v24 = vld [vmem:[%s2605_s14 + $0x8] sm:$0xe] }
  0x1e   : > { %2396 = vmatprep.mubr.msk.bf16.mxu0 %vm443_vm0, %v2132_v58  ;;  %v351_v5 = vsel %vm2635_vm3, %v346_v59, %v350_v42  ;;  %v378_v8 = vrot.slane %v376_v60, 5  ;;  %v383_v9 = vrot.slane %v381_v61, 4  ;;  %v390_v10 = vshll.u32 %v2655_v55, 16  ;;  %v2677_v27 = vld [vmem:[%s3057_s1 + $0x20] sm:$0xff]   ;;  %v626_v28 = vld [vmem:[%s2605_s14 + $0x10] sm:$0xe] }
  0x1f   : > { %v365_v12 = vsel %vm2635_vm3, %v360_v63, %v364_v47  ;;  %v373_v13 = vor.u32 %v372_v1, %v369_v0  ;;  %v386_v16 = vrot.slane %v384_v3, 5  ;;  %v2143_v17 = vcombine.low %v293_v38, %v294_v43  ;;  %v627_v35 = vld [vmem:[%s2605_s14 + $0x18] sm:$0xe]  ;;  %v2514_v36 = vld [vmem:[%s2605_s14 + $0x8] ss:$8 sps:$4 sm:$0xff]  }
  0x20   : > { %v2133_v19 = vcombine.low %v351_v5, %v365_v12  ;;  %v392_v20 = vrot.slane %v390_v10, 5  ;;  %v395_v21 = vshrl.u32 %v295_v62, 16  ;;  %v398_v22 = vshll.u32 %v295_v62, 16  ;;  %v629_v58 = vld [vmem:[%s2605_s14 + $0x28] sm:$0xe] }
  0x21   : > { %v374_v29 = vrot.slane %v373_v13, 4  ;;  %v387_v30 = vor.u32 %v386_v16, %v383_v9  ;;  %2410 = vmatprep.mubr.msk.bf16.mxu1 %vm443_vm0, %v2143_v17  ;;  %v404_v31 = vshll.u32 %v2665_v11, 16  ;;  %v409_v34 = vshrl.u32 %v296_v4, 16  ;;  %v630_v63 = vld [vmem:[%s2605_s14 + $0x30] sm:$0xe] }
  0x22   : > { %2397 = vmatmul.mubr.msk.bf16.vlgmr.msra.gmra.mxu0 %vm443_vm0, %v2133_v19  ;;  %v397_v37 = vrot.slane %v395_v21, 4  ;;  %v400_v38 = vrot.slane %v398_v22, 5  ;;  %v412_v39 = vshll.u32 %v296_v4, 16  ;;  %v418_v40 = vshll.u32 %v2670_v18, 16  ;;  %v631_v0 = vld [vmem:[%s2605_s14 + $0x38] sm:$0xe] }
  0x23   : > { %2415 = vmatpush3.bf16.msra.mxu0 %v2595_v2  ;;  %v379_v41 = vsel %vm2635_vm3, %v374_v29, %v378_v8  ;;  %v388_v42 = vrot.slane %v387_v30, 4  ;;  %v406_v43 = vrot.slane %v404_v31, 5  ;;  %v411_v44 = vrot.slane %v409_v34, 4  ;;  %v628_v2 = vld [vmem:[%s2605_s14 + $0x20] sm:$0xe] }
  0x24   : > { %v401_v45 = vor.u32 %v400_v38, %v397_v37  ;;  %v414_v46 = vrot.slane %v412_v39, 5  ;;  %v420_v47 = vrot.slane %v418_v40, 5  ;;  %v2144_v49 = vcombine.low %v295_v62, %v296_v4  ;;  %2434 = vmatprep.subr.bf16.mxu0 %v2677_v27  ;;  %v2515_v7 = vld [vmem:[%s2605_s14 + $0x18] ss:$8 sps:$4 sm:$0xff]   ;;  %v2516_v17 = vld [vmem:[%s2605_s14 + $0x28] ss:$8 sps:$4 sm:$0xff]  }
  0x25   : > { %v393_v53 = vsel %vm2635_vm3, %v388_v42, %v392_v20  ;;  %v2150_v54 = vrot.slane %v624_v23, 9  ;;  %v2151_v56 = vrot.slane %v625_v24, 9  ;;  %v2152_v57 = vrot.slane %v626_v28, 9  ;;  %v2188_v19 = vld [vmem:[%s2605_s14 + $0x8] sm:$0xf] }
  0x26   : > { %v2134_v59 = vcombine.low %v379_v41, %v393_v53  ;;  %v402_v60 = vrot.slane %v401_v45, 4  ;;  %v415_v61 = vor.u32 %v414_v46, %v411_v44  ;;  %2411 = vmatmul.mubr.msk.bf16.gmra.mxu1 %vm443_vm0, %v2144_v49  ;;  %v2153_v62 = vrot.slane %v627_v35, 9  ;;  %v2745_v20 = vld [vmem:[%s2605_s14 + $0xc] sm:$0x1]  ;;  %v2190_v23 = vld [vmem:[%s2605_s14 + $0x10] sm:$0xf] }
  0x27   : > { %v654_v1 = vsel %vm2691_vm6, %v2150_v54, %v653_v14  ;;  %v658_v3 = vsel %vm2691_vm6, %v2151_v56, %v657_v15  ;;  %2426 = vmatprep.mubr.msk.bf16.mxu1 %vm443_vm0, %v2514_v36  ;;  %v2154_v4 = vrot.slane %v628_v2, 9  ;;  %v2719_v6 = vsel %vm2691_vm6, %v2152_v57, %v661_v51  ;;  %v2760_v24 = vld [vmem:[%s2605_s14 + $0x14] sm:$0x1]  ;;  %v2192_v42 = vld [vmem:[%s2605_s14 + $0x18] sm:$0xf] }
  0x28   : > { %2400 = vmatprep.mubr.msk.bf16.mxu0 %vm443_vm0, %v2134_v59  ;;  %v407_v5 = vsel %vm2635_vm3, %v402_v60, %v406_v43  ;;  %v416_v8 = vrot.slane %v415_v61, 4  ;;  %v2160_v9 = vcombine.low %v654_v1, %v658_v3  ;;  %v2726_v14 = vsel %vm2691_vm6, %v2153_v62, %v665_v52  ;;  %v2194_v49 = vld [vmem:[%s2605_s14 + $0x20] sm:$0xf]  ;;  %v2786_v54 = vld [vmem:[%s3057_s1 + $0x30] sm:$0xff]   ;;  %v2195_v56 = vld [vmem:[%s2605_s14 + $0x24] sm:$0x1] }
  0x29   : > { %v669_v15 = vrot.slane %v2645_v48, 5  ;;  %v2155_v10 = vrot.slane %v629_v58, 9  ;;  %v673_v12 = vrot.slane %v2655_v55, 5  ;;  %v2156_v51 = vrot.slane %v630_v63, 9  ;;  %v2517_v53 = vld [vmem:[%s2605_s14 + $0x38] ss:$8 sps:$4 sm:$0xff]  }
  0x2a   : > { %v421_v25 = vsel %vm2635_vm3, %v416_v8, %v420_v47  ;;  %v677_v13 = vrot.slane %v2665_v11, 5  ;;  %v2157_v16 = vrot.slane %v631_v0, 9  ;;  %v681_v55 = vrot.slane %v2670_v18, 5  ;;  %v2750_v11 = vld [vmem:[%s3057_s1 + $0x38] sm:$0xff]   ;;  %v2215_v0 = vld [vmem:[%s2605_s14 + $0x8] sm:$0xe] }
  0x2b   : > { %v2135_v26 = vcombine.low %v407_v5, %v421_v25  ;;  %v2736_v52 = vsel %vm2691_vm6, %v2154_v4, %v669_v15  ;;  %v2740_v48 = vsel %vm2691_vm6, %v2155_v10, %v673_v12  ;;  %v2161_v21 = vcombine.low %v2719_v6, %v2726_v14  ;;  %v2193_v47 = vld [vmem:[%s2605_s14 + $0x1c] sm:$0x1]  ;;  %v2216_v8 = vld [vmem:[%s2605_s14 + $0x10] sm:$0xe]  ;;  %v2217_v15 = vld [vmem:[%s2605_s14 + $0x18] sm:$0xe] }
  0x2c   : > { %v2756_v22 = vsel %vm2691_vm6, %v2156_v51, %v677_v13  ;;  %v929_v28 = vshrl.u32 %v2188_v19, 16  ;;  %v932_v18 = vshll.u32 %v2188_v19, 16  ;;  %v2765_v29 = vsel %vm2691_vm6, %v2157_v16, %v681_v55  ;;  %v2218_v13 = vld [vmem:[%s2605_s14 + $0x20] sm:$0xe]  ;;  %v2196_v16 = vld [vmem:[%s2605_s14 + $0x28] sm:$0xf] }
  0x2d   : > { %2401 = vmatmul.mubr.msk.bf16.gmra.mxu0 %vm443_vm0, %v2135_v26  ;;  %v938_v30 = vshll.u32 %v2745_v20, 16  ;;  %v943_v31 = vshrl.u32 %v2190_v23, 16  ;;  %v946_v34 = vshll.u32 %v2190_v23, 16  ;;  %v2162_v35 = vcombine.low %v2736_v52, %v2740_v48  ;;  %v2805_v55 = vld [vmem:[%s2605_s14 + $0x2c] sm:$0x1] }
  0x2e   : > { %2416 = vmatprep.mubr.msk.bf16.mxu0 %vm443_vm0, %v2160_v9  ;;  %2427 = vmatmul.mubr.msk.bf16.vlgmr.msra.gmra.mxu1 %vm443_vm0, %v2515_v7  ;;  %v931_v36 = vrot.slane %v929_v28, 4  ;;  %v934_v37 = vrot.slane %v932_v18, 5  ;;  %v952_v38 = vshll.u32 %v2760_v24, 16  ;;  %v1172_v43 = vrot.slane %v2745_v20, 5  ;;  %v2198_v23 = vld [vmem:[%s2605_s14 + $0x30] sm:$0xf] }
  0x2f   : > { %2430 = vmatprep.mubr.msk.bf16.mxu1 %vm443_vm0, %v2516_v17  ;;  %2445 = vmatpush3.bf16.msra.mxu1 %v2631_v32  ;;  %v940_v39 = vrot.slane %v938_v30, 5  ;;  %v945_v40 = vrot.slane %v943_v31, 4  ;;  %v948_v41 = vrot.slane %v946_v34, 5  ;;  %v2163_v44 = vcombine.low %v2756_v22, %v2765_v29 }
  0x30   : > { %v935_v45 = vor.u32 %v934_v37, %v931_v36  ;;  %v954_v46 = vrot.slane %v952_v38, 5  ;;  %v957_v2 = vshrl.u32 %v2192_v42, 16  ;;  %2464 = vmatprep.subr.bf16.mxu1 %v2750_v11  ;;  %v960_v57 = vshll.u32 %v2192_v42, 16  ;;  %v2200_v38 = vld [vmem:[%s2605_s14 + $0x38] sm:$0xf] }
  0x31   : > { %v949_v32 = vor.u32 %v948_v41, %v945_v40  ;;  %v966_v58 = vshll.u32 %v2193_v47, 16  ;;  %v971_v59 = vshrl.u32 %v2194_v49, 16  ;;  %v974_v62 = vshll.u32 %v2194_v49, 16 }
  0x32   : > { %v936_v60 = vrot.slane %v935_v45, 4  ;;  %v959_v61 = vrot.slane %v957_v2, 4  ;;  %v980_v63 = vshll.u32 %v2195_v56, 16  ;;  %v962_v3 = vrot.slane %v960_v57, 5  ;;  %v2202_v45 = vld [vmem:[%s2605_s14 + $0x40] sm:$0xf] }
  0x33   : > { %v950_v1 = vrot.slane %v949_v32, 4  ;;  %v968_v4 = vrot.slane %v966_v58, 5  ;;  %v973_v5 = vrot.slane %v971_v59, 4  ;;  %v976_v6 = vrot.slane %v974_v62, 5  ;;  %v2219_v32 = vld [vmem:[%s2605_s14 + $0x28] sm:$0xe] }
  0x34   : > { %v941_v9 = vsel %vm2635_vm3, %v936_v60, %v940_v39  ;;  %v982_v7 = vrot.slane %v980_v63, 5  ;;  %v2223_v14 = vrot.slane %v2215_v0, 9  ;;  %v963_v12 = vor.u32 %v962_v3, %v959_v61  ;;  %v2220_v60 = vld [vmem:[%s2605_s14 + $0x30] sm:$0xe] }
  0x35   : > { %2417 = vmatmul.mubr.msk.bf16.vlgmr.msra.gmra.mxu0 %vm443_vm0, %v2161_v21  ;;  %v955_v10 = vsel %vm2635_vm3, %v950_v1, %v954_v46  ;;  %v2224_v25 = vrot.slane %v2216_v8, 9  ;;  %v1176_v51 = vrot.slane %v2760_v24, 5  ;;  %v977_v26 = vor.u32 %v976_v6, %v973_v5  ;;  %v2221_v8 = vld [vmem:[%s2605_s14 + $0x38] sm:$0xe] }
  0x36   : > { %2435 = vmatpush3.bf16.msra.mxu0 %v2677_v27  ;;  %2420 = vmatprep.mubr.msk.bf16.mxu0 %vm443_vm0, %v2162_v35  ;;  %v2206_v17 = vcombine.low %v941_v9, %v955_v10  ;;  %v1173_v52 = vsel %vm2691_vm6, %v2223_v14, %v1172_v43  ;;  %v2225_v48 = vrot.slane %v2217_v15, 9  ;;  %v964_v19 = vrot.slane %v963_v12, 4  ;;  %v2199_v35 = vld [vmem:[%s2605_s14 + $0x34] sm:$0x1]  ;;  %v2201_v43 = vld [vmem:[%s2605_s14 + $0x3c] sm:$0x1] }
  0x37   : > { %2431 = vmatmul.mubr.msk.bf16.gmra.mxu1 %vm443_vm0, %v2517_v53  ;;  %2454 = vmatprep.subr.bf16.mxu0 %v2786_v54  ;;  %v1177_v27 = vsel %vm2691_vm6, %v2224_v25, %v1176_v51  ;;  %v1180_v20 = vrot.slane %v2193_v47, 5  ;;  %v2226_v21 = vrot.slane %v2218_v13, 9  ;;  %v978_v24 = vrot.slane %v977_v26, 4  ;;  %v2827_v53 = vld [vmem:[%s2605_s14 + $0x44] sm:$0x1] }
  0x38   : > { %v2233_v28 = vcombine.low %v1173_v52, %v1177_v27  ;;  %v1184_v18 = vrot.slane %v2195_v56, 5  ;;  %v985_v30 = vshrl.u32 %v2196_v16, 16  ;;  %v969_v31 = vsel %vm2635_vm3, %v964_v19, %v968_v4  ;;  %v2222_v13 = vld [vmem:[%s2605_s14 + $0x40] sm:$0xe] }
  0x39   : > { %v1181_v34 = vsel %vm2691_vm6, %v2225_v48, %v1180_v20  ;;  %v988_v36 = vshll.u32 %v2196_v16, 16  ;;  %v994_v37 = vshll.u32 %v2805_v55, 16  ;;  %v983_v39 = vsel %vm2635_vm3, %v978_v24, %v982_v7  ;;  %v2853_v24 = vld [vmem:[%s3057_s1 + $0x40] sm:$0xff]  }
  0x3a   : > { %2446 = vmatprep.mubr.msk.bf16.mxu1 %vm443_vm0, %v2233_v28  ;;  %v1185_v40 = vsel %vm2691_vm6, %v2226_v21, %v1184_v18  ;;  %v987_v41 = vrot.slane %v985_v30, 4  ;;  %v999_v42 = vshrl.u32 %v2198_v23, 16  ;;  %v2207_v46 = vcombine.low %v969_v31, %v983_v39  ;;  %v2870_v39 = vld [vmem:[%s2605_s14 + $0x1c] sm:$0x1] }
  0x3b   : > { %v2234_v47 = vcombine.low %v1181_v34, %v1185_v40  ;;  %v990_v49 = vrot.slane %v988_v36, 5  ;;  %v996_v2 = vrot.slane %v994_v37, 5  ;;  %v1002_v57 = vshll.u32 %v2198_v23, 16  ;;  %v2261_v34 = vld [vmem:[%s2605_s14 + $0x10] sm:$0xf] }
  0x3c   : > { %v1001_v56 = vrot.slane %v999_v42, 4  ;;  %v1008_v58 = vshll.u32 %v2199_v35, 16  ;;  %v1013_v59 = vshrl.u32 %v2200_v38, 16  ;;  %v1016_v62 = vshll.u32 %v2200_v38, 16  ;;  %v2263_v36 = vld [vmem:[%s2605_s14 + $0x18] sm:$0xf] }
  0x3d   : > { %2421 = vmatmul.mubr.msk.bf16.gmra.mxu0 %vm443_vm0, %v2163_v44  ;;  %v991_v61 = vor.u32 %v990_v49, %v987_v41  ;;  %v1022_v63 = vshll.u32 %v2201_v43, 16  ;;  %v1027_v0 = vshrl.u32 %v2202_v45, 16  ;;  %v1004_v1 = vrot.slane %v1002_v57, 5  ;;  %v2521_v49 = vld [vmem:[%s2605_s14 + $0x10] ss:$8 sps:$4 sm:$0xff]  }
  0x3e   : > { %2436 = vmatprep.mubr.msk.bf16.mxu0 %vm443_vm0, %v2206_v17  ;;  %v1010_v3 = vrot.slane %v1008_v58, 5  ;;  %v1015_v4 = vrot.slane %v1013_v59, 4  ;;  %v1030_v5 = vshll.u32 %v2202_v45, 16  ;;  %v1018_v6 = vrot.slane %v1016_v62, 5 }
  0x3f   : > { %2447 = vmatmul.mubr.msk.bf16.vlgmr.msra.gmra.mxu1 %vm443_vm0, %v2234_v47  ;;  %v992_v9 = vrot.slane %v991_v61, 4  ;;  %v1024_v7 = vrot.slane %v1022_v63, 5  ;;  %v1029_v22 = vrot.slane %v1027_v0, 4  ;;  %v1005_v29 = vor.u32 %v1004_v1, %v1001_v56  ;;  %v2882_v56 = vld [vmem:[%s2605_s14 + $0x24] sm:$0x1] }
  0x40   : > { %v1032_v44 = vrot.slane %v1030_v5, 5  ;;  %v1036_v14 = vshll.u32 %v2827_v53, 16  ;;  %v2227_v15 = vrot.slane %v2219_v32, 9  ;;  %2465 = vmatpush3.bf16.msra.mxu1 %v2750_v11  ;;  %v1019_v12 = vor.u32 %v1018_v6, %v1015_v4  ;;  %v2267_v61 = vld [vmem:[%s2605_s14 + $0x28] sm:$0xf] }
  0x41   : > { %v997_v10 = vsel %vm2635_vm3, %v992_v9, %v996_v2  ;;  %v1188_v25 = vrot.slane %v2805_v55, 5  ;;  %v2228_v51 = vrot.slane %v2220_v60, 9  ;;  %v1006_v16 = vrot.slane %v1005_v29, 4  ;;  %v2886_v0 = vld [vmem:[%s2605_s14 + $0x2c] sm:$0x1] }
  0x42   : > { %v1033_v17 = vor.u32 %v1032_v44, %v1029_v22  ;;  %v1038_v26 = vrot.slane %v1036_v14, 5  ;;  %v1192_v52 = vrot.slane %v2199_v35, 5  ;;  %v1020_v48 = vrot.slane %v1019_v12, 4  ;;  %v2862_v35 = vld [vmem:[%s2605_s14 + $0x14] sm:$0x1] }
  0x43   : > { %v1189_v19 = vsel %vm2691_vm6, %v2227_v15, %v1188_v25  ;;  %v2229_v11 = vrot.slane %v2221_v8, 9  ;;  %v1196_v27 = vrot.slane %v2201_v43, 5  ;;  %v1011_v20 = vsel %vm2635_vm3, %v1006_v16, %v1010_v3 }
  0x44   : > { %v1034_v55 = vrot.slane %v1033_v17, 4  ;;  %v1193_v21 = vsel %vm2691_vm6, %v2228_v51, %v1192_v52  ;;  %v2230_v23 = vrot.slane %v2222_v13, 9  ;;  %v2208_v28 = vcombine.low %v997_v10, %v1011_v20  ;;  %v2523_v51 = vld [vmem:[%s2605_s14 + $0x20] ss:$8 sps:$4 sm:$0xff]   ;;  %v2900_v52 = vld [vmem:[%s2605_s14 + $0x34] sm:$0x1] }
  0x45   : > { %2437 = vmatmul.mubr.msk.bf16.vlgmr.msra.gmra.mxu0 %vm443_vm0, %v2207_v46  ;;  %v1025_v18 = vsel %vm2635_vm3, %v1020_v48, %v1024_v7  ;;  %v2235_v30 = vcombine.low %v1189_v19, %v1193_v21  ;;  %v1197_v31 = vsel %vm2691_vm6, %v2229_v11, %v1196_v27  ;;  %v1200_v38 = vrot.slane %v2827_v53, 5  ;;  %v2265_v46 = vld [vmem:[%s2605_s14 + $0x20] sm:$0xf]  ;;  %v2271_v27 = vld [vmem:[%s2605_s14 + $0x38] sm:$0xf] }
  0x46   : > { %2455 = vmatpush3.bf16.msra.mxu0 %v2786_v54  ;;  %v1039_v37 = vsel %vm2635_vm3, %v1034_v55, %v1038_v26  ;;  %v1448_v40 = vshrl.u32 %v2261_v34, 16  ;;  %v1451_v41 = vshll.u32 %v2261_v34, 16  ;;  %2440 = vmatprep.mubr.msk.bf16.mxu0 %vm443_vm0, %v2208_v28  ;;  %v1457_v43 = vshll.u32 %v2862_v35, 16  ;;  %v2269_v26 = vld [vmem:[%s2605_s14 + $0x30] sm:$0xf] }
  0x47   : > { %v2209_v42 = vcombine.low %v1025_v18, %v1039_v37  ;;  %2450 = vmatprep.mubr.msk.bf16.mxu1 %vm443_vm0, %v2235_v30  ;;  %v1462_v45 = vshrl.u32 %v2263_v36, 16  ;;  %v1465_v54 = vshll.u32 %v2263_v36, 16  ;;  %v1201_v47 = vsel %vm2691_vm6, %v2230_v23, %v1200_v38  ;;  %2474 = vmatprep.subr.bf16.mxu0 %v2853_v24  ;;  %v2905_v20 = vld [vmem:[%s2605_s14 + $0x3c] sm:$0x1]  ;;  %v2524_v23 = vld [vmem:[%s2605_s14 + $0x30] ss:$8 sps:$4 sm:$0xff]  }
  0x48   : > { %v1450_v2 = vrot.slane %v1448_v40, 4  ;;  %v1453_v53 = vrot.slane %v1451_v41, 5  ;;  %v1471_v32 = vshll.u32 %v2870_v39, 16  ;;  %v2236_v57 = vcombine.low %v1197_v31, %v1201_v47  ;;  %v2273_v31 = vld [vmem:[%s2605_s14 + $0x40] sm:$0xf] }
  0x49   : > { %v1459_v58 = vrot.slane %v1457_v43, 5  ;;  %v1464_v59 = vrot.slane %v1462_v45, 4  ;;  %v1467_v60 = vrot.slane %v1465_v54, 5  ;;  %v1476_v1 = vshrl.u32 %v2265_v46, 16  ;;  %v2915_v38 = vld [vmem:[%s2605_s14 + $0x44] sm:$0x1] }
  0x4a   : > { %v1454_v62 = vor.u32 %v1453_v53, %v1450_v2  ;;  %v1473_v63 = vrot.slane %v1471_v32, 5  ;;  %v1479_v3 = vshll.u32 %v2265_v46, 16  ;;  %2451 = vmatmul.mubr.msk.bf16.gmra.mxu1 %vm443_vm0, %v2236_v57  ;;  %v1485_v5 = vshll.u32 %v2882_v56, 16  ;;  %v2275_v45 = vld [vmem:[%s2605_s14 + $0x48] sm:$0xf] }
  0x4b   : > { %v1468_v4 = vor.u32 %v1467_v60, %v1464_v59  ;;  %v1490_v8 = vshrl.u32 %v2267_v61, 16  ;;  %v1493_v9 = vshll.u32 %v2267_v61, 16  ;;  %v1478_v7 = vrot.slane %v1476_v1, 4  ;;  %v2288_v59 = vld [vmem:[%s2605_s14 + $0x10] sm:$0xe] }
  0x4c   : > { %v1455_v6 = vrot.slane %v1454_v62, 4  ;;  %v1481_v22 = vrot.slane %v1479_v3, 5  ;;  %v1499_v29 = vshll.u32 %v2886_v0, 16  ;;  %v1487_v25 = vrot.slane %v1485_v5, 5  ;;  %v2289_v1 = vld [vmem:[%s2605_s14 + $0x18] sm:$0xe] }
  0x4d   : > { %2441 = vmatmul.mubr.msk.bf16.gmra.mxu0 %vm443_vm0, %v2209_v42  ;;  %v1469_v44 = vrot.slane %v1468_v4, 4  ;;  %v1492_v14 = vrot.slane %v1490_v8, 4  ;;  %v1495_v15 = vrot.slane %v1493_v9, 5  ;;  %v1691_v48 = vrot.slane %v2862_v35, 5  ;;  %v2290_v9 = vld [vmem:[%s2605_s14 + $0x20] sm:$0xe] }
  0x4e   : > { %2456 = vmatprep.mubr.msk.bf16.mxu0 %vm443_vm0, %v2521_v49  ;;  %v1460_v10 = vsel %vm2635_vm3, %v1455_v6, %v1459_v58  ;;  %v1482_v12 = vor.u32 %v1481_v22, %v1478_v7  ;;  %v1501_v17 = vrot.slane %v1499_v29, 5  ;;  %v1504_v55 = vshrl.u32 %v2269_v26, 16  ;;  %v2921_v49 = vld [vmem:[%s2605_s14 + $0x4c] sm:$0x1]  ;;  %v2525_v29 = vld [vmem:[%s2605_s14 + $0x40] ss:$8 sps:$4 sm:$0xff]  }
  0x4f   : > { %v1474_v13 = vsel %vm2635_vm3, %v1469_v44, %v1473_v63  ;;  %v1496_v16 = vor.u32 %v1495_v15, %v1492_v14  ;;  %v1507_v28 = vshll.u32 %v2269_v26, 16  ;;  %v1513_v18 = vshll.u32 %v2900_v52, 16  ;;  %v2293_v26 = vld [vmem:[%s2605_s14 + $0x38] sm:$0xe] }
  0x50   : > { %v2279_v19 = vcombine.low %v1460_v10, %v1474_v13  ;;  %v1483_v11 = vrot.slane %v1482_v12, 4  ;;  %v1518_v30 = vshrl.u32 %v2271_v27, 16  ;;  %v1506_v35 = vrot.slane %v1504_v55, 4  ;;  %v2291_v12 = vld [vmem:[%s2605_s14 + $0x28] sm:$0xe] }
  0x51   : > { %v1497_v21 = vrot.slane %v1496_v16, 4  ;;  %v1521_v36 = vshll.u32 %v2271_v27, 16  ;;  %v1527_v37 = vshll.u32 %v2905_v20, 16  ;;  %v1509_v41 = vrot.slane %v1507_v28, 5 }
  0x52   : > { %2466 = vmatprep.mubr.msk.bf16.mxu1 %vm443_vm0, %v2279_v19  ;;  %v1488_v34 = vsel %vm2635_vm3, %v1483_v11, %v1487_v25  ;;  %v1515_v42 = vrot.slane %v1513_v18, 5  ;;  %v1520_v43 = vrot.slane %v1518_v30, 4  ;;  %v1532_v2 = vshrl.u32 %v2273_v31, 16 }
  0x53   : > { %v1502_v40 = vsel %vm2635_vm3, %v1497_v21, %v1501_v17  ;;  %v1523_v46 = vrot.slane %v1521_v36, 5  ;;  %v1529_v47 = vrot.slane %v1527_v37, 5  ;;  %v1510_v53 = vor.u32 %v1509_v41, %v1506_v35  ;;  %v2292_v17 = vld [vmem:[%s2605_s14 + $0x30] sm:$0xe]  ;;  %v2294_v36 = vld [vmem:[%s2605_s14 + $0x40] sm:$0xe] }
  0x54   : > { %v2280_v54 = vcombine.low %v1488_v34, %v1502_v40  ;;  %v1535_v32 = vshll.u32 %v2273_v31, 16  ;;  %v1541_v57 = vshll.u32 %v2915_v38, 16  ;;  %v1546_v58 = vshrl.u32 %v2275_v45, 16  ;;  %v2295_v41 = vld [vmem:[%s2605_s14 + $0x48] sm:$0xe]  ;;  %s2334_s14 = sshll.u32 %s3077_s25, 5 }
  0x55   : > { %2457 = vmatmul.mubr.msk.bf16.vlgmr.msra.gmra.mxu0 %vm443_vm0, %v2523_v51  ;;  %v1524_v60 = vor.u32 %v1523_v46, %v1520_v43  ;;  %v1534_v61 = vrot.slane %v1532_v2, 4  ;;  %v1549_v62 = vshll.u32 %v2275_v45, 16  ;;  %v1555_v63 = vshll.u32 %v2921_v49, 16  ;;  %s3023_s17 = scalar_lea.vmem %s3062_s6, %s2334_s14 }
  0x56   : > { %2475 = vmatpush3.bf16.msra.mxu0 %v2853_v24  ;;  %2467 = vmatmul.mubr.msk.bf16.vlgmr.msra.gmra.mxu1 %vm443_vm0, %v2280_v54  ;;  %v1511_v3 = vrot.slane %v1510_v53, 4  ;;  %v1537_v4 = vrot.slane %v1535_v32, 5  ;;  %v1543_v5 = vrot.slane %v1541_v57, 5  ;;  %v1548_v8 = vrot.slane %v1546_v58, 4 }
  0x57   : > { %2460 = vmatprep.mubr.msk.bf16.mxu0 %vm443_vm0, %v2524_v23  ;;  %v1525_v24 = vrot.slane %v1524_v60, 4  ;;  %v1551_v6 = vrot.slane %v1549_v62, 5  ;;  %v1557_v7 = vrot.slane %v1555_v63, 5  ;;  %v2296_v22 = vrot.slane %v2288_v59, 9 }
  0x58   : > { %v1516_v44 = vsel %vm2635_vm3, %v1511_v3, %v1515_v42  ;;  %v1538_v14 = vor.u32 %v1537_v4, %v1534_v61  ;;  %v2297_v15 = vrot.slane %v2289_v1, 9  ;;  %v1695_v10 = vrot.slane %v2870_v39, 5 }
  0x59   : > { %v1530_v25 = vsel %vm2635_vm3, %v1525_v24, %v1529_v47  ;;  %v1552_v51 = vor.u32 %v1551_v6, %v1548_v8  ;;  %v1692_v13 = vsel %vm2691_vm6, %v2296_v22, %v1691_v48  ;;  %v2298_v16 = vrot.slane %v2290_v9, 9 }
  0x5a   : > { %v2281_v19 = vcombine.low %v1516_v44, %v1530_v25  ;;  %v1539_v11 = vrot.slane %v1538_v14, 4  ;;  %v1696_v27 = vsel %vm2691_vm6, %v2297_v15, %v1695_v10  ;;  %v1699_v55 = vrot.slane %v2882_v56, 5 }
  0x5b   : > { %v1553_v39 = vrot.slane %v1552_v51, 4  ;;  %v2306_v21 = vcombine.low %v1692_v13, %v1696_v27  ;;  %v2299_v23 = vrot.slane %v2291_v12, 9  ;;  %v1703_v28 = vrot.slane %v2886_v0, 5 }
  0x5c   : > { %2470 = vmatprep.mubr.msk.bf16.mxu1 %vm443_vm0, %v2281_v19  ;;  %v1544_v48 = vsel %vm2635_vm3, %v1539_v11, %v1543_v5  ;;  %v1700_v18 = vsel %vm2691_vm6, %v2298_v16, %v1699_v55  ;;  %v2300_v30 = vrot.slane %v2292_v17, 9  ;;  %v1707_v56 = vrot.slane %v2900_v52, 5 }
  0x5d   : > { %2461 = vmatmul.mubr.msk.bf16.gmra.mxu0 %vm443_vm0, %v2525_v29  ;;  %v1558_v31 = vsel %vm2635_vm3, %v1553_v39, %v1557_v7  ;;  %v1704_v0 = vsel %vm2691_vm6, %v2299_v23, %v1703_v28  ;;  %v2301_v34 = vrot.slane %v2293_v26, 9  ;;  %v1711_v35 = vrot.slane %v2905_v20, 5 }
  0x5e   : > { %2476 = vmatprep.mubr.msk.bf16.mxu0 %vm443_vm0, %v2306_v21  ;;  %v2282_v37 = vcombine.low %v1544_v48, %v1558_v31  ;;  %v1708_v40 = vsel %vm2691_vm6, %v2300_v30, %v1707_v56  ;;  %v2307_v33 = vcombine.low %v1700_v18, %v1704_v0  ;;  %v2302_v42 = vrot.slane %v2294_v36, 9 }
  0x5f   : > { %v1712_v52 = vsel %vm2691_vm6, %v2301_v34, %v1711_v35  ;;  %v1715_v45 = vrot.slane %v2915_v38, 5  ;;  %v2303_v54 = vrot.slane %v2295_v41, 9  ;;  %v1719_v46 = vrot.slane %v2921_v49, 5  ;;  %v2526_v38 = vld [vmem:[%s3060_s4 + $0x8] sm:$0xff]   ;;  %v2527_v49 = vld [vmem:[%s3060_s4] sm:$0xff]  }
  0x60   : > { %2471 = vmatmul.mubr.msk.bf16.gmra.mxu1 %vm443_vm0, %v2282_v37  ;;  %v2308_v43 = vcombine.low %v1708_v40, %v1712_v52  ;;  %2484 = vmatprep.subr.bf16.mxu1 %v2526_v38 }
  0x61   : > { %v1716_v20 = vsel %vm2691_vm6, %v2302_v42, %v1715_v45  ;;  %v1720_v47 = vsel %vm2691_vm6, %v2303_v54, %v1719_v46  ;;  %2485 = vmatpush3.bf16.msra.mxu1 %v2526_v38 }
  0x62   : > { %v2309_v2 = vcombine.low %v1716_v20, %v1720_v47  ;;  %2486 = vmatprep.subr.bf16.mxu1 %v2527_v49 }
  0x65   : > { %2477 = vmatmul.mubr.msk.bf16.vlgmr.msra.gmra.mxu0 %vm443_vm0, %v2307_v33  ;;  %2487 = vmatpush3.bf16.msra.mxu1 %v2527_v49 }
  0x66   : > { %2480 = vmatprep.mubr.msk.bf16.mxu0 %vm443_vm0, %v2308_v43 }
  0x6d   : > { %2481 = vmatmul.mubr.msk.bf16.gmra.mxu0 %vm443_vm0, %v2309_v2 }
  0xd8   : > { %v2408_v53 = vpop.f32.mrf.mxu1 }
  0xda   : > { %v593_v32 = vpop.f32.mrf.mxu1 }
  0xdc   : > { %v2409_v57 = vpop.f32.mrf.mxu1 }
  0xde   : > { %v596_v58 = vpop.f32.mrf.mxu1 }
  0xe2   : > { %v2398_v50 = vpop.f32.mrf.mxu0 }
  0xe3   : > { %v602_v36 = vadd.f32 %v2408_v53, %v2398_v50 }
  0xe4   : > { %v490_v59 = vpop.f32.mrf.mxu0 }
  0xe5   : > { %v594_v37 = vadd.f32 %v593_v32, %v490_v59 }
  0xe6   : > { %v2399_v60 = vpop.f32.mrf.mxu0  ;;  %v2412_v61 = vpop.f32.mrf.mxu1 }
  0xe7   : > { %v605_v41 = vadd.f32 %v2409_v57, %v2399_v60 }
  0xe8   : > { %v609_v62 = vpop.f32.mrf.mxu1  ;;  %v493_v63 = vpop.f32.mrf.mxu0 }
  0xe9   : > { %v597_v46 = vadd.f32 %v596_v58, %v493_v63 }
  0xea   : > { %v2413_v1 = vpop.f32.mrf.mxu1 }
  0xec   : > { %v2982_v3 = vpop.f32.mrf.mxu1 }
  0xed   : > { %v2402_v4 = vpop.f32.mrf.mxu0 }
  0xee   : > { %v2428_v5 = vpop.f32.mrf.mxu1  ;;  %v618_v38 = vadd.f32 %v2412_v61, %v2402_v4 }
  0xef   : > { %v506_v8 = vpop.f32.mrf.mxu0 }
  0xf0   : > { %v873_v9 = vpop.f32.mrf.mxu1 }
  0xf1   : > { %v2403_v24 = vpop.f32.mrf.mxu0 }
  0xf2   : > { %v2429_v6 = vpop.f32.mrf.mxu1  ;;  %v621_v50 = vadd.f32 %v2413_v1, %v2403_v24 }
  0xf3   : > { %v2984_v7 = vpop.f32.mrf.mxu0 }
  0xf4   : > { %v876_v22 = vpop.f32.mrf.mxu1  ;;  %v613_v61 = vadd.f32 %v2982_v3, %v2984_v7 }
  0xf5   : > { %v2418_v29 = vpop.f32.mrf.mxu0 }
  0xf6   : > { %v783_v52 = vadd.f32 %v2418_v29, %v602_v36 }
  0xf7   : > { %v750_v44 = vpop.f32.mrf.mxu0  ;;  %v2432_v14 = vpop.f32.mrf.mxu1 }
  0xf8   : > { %v781_v33 = vadd.f32 %v750_v44, %v594_v37  ;;  %v906_v47 = vadd.f32 %v2428_v5, %v783_v52 }
  0xf9   : > { %v2419_v15 = vpop.f32.mrf.mxu0  ;;  %v889_v10 = vpop.f32.mrf.mxu1 }
  0xfa   : > { %v784_v45 = vadd.f32 %v2419_v15, %v605_v41  ;;  %v904_v2 = vadd.f32 %v873_v9, %v781_v33 }
  0xfb   : > { %v753_v12 = vpop.f32.mrf.mxu0  ;;  %v2986_v25 = vpop.f32.mrf.mxu1 }
  0xfc   : > { %v782_v49 = vadd.f32 %v753_v12, %v597_v46 }
  0xfd   : > { %v2422_v51 = vpop.f32.mrf.mxu0  ;;  %v2988_v13 = vpop.f32.mrf.mxu1 }
  0xfe   : > { %v787_v57 = vadd.f32 %v2422_v51, %v618_v38  ;;  %v905_v44 = vadd.f32 %v876_v22, %v782_v49 }
  0xff   : > { %v766_v16 = vpop.f32.mrf.mxu0  ;;  %v2448_v17 = vpop.f32.mrf.mxu1 }
 0x100   : > { %v910_v4 = vadd.f32 %v2432_v14, %v787_v57 }
 0x101   : > { %v2423_v26 = vpop.f32.mrf.mxu0  ;;  %v1269_v19 = vpop.f32.mrf.mxu1 }
 0x102   : > { %v788_v15 = vadd.f32 %v2423_v26, %v621_v50 }
 0x103   : > { %v769_v11 = vpop.f32.mrf.mxu0  ;;  %v2449_v27 = vpop.f32.mrf.mxu1 }
 0x104   : > { %v786_v24 = vadd.f32 %v769_v11, %v613_v61  ;;  %v911_v51 = vadd.f32 %v2986_v25, %v788_v15 }
 0x105   : > { %v2438_v55 = vpop.f32.mrf.mxu0  ;;  %v1272_v21 = vpop.f32.mrf.mxu1 }
 0x106   : > { %v909_v7 = vadd.f32 %v2988_v13, %v786_v24 }
 0x107   : > { %v1107_v39 = vpop.f32.mrf.mxu0 }
 0x108   : > { %v1138_v53 = vadd.f32 %v1107_v39, %v904_v2  ;;  %v2316_v2 = vld [vmem:[%s3059_s3] ss:$0 sm:$0xff] }
 0x109   : > { %v2439_v23 = vpop.f32.mrf.mxu0 }
 0x10a   : > { %v2452_v48 = vpop.f32.mrf.mxu1  ;;  %v1300_v63 = vadd.f32 %v1269_v19, %v1138_v53 }
 0x10b   : > { %v1110_v28 = vpop.f32.mrf.mxu0 }
 0x10c   : > { %v2990_v30 = vpop.f32.mrf.mxu1 }
 0x10d   : > { %v2442_v18 = vpop.f32.mrf.mxu0  ;;  %3068 = vst [vmem:[#allocation2_spill] sm:$0xff] %v2990_v30  ;;  %v907_v30 = vadd.f32 %v2429_v6, %v784_v45 }
 0x10e   : > { %v2992_v31 = vpop.f32.mrf.mxu1 }
 0x10f   : > { %v1123_v56 = vpop.f32.mrf.mxu0  ;;  %3069 = vst [vmem:[#allocation3_spill] sm:$0xff] %v2992_v31  ;;  %v1141_v29 = vadd.f32 %v2439_v23, %v907_v30 }
 0x110   : > { %v2994_v34 = vpop.f32.mrf.mxu1 }
 0x111   : > { %v2443_v0 = vpop.f32.mrf.mxu0  ;;  %3070 = vst [vmem:[#allocation4_spill] sm:$0xff] %v2994_v34  ;;  %v610_v34 = vadd.f32 %v609_v62, %v506_v8  ;;  %v1139_v62 = vadd.f32 %v1110_v28, %v905_v44  ;;  %v1303_v6 = vadd.f32 %v2449_v27, %v1141_v29 }
 0x112   : > { %v1145_v39 = vadd.f32 %v2443_v0, %v911_v51 }
 0x113   : > { %v2996_v35 = vpop.f32.mrf.mxu0  ;;  %v785_v60 = vadd.f32 %v766_v16, %v610_v34  ;;  %v1144_v16 = vadd.f32 %v2442_v18, %v910_v4  ;;  %v1301_v19 = vadd.f32 %v1272_v21, %v1139_v62  ;;  %v2315_v21 = vld [vmem:[%s3058_s2] ss:$0 sm:$0xff] }
 0x114   : > { %3071 = vst [vmem:[#allocation5_spill] sm:$0xff] %v2996_v35  ;;  %v1140_v35 = vadd.f32 %v2438_v55, %v906_v47  ;;  %v3072_v28 = vld [vmem:[#allocation2_spill] sm:$0xff] }
 0x115   : > { %v2458_v40 = vpop.f32.mrf.mxu0  ;;  %v908_v9 = vadd.f32 %v889_v10, %v785_v60  ;;  %v1306_v14 = vadd.f32 %v2452_v48, %v1144_v16 }
 0x116   : > { %v2468_v42 = vpop.f32.mrf.mxu1  ;;  %v1302_v58 = vadd.f32 %v2448_v17, %v1140_v35 }
 0x117   : > { %v1392_v43 = vpop.f32.mrf.mxu0  ;;  %v1142_v26 = vadd.f32 %v1123_v56, %v908_v9 }
 0x118   : > { %v1626_v54 = vpop.f32.mrf.mxu1  ;;  %v1425_v12 = vadd.f32 %v2458_v40, %v1302_v58  ;;  %v1423_v1 = vadd.f32 %v1392_v43, %v1300_v63  ;;  %v3074_v40 = vld [vmem:[#allocation3_spill] sm:$0xff] }
 0x119   : > { %v2459_v20 = vpop.f32.mrf.mxu0  ;;  %v1304_v34 = vadd.f32 %v3072_v28, %v1142_v26  ;;  %v1307_v41 = vadd.f32 %v3074_v40, %v1145_v39 }
 0x11a   : > { %v2469_v32 = vpop.f32.mrf.mxu1  ;;  %v1426_v55 = vadd.f32 %v2459_v20, %v1303_v6  ;;  %v1659_v30 = vadd.f32 %v2468_v42, %v1425_v12  ;;  %v1657_v3 = vadd.f32 %v1626_v54, %v1423_v1  ;;  %v3075_v20 = vld [vmem:[#allocation4_spill] sm:$0xff] }
 0x11b   : > { %v1395_v31 = vpop.f32.mrf.mxu0  ;;  %v3073_v37 = vld [vmem:[#allocation5_spill] sm:$0xff] }
 0x11c   : > { %v1629_v5 = vpop.f32.mrf.mxu1  ;;  %v1424_v10 = vadd.f32 %v1395_v31, %v1301_v19  ;;  %v1660_v11 = vadd.f32 %v2469_v32, %v1426_v55  ;;  %v1143_v56 = vadd.f32 %v3073_v37, %v909_v7 }
 0x11d   : > { %v2462_v59 = vpop.f32.mrf.mxu0 }
 0x11e   : > { %v1429_v52 = vadd.f32 %v2462_v59, %v1306_v14  ;;  %v1658_v31 = vadd.f32 %v1629_v5, %v1424_v10  ;;  %v1305_v47 = vadd.f32 %v3075_v20, %v1143_v56 }
 0x11f   : > { %v1408_v36 = vpop.f32.mrf.mxu0 }
 0x120   : > { %v2472_v17 = vpop.f32.mrf.mxu1  ;;  %v1427_v13 = vadd.f32 %v1408_v36, %v1304_v34  ;;  %v2317_v34 = vld [vmem:[%s3061_s5] ss:$0 sm:$0xff] }
 0x121   : > { %v2463_v8 = vpop.f32.mrf.mxu0  ;;  %v1663_v53 = vadd.f32 %v2472_v17, %v1429_v52 }
 0x122   : > { %v1642_v35 = vpop.f32.mrf.mxu1  ;;  %v1430_v33 = vadd.f32 %v2463_v8, %v1307_v41 }
 0x123   : > { %v1411_v22 = vpop.f32.mrf.mxu0  ;;  %v1661_v32 = vadd.f32 %v1642_v35, %v1427_v13 }
 0x124   : > { %v2473_v43 = vpop.f32.mrf.mxu1  ;;  %v1428_v50 = vadd.f32 %v1411_v22, %v1305_v47 }
 0x125   : > { %v2478_v23 = vpop.f32.mrf.mxu0  ;;  %v1664_v57 = vadd.f32 %v2473_v43, %v1430_v33 }
 0x126   : > { %v1821_v25 = vadd.f32 %v2478_v23, %v1659_v30  ;;  %v1645_v44 = vpop.f32.mrf.mxu1 }
 0x127   : > { %v1788_v27 = vpop.f32.mrf.mxu0  ;;  %v1662_v62 = vadd.f32 %v1645_v44, %v1428_v50 }
 0x128   : > { %v1819_v18 = vadd.f32 %v1788_v27, %v1657_v3  ;;  %v1836_v45 = vadd.f32 %v2315_v21, %v1821_v25 }
 0x129   : > { %v2479_v0 = vpop.f32.mrf.mxu0 }
 0x12a   : > { %v1822_v48 = vadd.f32 %v2479_v0, %v1660_v11  ;;  %v1834_v54 = vadd.f32 %v2315_v21, %v1819_v18  ;;  %v1859_v15 = vmul.f32 %v2316_v2, %v1836_v45  ;;  %vm1844_vm10 = vcmp.gt.f32.partialorder %v1836_v45, 0.0 }
 0x12b   : > { %v1791_v42 = vpop.f32.mrf.mxu0 }
 0x12c   : > { %v1837_v46 = vadd.f32 %v2315_v21, %v1822_v48  ;;  %v1820_v38 = vadd.f32 %v1791_v42, %v1658_v31  ;;  %v1857_v36 = vmul.f32 %v2316_v2, %v1834_v54  ;;  %vm1842_vm8 = vcmp.gt.f32.partialorder %v1834_v54, 0.0 }
 0x12d   : > { %v2482_v49 = vpop.f32.mrf.mxu0  ;;  %v1867_v51 = vsel %vm1844_vm10, %v1836_v45, %v1859_v15 }
 0x12e   : > { %v1860_v59 = vmul.f32 %v2316_v2, %v1837_v46  ;;  %v1835_v60 = vadd.f32 %v2315_v21, %v1820_v38  ;;  %vm1845_vm7 = vcmp.gt.f32.partialorder %v1837_v46, 0.0  ;;  %v1825_v5 = vadd.f32 %v2482_v49, %v1663_v53 }
 0x12f   : > { %v1804_v29 = vpop.f32.mrf.mxu0  ;;  %v1865_v1 = vsel %vm1842_vm8, %v1834_v54, %v1857_v36 }
 0x130   : > { %v1823_v58 = vadd.f32 %v1804_v29, %v1661_v32  ;;  %vm1843_vm9 = vcmp.gt.f32.partialorder %v1835_v60, 0.0  ;;  %v1858_v63 = vmul.f32 %v2316_v2, %v1835_v60  ;;  %v1868_v8 = vsel %vm1845_vm7, %v1837_v46, %v1860_v59 }
 0x131   : > { %v2483_v61 = vpop.f32.mrf.mxu0  ;;  %v1840_v16 = vadd.f32 %v2315_v21, %v1825_v5  ;;  %v1874_v55 = vpack.c.bf16 %v1868_v8, %v1867_v51 }
 0x132   : > { %v1826_v4 = vadd.f32 %v2483_v61, %v1664_v57  ;;  %v1866_v9 = vsel %vm1843_vm9, %v1835_v60, %v1858_v63  ;;  %v1838_v6 = vadd.f32 %v2315_v21, %v1823_v58 }
 0x133   : > { %v1807_v12 = vpop.f32.mrf.mxu0  ;;  %v1873_v26 = vpack.c.bf16 %v1866_v9, %v1865_v1  ;;  %v1863_v23 = vmul.f32 %v2316_v2, %v1840_v16  ;;  %vm1848_vm15 = vcmp.gt.f32.partialorder %v1840_v16, 0.0 }
 0x134   : > { %v1841_v24 = vadd.f32 %v2315_v21, %v1826_v4  ;;  %v1824_v22 = vadd.f32 %v1807_v12, %v1662_v62  ;;  %v1861_v17 = vmul.f32 %v2316_v2, %v1838_v6  ;;  %vm1846_vm12 = vcmp.gt.f32.partialorder %v1838_v6, 0.0 }
 0x135   : > { %2488 = vmatprep.mubr.msk.bf16.mxu1 %vm1900_vm11, %v1873_v26  ;;  %v1871_v27 = vsel %vm1848_vm15, %v1840_v16, %v1863_v23 }
 0x136   : > { %v1864_v19 = vmul.f32 %v2316_v2, %v1841_v24  ;;  %v1839_v39 = vadd.f32 %v2315_v21, %v1824_v22  ;;  %vm1849_vm13 = vcmp.gt.f32.partialorder %v1841_v24, 0.0  ;;  %2489 = vmatmul.mubr.msk.bf16.vlgmr.msra.gmra.mxu1 %vm1900_vm11, %v1874_v55  ;;  %v1869_v3 = vsel %vm1846_vm12, %v1838_v6, %v1861_v17 }
 0x138   : > { %vm1847_vm14 = vcmp.gt.f32.partialorder %v1839_v39, 0.0  ;;  %v1862_v30 = vmul.f32 %v2316_v2, %v1839_v39  ;;  %v1872_v7 = vsel %vm1849_vm13, %v1841_v24, %v1864_v19 }
 0x139   : > { %v1876_v28 = vpack.c.bf16 %v1872_v7, %v1871_v27 }
 0x13a   : > { %v1870_v14 = vsel %vm1847_vm14, %v1839_v39, %v1862_v30 }
 0x13b   : > { %v1875_v10 = vpack.c.bf16 %v1870_v14, %v1869_v3 }
 0x13d   : > { %2492 = vmatprep.mubr.msk.bf16.mxu1 %vm1900_vm11, %v1875_v10 }
 0x13e   : > { %2493 = vmatmul.mubr.msk.bf16.gmra.mxu1 %vm1900_vm11, %v1876_v28 }
 0x1f6   : > { %v2490_v11 = vpop.f32.mrf.mxu1 }
 0x1f7   : > { %v1956_v35 = vadd.f32 %v2490_v11, %v2317_v34 }
 0x1f8   : > { %v1947_v25 = vpop.f32.mrf.mxu1 }
 0x1f9   : > { %v2337_v18 = vpack.c.bf16 %v1956_v35, %v1956_v35  ;;  %v1948_v37 = vadd.f32 %v2317_v34, %v1947_v25  ;;  %v2022_v54 = vsel %vm443_vm0, %v1956_v35, 0.0 }
 0x1fa   : > { %v2491_v56 = vpop.f32.mrf.mxu1 }
 0x1fb   : > { %2013 = vst.msk [vmem:[%s3023_s17 + $0x8] sm:$0xf] %vm2010_vm1, %v2337_v18  ;;  %v2335_v40 = vpack.c.bf16 %v1948_v37, %v1948_v37  ;;  %v1959_v41 = vadd.f32 %v2491_v56, %v2317_v34  ;;  %v2019_v48 = vsel %vm443_vm0, %v1948_v37, 0.0 }
 0x1fc   : > { %v1950_v21 = vpop.f32.mrf.mxu1 }
 0x1fd   : > { %2011 = vst.msk [vmem:[%s3023_s17] sm:$0xf] %vm2010_vm1, %v2335_v40  ;;  %v2338_v0 = vpack.c.bf16 %v1959_v41, %v1959_v41  ;;  %v1951_v52 = vadd.f32 %v2317_v34, %v1950_v21  ;;  %v2024_v38 = vsel %vm443_vm0, %v1959_v41, 0.0 }
 0x1fe   : > { %v2494_v13 = vpop.f32.mrf.mxu1 }
 0x1ff   : > { %2014 = vst.msk [vmem:[%s3023_s17 + $0xc] sm:$0xf] %vm2010_vm1, %v2338_v0  ;;  %v2336_v31 = vpack.c.bf16 %v1951_v52, %v1951_v52  ;;  %v2020_v33 = vsel %vm443_vm0, %v1951_v52, 0.0  ;;  %v1972_v42 = vadd.f32 %v2494_v13, %v2317_v34 }
 0x200   : > { %v2021_v43 = vadd.f32 %v2020_v33, %v2019_v48  ;;  %v1963_v45 = vpop.f32.mrf.mxu1 }
 0x201   : > { %2012 = vst.msk [vmem:[%s3023_s17 + $0x4] sm:$0xf] %vm2010_vm1, %v2336_v31  ;;  %v2341_v46 = vpack.c.bf16 %v1972_v42, %v1972_v42  ;;  %v1964_v20 = vadd.f32 %v2317_v34, %v1963_v45  ;;  %v2030_v58 = vsel %vm443_vm0, %v1972_v42, 0.0 }
 0x202   : > { %v2023_v47 = vadd.f32 %v2022_v54, %v2021_v43  ;;  %v2495_v2 = vpop.f32.mrf.mxu1 }
 0x203   : > { %2017 = vst.msk [vmem:[%s3023_s17 + $0x18] sm:$0xf] %vm2010_vm1, %v2341_v46  ;;  %v2339_v49 = vpack.c.bf16 %v1964_v20, %v1964_v20  ;;  %v1975_v53 = vadd.f32 %v2495_v2, %v2317_v34  ;;  %v2026_v57 = vsel %vm443_vm0, %v1964_v20, 0.0 }
 0x204   : > { %v2025_v32 = vadd.f32 %v2024_v38, %v2023_v47  ;;  %v1966_v50 = vpop.f32.mrf.mxu1 }
 0x205   : > { %2015 = vst.msk [vmem:[%s3023_s17 + $0x10] sm:$0xf] %vm2010_vm1, %v2339_v49  ;;  %v2342_v59 = vpack.c.bf16 %v1975_v53, %v1975_v53  ;;  %v1967_v60 = vadd.f32 %v2317_v34, %v1966_v50  ;;  %v2032_v5 = vsel %vm443_vm0, %v1975_v53, 0.0 }
 0x206   : > { %v2027_v29 = vadd.f32 %v2026_v57, %v2025_v32 }
 0x207   : > { %2018 = vst.msk [vmem:[%s3023_s17 + $0x1c] sm:$0xf] %vm2010_vm1, %v2342_v59  ;;  %v2340_v44 = vpack.c.bf16 %v1967_v60, %v1967_v60  ;;  %v2028_v15 = vsel %vm443_vm0, %v1967_v60, 0.0 }
 0x208   : > { %v2029_v36 = vadd.f32 %v2028_v15, %v2027_v29 }
 0x209   : > { %2016 = vst.msk [vmem:[%s3023_s17 + $0x14] sm:$0xf] %vm2010_vm1, %v2340_v44 }
 0x20a   : > { %v2031_v63 = vadd.f32 %v2030_v58, %v2029_v36 }
 0x20c   : > { %v2033_v61 = vadd.f32 %v2032_v5, %v2031_v63 }
 0x20e   : > { %v2034_v4 = vrot.slane %v2033_v61, 4 }
 0x210   : > { %v2035_v62 = vadd.f32 %v2034_v4, %v2033_v61 }
 0x212   : > { %v2036_v8 = vrot.slane %v2035_v62, 2 }
 0x214   : > { %v2037_v9 = vadd.f32 %v2036_v8, %v2035_v62 }
 0x216   : > { %v2038_v6 = vrot.slane %v2037_v9, 1 }
 0x218   : > { %v2039_v12 = vadd.f32 %v2038_v6, %v2037_v9 }
 0x21a   : > { %2041 = vst.msk [vmem:[%s287_s20] sm:$0x1] %vm2040_vm2, %v2039_v12 }
 0x21b PF: > { %s18_s24 = sadd.s32 1, %s2534_s24  }
 0x21c   : > { %p15_p4 = scmp.ge.s32.totalorder %s18_s24, 4  }
 0x21e   :  { %17 = sbr.rel (!%p15_p4) target bundleno = 1 (0x1), region = 96 }

// kernel: _lambda_.11
= control target key start
LH: loop header
LB: loop body
LE: loop exit
PB: predicated region body
PF: predicated region fallthrough
CT: control target
= control target key end

     0   :  { %s474_s15 = smov 0   ;;  %s476_s16 = smov 0   ;;  %s513_s0 = inlined_call_operand.vmem [shape: bf16[2,8,128], index: 0, kind: input, shape index: {}]   ;;  %s514_s1 = inlined_call_operand.vmem [shape: f32[2,1,128], index: 1, kind: input, shape index: {}]   ;;  %s515_s2 = inlined_call_operand.vmem [shape: bf16[2,8,128], index: 2, kind: input, shape index: {}]   ;;  %s516_s3 = inlined_call_operand.vmem [shape: f32[1,1,128], index: 3, kind: input, shape index: {}]   ;;  %s517_s4 = inlined_call_operand.vmem [shape: bf16[2,8,128], index: 4, kind: output, shape index: {}]  }
   0x1   :  { %s478_s17 = smov 0  }
   0x2 LB: > { %s26_s18 = sadd.s32 1, %s443_s16  ;;  %p393_p0 = scmp.ge.s32.totalorder %s447_s17, 1  ;;  %s447_s17 = sphi %s478_s17, %s14_s17   ;;  %s443_s16 = sphi %s476_s16, %s519_s16   ;;  %s439_s15 = sphi %s474_s15, %s518_s15  }
   0x3   : > { %p28_p1 = scmp.ge.s32.totalorder %s26_s18, 2  ;;  %p202_p2 = scmp.lt.s32.totalorder %s447_s17, 3 }
   0x5   : > { %s521_s18 = smov (%p28_p1, %s26_s18), 0  ;;  %p203_p3 = pnand %p393_p0, %p202_p2 }
   0x6   : > { %p242_p4 = scmp.lt.s32.totalorder (!%p203_p3), %s439_s15, 1 }
   0x7   : > { %206 = sbr.rel (%p203_p3) target bundleno = 28 (0x1c), region = 36 }
   0xc   : > { %s523_s15 = smov (!%p242_p4, %s439_s15), 1  ;;  %v398_v6 = vld [vmem:[%s516_s3] ss:$0 sm:$0xff] }
   0xd   : > { %s394_s19 = sshll.u32 %s523_s15, 2  ;;  %s251_s22 = scalar_lea.vmem %s514_s1, %s523_s15 }
   0xe   : > { %s248_s25 = scalar_lea.vmem %s513_s0, %s394_s19  ;;  %s258_s28 = scalar_lea.vmem %s515_s2, %s394_s19  ;;  %v397_v1 = vld [vmem:[%s251_s22] ss:$0 sm:$0xff] }
   0xf   : > { %v266_v0 = vld [vmem:[%s248_s25] sm:$0xf]  ;;  %s265_s7 = scalar_lea.vmem %s517_s4, %s394_s19 }
  0x10   : > { %v276_v2 = vld [vmem:[%s258_s28] sm:$0xf]  ;;  %v267_v3 = vunpack.c.l.bf16 %v266_v0 }
  0x11   : > { %v277_v4 = vunpack.c.l.bf16 %v276_v2 }
  0x12   : > { %v275_v5 = vmul.f32 %v397_v1, %v267_v3 }
  0x14   : > { %v278_v7 = vadd.f32 %v277_v4, %v275_v5 }
  0x16   : > { %vm279_vm0 = vcmp.gt.f32.partialorder %v278_v7, 0.0  ;;  %v287_v8 = vmul.f32 %v398_v6, %v278_v7 }
  0x18   : > { %v288_v9 = vsel %vm279_vm0, %v278_v7, %v287_v8 }
  0x19   : > { %v289_v10 = vpack.c.bf16 %v288_v9, %v288_v9 }
  0x1b   : > { %290 = vst [vmem:[%s265_s7] sm:$0xf] %v289_v10 }
  0x1c PF: > { %s14_s17 = sadd.s32 1, %s447_s17   ;;  %s518_s15 = smov %s443_s16 }
  0x1d   : > { %p11_p5 = scmp.ge.s32.totalorder %s14_s17, 4   ;;  %s519_s16 = smov %s521_s18 }
  0x1f   :  { %13 = sbr.rel (!%p11_p5) target bundleno = 2 (0x2), region = 72 }

// kernel: _lambda_.10
= control target key start
LH: loop header
LB: loop body
LE: loop exit
PB: predicated region body
PF: predicated region fallthrough
CT: control target
= control target key end

     0   :  { %s544_s21 = smov 0   ;;  %s583_s0 = inlined_call_operand.vmem [shape: f32[2,1,16], index: 0, kind: input, shape index: {}]   ;;  %s584_s1 = inlined_call_operand.vmem [shape: f32[16,4], index: 1, kind: input, shape index: {}]   ;;  %s585_s2 = inlined_call_operand.vmem [shape: f32[1,4], index: 2, kind: input, shape index: {}]   ;;  %s586_s3 = inlined_call_operand.vmem [shape: f32[1,4], index: 3, kind: input, shape index: {}]   ;;  %s587_s4 = inlined_call_operand.vmem [shape: f32[4,16], index: 4, kind: input, shape index: {}]   ;;  %s588_s5 = inlined_call_operand.vmem [shape: f32[1,16], index: 5, kind: input, shape index: {}]   ;;  %s589_s6 = inlined_call_operand.vmem [shape: f32[2,1,16], index: 6, kind: output, shape index: {}]  }
   0x1 LB: > { %s457_s22 = sadd.s32 4294967295, %s505_s21   ;;  %p461_p0 = scmp.ge.s32.totalorder %s505_s21, 1  ;;  %s505_s21 = sphi %s544_s21, %s16_s21  }
   0x2   : > { %p210_p1 = scmp.lt.s32.totalorder %s505_s21, 3 }
   0x4   : > { %p211_p2 = pnand %p461_p0, %p210_p1 }
   0x5   : > { %p236_p3 = scmp.lt.s32.totalorder (!%p211_p2), %s457_s22, 1 }
   0x6   : > { %214 = sbr.rel (%p211_p2) target bundleno = 442 (0x1ba), region = 44 }
   0xb   : > { %v245_v0 = vld [vmem:[%s584_s1 + $0x8] sm:$0xff]  ;;  %v507_v1 = vmov 0.0   ;;  %v244_v2 = vld [vmem:[%s584_s1] sm:$0xff]  ;;  %vm508_vm0 = vmmov 0   ;;  %s591_s22 = smov (!%p236_p3, %s457_s22), 1  ;;  %vm247_vm1 = vcmask 130048  }
   0xc   : > { %473 = vmatprep.subr.mxu0 %v507_v1  ;;  %477 = vmatprep.mubr.msk.f32.mxu0 %vm508_vm0, %v507_v1  ;;  %s238_s29 = scalar_lea.vmem %s583_s0, %s591_s22  ;;  %v325_v5 = vld [vmem:[%s587_s4] sm:$0xf]  ;;  %vm331_vm2 = vcmask 1043456   ;;  %vm327_vm4 = vcmask 31744   ;;  %s241_s16 = scalar_lea.vmem %s589_s6, %s591_s22  ;;  %vm411_vm5 = vcmask 122880  }
   0xd   : > { %474 = vmatpush3.msra.mxu0 %v245_v0  ;;  %480 = vmatprep.subr.mxu1 %v507_v1  ;;  %v242_v3 = vld [vmem:[%s238_s29] sm:$0x1] }
   0xe   : > { %475 = vmatprep.subr.mxu0 %v507_v1  ;;  %482 = vmatprep.mubr.msk.f32.mxu1 %vm508_vm0, %v507_v1  ;;  %v243_v4 = vmul.f32 0.015625, %v242_v3  ;;  %v246_v6 = vld [vmem:[%s585_s2] sm:$0x1] }
   0xf   : > { %476 = vmatpush3.msra.mxu0 %v244_v2  ;;  %481 = vmatpush3.msk.msra.mxu1 %vm331_vm2, %v325_v5  ;;  %v322_v8 = vld [vmem:[%s586_s3] sm:$0x1] }
  0x10   : > { %478 = vmatmul.mubr.msk.f32.vlgmr.msra.gmra.mxu0 %vm247_vm1, %v243_v4  ;;  %v326_v13 = vld [vmem:[%s588_s5] sm:$0x1] }
  0xd0   : > { %v317_v7 = vpop.f32.mrf.mxu0 }
  0xd1   : > { %v318_v9 = vadd.f32 %v317_v7, %v246_v6 }
  0xd2   : > { %v479_v10 = vpop.f32.mrf.mxu0 }
  0xd3   : > { %vm321_vm3 = vcmp.gt.f32.partialorder %v318_v9, 0.0  ;;  %v323_v11 = vmul.f32 %v322_v8, %v318_v9 }
  0xd5   : > { %v324_v12 = vsel %vm321_vm3, %v318_v9, %v323_v11 }
  0xd6   : > { %483 = vmatmul.mubr.msk.f32.vlgmr.msra.gmra.mxu1 %vm327_vm4, %v324_v12 }
 0x196   : > { %v401_v14 = vpop.f32.mrf.mxu1 }
 0x197   : > { %v402_v15 = vadd.f32 %v401_v14, %v326_v13 }
 0x198   : > { %v484_v16 = vpop.f32.mrf.mxu1 }
 0x199   : > { %v465_v17 = vmul.f32 -1.442695, %v402_v15 }
 0x19b   : > { %495 = vpow2.f32 %v465_v17 }
 0x1a8   : > { %v496_v18 = vpop.eup %495 }
 0x1a9   : > { %v408_v19 = vadd.f32 1.0, %v496_v18 }
 0x1ab   : > { %497 = vrcp.f32 %v408_v19 }
 0x1b8   : > { %v498_v20 = vpop.eup %497 }
 0x1b9   : > { %412 = vst.msk [vmem:[%s241_s16] sm:$0x1] %vm411_vm5, %v498_v20 }
 0x1ba PF: > { %s16_s21 = sadd.s32 1, %s505_s21  }
 0x1bb   : > { %p13_p4 = scmp.ge.s32.totalorder %s16_s21, 4  }
 0x1bd   :  { %15 = sbr.rel (!%p13_p4) target bundleno = 1 (0x1), region = 74 }

</bundles_post_ra>
